<compile_context>
chip_gen: v7x
topology: tpu7x:2x2x1
jax: 0.10.0
libtpu: 0.0.40
codegen_flags: <defaults>
</compile_context>

<pallas_src>
import functools

import numpy as np

import jax
import jax.numpy as jnp
from jax import lax
from jax.experimental import pallas as pl
from jax.experimental.pallas import tpu as pltpu


def _vmem_limit_bytes():
    """~3/4 of physical VMEM (96 MiB on v5e/v6e, 48 MiB on v7x); safe fallback."""
    try:
        info = pltpu.get_tpu_info()
        cap = getattr(info, "vmem_capacity_bytes", None)
        if cap:
            return int(cap) * 3 // 4
    except Exception:
        pass
    return 48 * 1024 * 1024


def _pick_row_tile(Hs, Ws, s, target_lanes=4096, max_rows=32):
    """Largest valid high-res row tile: divides Hs, multiple of s and 2, lane-dense."""
    if Hs * Ws <= target_lanes:
        return Hs
    if Hs % 2 != 0 or (2 * Ws) % 128 != 0:
        return Hs
    best = None
    for th in range(2, Hs, 2):
        if Hs % th or th % s or (th * Ws) % 128:
            continue
        if th * Ws > target_lanes or th > max_rows:
            continue
        best = th
    return best if best is not None else Hs


def _make_fused_upsample_kernel(*, Cin, C0, H, W, s, th, Ws, cdt):
    nb = th + 4                      # buffer rows: tile + 2-row halo each side
    L = nb * Ws                      # flattened buffer lanes
    lo_off = (-2) // s               # first low-res row offset (floor)
    nl = (th + 1) // s - lo_off + 1  # number of low-res rows feeding this tile

    def tap_reduce(z, cm_m1, cm_p1):
        # z: (9*C0, L) f32, rows ordered tap-major (tpos = (di+1)*3 + (dj+1)).
        # Factored rolls: sum the 3 row offsets per dj first (rolls by +-Ws lanes),
        # then apply only 2 single-lane column rolls + column masks.
        parts = []
        for dj in (-1, 0, 1):
            acc = None
            for di in (-1, 0, 1):
                tpos = (di + 1) * 3 + (dj + 1)
                zt = z[tpos * C0:(tpos + 1) * C0, :]
                if di != 0:
                    zt = pltpu.roll(zt, shift=(-di * Ws) % L, axis=1)
                acc = zt if acc is None else acc + zt
            if dj != 0:
                acc = pltpu.roll(acc, shift=(-dj) % L, axis=1)
                acc = acc * (cm_m1 if dj == -1 else cm_p1)
            parts.append(acc)
        return parts[0] + parts[1] + parts[2]

    def kernel(x_ref, skip_ref, skip_top_ref, skip_bot_ref, aux_ref,
               wt_ref, e_ref, bt_ref, w1_ref, b1_ref, w2_ref, b2_ref,
               o_ref, cat_ref):
        t = pl.program_id(1)
        ntiles = pl.num_programs(1)
        is_first = (t == 0).astype(jnp.float32)
        is_last = (t == ntiles - 1).astype(jnp.float32)
        keep_first = 1.0 - is_first
        keep_last = 1.0 - is_last

        wt_all = wt_ref[...]          # (s*s*C0, Cin)   compute dtype
        e_all = e_ref[...]            # (s*W, Ws)       compute dtype (0/1 pixel-shuffle)
        bt = bt_ref[...]              # (C0, 1)         f32

        # ---------- transposed conv + pixel shuffle, built directly in VMEM ----------
        # up[c, s*hl + i, s*w + j] = sum_cin wt[cin, c, i, j] * x[cin, hl, w] + bt[c]
        for l in range(nl):
            hl = t * (th // s) + (lo_off + l)            # absolute low-res row (traced)
            hl_c = jnp.clip(hl, 0, H - 1)
            x_row = x_ref[0, :, hl_c, :].astype(cdt)     # (Cin, W)
            u = jnp.dot(wt_all, x_row, preferred_element_type=jnp.float32)  # (s*s*C0, W)
            for i in range(s):
                rho = s * (lo_off + l) + i + 2           # buffer row (static)
                if rho < 0 or rho >= nb:
                    continue
                row = None
                for j in range(s):
                    uij = u[(i * s + j) * C0:(i * s + j + 1) * C0, :].astype(cdt)
                    contrib = jnp.dot(uij, e_all[j * W:(j + 1) * W, :],
                                      preferred_element_type=jnp.float32)
                    row = contrib if row is None else row + contrib
                row = row + bt
                if rho in (0, 1):                        # halo rows above the tile
                    row = row * keep_first
                elif rho in (nb - 2, nb - 1):            # halo rows below the tile
                    row = row * keep_last
                cat_ref[0:C0, rho * Ws:(rho + 1) * Ws] = row.astype(cat_ref.dtype)

        # ---------- skip into the cat buffer (concat folded; halo rows from neighbours) ----------
        cat_ref[C0:2 * C0, 2 * Ws:(2 + th) * Ws] = skip_ref[0].astype(cat_ref.dtype)
        cat_ref[C0:2 * C0, 0:2 * Ws] = (skip_top_ref[0] * keep_first).astype(cat_ref.dtype)
        cat_ref[C0:2 * C0, (nb - 2) * Ws:nb * Ws] = (skip_bot_ref[0] * keep_last).astype(cat_ref.dtype)

        aux = aux_ref[...]
        cm_m1 = aux[0:1, :]                              # column mask for dj = -1
        cm_p1 = aux[1:2, :]                              # column mask for dj = +1
        keep = 1.0 - is_first * aux[2:3, :] - is_last * aux[3:4, :]

        # ---------- conv1 over concat([up, skip])  (single merged matmul) ----------
        cat = cat_ref[...]                               # (2*C0, L)
        z1 = jnp.dot(w1_ref[...], cat, preferred_element_type=jnp.float32)   # (9*C0, L)
        h1 = tap_reduce(z1, cm_m1, cm_p1) + b1_ref[...]
        h1 = h1 * keep                                   # zero-pad rows outside the image

        # ---------- conv2 (stays in VMEM) ----------
        z2 = jnp.dot(w2_ref[...], h1.astype(cdt), preferred_element_type=jnp.float32)
        h2 = tap_reduce(z2, cm_m1, cm_p1) + b2_ref[...]

        o_ref[0] = h2[:, 2 * Ws:(2 + th) * Ws].astype(o_ref.dtype)

    return kernel


def upsample_block_forward(input_nchw, skip_nchw, params, stride, kernel_size=3,
                           *, row_tile=None, compute_dtype=None):
    """UpsampleBlock forward.  NCHW in / NCHW out, like the PyTorch module."""
    N, Cin, H, W = map(int, input_nchw.shape)
    s = int(stride)
    k = int(kernel_size)
    assert k == 3, "only kernel_size=3 ('same' padding) implemented"
    C0 = int(params["wt"].shape[1])
    Hs, Ws = H * s, W * s
    out_dtype = input_nchw.dtype
    cdt = compute_dtype if compute_dtype is not None else input_nchw.dtype

    # ---- spatial row tile (multiple of 128 lanes when tiled; Hs == single tile fallback) ----
    th = int(row_tile) if row_tile is not None else _pick_row_tile(Hs, Ws, s)
    if th != Hs:
        ok = (Hs % th == 0 and th % s == 0 and th % 2 == 0 and th >= 2 and
              (th * Ws) % 128 == 0 and (2 * Ws) % 128 == 0 and Hs % 2 == 0)
        if not ok:
            th = Hs
    ntiles = Hs // th
    nb = th + 4
    L = nb * Ws

    # ---- parameter repacking (tiny, once per call) ----
    # ConvTranspose2d weight (Cin, C0, s, s) -> rows ordered (i, j, c)
    wt_rows = jnp.transpose(params["wt"], (2, 3, 1, 0)).reshape(s * s * C0, Cin).astype(cdt)
    bt_col = params["bt"].astype(jnp.float32).reshape(C0, 1)

    def stack_taps(w):  # (O, I, k, k) -> (k*k*O, I), row = tap*O + o
        o, i_ = int(w.shape[0]), int(w.shape[1])
        return jnp.transpose(w, (2, 3, 0, 1)).reshape(k * k * o, i_).astype(cdt)

    w1s = stack_taps(params["w1"])     # (9*C0, 2*C0): cols [0:C0]=up half, [C0:2*C0]=skip half
    w2s = stack_taps(params["w2"])     # (9*C0, C0)
    b1c = params["b1"].astype(jnp.float32).reshape(C0, 1)
    b2c = params["b2"].astype(jnp.float32).reshape(C0, 1)

    # 0/1 W-interleave ("pixel shuffle") expansion matrices: E[j*W + w, s*w + j] = 1
    e_np = np.zeros((s * W, Ws), np.float32)
    for j in range(s):
        e_np[j * W + np.arange(W), s * np.arange(W) + j] = 1.0
    e_all = jnp.asarray(e_np, dtype=cdt)

    # column-wrap masks + first/last-halo-row indicators (tile-sized, tiny)
    col = np.arange(L, dtype=np.int64) % Ws
    aux_np = np.zeros((4, L), np.float32)
    aux_np[0] = (col >= 1).astype(np.float32)
    aux_np[1] = (col <= Ws - 2).astype(np.float32)
    aux_np[2, Ws:2 * Ws] = 1.0
    aux_np[3, (nb - 2) * Ws:(nb - 1) * Ws] = 1.0
    aux = jnp.asarray(aux_np)

    skip_flat = skip_nchw.reshape(N, C0, Hs * Ws)        # free reshape

    if ntiles > 1:
        halo_top = skip_flat
        halo_bot = skip_flat
        halo_spec_top = pl.BlockSpec(
            (1, C0, 2 * Ws), lambda n, t: (n, 0, jnp.maximum(t * (th // 2) - 1, 0)))
        halo_spec_bot = pl.BlockSpec(
            (1, C0, 2 * Ws), lambda n, t: (n, 0, jnp.minimum((t + 1) * (th // 2), Hs // 2 - 1)))
    else:
        # single-tile: halo contributions are always zeroed; pass tiny dummies
        halo_top = jnp.zeros((1, C0, 2 * Ws), skip_nchw.dtype)
        halo_bot = halo_top
        halo_spec_top = pl.BlockSpec((1, C0, 2 * Ws), lambda n, t: (0, 0, 0))
        halo_spec_bot = pl.BlockSpec((1, C0, 2 * Ws), lambda n, t: (0, 0, 0))

    kernel = _make_fused_upsample_kernel(Cin=Cin, C0=C0, H=H, W=W, s=s,
                                         th=th, Ws=Ws, cdt=cdt)

    out_flat = pl.pallas_call(
        kernel,
        out_shape=jax.ShapeDtypeStruct((N, C0, Hs * Ws), out_dtype),
        grid=(N, ntiles),
        in_specs=[
            pl.BlockSpec((1, Cin, H, W), lambda n, t: (n, 0, 0, 0)),   # x (whole low-res image)
            pl.BlockSpec((1, C0, th * Ws), lambda n, t: (n, 0, t)),    # skip (this tile)
            halo_spec_top,                                             # skip (2 rows above)
            halo_spec_bot,                                             # skip (2 rows below)
            pl.BlockSpec((4, L), lambda n, t: (0, 0)),                 # column masks / row indicators
            pl.BlockSpec((s * s * C0, Cin), lambda n, t: (0, 0)),      # transposed-conv weights
            pl.BlockSpec((s * W, Ws), lambda n, t: (0, 0)),            # W-interleave matrices
            pl.BlockSpec((C0, 1), lambda n, t: (0, 0)),                # bt
            pl.BlockSpec((k * k * C0, 2 * C0), lambda n, t: (0, 0)),   # w1 (concat folded)
            pl.BlockSpec((C0, 1), lambda n, t: (0, 0)),                # b1
            pl.BlockSpec((k * k * C0, C0), lambda n, t: (0, 0)),       # w2
            pl.BlockSpec((C0, 1), lambda n, t: (0, 0)),                # b2
        ],
        out_specs=pl.BlockSpec((1, C0, th * Ws), lambda n, t: (n, 0, t)),
        scratch_shapes=[pltpu.VMEM((2 * C0, L), cdt)],                 # concat([up, skip]) tile
        compiler_params=pltpu.CompilerParams(
            dimension_semantics=("parallel", "parallel"),
            vmem_limit_bytes=_vmem_limit_bytes(),
        ),
    )(input_nchw, skip_flat, halo_top, halo_bot, aux,
      wt_rows, e_all, bt_col, w1s, b1c, w2s, b2c)

    return out_flat.reshape(N, C0, Hs, Ws)               # free reshape -> NCHW


# ----------------------------------------------------------------------------
# Pure-JAX (lax.conv) reference for verification
# ----------------------------------------------------------------------------
def reference_forward(input_nchw, skip_nchw, params, stride):
    s = stride
    dn = ("NCHW", "OIHW", "NCHW")
    # ConvTranspose2d == lhs-dilated conv with flipped, channel-swapped kernel
    w_eq = jnp.transpose(params["wt"], (1, 0, 2, 3))[:, :, ::-1, ::-1]
    up = lax.conv_general_dilated(
        input_nchw, w_eq, window_strides=(1, 1),
        padding=[(s - 1, s - 1), (s - 1, s - 1)],
        lhs_dilation=(s, s), dimension_numbers=dn,
    ) + params["bt"][None, :, None, None]
    cat = jnp.concatenate([up, skip_nchw], axis=1)
    h = lax.conv_general_dilated(cat, params["w1"], (1, 1), [(1, 1), (1, 1)],
                                 dimension_numbers=dn) + params["b1"][None, :, None, None]
    h = lax.conv_general_dilated(h, params["w2"], (1, 1), [(1, 1), (1, 1)],
                                 dimension_numbers=dn) + params["b2"][None, :, None, None]
    return h


if __name__ == "__main__":
    # Module hyper-params (defaults): num_conv=2, dim=2, attention=False
    in_channels = 8
    out_channels = 16          # -> out_channels = (16, 16)
    kernel_size = 3
    stride = 2
    N, H, W = 2, 8, 64         # low-res input; upsampled output is (16, 128) -> 128-lane rows

    key = jax.random.PRNGKey(0)
    kx, ks, k1, k2, k3, k4, k5, k6 = jax.random.split(key, 8)

    input_data = jax.random.normal(kx, (N, in_channels, H, W), jnp.float32)
    skip_data = jax.random.normal(ks, (N, out_channels, H * stride, W * stride), jnp.float32)

    params = {
        # ConvTranspose2d(in, C0, kernel=stride, stride=stride), PyTorch layout (I, O, kh, kw)
        "wt": 0.1 * jax.random.normal(k1, (in_channels, out_channels, stride, stride), jnp.float32),
        "bt": 0.1 * jax.random.normal(k2, (out_channels,), jnp.float32),
        # Conv2d(2*C0 -> C0, k=3, s=1, p=1), PyTorch layout (O, I, kh, kw)
        "w1": 0.1 * jax.random.normal(k3, (out_channels, 2 * out_channels, kernel_size, kernel_size), jnp.float32),
        "b1": 0.1 * jax.random.normal(k4, (out_channels,), jnp.float32),
        # Conv2d(C0 -> C0, k=3, s=1, p=1)
        "w2": 0.1 * jax.random.normal(k5, (out_channels, out_channels, kernel_size, kernel_size), jnp.float32),
        "b2": 0.1 * jax.random.normal(k6, (out_channels,), jnp.float32),
    }

    ref = jax.block_until_ready(reference_forward(input_data, skip_data, params, stride))

    # 1) f32, auto tile (single spatial tile at this size)
    fwd1 = jax.jit(functools.partial(upsample_block_forward,
                                     stride=stride, kernel_size=kernel_size))
    out1 = jax.block_until_ready(fwd1(input_data, skip_data, params))
    assert out1.shape == ref.shape, out1.shape
    assert jnp.allclose(out1, ref, atol=2e-4, rtol=2e-4), float(jnp.max(jnp.abs(out1 - ref)))

    # 2) f32, forced multi-tile (grid=(N, 4)) -> exercises the halo / boundary path
    fwd2 = jax.jit(functools.partial(upsample_block_forward,
                                     stride=stride, kernel_size=kernel_size, row_tile=4))
    out2 = jax.block_until_ready(fwd2(input_data, skip_data, params))
    assert jnp.allclose(out2, ref, atol=2e-4, rtol=2e-4), float(jnp.max(jnp.abs(out2 - ref)))

    # 3) bf16 MXU compute (f32 accumulate), multi-tile; relaxed tolerance vs f32 reference
    fwd3 = jax.jit(functools.partial(upsample_block_forward,
                                     stride=stride, kernel_size=kernel_size,
                                     row_tile=8, compute_dtype=jnp.bfloat16))
    out3 = jax.block_until_ready(fwd3(input_data, skip_data, params))
    assert jnp.allclose(out3, ref, atol=1.5e-1, rtol=5e-2), float(jnp.max(jnp.abs(out3 - ref)))

    print("KERNEL_OK")
</pallas_src>

<mosaic_0001>
module attributes {stable_mosaic.version = 11 : i64} {
  func.func @kernel(%arg0: i32, %arg1: i32, %arg2: memref<1x8x8x64xf32, #tpu.memory_space<vmem>>, %arg3: memref<1x16x2048xf32, #tpu.memory_space<vmem>>, %arg4: memref<1x16x256xf32, #tpu.memory_space<vmem>>, %arg5: memref<1x16x256xf32, #tpu.memory_space<vmem>>, %arg6: memref<4x2560xf32, #tpu.memory_space<vmem>>, %arg7: memref<64x8xf32, #tpu.memory_space<vmem>>, %arg8: memref<128x128xf32, #tpu.memory_space<vmem>>, %arg9: memref<16x1xf32, #tpu.memory_space<vmem>>, %arg10: memref<144x32xf32, #tpu.memory_space<vmem>>, %arg11: memref<16x1xf32, #tpu.memory_space<vmem>>, %arg12: memref<144x16xf32, #tpu.memory_space<vmem>>, %arg13: memref<16x1xf32, #tpu.memory_space<vmem>>, %arg14: memref<1x16x2048xf32, #tpu.memory_space<vmem>>, %arg15: memref<32x2560xf32, #tpu.memory_space<vmem>>) attributes {dimension_semantics = [#tpu.dimension_semantics<parallel>, #tpu.dimension_semantics<parallel>], iteration_bounds = array<i64: 2, 1>, scalar_prefetch = 0 : i64, scratch_operands = 1 : i64, tpu.core_type = #tpu.core_type<tc>, window_params = [{transform_indices = @transform_0, window_bounds = array<i64: 1, 8, 8, 64>}, {transform_indices = @transform_1, window_bounds = array<i64: 1, 16, 2048>}, {pipeline_mode = #tpu.pipeline_mode<synchronous>, transform_indices = @transform_2, window_bounds = array<i64: 1, 16, 256>}, {pipeline_mode = #tpu.pipeline_mode<synchronous>, transform_indices = @transform_3, window_bounds = array<i64: 1, 16, 256>}, {pipeline_mode = #tpu.pipeline_mode<synchronous>, transform_indices = @transform_4, window_bounds = array<i64: 4, 2560>}, {pipeline_mode = #tpu.pipeline_mode<synchronous>, transform_indices = @transform_5, window_bounds = array<i64: 64, 8>}, {pipeline_mode = #tpu.pipeline_mode<synchronous>, transform_indices = @transform_6, window_bounds = array<i64: 128, 128>}, {pipeline_mode = #tpu.pipeline_mode<synchronous>, transform_indices = @transform_7, window_bounds = array<i64: 16, 1>}, {pipeline_mode = #tpu.pipeline_mode<synchronous>, transform_indices = @transform_8, window_bounds = array<i64: 144, 32>}, {pipeline_mode = #tpu.pipeline_mode<synchronous>, transform_indices = @transform_9, window_bounds = array<i64: 16, 1>}, {pipeline_mode = #tpu.pipeline_mode<synchronous>, transform_indices = @transform_10, window_bounds = array<i64: 144, 16>}, {pipeline_mode = #tpu.pipeline_mode<synchronous>, transform_indices = @transform_11, window_bounds = array<i64: 16, 1>}, {transform_indices = @transform_12, window_bounds = array<i64: 1, 16, 2048>}]} {
    %c0_i32 = arith.constant 0 : i32
    %0 = arith.cmpi eq, %arg1, %c0_i32 : i32
    %1 = arith.extui %0 : i1 to i32
    %2 = arith.sitofp %1 : i32 to f32
    %c0_i32_0 = arith.constant 0 : i32
    %3 = arith.cmpi eq, %arg1, %c0_i32_0 : i32
    %4 = arith.extui %3 : i1 to i32
    %5 = arith.sitofp %4 : i32 to f32
    %cst = arith.constant 1.000000e+00 : f32
    %6 = arith.subf %cst, %2 : f32
    %cst_1 = arith.constant 1.000000e+00 : f32
    %7 = arith.subf %cst_1, %5 : f32
    %c0 = arith.constant 0 : index
    %c0_2 = arith.constant 0 : index
    %8 = vector.load %arg7[%c0, %c0_2] : memref<64x8xf32, #tpu.memory_space<vmem>>, vector<64x8xf32>
    %c0_3 = arith.constant 0 : index
    %c0_4 = arith.constant 0 : index
    %9 = vector.load %arg8[%c0_3, %c0_4] : memref<128x128xf32, #tpu.memory_space<vmem>>, vector<128x128xf32>
    %c0_5 = arith.constant 0 : index
    %c0_6 = arith.constant 0 : index
    %10 = vector.load %arg9[%c0_5, %c0_6] : memref<16x1xf32, #tpu.memory_space<vmem>>, vector<16x1xf32>
    %c8_i32 = arith.constant 8 : i32
    %11 = arith.muli %arg1, %c8_i32 : i32
    %c-1_i32 = arith.constant -1 : i32
    %12 = arith.addi %11, %c-1_i32 : i32
    %c0_i32_7 = arith.constant 0 : i32
    %c7_i32 = arith.constant 7 : i32
    %13 = arith.maxsi %c0_i32_7, %12 : i32
    %14 = arith.minsi %c7_i32, %13 : i32
    %c0_8 = arith.constant 0 : index
    %c0_9 = arith.constant 0 : index
    %15 = arith.index_cast %14 : i32 to index
    %c0_10 = arith.constant 0 : index
    %16 = vector.load %arg2[%c0_8, %c0_9, %15, %c0_10] : memref<1x8x8x64xf32, #tpu.memory_space<vmem>>, vector<1x8x1x64xf32>
    %17 = vector.shape_cast %16 : vector<1x8x1x64xf32> to vector<8x64xf32>
    %cst_11 = arith.constant dense<0.000000e+00> : vector<64x64xf32>
    %18 = tpu.matmul %8, %17, %cst_11 {dimension_numbers = #tpu.dot_dimension_numbers<[1], [0], [0], [1], [0, 0, 1, 1], [], []>} : vector<64x8xf32>, vector<8x64xf32>, vector<64x64xf32> -> vector<64x64xf32>
    %19 = vector.extract_strided_slice %18 {offsets = [0, 0], sizes = [16, 64], strides = [1, 1]} : vector<64x64xf32> to vector<16x64xf32>
    %20 = vector.extract_strided_slice %9 {offsets = [0, 0], sizes = [64, 128], strides = [1, 1]} : vector<128x128xf32> to vector<64x128xf32>
    %cst_12 = arith.constant dense<0.000000e+00> : vector<16x128xf32>
    %21 = tpu.matmul %19, %20, %cst_12 {dimension_numbers = #tpu.dot_dimension_numbers<[1], [0], [0], [1], [0, 0, 1, 1], [], []>} : vector<16x64xf32>, vector<64x128xf32>, vector<16x128xf32> -> vector<16x128xf32>
    %22 = vector.extract_strided_slice %18 {offsets = [16, 0], sizes = [16, 64], strides = [1, 1]} : vector<64x64xf32> to vector<16x64xf32>
    %23 = vector.extract_strided_slice %9 {offsets = [64, 0], sizes = [64, 128], strides = [1, 1]} : vector<128x128xf32> to vector<64x128xf32>
    %cst_13 = arith.constant dense<0.000000e+00> : vector<16x128xf32>
    %24 = tpu.matmul %22, %23, %cst_13 {dimension_numbers = #tpu.dot_dimension_numbers<[1], [0], [0], [1], [0, 0, 1, 1], [], []>} : vector<16x64xf32>, vector<64x128xf32>, vector<16x128xf32> -> vector<16x128xf32>
    %25 = arith.addf %21, %24 : vector<16x128xf32>
    %26 = vector.broadcast %10 : vector<16x1xf32> to vector<16x128xf32>
    %27 = arith.addf %25, %26 : vector<16x128xf32>
    %28 = vector.broadcast %6 : f32 to vector<16x128xf32>
    %29 = arith.mulf %27, %28 : vector<16x128xf32>
    %c0_14 = arith.constant 0 : index
    %c0_15 = arith.constant 0 : index
    %30 = vector.load %arg15[%c0_14, %c0_15] : memref<32x2560xf32, #tpu.memory_space<vmem>>, vector<16x128xf32>
    tpu.vector_store %arg15[%c0_14, %c0_15], %29 {strides = array<i32>} : memref<32x2560xf32, #tpu.memory_space<vmem>>, vector<16x128xf32>,
    %31 = vector.extract_strided_slice %18 {offsets = [32, 0], sizes = [16, 64], strides = [1, 1]} : vector<64x64xf32> to vector<16x64xf32>
    %32 = vector.extract_strided_slice %9 {offsets = [0, 0], sizes = [64, 128], strides = [1, 1]} : vector<128x128xf32> to vector<64x128xf32>
    %cst_16 = arith.constant dense<0.000000e+00> : vector<16x128xf32>
    %33 = tpu.matmul %31, %32, %cst_16 {dimension_numbers = #tpu.dot_dimension_numbers<[1], [0], [0], [1], [0, 0, 1, 1], [], []>} : vector<16x64xf32>, vector<64x128xf32>, vector<16x128xf32> -> vector<16x128xf32>
    %34 = vector.extract_strided_slice %18 {offsets = [48, 0], sizes = [16, 64], strides = [1, 1]} : vector<64x64xf32> to vector<16x64xf32>
    %35 = vector.extract_strided_slice %9 {offsets = [64, 0], sizes = [64, 128], strides = [1, 1]} : vector<128x128xf32> to vector<64x128xf32>
    %cst_17 = arith.constant dense<0.000000e+00> : vector<16x128xf32>
    %36 = tpu.matmul %34, %35, %cst_17 {dimension_numbers = #tpu.dot_dimension_numbers<[1], [0], [0], [1], [0, 0, 1, 1], [], []>} : vector<16x64xf32>, vector<64x128xf32>, vector<16x128xf32> -> vector<16x128xf32>
    %37 = arith.addf %33, %36 : vector<16x128xf32>
    %38 = vector.broadcast %10 : vector<16x1xf32> to vector<16x128xf32>
    %39 = arith.addf %37, %38 : vector<16x128xf32>
    %40 = vector.broadcast %6 : f32 to vector<16x128xf32>
    %41 = arith.mulf %39, %40 : vector<16x128xf32>
    %c0_18 = arith.constant 0 : index
    %c128 = arith.constant 128 : index
    %42 = vector.load %arg15[%c0_18, %c128] : memref<32x2560xf32, #tpu.memory_space<vmem>>, vector<16x128xf32>
    tpu.vector_store %arg15[%c0_18, %c128], %41 {strides = array<i32>} : memref<32x2560xf32, #tpu.memory_space<vmem>>, vector<16x128xf32>,
    %c8_i32_19 = arith.constant 8 : i32
    %43 = arith.muli %arg1, %c8_i32_19 : i32
    %c0_i32_20 = arith.constant 0 : i32
    %44 = arith.addi %43, %c0_i32_20 : i32
    %c0_i32_21 = arith.constant 0 : i32
    %c7_i32_22 = arith.constant 7 : i32
    %45 = arith.maxsi %c0_i32_21, %44 : i32
    %46 = arith.minsi %c7_i32_22, %45 : i32
    %c0_23 = arith.constant 0 : index
    %c0_24 = arith.constant 0 : index
    %47 = arith.index_cast %46 : i32 to index
    %c0_25 = arith.constant 0 : index
    %48 = vector.load %arg2[%c0_23, %c0_24, %47, %c0_25] : memref<1x8x8x64xf32, #tpu.memory_space<vmem>>, vector<1x8x1x64xf32>
    %49 = vector.shape_cast %48 : vector<1x8x1x64xf32> to vector<8x64xf32>
    %cst_26 = arith.constant dense<0.000000e+00> : vector<64x64xf32>
    %50 = tpu.matmul %8, %49, %cst_26 {dimension_numbers = #tpu.dot_dimension_numbers<[1], [0], [0], [1], [0, 0, 1, 1], [], []>} : vector<64x8xf32>, vector<8x64xf32>, vector<64x64xf32> -> vector<64x64xf32>
    %51 = vector.extract_strided_slice %50 {offsets = [0, 0], sizes = [16, 64], strides = [1, 1]} : vector<64x64xf32> to vector<16x64xf32>
    %52 = vector.extract_strided_slice %9 {offsets = [0, 0], sizes = [64, 128], strides = [1, 1]} : vector<128x128xf32> to vector<64x128xf32>
    %cst_27 = arith.constant dense<0.000000e+00> : vector<16x128xf32>
    %53 = tpu.matmul %51, %52, %cst_27 {dimension_numbers = #tpu.dot_dimension_numbers<[1], [0], [0], [1], [0, 0, 1, 1], [], []>} : vector<16x64xf32>, vector<64x128xf32>, vector<16x128xf32> -> vector<16x128xf32>
    %54 = vector.extract_strided_slice %50 {offsets = [16, 0], sizes = [16, 64], strides = [1, 1]} : vector<64x64xf32> to vector<16x64xf32>
    %55 = vector.extract_strided_slice %9 {offsets = [64, 0], sizes = [64, 128], strides = [1, 1]} : vector<128x128xf32> to vector<64x128xf32>
    %cst_28 = arith.constant dense<0.000000e+00> : vector<16x128xf32>
    %56 = tpu.matmul %54, %55, %cst_28 {dimension_numbers = #tpu.dot_dimension_numbers<[1], [0], [0], [1], [0, 0, 1, 1], [], []>} : vector<16x64xf32>, vector<64x128xf32>, vector<16x128xf32> -> vector<16x128xf32>
    %57 = arith.addf %53, %56 : vector<16x128xf32>
    %58 = vector.broadcast %10 : vector<16x1xf32> to vector<16x128xf32>
    %59 = arith.addf %57, %58 : vector<16x128xf32>
    %c0_29 = arith.constant 0 : index
    %c256 = arith.constant 256 : index
    %60 = vector.load %arg15[%c0_29, %c256] : memref<32x2560xf32, #tpu.memory_space<vmem>>, vector<16x128xf32>
    tpu.vector_store %arg15[%c0_29, %c256], %59 {strides = array<i32>} : memref<32x2560xf32, #tpu.memory_space<vmem>>, vector<16x128xf32>,
    %61 = vector.extract_strided_slice %50 {offsets = [32, 0], sizes = [16, 64], strides = [1, 1]} : vector<64x64xf32> to vector<16x64xf32>
    %62 = vector.extract_strided_slice %9 {offsets = [0, 0], sizes = [64, 128], strides = [1, 1]} : vector<128x128xf32> to vector<64x128xf32>
    %cst_30 = arith.constant dense<0.000000e+00> : vector<16x128xf32>
    %63 = tpu.matmul %61, %62, %cst_30 {dimension_numbers = #tpu.dot_dimension_numbers<[1], [0], [0], [1], [0, 0, 1, 1], [], []>} : vector<16x64xf32>, vector<64x128xf32>, vector<16x128xf32> -> vector<16x128xf32>
    %64 = vector.extract_strided_slice %50 {offsets = [48, 0], sizes = [16, 64], strides = [1, 1]} : vector<64x64xf32> to vector<16x64xf32>
    %65 = vector.extract_strided_slice %9 {offsets = [64, 0], sizes = [64, 128], strides = [1, 1]} : vector<128x128xf32> to vector<64x128xf32>
    %cst_31 = arith.constant dense<0.000000e+00> : vector<16x128xf32>
    %66 = tpu.matmul %64, %65, %cst_31 {dimension_numbers = #tpu.dot_dimension_numbers<[1], [0], [0], [1], [0, 0, 1, 1], [], []>} : vector<16x64xf32>, vector<64x128xf32>, vector<16x128xf32> -> vector<16x128xf32>
    %67 = arith.addf %63, %66 : vector<16x128xf32>
    %68 = vector.broadcast %10 : vector<16x1xf32> to vector<16x128xf32>
    %69 = arith.addf %67, %68 : vector<16x128xf32>
    %c0_32 = arith.constant 0 : index
    %c384 = arith.constant 384 : index
    %70 = vector.load %arg15[%c0_32, %c384] : memref<32x2560xf32, #tpu.memory_space<vmem>>, vector<16x128xf32>
    tpu.vector_store %arg15[%c0_32, %c384], %69 {strides = array<i32>} : memref<32x2560xf32, #tpu.memory_space<vmem>>, vector<16x128xf32>,
    %c8_i32_33 = arith.constant 8 : i32
    %71 = arith.muli %arg1, %c8_i32_33 : i32
    %c1_i32 = arith.constant 1 : i32
    %72 = arith.addi %71, %c1_i32 : i32
    %c0_i32_34 = arith.constant 0 : i32
    %c7_i32_35 = arith.constant 7 : i32
    %73 = arith.maxsi %c0_i32_34, %72 : i32
    %74 = arith.minsi %c7_i32_35, %73 : i32
    %c0_36 = arith.constant 0 : index
    %c0_37 = arith.constant 0 : index
    %75 = arith.index_cast %74 : i32 to index
    %c0_38 = arith.constant 0 : index
    %76 = vector.load %arg2[%c0_36, %c0_37, %75, %c0_38] : memref<1x8x8x64xf32, #tpu.memory_space<vmem>>, vector<1x8x1x64xf32>
    %77 = vector.shape_cast %76 : vector<1x8x1x64xf32> to vector<8x64xf32>
    %cst_39 = arith.constant dense<0.000000e+00> : vector<64x64xf32>
    %78 = tpu.matmul %8, %77, %cst_39 {dimension_numbers = #tpu.dot_dimension_numbers<[1], [0], [0], [1], [0, 0, 1, 1], [], []>} : vector<64x8xf32>, vector<8x64xf32>, vector<64x64xf32> -> vector<64x64xf32>
    %79 = vector.extract_strided_slice %78 {offsets = [0, 0], sizes = [16, 64], strides = [1, 1]} : vector<64x64xf32> to vector<16x64xf32>
    %80 = vector.extract_strided_slice %9 {offsets = [0, 0], sizes = [64, 128], strides = [1, 1]} : vector<128x128xf32> to vector<64x128xf32>
    %cst_40 = arith.constant dense<0.000000e+00> : vector<16x128xf32>
    %81 = tpu.matmul %79, %80, %cst_40 {dimension_numbers = #tpu.dot_dimension_numbers<[1], [0], [0], [1], [0, 0, 1, 1], [], []>} : vector<16x64xf32>, vector<64x128xf32>, vector<16x128xf32> -> vector<16x128xf32>
    %82 = vector.extract_strided_slice %78 {offsets = [16, 0], sizes = [16, 64], strides = [1, 1]} : vector<64x64xf32> to vector<16x64xf32>
    %83 = vector.extract_strided_slice %9 {offsets = [64, 0], sizes = [64, 128], strides = [1, 1]} : vector<128x128xf32> to vector<64x128xf32>
    %cst_41 = arith.constant dense<0.000000e+00> : vector<16x128xf32>
    %84 = tpu.matmul %82, %83, %cst_41 {dimension_numbers = #tpu.dot_dimension_numbers<[1], [0], [0], [1], [0, 0, 1, 1], [], []>} : vector<16x64xf32>, vector<64x128xf32>, vector<16x128xf32> -> vector<16x128xf32>
    %85 = arith.addf %81, %84 : vector<16x128xf32>
    %86 = vector.broadcast %10 : vector<16x1xf32> to vector<16x128xf32>
    %87 = arith.addf %85, %86 : vector<16x128xf32>
    %c0_42 = arith.constant 0 : index
    %c512 = arith.constant 512 : index
    %88 = vector.load %arg15[%c0_42, %c512] : memref<32x2560xf32, #tpu.memory_space<vmem>>, vector<16x128xf32>
    tpu.vector_store %arg15[%c0_42, %c512], %87 {strides = array<i32>} : memref<32x2560xf32, #tpu.memory_space<vmem>>, vector<16x128xf32>,
    %89 = vector.extract_strided_slice %78 {offsets = [32, 0], sizes = [16, 64], strides = [1, 1]} : vector<64x64xf32> to vector<16x64xf32>
    %90 = vector.extract_strided_slice %9 {offsets = [0, 0], sizes = [64, 128], strides = [1, 1]} : vector<128x128xf32> to vector<64x128xf32>
    %cst_43 = arith.constant dense<0.000000e+00> : vector<16x128xf32>
    %91 = tpu.matmul %89, %90, %cst_43 {dimension_numbers = #tpu.dot_dimension_numbers<[1], [0], [0], [1], [0, 0, 1, 1], [], []>} : vector<16x64xf32>, vector<64x128xf32>, vector<16x128xf32> -> vector<16x128xf32>
    %92 = vector.extract_strided_slice %78 {offsets = [48, 0], sizes = [16, 64], strides = [1, 1]} : vector<64x64xf32> to vector<16x64xf32>
    %93 = vector.extract_strided_slice %9 {offsets = [64, 0], sizes = [64, 128], strides = [1, 1]} : vector<128x128xf32> to vector<64x128xf32>
    %cst_44 = arith.constant dense<0.000000e+00> : vector<16x128xf32>
    %94 = tpu.matmul %92, %93, %cst_44 {dimension_numbers = #tpu.dot_dimension_numbers<[1], [0], [0], [1], [0, 0, 1, 1], [], []>} : vector<16x64xf32>, vector<64x128xf32>, vector<16x128xf32> -> vector<16x128xf32>
    %95 = arith.addf %91, %94 : vector<16x128xf32>
    %96 = vector.broadcast %10 : vector<16x1xf32> to vector<16x128xf32>
    %97 = arith.addf %95, %96 : vector<16x128xf32>
    %c0_45 = arith.constant 0 : index
    %c640 = arith.constant 640 : index
    %98 = vector.load %arg15[%c0_45, %c640] : memref<32x2560xf32, #tpu.memory_space<vmem>>, vector<16x128xf32>
    tpu.vector_store %arg15[%c0_45, %c640], %97 {strides = array<i32>} : memref<32x2560xf32, #tpu.memory_space<vmem>>, vector<16x128xf32>,
    %c8_i32_46 = arith.constant 8 : i32
    %99 = arith.muli %arg1, %c8_i32_46 : i32
    %c2_i32 = arith.constant 2 : i32
    %100 = arith.addi %99, %c2_i32 : i32
    %c0_i32_47 = arith.constant 0 : i32
    %c7_i32_48 = arith.constant 7 : i32
    %101 = arith.maxsi %c0_i32_47, %100 : i32
    %102 = arith.minsi %c7_i32_48, %101 : i32
    %c0_49 = arith.constant 0 : index
    %c0_50 = arith.constant 0 : index
    %103 = arith.index_cast %102 : i32 to index
    %c0_51 = arith.constant 0 : index
    %104 = vector.load %arg2[%c0_49, %c0_50, %103, %c0_51] : memref<1x8x8x64xf32, #tpu.memory_space<vmem>>, vector<1x8x1x64xf32>
    %105 = vector.shape_cast %104 : vector<1x8x1x64xf32> to vector<8x64xf32>
    %cst_52 = arith.constant dense<0.000000e+00> : vector<64x64xf32>
    %106 = tpu.matmul %8, %105, %cst_52 {dimension_numbers = #tpu.dot_dimension_numbers<[1], [0], [0], [1], [0, 0, 1, 1], [], []>} : vector<64x8xf32>, vector<8x64xf32>, vector<64x64xf32> -> vector<64x64xf32>
    %107 = vector.extract_strided_slice %106 {offsets = [0, 0], sizes = [16, 64], strides = [1, 1]} : vector<64x64xf32> to vector<16x64xf32>
    %108 = vector.extract_strided_slice %9 {offsets = [0, 0], sizes = [64, 128], strides = [1, 1]} : vector<128x128xf32> to vector<64x128xf32>
    %cst_53 = arith.constant dense<0.000000e+00> : vector<16x128xf32>
    %109 = tpu.matmul %107, %108, %cst_53 {dimension_numbers = #tpu.dot_dimension_numbers<[1], [0], [0], [1], [0, 0, 1, 1], [], []>} : vector<16x64xf32>, vector<64x128xf32>, vector<16x128xf32> -> vector<16x128xf32>
    %110 = vector.extract_strided_slice %106 {offsets = [16, 0], sizes = [16, 64], strides = [1, 1]} : vector<64x64xf32> to vector<16x64xf32>
    %111 = vector.extract_strided_slice %9 {offsets = [64, 0], sizes = [64, 128], strides = [1, 1]} : vector<128x128xf32> to vector<64x128xf32>
    %cst_54 = arith.constant dense<0.000000e+00> : vector<16x128xf32>
    %112 = tpu.matmul %110, %111, %cst_54 {dimension_numbers = #tpu.dot_dimension_numbers<[1], [0], [0], [1], [0, 0, 1, 1], [], []>} : vector<16x64xf32>, vector<64x128xf32>, vector<16x128xf32> -> vector<16x128xf32>
    %113 = arith.addf %109, %112 : vector<16x128xf32>
    %114 = vector.broadcast %10 : vector<16x1xf32> to vector<16x128xf32>
    %115 = arith.addf %113, %114 : vector<16x128xf32>
    %c0_55 = arith.constant 0 : index
    %c768 = arith.constant 768 : index
    %116 = vector.load %arg15[%c0_55, %c768] : memref<32x2560xf32, #tpu.memory_space<vmem>>, vector<16x128xf32>
    tpu.vector_store %arg15[%c0_55, %c768], %115 {strides = array<i32>} : memref<32x2560xf32, #tpu.memory_space<vmem>>, vector<16x128xf32>,
    %117 = vector.extract_strided_slice %106 {offsets = [32, 0], sizes = [16, 64], strides = [1, 1]} : vector<64x64xf32> to vector<16x64xf32>
    %118 = vector.extract_strided_slice %9 {offsets = [0, 0], sizes = [64, 128], strides = [1, 1]} : vector<128x128xf32> to vector<64x128xf32>
    %cst_56 = arith.constant dense<0.000000e+00> : vector<16x128xf32>
    %119 = tpu.matmul %117, %118, %cst_56 {dimension_numbers = #tpu.dot_dimension_numbers<[1], [0], [0], [1], [0, 0, 1, 1], [], []>} : vector<16x64xf32>, vector<64x128xf32>, vector<16x128xf32> -> vector<16x128xf32>
    %120 = vector.extract_strided_slice %106 {offsets = [48, 0], sizes = [16, 64], strides = [1, 1]} : vector<64x64xf32> to vector<16x64xf32>
    %121 = vector.extract_strided_slice %9 {offsets = [64, 0], sizes = [64, 128], strides = [1, 1]} : vector<128x128xf32> to vector<64x128xf32>
    %cst_57 = arith.constant dense<0.000000e+00> : vector<16x128xf32>
    %122 = tpu.matmul %120, %121, %cst_57 {dimension_numbers = #tpu.dot_dimension_numbers<[1], [0], [0], [1], [0, 0, 1, 1], [], []>} : vector<16x64xf32>, vector<64x128xf32>, vector<16x128xf32> -> vector<16x128xf32>
    %123 = arith.addf %119, %122 : vector<16x128xf32>
    %124 = vector.broadcast %10 : vector<16x1xf32> to vector<16x128xf32>
    %125 = arith.addf %123, %124 : vector<16x128xf32>
    %c0_58 = arith.constant 0 : index
    %c896 = arith.constant 896 : index
    %126 = vector.load %arg15[%c0_58, %c896] : memref<32x2560xf32, #tpu.memory_space<vmem>>, vector<16x128xf32>
    tpu.vector_store %arg15[%c0_58, %c896], %125 {strides = array<i32>} : memref<32x2560xf32, #tpu.memory_space<vmem>>, vector<16x128xf32>,
    %c8_i32_59 = arith.constant 8 : i32
    %127 = arith.muli %arg1, %c8_i32_59 : i32
    %c3_i32 = arith.constant 3 : i32
    %128 = arith.addi %127, %c3_i32 : i32
    %c0_i32_60 = arith.constant 0 : i32
    %c7_i32_61 = arith.constant 7 : i32
    %129 = arith.maxsi %c0_i32_60, %128 : i32
    %130 = arith.minsi %c7_i32_61, %129 : i32
    %c0_62 = arith.constant 0 : index
    %c0_63 = arith.constant 0 : index
    %131 = arith.index_cast %130 : i32 to index
    %c0_64 = arith.constant 0 : index
    %132 = vector.load %arg2[%c0_62, %c0_63, %131, %c0_64] : memref<1x8x8x64xf32, #tpu.memory_space<vmem>>, vector<1x8x1x64xf32>
    %133 = vector.shape_cast %132 : vector<1x8x1x64xf32> to vector<8x64xf32>
    %cst_65 = arith.constant dense<0.000000e+00> : vector<64x64xf32>
    %134 = tpu.matmul %8, %133, %cst_65 {dimension_numbers = #tpu.dot_dimension_numbers<[1], [0], [0], [1], [0, 0, 1, 1], [], []>} : vector<64x8xf32>, vector<8x64xf32>, vector<64x64xf32> -> vector<64x64xf32>
    %135 = vector.extract_strided_slice %134 {offsets = [0, 0], sizes = [16, 64], strides = [1, 1]} : vector<64x64xf32> to vector<16x64xf32>
    %136 = vector.extract_strided_slice %9 {offsets = [0, 0], sizes = [64, 128], strides = [1, 1]} : vector<128x128xf32> to vector<64x128xf32>
    %cst_66 = arith.constant dense<0.000000e+00> : vector<16x128xf32>
    %137 = tpu.matmul %135, %136, %cst_66 {dimension_numbers = #tpu.dot_dimension_numbers<[1], [0], [0], [1], [0, 0, 1, 1], [], []>} : vector<16x64xf32>, vector<64x128xf32>, vector<16x128xf32> -> vector<16x128xf32>
    %138 = vector.extract_strided_slice %134 {offsets = [16, 0], sizes = [16, 64], strides = [1, 1]} : vector<64x64xf32> to vector<16x64xf32>
    %139 = vector.extract_strided_slice %9 {offsets = [64, 0], sizes = [64, 128], strides = [1, 1]} : vector<128x128xf32> to vector<64x128xf32>
    %cst_67 = arith.constant dense<0.000000e+00> : vector<16x128xf32>
    %140 = tpu.matmul %138, %139, %cst_67 {dimension_numbers = #tpu.dot_dimension_numbers<[1], [0], [0], [1], [0, 0, 1, 1], [], []>} : vector<16x64xf32>, vector<64x128xf32>, vector<16x128xf32> -> vector<16x128xf32>
    %141 = arith.addf %137, %140 : vector<16x128xf32>
    %142 = vector.broadcast %10 : vector<16x1xf32> to vector<16x128xf32>
    %143 = arith.addf %141, %142 : vector<16x128xf32>
    %c0_68 = arith.constant 0 : index
    %c1024 = arith.constant 1024 : index
    %144 = vector.load %arg15[%c0_68, %c1024] : memref<32x2560xf32, #tpu.memory_space<vmem>>, vector<16x128xf32>
    tpu.vector_store %arg15[%c0_68, %c1024], %143 {strides = array<i32>} : memref<32x2560xf32, #tpu.memory_space<vmem>>, vector<16x128xf32>,
    %145 = vector.extract_strided_slice %134 {offsets = [32, 0], sizes = [16, 64], strides = [1, 1]} : vector<64x64xf32> to vector<16x64xf32>
    %146 = vector.extract_strided_slice %9 {offsets = [0, 0], sizes = [64, 128], strides = [1, 1]} : vector<128x128xf32> to vector<64x128xf32>
    %cst_69 = arith.constant dense<0.000000e+00> : vector<16x128xf32>
    %147 = tpu.matmul %145, %146, %cst_69 {dimension_numbers = #tpu.dot_dimension_numbers<[1], [0], [0], [1], [0, 0, 1, 1], [], []>} : vector<16x64xf32>, vector<64x128xf32>, vector<16x128xf32> -> vector<16x128xf32>
    %148 = vector.extract_strided_slice %134 {offsets = [48, 0], sizes = [16, 64], strides = [1, 1]} : vector<64x64xf32> to vector<16x64xf32>
    %149 = vector.extract_strided_slice %9 {offsets = [64, 0], sizes = [64, 128], strides = [1, 1]} : vector<128x128xf32> to vector<64x128xf32>
    %cst_70 = arith.constant dense<0.000000e+00> : vector<16x128xf32>
    %150 = tpu.matmul %148, %149, %cst_70 {dimension_numbers = #tpu.dot_dimension_numbers<[1], [0], [0], [1], [0, 0, 1, 1], [], []>} : vector<16x64xf32>, vector<64x128xf32>, vector<16x128xf32> -> vector<16x128xf32>
    %151 = arith.addf %147, %150 : vector<16x128xf32>
    %152 = vector.broadcast %10 : vector<16x1xf32> to vector<16x128xf32>
    %153 = arith.addf %151, %152 : vector<16x128xf32>
    %c0_71 = arith.constant 0 : index
    %c1152 = arith.constant 1152 : index
    %154 = vector.load %arg15[%c0_71, %c1152] : memref<32x2560xf32, #tpu.memory_space<vmem>>, vector<16x128xf32>
    tpu.vector_store %arg15[%c0_71, %c1152], %153 {strides = array<i32>} : memref<32x2560xf32, #tpu.memory_space<vmem>>, vector<16x128xf32>,
    %c8_i32_72 = arith.constant 8 : i32
    %155 = arith.muli %arg1, %c8_i32_72 : i32
    %c4_i32 = arith.constant 4 : i32
    %156 = arith.addi %155, %c4_i32 : i32
    %c0_i32_73 = arith.constant 0 : i32
    %c7_i32_74 = arith.constant 7 : i32
    %157 = arith.maxsi %c0_i32_73, %156 : i32
    %158 = arith.minsi %c7_i32_74, %157 : i32
    %c0_75 = arith.constant 0 : index
    %c0_76 = arith.constant 0 : index
    %159 = arith.index_cast %158 : i32 to index
    %c0_77 = arith.constant 0 : index
    %160 = vector.load %arg2[%c0_75, %c0_76, %159, %c0_77] : memref<1x8x8x64xf32, #tpu.memory_space<vmem>>, vector<1x8x1x64xf32>
    %161 = vector.shape_cast %160 : vector<1x8x1x64xf32> to vector<8x64xf32>
    %cst_78 = arith.constant dense<0.000000e+00> : vector<64x64xf32>
    %162 = tpu.matmul %8, %161, %cst_78 {dimension_numbers = #tpu.dot_dimension_numbers<[1], [0], [0], [1], [0, 0, 1, 1], [], []>} : vector<64x8xf32>, vector<8x64xf32>, vector<64x64xf32> -> vector<64x64xf32>
    %163 = vector.extract_strided_slice %162 {offsets = [0, 0], sizes = [16, 64], strides = [1, 1]} : vector<64x64xf32> to vector<16x64xf32>
    %164 = vector.extract_strided_slice %9 {offsets = [0, 0], sizes = [64, 128], strides = [1, 1]} : vector<128x128xf32> to vector<64x128xf32>
    %cst_79 = arith.constant dense<0.000000e+00> : vector<16x128xf32>
    %165 = tpu.matmul %163, %164, %cst_79 {dimension_numbers = #tpu.dot_dimension_numbers<[1], [0], [0], [1], [0, 0, 1, 1], [], []>} : vector<16x64xf32>, vector<64x128xf32>, vector<16x128xf32> -> vector<16x128xf32>
    %166 = vector.extract_strided_slice %162 {offsets = [16, 0], sizes = [16, 64], strides = [1, 1]} : vector<64x64xf32> to vector<16x64xf32>
    %167 = vector.extract_strided_slice %9 {offsets = [64, 0], sizes = [64, 128], strides = [1, 1]} : vector<128x128xf32> to vector<64x128xf32>
    %cst_80 = arith.constant dense<0.000000e+00> : vector<16x128xf32>
    %168 = tpu.matmul %166, %167, %cst_80 {dimension_numbers = #tpu.dot_dimension_numbers<[1], [0], [0], [1], [0, 0, 1, 1], [], []>} : vector<16x64xf32>, vector<64x128xf32>, vector<16x128xf32> -> vector<16x128xf32>
    %169 = arith.addf %165, %168 : vector<16x128xf32>
    %170 = vector.broadcast %10 : vector<16x1xf32> to vector<16x128xf32>
    %171 = arith.addf %169, %170 : vector<16x128xf32>
    %c0_81 = arith.constant 0 : index
    %c1280 = arith.constant 1280 : index
    %172 = vector.load %arg15[%c0_81, %c1280] : memref<32x2560xf32, #tpu.memory_space<vmem>>, vector<16x128xf32>
    tpu.vector_store %arg15[%c0_81, %c1280], %171 {strides = array<i32>} : memref<32x2560xf32, #tpu.memory_space<vmem>>, vector<16x128xf32>,
    %173 = vector.extract_strided_slice %162 {offsets = [32, 0], sizes = [16, 64], strides = [1, 1]} : vector<64x64xf32> to vector<16x64xf32>
    %174 = vector.extract_strided_slice %9 {offsets = [0, 0], sizes = [64, 128], strides = [1, 1]} : vector<128x128xf32> to vector<64x128xf32>
    %cst_82 = arith.constant dense<0.000000e+00> : vector<16x128xf32>
    %175 = tpu.matmul %173, %174, %cst_82 {dimension_numbers = #tpu.dot_dimension_numbers<[1], [0], [0], [1], [0, 0, 1, 1], [], []>} : vector<16x64xf32>, vector<64x128xf32>, vector<16x128xf32> -> vector<16x128xf32>
    %176 = vector.extract_strided_slice %162 {offsets = [48, 0], sizes = [16, 64], strides = [1, 1]} : vector<64x64xf32> to vector<16x64xf32>
    %177 = vector.extract_strided_slice %9 {offsets = [64, 0], sizes = [64, 128], strides = [1, 1]} : vector<128x128xf32> to vector<64x128xf32>
    %cst_83 = arith.constant dense<0.000000e+00> : vector<16x128xf32>
    %178 = tpu.matmul %176, %177, %cst_83 {dimension_numbers = #tpu.dot_dimension_numbers<[1], [0], [0], [1], [0, 0, 1, 1], [], []>} : vector<16x64xf32>, vector<64x128xf32>, vector<16x128xf32> -> vector<16x128xf32>
    %179 = arith.addf %175, %178 : vector<16x128xf32>
    %180 = vector.broadcast %10 : vector<16x1xf32> to vector<16x128xf32>
    %181 = arith.addf %179, %180 : vector<16x128xf32>
    %c0_84 = arith.constant 0 : index
    %c1408 = arith.constant 1408 : index
    %182 = vector.load %arg15[%c0_84, %c1408] : memref<32x2560xf32, #tpu.memory_space<vmem>>, vector<16x128xf32>
    tpu.vector_store %arg15[%c0_84, %c1408], %181 {strides = array<i32>} : memref<32x2560xf32, #tpu.memory_space<vmem>>, vector<16x128xf32>,
    %c8_i32_85 = arith.constant 8 : i32
    %183 = arith.muli %arg1, %c8_i32_85 : i32
    %c5_i32 = arith.constant 5 : i32
    %184 = arith.addi %183, %c5_i32 : i32
    %c0_i32_86 = arith.constant 0 : i32
    %c7_i32_87 = arith.constant 7 : i32
    %185 = arith.maxsi %c0_i32_86, %184 : i32
    %186 = arith.minsi %c7_i32_87, %185 : i32
    %c0_88 = arith.constant 0 : index
    %c0_89 = arith.constant 0 : index
    %187 = arith.index_cast %186 : i32 to index
    %c0_90 = arith.constant 0 : index
    %188 = vector.load %arg2[%c0_88, %c0_89, %187, %c0_90] : memref<1x8x8x64xf32, #tpu.memory_space<vmem>>, vector<1x8x1x64xf32>
    %189 = vector.shape_cast %188 : vector<1x8x1x64xf32> to vector<8x64xf32>
    %cst_91 = arith.constant dense<0.000000e+00> : vector<64x64xf32>
    %190 = tpu.matmul %8, %189, %cst_91 {dimension_numbers = #tpu.dot_dimension_numbers<[1], [0], [0], [1], [0, 0, 1, 1], [], []>} : vector<64x8xf32>, vector<8x64xf32>, vector<64x64xf32> -> vector<64x64xf32>
    %191 = vector.extract_strided_slice %190 {offsets = [0, 0], sizes = [16, 64], strides = [1, 1]} : vector<64x64xf32> to vector<16x64xf32>
    %192 = vector.extract_strided_slice %9 {offsets = [0, 0], sizes = [64, 128], strides = [1, 1]} : vector<128x128xf32> to vector<64x128xf32>
    %cst_92 = arith.constant dense<0.000000e+00> : vector<16x128xf32>
    %193 = tpu.matmul %191, %192, %cst_92 {dimension_numbers = #tpu.dot_dimension_numbers<[1], [0], [0], [1], [0, 0, 1, 1], [], []>} : vector<16x64xf32>, vector<64x128xf32>, vector<16x128xf32> -> vector<16x128xf32>
    %194 = vector.extract_strided_slice %190 {offsets = [16, 0], sizes = [16, 64], strides = [1, 1]} : vector<64x64xf32> to vector<16x64xf32>
    %195 = vector.extract_strided_slice %9 {offsets = [64, 0], sizes = [64, 128], strides = [1, 1]} : vector<128x128xf32> to vector<64x128xf32>
    %cst_93 = arith.constant dense<0.000000e+00> : vector<16x128xf32>
    %196 = tpu.matmul %194, %195, %cst_93 {dimension_numbers = #tpu.dot_dimension_numbers<[1], [0], [0], [1], [0, 0, 1, 1], [], []>} : vector<16x64xf32>, vector<64x128xf32>, vector<16x128xf32> -> vector<16x128xf32>
    %197 = arith.addf %193, %196 : vector<16x128xf32>
    %198 = vector.broadcast %10 : vector<16x1xf32> to vector<16x128xf32>
    %199 = arith.addf %197, %198 : vector<16x128xf32>
    %c0_94 = arith.constant 0 : index
    %c1536 = arith.constant 1536 : index
    %200 = vector.load %arg15[%c0_94, %c1536] : memref<32x2560xf32, #tpu.memory_space<vmem>>, vector<16x128xf32>
    tpu.vector_store %arg15[%c0_94, %c1536], %199 {strides = array<i32>} : memref<32x2560xf32, #tpu.memory_space<vmem>>, vector<16x128xf32>,
    %201 = vector.extract_strided_slice %190 {offsets = [32, 0], sizes = [16, 64], strides = [1, 1]} : vector<64x64xf32> to vector<16x64xf32>
    %202 = vector.extract_strided_slice %9 {offsets = [0, 0], sizes = [64, 128], strides = [1, 1]} : vector<128x128xf32> to vector<64x128xf32>
    %cst_95 = arith.constant dense<0.000000e+00> : vector<16x128xf32>
    %203 = tpu.matmul %201, %202, %cst_95 {dimension_numbers = #tpu.dot_dimension_numbers<[1], [0], [0], [1], [0, 0, 1, 1], [], []>} : vector<16x64xf32>, vector<64x128xf32>, vector<16x128xf32> -> vector<16x128xf32>
    %204 = vector.extract_strided_slice %190 {offsets = [48, 0], sizes = [16, 64], strides = [1, 1]} : vector<64x64xf32> to vector<16x64xf32>
    %205 = vector.extract_strided_slice %9 {offsets = [64, 0], sizes = [64, 128], strides = [1, 1]} : vector<128x128xf32> to vector<64x128xf32>
    %cst_96 = arith.constant dense<0.000000e+00> : vector<16x128xf32>
    %206 = tpu.matmul %204, %205, %cst_96 {dimension_numbers = #tpu.dot_dimension_numbers<[1], [0], [0], [1], [0, 0, 1, 1], [], []>} : vector<16x64xf32>, vector<64x128xf32>, vector<16x128xf32> -> vector<16x128xf32>
    %207 = arith.addf %203, %206 : vector<16x128xf32>
    %208 = vector.broadcast %10 : vector<16x1xf32> to vector<16x128xf32>
    %209 = arith.addf %207, %208 : vector<16x128xf32>
    %c0_97 = arith.constant 0 : index
    %c1664 = arith.constant 1664 : index
    %210 = vector.load %arg15[%c0_97, %c1664] : memref<32x2560xf32, #tpu.memory_space<vmem>>, vector<16x128xf32>
    tpu.vector_store %arg15[%c0_97, %c1664], %209 {strides = array<i32>} : memref<32x2560xf32, #tpu.memory_space<vmem>>, vector<16x128xf32>,
    %c8_i32_98 = arith.constant 8 : i32
    %211 = arith.muli %arg1, %c8_i32_98 : i32
    %c6_i32 = arith.constant 6 : i32
    %212 = arith.addi %211, %c6_i32 : i32
    %c0_i32_99 = arith.constant 0 : i32
    %c7_i32_100 = arith.constant 7 : i32
    %213 = arith.maxsi %c0_i32_99, %212 : i32
    %214 = arith.minsi %c7_i32_100, %213 : i32
    %c0_101 = arith.constant 0 : index
    %c0_102 = arith.constant 0 : index
    %215 = arith.index_cast %214 : i32 to index
    %c0_103 = arith.constant 0 : index
    %216 = vector.load %arg2[%c0_101, %c0_102, %215, %c0_103] : memref<1x8x8x64xf32, #tpu.memory_space<vmem>>, vector<1x8x1x64xf32>
    %217 = vector.shape_cast %216 : vector<1x8x1x64xf32> to vector<8x64xf32>
    %cst_104 = arith.constant dense<0.000000e+00> : vector<64x64xf32>
    %218 = tpu.matmul %8, %217, %cst_104 {dimension_numbers = #tpu.dot_dimension_numbers<[1], [0], [0], [1], [0, 0, 1, 1], [], []>} : vector<64x8xf32>, vector<8x64xf32>, vector<64x64xf32> -> vector<64x64xf32>
    %219 = vector.extract_strided_slice %218 {offsets = [0, 0], sizes = [16, 64], strides = [1, 1]} : vector<64x64xf32> to vector<16x64xf32>
    %220 = vector.extract_strided_slice %9 {offsets = [0, 0], sizes = [64, 128], strides = [1, 1]} : vector<128x128xf32> to vector<64x128xf32>
    %cst_105 = arith.constant dense<0.000000e+00> : vector<16x128xf32>
    %221 = tpu.matmul %219, %220, %cst_105 {dimension_numbers = #tpu.dot_dimension_numbers<[1], [0], [0], [1], [0, 0, 1, 1], [], []>} : vector<16x64xf32>, vector<64x128xf32>, vector<16x128xf32> -> vector<16x128xf32>
    %222 = vector.extract_strided_slice %218 {offsets = [16, 0], sizes = [16, 64], strides = [1, 1]} : vector<64x64xf32> to vector<16x64xf32>
    %223 = vector.extract_strided_slice %9 {offsets = [64, 0], sizes = [64, 128], strides = [1, 1]} : vector<128x128xf32> to vector<64x128xf32>
    %cst_106 = arith.constant dense<0.000000e+00> : vector<16x128xf32>
    %224 = tpu.matmul %222, %223, %cst_106 {dimension_numbers = #tpu.dot_dimension_numbers<[1], [0], [0], [1], [0, 0, 1, 1], [], []>} : vector<16x64xf32>, vector<64x128xf32>, vector<16x128xf32> -> vector<16x128xf32>
    %225 = arith.addf %221, %224 : vector<16x128xf32>
    %226 = vector.broadcast %10 : vector<16x1xf32> to vector<16x128xf32>
    %227 = arith.addf %225, %226 : vector<16x128xf32>
    %c0_107 = arith.constant 0 : index
    %c1792 = arith.constant 1792 : index
    %228 = vector.load %arg15[%c0_107, %c1792] : memref<32x2560xf32, #tpu.memory_space<vmem>>, vector<16x128xf32>
    tpu.vector_store %arg15[%c0_107, %c1792], %227 {strides = array<i32>} : memref<32x2560xf32, #tpu.memory_space<vmem>>, vector<16x128xf32>,
    %229 = vector.extract_strided_slice %218 {offsets = [32, 0], sizes = [16, 64], strides = [1, 1]} : vector<64x64xf32> to vector<16x64xf32>
    %230 = vector.extract_strided_slice %9 {offsets = [0, 0], sizes = [64, 128], strides = [1, 1]} : vector<128x128xf32> to vector<64x128xf32>
    %cst_108 = arith.constant dense<0.000000e+00> : vector<16x128xf32>
    %231 = tpu.matmul %229, %230, %cst_108 {dimension_numbers = #tpu.dot_dimension_numbers<[1], [0], [0], [1], [0, 0, 1, 1], [], []>} : vector<16x64xf32>, vector<64x128xf32>, vector<16x128xf32> -> vector<16x128xf32>
    %232 = vector.extract_strided_slice %218 {offsets = [48, 0], sizes = [16, 64], strides = [1, 1]} : vector<64x64xf32> to vector<16x64xf32>
    %233 = vector.extract_strided_slice %9 {offsets = [64, 0], sizes = [64, 128], strides = [1, 1]} : vector<128x128xf32> to vector<64x128xf32>
    %cst_109 = arith.constant dense<0.000000e+00> : vector<16x128xf32>
    %234 = tpu.matmul %232, %233, %cst_109 {dimension_numbers = #tpu.dot_dimension_numbers<[1], [0], [0], [1], [0, 0, 1, 1], [], []>} : vector<16x64xf32>, vector<64x128xf32>, vector<16x128xf32> -> vector<16x128xf32>
    %235 = arith.addf %231, %234 : vector<16x128xf32>
    %236 = vector.broadcast %10 : vector<16x1xf32> to vector<16x128xf32>
    %237 = arith.addf %235, %236 : vector<16x128xf32>
    %c0_110 = arith.constant 0 : index
    %c1920 = arith.constant 1920 : index
    %238 = vector.load %arg15[%c0_110, %c1920] : memref<32x2560xf32, #tpu.memory_space<vmem>>, vector<16x128xf32>
    tpu.vector_store %arg15[%c0_110, %c1920], %237 {strides = array<i32>} : memref<32x2560xf32, #tpu.memory_space<vmem>>, vector<16x128xf32>,
    %c8_i32_111 = arith.constant 8 : i32
    %239 = arith.muli %arg1, %c8_i32_111 : i32
    %c7_i32_112 = arith.constant 7 : i32
    %240 = arith.addi %239, %c7_i32_112 : i32
    %c0_i32_113 = arith.constant 0 : i32
    %c7_i32_114 = arith.constant 7 : i32
    %241 = arith.maxsi %c0_i32_113, %240 : i32
    %242 = arith.minsi %c7_i32_114, %241 : i32
    %c0_115 = arith.constant 0 : index
    %c0_116 = arith.constant 0 : index
    %243 = arith.index_cast %242 : i32 to index
    %c0_117 = arith.constant 0 : index
    %244 = vector.load %arg2[%c0_115, %c0_116, %243, %c0_117] : memref<1x8x8x64xf32, #tpu.memory_space<vmem>>, vector<1x8x1x64xf32>
    %245 = vector.shape_cast %244 : vector<1x8x1x64xf32> to vector<8x64xf32>
    %cst_118 = arith.constant dense<0.000000e+00> : vector<64x64xf32>
    %246 = tpu.matmul %8, %245, %cst_118 {dimension_numbers = #tpu.dot_dimension_numbers<[1], [0], [0], [1], [0, 0, 1, 1], [], []>} : vector<64x8xf32>, vector<8x64xf32>, vector<64x64xf32> -> vector<64x64xf32>
    %247 = vector.extract_strided_slice %246 {offsets = [0, 0], sizes = [16, 64], strides = [1, 1]} : vector<64x64xf32> to vector<16x64xf32>
    %248 = vector.extract_strided_slice %9 {offsets = [0, 0], sizes = [64, 128], strides = [1, 1]} : vector<128x128xf32> to vector<64x128xf32>
    %cst_119 = arith.constant dense<0.000000e+00> : vector<16x128xf32>
    %249 = tpu.matmul %247, %248, %cst_119 {dimension_numbers = #tpu.dot_dimension_numbers<[1], [0], [0], [1], [0, 0, 1, 1], [], []>} : vector<16x64xf32>, vector<64x128xf32>, vector<16x128xf32> -> vector<16x128xf32>
    %250 = vector.extract_strided_slice %246 {offsets = [16, 0], sizes = [16, 64], strides = [1, 1]} : vector<64x64xf32> to vector<16x64xf32>
    %251 = vector.extract_strided_slice %9 {offsets = [64, 0], sizes = [64, 128], strides = [1, 1]} : vector<128x128xf32> to vector<64x128xf32>
    %cst_120 = arith.constant dense<0.000000e+00> : vector<16x128xf32>
    %252 = tpu.matmul %250, %251, %cst_120 {dimension_numbers = #tpu.dot_dimension_numbers<[1], [0], [0], [1], [0, 0, 1, 1], [], []>} : vector<16x64xf32>, vector<64x128xf32>, vector<16x128xf32> -> vector<16x128xf32>
    %253 = arith.addf %249, %252 : vector<16x128xf32>
    %254 = vector.broadcast %10 : vector<16x1xf32> to vector<16x128xf32>
    %255 = arith.addf %253, %254 : vector<16x128xf32>
    %c0_121 = arith.constant 0 : index
    %c2048 = arith.constant 2048 : index
    %256 = vector.load %arg15[%c0_121, %c2048] : memref<32x2560xf32, #tpu.memory_space<vmem>>, vector<16x128xf32>
    tpu.vector_store %arg15[%c0_121, %c2048], %255 {strides = array<i32>} : memref<32x2560xf32, #tpu.memory_space<vmem>>, vector<16x128xf32>,
    %257 = vector.extract_strided_slice %246 {offsets = [32, 0], sizes = [16, 64], strides = [1, 1]} : vector<64x64xf32> to vector<16x64xf32>
    %258 = vector.extract_strided_slice %9 {offsets = [0, 0], sizes = [64, 128], strides = [1, 1]} : vector<128x128xf32> to vector<64x128xf32>
    %cst_122 = arith.constant dense<0.000000e+00> : vector<16x128xf32>
    %259 = tpu.matmul %257, %258, %cst_122 {dimension_numbers = #tpu.dot_dimension_numbers<[1], [0], [0], [1], [0, 0, 1, 1], [], []>} : vector<16x64xf32>, vector<64x128xf32>, vector<16x128xf32> -> vector<16x128xf32>
    %260 = vector.extract_strided_slice %246 {offsets = [48, 0], sizes = [16, 64], strides = [1, 1]} : vector<64x64xf32> to vector<16x64xf32>
    %261 = vector.extract_strided_slice %9 {offsets = [64, 0], sizes = [64, 128], strides = [1, 1]} : vector<128x128xf32> to vector<64x128xf32>
    %cst_123 = arith.constant dense<0.000000e+00> : vector<16x128xf32>
    %262 = tpu.matmul %260, %261, %cst_123 {dimension_numbers = #tpu.dot_dimension_numbers<[1], [0], [0], [1], [0, 0, 1, 1], [], []>} : vector<16x64xf32>, vector<64x128xf32>, vector<16x128xf32> -> vector<16x128xf32>
    %263 = arith.addf %259, %262 : vector<16x128xf32>
    %264 = vector.broadcast %10 : vector<16x1xf32> to vector<16x128xf32>
    %265 = arith.addf %263, %264 : vector<16x128xf32>
    %c0_124 = arith.constant 0 : index
    %c2176 = arith.constant 2176 : index
    %266 = vector.load %arg15[%c0_124, %c2176] : memref<32x2560xf32, #tpu.memory_space<vmem>>, vector<16x128xf32>
    tpu.vector_store %arg15[%c0_124, %c2176], %265 {strides = array<i32>} : memref<32x2560xf32, #tpu.memory_space<vmem>>, vector<16x128xf32>,
    %c8_i32_125 = arith.constant 8 : i32
    %267 = arith.muli %arg1, %c8_i32_125 : i32
    %c8_i32_126 = arith.constant 8 : i32
    %268 = arith.addi %267, %c8_i32_126 : i32
    %c0_i32_127 = arith.constant 0 : i32
    %c7_i32_128 = arith.constant 7 : i32
    %269 = arith.maxsi %c0_i32_127, %268 : i32
    %270 = arith.minsi %c7_i32_128, %269 : i32
    %c0_129 = arith.constant 0 : index
    %c0_130 = arith.constant 0 : index
    %271 = arith.index_cast %270 : i32 to index
    %c0_131 = arith.constant 0 : index
    %272 = vector.load %arg2[%c0_129, %c0_130, %271, %c0_131] : memref<1x8x8x64xf32, #tpu.memory_space<vmem>>, vector<1x8x1x64xf32>
    %273 = vector.shape_cast %272 : vector<1x8x1x64xf32> to vector<8x64xf32>
    %cst_132 = arith.constant dense<0.000000e+00> : vector<64x64xf32>
    %274 = tpu.matmul %8, %273, %cst_132 {dimension_numbers = #tpu.dot_dimension_numbers<[1], [0], [0], [1], [0, 0, 1, 1], [], []>} : vector<64x8xf32>, vector<8x64xf32>, vector<64x64xf32> -> vector<64x64xf32>
    %275 = vector.extract_strided_slice %274 {offsets = [0, 0], sizes = [16, 64], strides = [1, 1]} : vector<64x64xf32> to vector<16x64xf32>
    %276 = vector.extract_strided_slice %9 {offsets = [0, 0], sizes = [64, 128], strides = [1, 1]} : vector<128x128xf32> to vector<64x128xf32>
    %cst_133 = arith.constant dense<0.000000e+00> : vector<16x128xf32>
    %277 = tpu.matmul %275, %276, %cst_133 {dimension_numbers = #tpu.dot_dimension_numbers<[1], [0], [0], [1], [0, 0, 1, 1], [], []>} : vector<16x64xf32>, vector<64x128xf32>, vector<16x128xf32> -> vector<16x128xf32>
    %278 = vector.extract_strided_slice %274 {offsets = [16, 0], sizes = [16, 64], strides = [1, 1]} : vector<64x64xf32> to vector<16x64xf32>
    %279 = vector.extract_strided_slice %9 {offsets = [64, 0], sizes = [64, 128], strides = [1, 1]} : vector<128x128xf32> to vector<64x128xf32>
    %cst_134 = arith.constant dense<0.000000e+00> : vector<16x128xf32>
    %280 = tpu.matmul %278, %279, %cst_134 {dimension_numbers = #tpu.dot_dimension_numbers<[1], [0], [0], [1], [0, 0, 1, 1], [], []>} : vector<16x64xf32>, vector<64x128xf32>, vector<16x128xf32> -> vector<16x128xf32>
    %281 = arith.addf %277, %280 : vector<16x128xf32>
    %282 = vector.broadcast %10 : vector<16x1xf32> to vector<16x128xf32>
    %283 = arith.addf %281, %282 : vector<16x128xf32>
    %284 = vector.broadcast %7 : f32 to vector<16x128xf32>
    %285 = arith.mulf %283, %284 : vector<16x128xf32>
    %c0_135 = arith.constant 0 : index
    %c2304 = arith.constant 2304 : index
    %286 = vector.load %arg15[%c0_135, %c2304] : memref<32x2560xf32, #tpu.memory_space<vmem>>, vector<16x128xf32>
    tpu.vector_store %arg15[%c0_135, %c2304], %285 {strides = array<i32>} : memref<32x2560xf32, #tpu.memory_space<vmem>>, vector<16x128xf32>,
    %287 = vector.extract_strided_slice %274 {offsets = [32, 0], sizes = [16, 64], strides = [1, 1]} : vector<64x64xf32> to vector<16x64xf32>
    %288 = vector.extract_strided_slice %9 {offsets = [0, 0], sizes = [64, 128], strides = [1, 1]} : vector<128x128xf32> to vector<64x128xf32>
    %cst_136 = arith.constant dense<0.000000e+00> : vector<16x128xf32>
    %289 = tpu.matmul %287, %288, %cst_136 {dimension_numbers = #tpu.dot_dimension_numbers<[1], [0], [0], [1], [0, 0, 1, 1], [], []>} : vector<16x64xf32>, vector<64x128xf32>, vector<16x128xf32> -> vector<16x128xf32>
    %290 = vector.extract_strided_slice %274 {offsets = [48, 0], sizes = [16, 64], strides = [1, 1]} : vector<64x64xf32> to vector<16x64xf32>
    %291 = vector.extract_strided_slice %9 {offsets = [64, 0], sizes = [64, 128], strides = [1, 1]} : vector<128x128xf32> to vector<64x128xf32>
    %cst_137 = arith.constant dense<0.000000e+00> : vector<16x128xf32>
    %292 = tpu.matmul %290, %291, %cst_137 {dimension_numbers = #tpu.dot_dimension_numbers<[1], [0], [0], [1], [0, 0, 1, 1], [], []>} : vector<16x64xf32>, vector<64x128xf32>, vector<16x128xf32> -> vector<16x128xf32>
    %293 = arith.addf %289, %292 : vector<16x128xf32>
    %294 = vector.broadcast %10 : vector<16x1xf32> to vector<16x128xf32>
    %295 = arith.addf %293, %294 : vector<16x128xf32>
    %296 = vector.broadcast %7 : f32 to vector<16x128xf32>
    %297 = arith.mulf %295, %296 : vector<16x128xf32>
    %c0_138 = arith.constant 0 : index
    %c2432 = arith.constant 2432 : index
    %298 = vector.load %arg15[%c0_138, %c2432] : memref<32x2560xf32, #tpu.memory_space<vmem>>, vector<16x128xf32>
    tpu.vector_store %arg15[%c0_138, %c2432], %297 {strides = array<i32>} : memref<32x2560xf32, #tpu.memory_space<vmem>>, vector<16x128xf32>,
    %c0_139 = arith.constant 0 : index
    %c0_140 = arith.constant 0 : index
    %c0_141 = arith.constant 0 : index
    %299 = vector.load %arg3[%c0_139, %c0_140, %c0_141] : memref<1x16x2048xf32, #tpu.memory_space<vmem>>, vector<1x16x2048xf32>
    %300 = vector.shape_cast %299 : vector<1x16x2048xf32> to vector<16x2048xf32>
    %c16 = arith.constant 16 : index
    %c256_142 = arith.constant 256 : index
    %301 = vector.load %arg15[%c16, %c256_142] : memref<32x2560xf32, #tpu.memory_space<vmem>>, vector<16x2048xf32>
    tpu.vector_store %arg15[%c16, %c256_142], %300 {strides = array<i32>} : memref<32x2560xf32, #tpu.memory_space<vmem>>, vector<16x2048xf32>,
    %c0_143 = arith.constant 0 : index
    %c0_144 = arith.constant 0 : index
    %c0_145 = arith.constant 0 : index
    %302 = vector.load %arg4[%c0_143, %c0_144, %c0_145] : memref<1x16x256xf32, #tpu.memory_space<vmem>>, vector<1x16x256xf32>
    %303 = vector.shape_cast %302 : vector<1x16x256xf32> to vector<16x256xf32>
    %304 = vector.broadcast %6 : f32 to vector<16x256xf32>
    %305 = arith.mulf %303, %304 : vector<16x256xf32>
    %c16_146 = arith.constant 16 : index
    %c0_147 = arith.constant 0 : index
    %306 = vector.load %arg15[%c16_146, %c0_147] : memref<32x2560xf32, #tpu.memory_space<vmem>>, vector<16x256xf32>
    tpu.vector_store %arg15[%c16_146, %c0_147], %305 {strides = array<i32>} : memref<32x2560xf32, #tpu.memory_space<vmem>>, vector<16x256xf32>,
    %c0_148 = arith.constant 0 : index
    %c0_149 = arith.constant 0 : index
    %c0_150 = arith.constant 0 : index
    %307 = vector.load %arg5[%c0_148, %c0_149, %c0_150] : memref<1x16x256xf32, #tpu.memory_space<vmem>>, vector<1x16x256xf32>
    %308 = vector.shape_cast %307 : vector<1x16x256xf32> to vector<16x256xf32>
    %309 = vector.broadcast %7 : f32 to vector<16x256xf32>
    %310 = arith.mulf %308, %309 : vector<16x256xf32>
    %c16_151 = arith.constant 16 : index
    %c2304_152 = arith.constant 2304 : index
    %311 = vector.load %arg15[%c16_151, %c2304_152] : memref<32x2560xf32, #tpu.memory_space<vmem>>, vector<16x256xf32>
    tpu.vector_store %arg15[%c16_151, %c2304_152], %310 {strides = array<i32>} : memref<32x2560xf32, #tpu.memory_space<vmem>>, vector<16x256xf32>,
    %c0_153 = arith.constant 0 : index
    %c0_154 = arith.constant 0 : index
    %312 = vector.load %arg6[%c0_153, %c0_154] : memref<4x2560xf32, #tpu.memory_space<vmem>>, vector<4x2560xf32>
    %313 = vector.extract_strided_slice %312 {offsets = [0, 0], sizes = [1, 2560], strides = [1, 1]} : vector<4x2560xf32> to vector<1x2560xf32>
    %314 = vector.extract_strided_slice %312 {offsets = [1, 0], sizes = [1, 2560], strides = [1, 1]} : vector<4x2560xf32> to vector<1x2560xf32>
    %315 = vector.extract_strided_slice %312 {offsets = [2, 0], sizes = [1, 2560], strides = [1, 1]} : vector<4x2560xf32> to vector<1x2560xf32>
    %316 = vector.broadcast %2 : f32 to vector<1x2560xf32>
    %317 = arith.mulf %316, %315 : vector<1x2560xf32>
    %cst_155 = arith.constant 1.000000e+00 : f32
    %318 = vector.broadcast %cst_155 : f32 to vector<1x2560xf32>
    %319 = arith.subf %318, %317 : vector<1x2560xf32>
    %320 = vector.extract_strided_slice %312 {offsets = [3, 0], sizes = [1, 2560], strides = [1, 1]} : vector<4x2560xf32> to vector<1x2560xf32>
    %321 = vector.broadcast %5 : f32 to vector<1x2560xf32>
    %322 = arith.mulf %321, %320 : vector<1x2560xf32>
    %323 = arith.subf %319, %322 : vector<1x2560xf32>
    %c0_156 = arith.constant 0 : index
    %c0_157 = arith.constant 0 : index
    %324 = vector.load %arg15[%c0_156, %c0_157] : memref<32x2560xf32, #tpu.memory_space<vmem>>, vector<32x2560xf32>
    %c0_158 = arith.constant 0 : index
    %c0_159 = arith.constant 0 : index
    %325 = vector.load %arg10[%c0_158, %c0_159] : memref<144x32xf32, #tpu.memory_space<vmem>>, vector<144x32xf32>
    %cst_160 = arith.constant dense<0.000000e+00> : vector<144x2560xf32>
    %326 = tpu.matmul %325, %324, %cst_160 {dimension_numbers = #tpu.dot_dimension_numbers<[1], [0], [0], [1], [0, 0, 1, 1], [], []>} : vector<144x32xf32>, vector<32x2560xf32>, vector<144x2560xf32> -> vector<144x2560xf32>
    %327 = vector.extract_strided_slice %326 {offsets = [0, 0], sizes = [16, 2560], strides = [1, 1]} : vector<144x2560xf32> to vector<16x2560xf32>
    %c128_i32 = arith.constant 128 : i32
    %328 = tpu.dynamic_rotate %327 by %c128_i32 dim 1 : vector<16x2560xf32>, i32 -> vector<16x2560xf32>
    %329 = vector.extract_strided_slice %326 {offsets = [48, 0], sizes = [16, 2560], strides = [1, 1]} : vector<144x2560xf32> to vector<16x2560xf32>
    %330 = arith.addf %328, %329 : vector<16x2560xf32>
    %331 = vector.extract_strided_slice %326 {offsets = [96, 0], sizes = [16, 2560], strides = [1, 1]} : vector<144x2560xf32> to vector<16x2560xf32>
    %c2432_i32 = arith.constant 2432 : i32
    %332 = tpu.dynamic_rotate %331 by %c2432_i32 dim 1 : vector<16x2560xf32>, i32 -> vector<16x2560xf32>
    %333 = arith.addf %330, %332 : vector<16x2560xf32>
    %c1_i32_161 = arith.constant 1 : i32
    %334 = tpu.dynamic_rotate %333 by %c1_i32_161 dim 1 : vector<16x2560xf32>, i32 -> vector<16x2560xf32>
    %335 = vector.broadcast %313 : vector<1x2560xf32> to vector<16x2560xf32>
    %336 = arith.mulf %334, %335 : vector<16x2560xf32>
    %337 = vector.extract_strided_slice %326 {offsets = [16, 0], sizes = [16, 2560], strides = [1, 1]} : vector<144x2560xf32> to vector<16x2560xf32>
    %c128_i32_162 = arith.constant 128 : i32
    %338 = tpu.dynamic_rotate %337 by %c128_i32_162 dim 1 : vector<16x2560xf32>, i32 -> vector<16x2560xf32>
    %339 = vector.extract_strided_slice %326 {offsets = [64, 0], sizes = [16, 2560], strides = [1, 1]} : vector<144x2560xf32> to vector<16x2560xf32>
    %340 = arith.addf %338, %339 : vector<16x2560xf32>
    %341 = vector.extract_strided_slice %326 {offsets = [112, 0], sizes = [16, 2560], strides = [1, 1]} : vector<144x2560xf32> to vector<16x2560xf32>
    %c2432_i32_163 = arith.constant 2432 : i32
    %342 = tpu.dynamic_rotate %341 by %c2432_i32_163 dim 1 : vector<16x2560xf32>, i32 -> vector<16x2560xf32>
    %343 = arith.addf %340, %342 : vector<16x2560xf32>
    %344 = vector.extract_strided_slice %326 {offsets = [32, 0], sizes = [16, 2560], strides = [1, 1]} : vector<144x2560xf32> to vector<16x2560xf32>
    %c128_i32_164 = arith.constant 128 : i32
    %345 = tpu.dynamic_rotate %344 by %c128_i32_164 dim 1 : vector<16x2560xf32>, i32 -> vector<16x2560xf32>
    %346 = vector.extract_strided_slice %326 {offsets = [80, 0], sizes = [16, 2560], strides = [1, 1]} : vector<144x2560xf32> to vector<16x2560xf32>
    %347 = arith.addf %345, %346 : vector<16x2560xf32>
    %348 = vector.extract_strided_slice %326 {offsets = [128, 0], sizes = [16, 2560], strides = [1, 1]} : vector<144x2560xf32> to vector<16x2560xf32>
    %c2432_i32_165 = arith.constant 2432 : i32
    %349 = tpu.dynamic_rotate %348 by %c2432_i32_165 dim 1 : vector<16x2560xf32>, i32 -> vector<16x2560xf32>
    %350 = arith.addf %347, %349 : vector<16x2560xf32>
    %c2559_i32 = arith.constant 2559 : i32
    %351 = tpu.dynamic_rotate %350 by %c2559_i32 dim 1 : vector<16x2560xf32>, i32 -> vector<16x2560xf32>
    %352 = vector.broadcast %314 : vector<1x2560xf32> to vector<16x2560xf32>
    %353 = arith.mulf %351, %352 : vector<16x2560xf32>
    %354 = arith.addf %336, %343 : vector<16x2560xf32>
    %355 = arith.addf %354, %353 : vector<16x2560xf32>
    %c0_166 = arith.constant 0 : index
    %c0_167 = arith.constant 0 : index
    %356 = vector.load %arg11[%c0_166, %c0_167] : memref<16x1xf32, #tpu.memory_space<vmem>>, vector<16x1xf32>
    %357 = vector.broadcast %356 : vector<16x1xf32> to vector<16x2560xf32>
    %358 = arith.addf %355, %357 : vector<16x2560xf32>
    %359 = vector.broadcast %323 : vector<1x2560xf32> to vector<16x2560xf32>
    %360 = arith.mulf %358, %359 : vector<16x2560xf32>
    %c0_168 = arith.constant 0 : index
    %c0_169 = arith.constant 0 : index
    %361 = vector.load %arg12[%c0_168, %c0_169] : memref<144x16xf32, #tpu.memory_space<vmem>>, vector<144x16xf32>
    %cst_170 = arith.constant dense<0.000000e+00> : vector<144x2560xf32>
    %362 = tpu.matmul %361, %360, %cst_170 {dimension_numbers = #tpu.dot_dimension_numbers<[1], [0], [0], [1], [0, 0, 1, 1], [], []>} : vector<144x16xf32>, vector<16x2560xf32>, vector<144x2560xf32> -> vector<144x2560xf32>
    %363 = vector.extract_strided_slice %362 {offsets = [0, 0], sizes = [16, 2560], strides = [1, 1]} : vector<144x2560xf32> to vector<16x2560xf32>
    %c128_i32_171 = arith.constant 128 : i32
    %364 = tpu.dynamic_rotate %363 by %c128_i32_171 dim 1 : vector<16x2560xf32>, i32 -> vector<16x2560xf32>
    %365 = vector.extract_strided_slice %362 {offsets = [48, 0], sizes = [16, 2560], strides = [1, 1]} : vector<144x2560xf32> to vector<16x2560xf32>
    %366 = arith.addf %364, %365 : vector<16x2560xf32>
    %367 = vector.extract_strided_slice %362 {offsets = [96, 0], sizes = [16, 2560], strides = [1, 1]} : vector<144x2560xf32> to vector<16x2560xf32>
    %c2432_i32_172 = arith.constant 2432 : i32
    %368 = tpu.dynamic_rotate %367 by %c2432_i32_172 dim 1 : vector<16x2560xf32>, i32 -> vector<16x2560xf32>
    %369 = arith.addf %366, %368 : vector<16x2560xf32>
    %c1_i32_173 = arith.constant 1 : i32
    %370 = tpu.dynamic_rotate %369 by %c1_i32_173 dim 1 : vector<16x2560xf32>, i32 -> vector<16x2560xf32>
    %371 = vector.broadcast %313 : vector<1x2560xf32> to vector<16x2560xf32>
    %372 = arith.mulf %370, %371 : vector<16x2560xf32>
    %373 = vector.extract_strided_slice %362 {offsets = [16, 0], sizes = [16, 2560], strides = [1, 1]} : vector<144x2560xf32> to vector<16x2560xf32>
    %c128_i32_174 = arith.constant 128 : i32
    %374 = tpu.dynamic_rotate %373 by %c128_i32_174 dim 1 : vector<16x2560xf32>, i32 -> vector<16x2560xf32>
    %375 = vector.extract_strided_slice %362 {offsets = [64, 0], sizes = [16, 2560], strides = [1, 1]} : vector<144x2560xf32> to vector<16x2560xf32>
    %376 = arith.addf %374, %375 : vector<16x2560xf32>
    %377 = vector.extract_strided_slice %362 {offsets = [112, 0], sizes = [16, 2560], strides = [1, 1]} : vector<144x2560xf32> to vector<16x2560xf32>
    %c2432_i32_175 = arith.constant 2432 : i32
    %378 = tpu.dynamic_rotate %377 by %c2432_i32_175 dim 1 : vector<16x2560xf32>, i32 -> vector<16x2560xf32>
    %379 = arith.addf %376, %378 : vector<16x2560xf32>
    %380 = vector.extract_strided_slice %362 {offsets = [32, 0], sizes = [16, 2560], strides = [1, 1]} : vector<144x2560xf32> to vector<16x2560xf32>
    %c128_i32_176 = arith.constant 128 : i32
    %381 = tpu.dynamic_rotate %380 by %c128_i32_176 dim 1 : vector<16x2560xf32>, i32 -> vector<16x2560xf32>
    %382 = vector.extract_strided_slice %362 {offsets = [80, 0], sizes = [16, 2560], strides = [1, 1]} : vector<144x2560xf32> to vector<16x2560xf32>
    %383 = arith.addf %381, %382 : vector<16x2560xf32>
    %384 = vector.extract_strided_slice %362 {offsets = [128, 0], sizes = [16, 2560], strides = [1, 1]} : vector<144x2560xf32> to vector<16x2560xf32>
    %c2432_i32_177 = arith.constant 2432 : i32
    %385 = tpu.dynamic_rotate %384 by %c2432_i32_177 dim 1 : vector<16x2560xf32>, i32 -> vector<16x2560xf32>
    %386 = arith.addf %383, %385 : vector<16x2560xf32>
    %c2559_i32_178 = arith.constant 2559 : i32
    %387 = tpu.dynamic_rotate %386 by %c2559_i32_178 dim 1 : vector<16x2560xf32>, i32 -> vector<16x2560xf32>
    %388 = vector.broadcast %314 : vector<1x2560xf32> to vector<16x2560xf32>
    %389 = arith.mulf %387, %388 : vector<16x2560xf32>
    %390 = arith.addf %372, %379 : vector<16x2560xf32>
    %391 = arith.addf %390, %389 : vector<16x2560xf32>
    %c0_179 = arith.constant 0 : index
    %c0_180 = arith.constant 0 : index
    %392 = vector.load %arg13[%c0_179, %c0_180] : memref<16x1xf32, #tpu.memory_space<vmem>>, vector<16x1xf32>
    %393 = vector.broadcast %392 : vector<16x1xf32> to vector<16x2560xf32>
    %394 = arith.addf %391, %393 : vector<16x2560xf32>
    %395 = vector.extract_strided_slice %394 {offsets = [0, 256], sizes = [16, 2048], strides = [1, 1]} : vector<16x2560xf32> to vector<16x2048xf32>
    %c0_181 = arith.constant 0 : index
    %c0_182 = arith.constant 0 : index
    %c0_183 = arith.constant 0 : index
    %396 = vector.load %arg14[%c0_181, %c0_182, %c0_183] : memref<1x16x2048xf32, #tpu.memory_space<vmem>>, vector<1x16x2048xf32>
    %397 = vector.shape_cast %396 : vector<1x16x2048xf32> to vector<16x2048xf32>
    %398 = vector.shape_cast %395 : vector<16x2048xf32> to vector<1x16x2048xf32>
    tpu.vector_store %arg14[%c0_181, %c0_182, %c0_183], %398 {strides = array<i32>} : memref<1x16x2048xf32, #tpu.memory_space<vmem>>, vector<1x16x2048xf32>,
    return
  }
  func.func @transform_0(%arg0: i32, %arg1: i32) -> (i32, i32, i32, i32) {
    %c0_i32 = arith.constant 0 : i32
    %c0_i32_0 = arith.constant 0 : i32
    %c0_i32_1 = arith.constant 0 : i32
    %c0_i32_2 = arith.constant 0 : i32
    return %arg0, %c0_i32, %c0_i32_0, %c0_i32_1 : i32, i32, i32, i32
  }
  func.func @transform_1(%arg0: i32, %arg1: i32) -> (i32, i32, i32) {
    %c0_i32 = arith.constant 0 : i32
    %c0_i32_0 = arith.constant 0 : i32
    return %arg0, %c0_i32, %arg1 : i32, i32, i32
  }
  func.func @transform_2(%arg0: i32, %arg1: i32) -> (i32, i32, i32) {
    %c0_i32 = arith.constant 0 : i32
    %c0_i32_0 = arith.constant 0 : i32
    %c0_i32_1 = arith.constant 0 : i32
    %c0_i32_2 = arith.constant 0 : i32
    return %c0_i32, %c0_i32_0, %c0_i32_1 : i32, i32, i32
  }
  func.func @transform_3(%arg0: i32, %arg1: i32) -> (i32, i32, i32) {
    %c0_i32 = arith.constant 0 : i32
    %c0_i32_0 = arith.constant 0 : i32
    %c0_i32_1 = arith.constant 0 : i32
    %c0_i32_2 = arith.constant 0 : i32
    return %c0_i32, %c0_i32_0, %c0_i32_1 : i32, i32, i32
  }
  func.func @transform_4(%arg0: i32, %arg1: i32) -> (i32, i32) {
    %c0_i32 = arith.constant 0 : i32
    %c0_i32_0 = arith.constant 0 : i32
    %c0_i32_1 = arith.constant 0 : i32
    return %c0_i32, %c0_i32_0 : i32, i32
  }
  func.func @transform_5(%arg0: i32, %arg1: i32) -> (i32, i32) {
    %c0_i32 = arith.constant 0 : i32
    %c0_i32_0 = arith.constant 0 : i32
    %c0_i32_1 = arith.constant 0 : i32
    return %c0_i32, %c0_i32_0 : i32, i32
  }
  func.func @transform_6(%arg0: i32, %arg1: i32) -> (i32, i32) {
    %c0_i32 = arith.constant 0 : i32
    %c0_i32_0 = arith.constant 0 : i32
    %c0_i32_1 = arith.constant 0 : i32
    return %c0_i32, %c0_i32_0 : i32, i32
  }
  func.func @transform_7(%arg0: i32, %arg1: i32) -> (i32, i32) {
    %c0_i32 = arith.constant 0 : i32
    %c0_i32_0 = arith.constant 0 : i32
    %c0_i32_1 = arith.constant 0 : i32
    return %c0_i32, %c0_i32_0 : i32, i32
  }
  func.func @transform_8(%arg0: i32, %arg1: i32) -> (i32, i32) {
    %c0_i32 = arith.constant 0 : i32
    %c0_i32_0 = arith.constant 0 : i32
    %c0_i32_1 = arith.constant 0 : i32
    return %c0_i32, %c0_i32_0 : i32, i32
  }
  func.func @transform_9(%arg0: i32, %arg1: i32) -> (i32, i32) {
    %c0_i32 = arith.constant 0 : i32
    %c0_i32_0 = arith.constant 0 : i32
    %c0_i32_1 = arith.constant 0 : i32
    return %c0_i32, %c0_i32_0 : i32, i32
  }
  func.func @transform_10(%arg0: i32, %arg1: i32) -> (i32, i32) {
    %c0_i32 = arith.constant 0 : i32
    %c0_i32_0 = arith.constant 0 : i32
    %c0_i32_1 = arith.constant 0 : i32
    return %c0_i32, %c0_i32_0 : i32, i32
  }
  func.func @transform_11(%arg0: i32, %arg1: i32) -> (i32, i32) {
    %c0_i32 = arith.constant 0 : i32
    %c0_i32_0 = arith.constant 0 : i32
    %c0_i32_1 = arith.constant 0 : i32
    return %c0_i32, %c0_i32_0 : i32, i32
  }
  func.func @transform_12(%arg0: i32, %arg1: i32) -> (i32, i32, i32) {
    %c0_i32 = arith.constant 0 : i32
    %c0_i32_0 = arith.constant 0 : i32
    return %arg0, %c0_i32, %arg1 : i32, i32, i32
  }
}

</mosaic_0001>

<bundles_post_ra>
// kernel: upsample_block_forward.1
= control target key start
LH: loop header
LB: loop body
LE: loop exit
PB: predicated region body
PF: predicated region fallthrough
CT: control target
= control target key end

     0   :  { %s14082_s21 = smov 0   ;;  %s14084_s22 = smov 0   ;;  %s19381_s0 = inlined_call_operand.vmem [shape: f32[2,8,8,64], index: 0, kind: input, shape index: {}]   ;;  %s19382_s1 = inlined_call_operand.vmem [shape: f32[2,16,2048], index: 1, kind: input, shape index: {}]   ;;  %s19383_s2 = inlined_call_operand.vmem [shape: f32[1,16,256], index: 2, kind: input, shape index: {}, may-alias: {2,3}]   ;;  %s19384_s3 = inlined_call_operand.vmem [shape: f32[1,16,256], index: 3, kind: input, shape index: {}, may-alias: {2,3}]   ;;  %s19385_s4 = inlined_call_operand.vmem [shape: f32[4,2560], index: 4, kind: input, shape index: {}]   ;;  %s19386_s5 = inlined_call_operand.vmem [shape: f32[64,8], index: 5, kind: input, shape index: {}]   ;;  %s19387_s6 = inlined_call_operand.vmem [shape: f32[128,128], index: 6, kind: input, shape index: {}]   ;;  %s19388_s7 = inlined_call_operand.vmem [shape: f32[16,1], index: 7, kind: input, shape index: {}]   ;;  %s19389_s8 = inlined_call_operand.vmem [shape: f32[144,32], index: 8, kind: input, shape index: {}]   ;;  %s19390_s9 = inlined_call_operand.vmem [shape: f32[16,1], index: 9, kind: input, shape index: {}]   ;;  %s19391_s10 = inlined_call_operand.vmem [shape: f32[144,16], index: 10, kind: input, shape index: {}]   ;;  %s19392_s11 = inlined_call_operand.vmem [shape: f32[16,1], index: 11, kind: input, shape index: {}]   ;;  %s19393_s12 = inlined_call_operand.vmem [shape: f32[2,16,2048], index: 12, kind: output, shape index: {}]  }
   0x1   :  { %s14086_s23 = smov 0  }
   0x2 LB: > { %s34_s24 = sadd.s32 1, %s14007_s22  ;;  %p11103_p0 = scmp.ge.s32.totalorder %s14011_s23, 1  ;;  %s14011_s23 = sphi %s14086_s23, %s22_s23   ;;  %s14007_s22 = sphi %s14084_s22, %s19907_s22   ;;  %s14003_s21 = sphi %s14082_s21, %s19906_s21  }
   0x3   : > { %p36_p1 = scmp.ge.s32.totalorder %s34_s24, 2  ;;  %p393_p2 = scmp.lt.s32.totalorder %s14011_s23, 3 }
   0x5   : > { %s19909_s24 = smov (%p36_p1, %s34_s24), 0  ;;  %p394_p3 = pnand %p11103_p0, %p393_p2 }
   0x7   : > { %397 = sbr.rel (%p394_p3) target bundleno = 3793 (0xed1), region = 68 }
   0xe   : > { %p448_p4 = scmp.lt.s32.totalorder %s14003_s21, 1  ;;  %v14103_v0 = vld [vmem:[%s19386_s5] sm:$0xff]  ;;  %vm548_vm0 = vcmask 64512   ;;  %v494_v2 = vld [vmem:[%s19387_s6 + $0x48] sm:$0xff]  ;;  %v495_v3 = vld [vmem:[%s19387_s6 + $0x50] sm:$0xff]  ;;  %vm527_vm1 = vcmask 1041409  }
   0xf   : > { %12201 = vmatprep.mubr.msk.f32.mxu0 %vm548_vm0, %v14103_v0  ;;  %v493_v1 = vld [vmem:[%s19387_s6 + $0x40] sm:$0xff]  ;;  %v496_v4 = vld [vmem:[%s19387_s6 + $0x58] sm:$0xff]  ;;  %v498_v8 = vld [vmem:[%s19387_s6 + $0x68] sm:$0xff]  ;;  %vm530_vm2 = vcmask 1042434   ;;  %vm533_vm3 = vcmask 1043459   ;;  %vm536_vm4 = vcmask 1044484  }
  0x10   : > { %s19911_s21 = smov (!%p448_p4, %s14003_s21), 1  ;;  %v14127_v5 = vpack.c.bf16 %v494_v2, %v493_v1  ;;  %v14129_v6 = vpack.c.bf16 %v496_v4, %v495_v3  ;;  %v497_v7 = vld [vmem:[%s19387_s6 + $0x60] sm:$0xff]  ;;  %vm539_vm5 = vcmask 1045509   ;;  %vm542_vm6 = vcmask 1046534   ;;  %v14162_v32 = vld [vmem:[%s19386_s5 + $0x8] sm:$0xff]  ;;  %v14168_v33 = vld [vmem:[%s19386_s5 + $0x10] sm:$0xff] }
  0x11   : > { %s11706_s29 = sshll.u32 %s19911_s21, 6  ;;  %v14148_v21 = vpack.c.bf16 %v498_v8, %v497_v7  ;;  %vm545_vm7 = vcmask 1047559   ;;  %v14178_v34 = vld [vmem:[%s19386_s5 + $0x18] sm:$0xff]  ;;  %v14184_v35 = vld [vmem:[%s19386_s5 + $0x20] sm:$0xff]  ;;  %v14194_v36 = vld [vmem:[%s19386_s5 + $0x28] sm:$0xff]  ;;  %v14013_v46 = vmov 0  }
  0x12   : > { %s14125_s20 = scalar_lea.vmem %s19381_s0, %s11706_s29  ;;  %13100 = vmatprep.subr.bf16.mxu1 %v14127_v5  ;;  %v14200_v37 = vld [vmem:[%s19386_s5 + $0x30] sm:$0xff]  ;;  %v14210_v38 = vld [vmem:[%s19386_s5 + $0x38] sm:$0xff]  ;;  %v485_v42 = vld [vmem:[%s19387_s6] sm:$0xff]  ;;  %13927 = vset.pattern.permute.xlu0 %v14013_v46  ;;  %vm678_vm8 = vcmask 523264   ;;  %s11707_s27 = sshll.u32 %s19911_s21, 8  ;;  %vm5562_vm9 = vcmask 261120  }
  0x13   : > { %v510_v9 = vld [vmem:[%s14125_s20] sm:$0x1]  ;;  %v511_v10 = vld [vmem:[%s14125_s20 + $0x8] sm:$0x1]  ;;  %v512_v11 = vld [vmem:[%s14125_s20 + $0x10] sm:$0x1]  ;;  %13102 = vmatpush3.bf16.msra.mxu1 %v14127_v5  ;;  %13928 = vset.pattern.permute.xlu1 %v14013_v46  ;;  %s15184_s30 = scalar_lea.vmem %s19382_s1, %s11707_s27  ;;  %s18898_s13 = scalar_lea.vmem %s19393_s12, %s11707_s27 }
  0x14   : > { %v513_v12 = vld [vmem:[%s14125_s20 + $0x18] sm:$0x1]  ;;  %v514_v13 = vld [vmem:[%s14125_s20 + $0x20] sm:$0x1]  ;;  %v515_v14 = vld [vmem:[%s14125_s20 + $0x28] sm:$0x1]  ;;  %13104 = vmatprep.subr.bf16.mxu1 %v14129_v6 }
  0x15   : > { %v516_v15 = vld [vmem:[%s14125_s20 + $0x30] sm:$0x1]  ;;  %v526_v16 = vrot.slane %v511_v10, 7  ;;  %v529_v17 = vrot.slane %v512_v11, 6  ;;  %v517_v18 = vld [vmem:[%s14125_s20 + $0x38] sm:$0x1] }
  0x16   : > { %v532_v19 = vrot.slane %v513_v12, 5  ;;  %v535_v20 = vrot.slane %v514_v13, 4  ;;  %v538_v23 = vrot.slane %v515_v14, 3  ;;  %v541_v25 = vrot.slane %v516_v15, 2  ;;  %v499_v39 = vld [vmem:[%s19387_s6 + $0x70] sm:$0xff]  ;;  %v500_v40 = vld [vmem:[%s19387_s6 + $0x78] sm:$0xff] }
  0x17   : > { %v528_v22 = vsel %vm527_vm1, %v526_v16, %v510_v9  ;;  %v544_v27 = vrot.slane %v517_v18, 1  ;;  %13106 = vmatpush3.bf16.msra.mxu1 %v14129_v6  ;;  %v14221_v41 = vpack.c.bf16 %v500_v40, %v499_v39  ;;  %v486_v43 = vld [vmem:[%s19387_s6 + $0x8] sm:$0xff]  ;;  %v501_v45 = vld [vmem:[%s19388_s7] sm:$0xff]  ;;  %v1033_v49 = vld [vmem:[%s14125_s20 + $0x10] sm:$0x1]  ;;  %s14015_s26 = smov 1  }
  0x18   : > { %v531_v24 = vsel %vm530_vm2, %v529_v17, %v528_v22  ;;  %13108 = vmatprep.subr.bf16.mxu1 %v14148_v21  ;;  %v14233_v44 = vpack.c.bf16 %v486_v43, %v485_v42  ;;  %843 = vperm.xlu0 %13927, %v501_v45   ;;  %v502_v47 = vld [vmem:[%s19388_s7 + $0x8] sm:$0xff]  ;;  %v1031_v51 = vld [vmem:[%s14125_s20] sm:$0x1]  ;;  %v1034_v52 = vld [vmem:[%s14125_s20 + $0x18] sm:$0x1]  ;;  %v1049_v53 = vrot.slane %v1033_v49, 6 }
  0x19   : > { %v534_v26 = vsel %vm533_vm3, %v532_v19, %v531_v24  ;;  %v1032_v48 = vld [vmem:[%s14125_s20 + $0x8] sm:$0x1]  ;;  %v487_v57 = vld [vmem:[%s19387_s6 + $0x10] sm:$0xff]  ;;  %v488_v58 = vld [vmem:[%s19387_s6 + $0x18] sm:$0xff]  ;;  %v1051_v60 = vrot.slane %v1034_v52, 5  ;;  %s14016_s28 = smov 127  }
  0x1a   : > { %v537_v28 = vsel %vm536_vm4, %v535_v20, %v534_v26  ;;  %v1047_v50 = vrot.slane %v1032_v48, 7  ;;  %v1035_v59 = vld [vmem:[%s14125_s20 + $0x20] sm:$0x1]  ;;  %v14256_v1 = vpack.c.bf16 %v488_v58, %v487_v57  ;;  %v1036_v2 = vld [vmem:[%s14125_s20 + $0x28] sm:$0x1]  ;;  %v491_v15 = vld [vmem:[%s19387_s6 + $0x30] sm:$0xff] }
  0x1b   : > { %v540_v29 = vsel %vm539_vm5, %v538_v23, %v537_v28  ;;  %13110 = vmatpush3.bf16.msra.mxu1 %v14148_v21  ;;  %v1053_v3 = vrot.slane %v1035_v59, 4  ;;  %v489_v4 = vld [vmem:[%s19387_s6 + $0x20] sm:$0xff]  ;;  %v490_v7 = vld [vmem:[%s19387_s6 + $0x28] sm:$0xff]  ;;  %v1037_v9 = vld [vmem:[%s14125_s20 + $0x30] sm:$0x1]  ;;  %v1055_v10 = vrot.slane %v1036_v2, 3 }
  0x1c   : > { %v543_v30 = vsel %vm542_vm6, %v541_v25, %v540_v29  ;;  %13112 = vmatprep.subr.bf16.mxu1 %v14221_v41  ;;  %848 = vperm.xlu0 %13927, %v502_v47   ;;  %v1048_v55 = vsel %vm527_vm1, %v1047_v50, %v1031_v51  ;;  %v14272_v12 = vpack.c.bf16 %v490_v7, %v489_v4  ;;  %v492_v16 = vld [vmem:[%s19387_s6 + $0x38] sm:$0xff]  ;;  %v1057_v18 = vrot.slane %v1037_v9, 2  ;;  %v11143_v28 = vld [vmem:[%s14125_s20 + $0x9] sm:$0x1]  ;;  %v11142_v43 = vld [vmem:[%s14125_s20 + $0x1] sm:$0x1] }
  0x1d   : > { %v546_v31 = vsel %vm545_vm7, %v544_v27, %v543_v30  ;;  %v1050_v61 = vsel %vm530_vm2, %v1049_v53, %v1048_v55  ;;  %v1038_v17 = vld [vmem:[%s14125_s20 + $0x38] sm:$0x1]  ;;  %v14285_v22 = vpack.c.bf16 %v492_v16, %v491_v15  ;;  %v1521_v39 = vrot.slane %v11143_v28, 7  ;;  %v11145_v47 = vld [vmem:[%s14125_s20 + $0x19] sm:$0x1] }
  0x1e   : > { %12199 = vmatprep.subr.mxu0 %v546_v31  ;;  %v1052_v8 = vsel %vm533_vm3, %v1051_v60, %v1050_v61  ;;  %v1059_v24 = vrot.slane %v1038_v17, 1  ;;  %v1525_v55 = vrot.slane %v11145_v47, 5  ;;  %v11147_v59 = vld [vmem:[%s14125_s20 + $0x29] sm:$0x1]  ;;  %v11148_v2 = vld [vmem:[%s14125_s20 + $0x31] sm:$0x1] }
  0x1f   : > { %12200 = vmatpush3.msra.mxu0 %v546_v31  ;;  %13114 = vmatpush3.bf16.msra.mxu1 %v14221_v41  ;;  %v1054_v13 = vsel %vm536_vm4, %v1053_v3, %v1052_v8  ;;  %v11144_v31 = vld [vmem:[%s14125_s20 + $0x11] sm:$0x1]  ;;  %v1522_v51 = vsel %vm527_vm1, %v1521_v39, %v11142_v43  ;;  %v1529_v3 = vrot.slane %v11147_v59, 3  ;;  %v11149_v9 = vld [vmem:[%s14125_s20 + $0x39] sm:$0x1]  ;;  %vm8661_vm12 = vcmask 130048  }
  0x20   : > { %12202 = vmatmul.mubr.msk.f32.vlgmr.msra.gmra.mrb[0].mxu0 %vm548_vm0, %v14162_v32  ;;  %13132 = vmatprep.subr.bf16.mxu0 %v14127_v5  ;;  %v1056_v19 = vsel %vm539_vm5, %v1055_v10, %v1054_v13  ;;  %v1523_v48 = vrot.slane %v11144_v31, 6  ;;  %v1531_v10 = vrot.slane %v11148_v2, 2  ;;  %v1533_v15 = vrot.slane %v11149_v9, 1  ;;  %v11168_v28 = vld [vmem:[%s14125_s20 + $0x12] sm:$0x1] }
  0x21   : > { %12204 = vmatprep.mubr.msk.f32.mxu0 %vm548_vm0, %v14168_v33  ;;  %13134 = vmatpush3.bf16.msra.mxu0 %v14127_v5  ;;  %v1058_v25 = vsel %vm542_vm6, %v1057_v18, %v1056_v19  ;;  %v11169_v43 = vld [vmem:[%s14125_s20 + $0x1a] sm:$0x1]  ;;  %v11291_v47 = vld [vmem:[%s14125_s20 + $0x2f] sm:$0x1] }
  0x22   : > { %13136 = vmatprep.subr.bf16.mxu0 %v14129_v6  ;;  %13116 = vmatprep.subr.bf16.mxu1 %v14233_v44  ;;  %v1060_v26 = vsel %vm545_vm7, %v1059_v24, %v1058_v25  ;;  %v11167_v25 = vld [vmem:[%s14125_s20 + $0xa] sm:$0x1]  ;;  %v11315_v24 = vld [vmem:[%s14125_s20 + $0x2f] sm:$0x1] }
  0x24   : > { %12205 = vmatmul.mubr.msk.f32.gmra.mrb[2].mxu0 %vm548_vm0, %v14178_v34 }
  0x25   : > { %12207 = vmatprep.mubr.msk.f32.mxu0 %vm548_vm0, %v14184_v35  ;;  %13138 = vmatpush3.bf16.msra.mxu0 %v14129_v6 }
  0x26   : > { %13140 = vmatprep.subr.bf16.mxu0 %v14148_v21 }
  0x28   : > { %12208 = vmatmul.mubr.msk.f32.gmra.mrb[4].mxu0 %vm548_vm0, %v14194_v36 }
  0x29   : > { %12210 = vmatprep.mubr.msk.f32.mxu0 %vm548_vm0, %v14200_v37  ;;  %13142 = vmatpush3.bf16.msra.mxu0 %v14148_v21 }
  0x2a   : > { %13144 = vmatprep.subr.bf16.mxu0 %v14221_v41 }
  0x2c   : > { %12211 = vmatmul.mubr.msk.f32.gmra.mrb[6].mxu0 %vm548_vm0, %v14210_v38 }
  0x2d   : > { %13146 = vmatpush3.bf16.msra.mxu0 %v14221_v41 }
  0x2e   : > { %13148 = vmatprep.subr.bf16.mxu0 %v14233_v44 }
  0x97   : > { %v14338_v27 = vpop.permute.xlu0 %843 }
  0x9b   : > { %v14341_v29 = vpop.permute.xlu0 %848 }
  0xf3   : > { %v12203_v54 = vpop.f32.mrb[0].mxu0 }
  0xf4   : > { %v639_v56 = vpop.f32.mrb[1].mxu0 }
  0xf7   : > { %v12206_v62 = vpop.f32.mrb[2].mxu0 }
  0xf8   : > { %v649_v63 = vpop.f32.mrb[3].mxu0 }
  0xf9   : > { %12229 = vmatprep.mubr.msk.f32.mxu1 %vm678_vm8, %v649_v63 }
  0xfa   : > { %12230 = vmatmul.mubr.msk.f32.vlgmr.msra.gmra.mrb[0].mxu1 %vm678_vm8, %v12206_v62 }
  0xfb   : > { %13118 = vmatpush3.bf16.msra.mxu1 %v14233_v44  ;;  %12248 = vmatprep.mubr.msk.f32.mxu1 %vm678_vm8, %v639_v56  ;;  %v12209_v11 = vpop.f32.mrb[4].mxu0  ;;  %v1524_v56 = vsel %vm530_vm2, %v1523_v48, %v1522_v51 }
  0xfc   : > { %13120 = vmatprep.subr.bf16.mxu1 %v14256_v1  ;;  %v659_v14 = vpop.f32.mrb[5].mxu0  ;;  %v1526_v62 = vsel %vm533_vm3, %v1525_v55, %v1524_v56 }
  0xff   : > { %13122 = vmatpush3.bf16.msra.mxu1 %v14256_v1  ;;  %v12212_v20 = vpop.f32.mrb[6].mxu0 }
 0x100   : > { %13124 = vmatprep.subr.bf16.mxu1 %v14272_v12  ;;  %v669_v23 = vpop.f32.mrb[7].mxu0 }
 0x101   : > { %12267 = vmatprep.mubr.msk.f32.mxu0 %vm678_vm8, %v669_v23 }
 0x102   : > { %12268 = vmatmul.mubr.msk.f32.vlgmr.msra.gmra.mrb[8].mxu0 %vm678_vm8, %v12212_v20 }
 0x103   : > { %13126 = vmatpush3.bf16.msra.mxu1 %v14272_v12  ;;  %13150 = vmatpush3.bf16.msra.mxu0 %v14233_v44 }
 0x104   : > { %13128 = vmatprep.subr.bf16.mxu1 %v14285_v22  ;;  %13152 = vmatprep.subr.bf16.mxu0 %v14256_v1 }
 0x105   : > { %12286 = vmatprep.mubr.msk.f32.mxu0 %vm678_vm8, %v659_v14 }
 0x107   : > { %13130 = vmatpush3.bf16.msra.mxu1 %v14285_v22  ;;  %13154 = vmatpush3.bf16.msra.mxu0 %v14256_v1 }
 0x108   : > { %12289 = vmatprep.subr.mxu1 %v1060_v26  ;;  %13156 = vmatprep.subr.bf16.mxu0 %v14272_v12 }
 0x10a   : > { %12249 = vmatmul.mubr.msk.f32.vlgmr.msra.gmra.mrb[0].mxu1 %vm678_vm8, %v12203_v54  ;;  %v11146_v54 = vld [vmem:[%s14125_s20 + $0x21] sm:$0x1] }
 0x10b   : > { %12290 = vmatpush3.msra.mxu1 %v1060_v26  ;;  %12291 = vmatprep.mubr.msk.f32.mxu1 %vm548_vm0, %v14103_v0  ;;  %v1527_v60 = vrot.slane %v11146_v54, 4  ;;  %v1999_v54 = vrot.slane %v11169_v43, 5  ;;  %v11190_v43 = vld [vmem:[%s14125_s20 + $0x3] sm:$0x1] }
 0x10c   : > { %13158 = vmatpush3.bf16.msra.mxu0 %v14272_v12  ;;  %13196 = vmatprep.subr.bf16.mxu1 %v14127_v5 }
 0x10d   : > { %13160 = vmatprep.subr.bf16.mxu0 %v14285_v22  ;;  %v1528_v7 = vsel %vm536_vm4, %v1527_v60, %v1526_v62 }
 0x10e   : > { %12292 = vmatmul.mubr.msk.f32.vlgmr.msra.gmra.mrb[2].mxu1 %vm548_vm0, %v14162_v32 }
 0x10f   : > { %12294 = vmatprep.mubr.msk.f32.mxu1 %vm548_vm0, %v14168_v33  ;;  %13198 = vmatpush3.bf16.msra.mxu1 %v14127_v5 }
 0x110   : > { %13162 = vmatpush3.bf16.msra.mxu0 %v14285_v22  ;;  %13200 = vmatprep.subr.bf16.mxu1 %v14129_v6 }
 0x111   : > { %13164 = vmatprep.subr.bf16.mxu0 %v14127_v5 }
 0x112   : > { %12295 = vmatmul.mubr.msk.f32.gmra.mrb[4].mxu1 %vm548_vm0, %v14178_v34 }
 0x113   : > { %12287 = vmatmul.mubr.msk.f32.vlgmr.msra.gmra.mrb[8].mxu0 %vm678_vm8, %v12209_v11  ;;  %12297 = vmatprep.mubr.msk.f32.mxu1 %vm548_vm0, %v14184_v35  ;;  %v1530_v11 = vsel %vm539_vm5, %v1529_v3, %v1528_v7 }
 0x114   : > { %13166 = vmatpush3.bf16.msra.mxu0 %v14127_v5  ;;  %13202 = vmatpush3.bf16.msra.mxu1 %v14129_v6  ;;  %v1532_v16 = vsel %vm542_vm6, %v1531_v10, %v1530_v11 }
 0x115   : > { %13168 = vmatprep.subr.bf16.mxu0 %v14129_v6  ;;  %13204 = vmatprep.subr.bf16.mxu1 %v14148_v21  ;;  %v1534_v17 = vsel %vm545_vm7, %v1533_v15, %v1532_v16 }
 0x116   : > { %12298 = vmatmul.mubr.msk.f32.gmra.mrb[6].mxu1 %vm548_vm0, %v14194_v36 }
 0x117   : > { %12300 = vmatprep.mubr.msk.f32.mxu1 %vm548_vm0, %v14200_v37 }
 0x118   : > { %13170 = vmatpush3.bf16.msra.mxu0 %v14129_v6  ;;  %13206 = vmatpush3.bf16.msra.mxu1 %v14148_v21 }
 0x119   : > { %13172 = vmatprep.subr.bf16.mxu0 %v14148_v21  ;;  %13208 = vmatprep.subr.bf16.mxu1 %v14221_v41 }
 0x11a   : > { %12301 = vmatmul.mubr.msk.f32.gmra.mrb[8].mxu1 %vm548_vm0, %v14210_v38 }
 0x11c   : > { %13174 = vmatpush3.bf16.msra.mxu0 %v14148_v21  ;;  %13210 = vmatpush3.bf16.msra.mxu1 %v14221_v41 }
 0x11d   : > { %13176 = vmatprep.subr.bf16.mxu0 %v14221_v41  ;;  %13212 = vmatprep.subr.bf16.mxu1 %v14233_v44 }
 0x120   : > { %13178 = vmatpush3.bf16.msra.mxu0 %v14221_v41 }
 0x121   : > { %13180 = vmatprep.subr.bf16.mxu0 %v14233_v44 }
 0x1dd   : > { %v12250_v30 = vpop.f32.mrb[0].mxu1 }
 0x1de   : > { %v852_v40 = vadd.f32 %v12250_v30, %v14341_v29  ;;  %v832_v42 = vpop.f32.mrb[1].mxu1  ;;  %v1995_v30 = vrot.slane %v11167_v25, 7  ;;  %v11191_v25 = vld [vmem:[%s14125_s20 + $0xb] sm:$0x1] }
 0x1df   : > { %v851_v45 = vadd.f32 %v14338_v27, %v832_v42 }
 0x1e0   : > { %v14347_v46 = vmul.f32 0.0, %v852_v40  ;;  %v11166_v40 = vld [vmem:[%s14125_s20 + $0x2] sm:$0x1] }
 0x1e1   : > { %v14350_v49 = vmul.f32 0.0, %v851_v45  ;;  %v12293_v50 = vpop.f32.mrb[2].mxu1  ;;  %v1997_v45 = vrot.slane %v11168_v28, 6  ;;  %v11192_v28 = vld [vmem:[%s14125_s20 + $0x13] sm:$0x1] }
 0x1e2   : > { %v1128_v52 = vpop.f32.mrb[3].mxu1 }
 0x1e5   : > { %v12296_v57 = vpop.f32.mrb[4].mxu1 }
 0x1e6   : > { %v1138_v58 = vpop.f32.mrb[5].mxu1  ;;  %v14358_v61 = vpop.f32.mrb[8].mxu0 }
 0x1e7   : > { %12319 = vmatprep.mubr.msk.f32.mxu0 %vm678_vm8, %v1138_v58  ;;  %v14362_v63 = vpop.f32.mrb[9].mxu0  ;;  %v1021_v18 = vadd.f32 %v14358_v61, %v14341_v29  ;;  %v11171_v58 = vld [vmem:[%s14125_s20 + $0x2a] sm:$0x1] }
 0x1e8   : > { %12320 = vmatmul.mubr.msk.f32.vlgmr.msra.gmra.mrb[10].mxu0 %vm678_vm8, %v12296_v57  ;;  %v1020_v19 = vadd.f32 %v14362_v63, %v14338_v27  ;;  %v11172_v63 = vld [vmem:[%s14125_s20 + $0x32] sm:$0x1]  ;;  %v2003_v2 = vrot.slane %v11171_v58, 3 }
 0x1e9   : > { %13182 = vmatpush3.bf16.msra.mxu0 %v14233_v44  ;;  %12338 = vmatprep.mubr.msk.f32.mxu0 %vm678_vm8, %v1128_v52  ;;  %v12299_v4 = vpop.f32.mrb[6].mxu1  ;;  %v14429_v20 = vmul.f32 0.0, %v1021_v18  ;;  %v11170_v52 = vld [vmem:[%s14125_s20 + $0x22] sm:$0x1]  ;;  %v2005_v9 = vrot.slane %v11172_v63, 2 }
 0x1ea   : > { %13184 = vmatprep.subr.bf16.mxu0 %v14256_v1  ;;  %v1148_v8 = vpop.f32.mrb[7].mxu1  ;;  %v14431_v23 = vmul.f32 0.0, %v1020_v19  ;;  %v2001_v59 = vrot.slane %v11170_v52, 4 }
 0x1ed   : > { %13186 = vmatpush3.bf16.msra.mxu0 %v14256_v1  ;;  %v12302_v13 = vpop.f32.mrb[8].mxu1 }
 0x1ee   : > { %13188 = vmatprep.subr.bf16.mxu0 %v14272_v12  ;;  %v1158_v14 = vpop.f32.mrb[9].mxu1 }
 0x1ef   : > { %12357 = vmatprep.mubr.msk.f32.mxu1 %vm678_vm8, %v1158_v14 }
 0x1f0   : > { %12358 = vmatmul.mubr.msk.f32.vlgmr.msra.gmra.mrb[10].mxu1 %vm678_vm8, %v12302_v13 }
 0x1f1   : > { %13190 = vmatpush3.bf16.msra.mxu0 %v14272_v12  ;;  %13214 = vmatpush3.bf16.msra.mxu1 %v14233_v44 }
 0x1f2   : > { %13192 = vmatprep.subr.bf16.mxu0 %v14285_v22  ;;  %13216 = vmatprep.subr.bf16.mxu1 %v14256_v1 }
 0x1f3   : > { %12376 = vmatprep.mubr.msk.f32.mxu1 %vm678_vm8, %v1148_v8  ;;  %v11173_v8 = vld [vmem:[%s14125_s20 + $0x3a] sm:$0x1] }
 0x1f4   : > { %v2007_v14 = vrot.slane %v11173_v8, 1 }
 0x1f5   : > { %13194 = vmatpush3.bf16.msra.mxu0 %v14285_v22  ;;  %13218 = vmatpush3.bf16.msra.mxu1 %v14256_v1 }
 0x1f6   : > { %12379 = vmatprep.subr.mxu0 %v1534_v17  ;;  %13220 = vmatprep.subr.bf16.mxu1 %v14272_v12 }
 0x1f8   : > { %12339 = vmatmul.mubr.msk.f32.vlgmr.msra.gmra.mrb[10].mxu0 %vm678_vm8, %v12293_v50  ;;  %v1996_v50 = vsel %vm527_vm1, %v1995_v30, %v11166_v40  ;;  %v2469_v30 = vrot.slane %v11191_v25, 7 }
 0x1f9   : > { %12380 = vmatpush3.msra.mxu0 %v1534_v17  ;;  %12381 = vmatprep.mubr.msk.f32.mxu0 %vm548_vm0, %v14103_v0  ;;  %v1998_v55 = vsel %vm530_vm2, %v1997_v45, %v1996_v50  ;;  %v2471_v50 = vrot.slane %v11192_v28, 6 }
 0x1fa   : > { %13222 = vmatpush3.bf16.msra.mxu1 %v14272_v12  ;;  %13260 = vmatprep.subr.bf16.mxu0 %v14127_v5  ;;  %v2000_v61 = vsel %vm533_vm3, %v1999_v54, %v1998_v55  ;;  %v2470_v54 = vsel %vm527_vm1, %v2469_v30, %v11190_v43  ;;  %v11215_v43 = vld [vmem:[%s14125_s20 + $0xc] sm:$0x1] }
 0x1fb   : > { %13224 = vmatprep.subr.bf16.mxu1 %v14285_v22  ;;  %v2472_v58 = vsel %vm530_vm2, %v2471_v50, %v2470_v54  ;;  %v11216_v50 = vld [vmem:[%s14125_s20 + $0x14] sm:$0x1] }
 0x1fc   : > { %12382 = vmatmul.mubr.msk.f32.vlgmr.msra.gmra.mrb[12].mxu0 %vm548_vm0, %v14162_v32 }
 0x1fd   : > { %12384 = vmatprep.mubr.msk.f32.mxu0 %vm548_vm0, %v14168_v33  ;;  %13262 = vmatpush3.bf16.msra.mxu0 %v14127_v5 }
 0x1fe   : > { %13226 = vmatpush3.bf16.msra.mxu1 %v14285_v22  ;;  %13264 = vmatprep.subr.bf16.mxu0 %v14129_v6 }
 0x1ff   : > { %13228 = vmatprep.subr.bf16.mxu1 %v14127_v5 }
 0x200   : > { %12385 = vmatmul.mubr.msk.f32.gmra.mrb[14].mxu0 %vm548_vm0, %v14178_v34 }
 0x201   : > { %12377 = vmatmul.mubr.msk.f32.vlgmr.msra.gmra.mrb[10].mxu1 %vm678_vm8, %v12299_v4  ;;  %12387 = vmatprep.mubr.msk.f32.mxu0 %vm548_vm0, %v14184_v35  ;;  %v2002_v4 = vsel %vm536_vm4, %v2001_v59, %v2000_v61  ;;  %v11195_v61 = vld [vmem:[%s14125_s20 + $0x2b] sm:$0x1] }
 0x202   : > { %13230 = vmatpush3.bf16.msra.mxu1 %v14127_v5  ;;  %13266 = vmatpush3.bf16.msra.mxu0 %v14129_v6  ;;  %v2004_v10 = vsel %vm539_vm5, %v2003_v2, %v2002_v4  ;;  %v11196_v4 = vld [vmem:[%s14125_s20 + $0x33] sm:$0x1] }
 0x203   : > { %13232 = vmatprep.subr.bf16.mxu1 %v14129_v6  ;;  %13268 = vmatprep.subr.bf16.mxu0 %v14148_v21  ;;  %v2006_v15 = vsel %vm542_vm6, %v2005_v9, %v2004_v10 }
 0x204   : > { %12388 = vmatmul.mubr.msk.f32.gmra.mrb[16].mxu0 %vm548_vm0, %v14194_v36  ;;  %v2008_v16 = vsel %vm545_vm7, %v2007_v14, %v2006_v15 }
 0x205   : > { %12390 = vmatprep.mubr.msk.f32.mxu0 %vm548_vm0, %v14200_v37 }
 0x206   : > { %13234 = vmatpush3.bf16.msra.mxu1 %v14129_v6  ;;  %13270 = vmatpush3.bf16.msra.mxu0 %v14148_v21 }
 0x207   : > { %13236 = vmatprep.subr.bf16.mxu1 %v14148_v21  ;;  %13272 = vmatprep.subr.bf16.mxu0 %v14221_v41 }
 0x208   : > { %12391 = vmatmul.mubr.msk.f32.gmra.mrb[18].mxu0 %vm548_vm0, %v14210_v38 }
 0x20a   : > { %13238 = vmatpush3.bf16.msra.mxu1 %v14148_v21  ;;  %13274 = vmatpush3.bf16.msra.mxu0 %v14221_v41 }
 0x20b   : > { %13240 = vmatprep.subr.bf16.mxu1 %v14221_v41  ;;  %13276 = vmatprep.subr.bf16.mxu0 %v14233_v44 }
 0x20e   : > { %13242 = vmatpush3.bf16.msra.mxu1 %v14221_v41 }
 0x20f   : > { %13244 = vmatprep.subr.bf16.mxu1 %v14233_v44 }
 0x2cb   : > { %v12340_v26 = vpop.f32.mrb[10].mxu0 }
 0x2cc   : > { %v14438_v31 = vadd.f32 %v12340_v26, %v14341_v29  ;;  %v1320_v39 = vpop.f32.mrb[11].mxu0 }
 0x2cd   : > { %v14442_v42 = vadd.f32 %v1320_v39, %v14338_v27 }
 0x2cf   : > { %v12383_v48 = vpop.f32.mrb[12].mxu0 }
 0x2d0   : > { %v1602_v51 = vpop.f32.mrb[13].mxu0 }
 0x2d3   : > { %v12386_v56 = vpop.f32.mrb[14].mxu0 }
 0x2d4   : > { %v1612_v57 = vpop.f32.mrb[15].mxu0  ;;  %v14451_v60 = vpop.f32.mrb[10].mxu1 }
 0x2d5   : > { %12409 = vmatprep.mubr.msk.f32.mxu1 %vm678_vm8, %v1612_v57  ;;  %v14455_v62 = vpop.f32.mrb[11].mxu1  ;;  %v14520_v17 = vadd.f32 %v14451_v60, %v14341_v29 }
 0x2d6   : > { %12410 = vmatmul.mubr.msk.f32.vlgmr.msra.gmra.mrb[12].mxu1 %vm678_vm8, %v12386_v56  ;;  %v14524_v18 = vadd.f32 %v14455_v62, %v14338_v27  ;;  %v11194_v56 = vld [vmem:[%s14125_s20 + $0x23] sm:$0x1] }
 0x2d7   : > { %13246 = vmatpush3.bf16.msra.mxu1 %v14233_v44  ;;  %12428 = vmatprep.mubr.msk.f32.mxu1 %vm678_vm8, %v1602_v51  ;;  %v12389_v3 = vpop.f32.mrb[16].mxu0  ;;  %v2475_v62 = vrot.slane %v11194_v56, 4  ;;  %v11214_v56 = vld [vmem:[%s14125_s20 + $0x4] sm:$0x1] }
 0x2d8   : > { %13248 = vmatprep.subr.bf16.mxu1 %v14256_v1  ;;  %v1622_v7 = vpop.f32.mrb[17].mxu0 }
 0x2db   : > { %13250 = vmatpush3.bf16.msra.mxu1 %v14256_v1  ;;  %v12392_v11 = vpop.f32.mrb[18].mxu0 }
 0x2dc   : > { %13252 = vmatprep.subr.bf16.mxu1 %v14272_v12  ;;  %v1632_v13 = vpop.f32.mrb[19].mxu0 }
 0x2dd   : > { %12447 = vmatprep.mubr.msk.f32.mxu0 %vm678_vm8, %v1632_v13  ;;  %v2479_v13 = vrot.slane %v11196_v4, 2 }
 0x2de   : > { %12448 = vmatmul.mubr.msk.f32.vlgmr.msra.gmra.mrb[20].mxu0 %vm678_vm8, %v12392_v11  ;;  %v11197_v11 = vld [vmem:[%s14125_s20 + $0x3b] sm:$0x1] }
 0x2df   : > { %13254 = vmatpush3.bf16.msra.mxu1 %v14272_v12  ;;  %13278 = vmatpush3.bf16.msra.mxu0 %v14233_v44  ;;  %v2481_v25 = vrot.slane %v11197_v11, 1 }
 0x2e0   : > { %13256 = vmatprep.subr.bf16.mxu1 %v14285_v22  ;;  %13280 = vmatprep.subr.bf16.mxu0 %v14256_v1 }
 0x2e1   : > { %12466 = vmatprep.mubr.msk.f32.mxu0 %vm678_vm8, %v1622_v7  ;;  %v2477_v7 = vrot.slane %v11195_v61, 3 }
 0x2e3   : > { %13258 = vmatpush3.bf16.msra.mxu1 %v14285_v22  ;;  %13282 = vmatpush3.bf16.msra.mxu0 %v14256_v1 }
 0x2e4   : > { %12469 = vmatprep.subr.mxu1 %v2008_v16  ;;  %13284 = vmatprep.subr.bf16.mxu0 %v14272_v12 }
 0x2e6   : > { %12429 = vmatmul.mubr.msk.f32.vlgmr.msra.gmra.mrb[12].mxu1 %vm678_vm8, %v12383_v48  ;;  %v11193_v48 = vld [vmem:[%s14125_s20 + $0x1b] sm:$0x1] }
 0x2e7   : > { %12470 = vmatpush3.msra.mxu1 %v2008_v16  ;;  %12471 = vmatprep.mubr.msk.f32.mxu1 %vm548_vm0, %v14103_v0  ;;  %v2473_v57 = vrot.slane %v11193_v48, 5 }
 0x2e8   : > { %13286 = vmatpush3.bf16.msra.mxu0 %v14272_v12  ;;  %13324 = vmatprep.subr.bf16.mxu1 %v14127_v5 }
 0x2e9   : > { %13288 = vmatprep.subr.bf16.mxu0 %v14285_v22  ;;  %v2474_v2 = vsel %vm533_vm3, %v2473_v57, %v2472_v58  ;;  %v11217_v58 = vld [vmem:[%s14125_s20 + $0x1c] sm:$0x1] }
 0x2ea   : > { %12472 = vmatmul.mubr.msk.f32.vlgmr.msra.gmra.mrb[14].mxu1 %vm548_vm0, %v14162_v32  ;;  %v2476_v9 = vsel %vm536_vm4, %v2475_v62, %v2474_v2  ;;  %v11218_v2 = vld [vmem:[%s14125_s20 + $0x24] sm:$0x1] }
 0x2eb   : > { %12474 = vmatprep.mubr.msk.f32.mxu1 %vm548_vm0, %v14168_v33  ;;  %13326 = vmatpush3.bf16.msra.mxu1 %v14127_v5  ;;  %v2478_v14 = vsel %vm539_vm5, %v2477_v7, %v2476_v9  ;;  %v11219_v9 = vld [vmem:[%s14125_s20 + $0x2c] sm:$0x1] }
 0x2ec   : > { %13290 = vmatpush3.bf16.msra.mxu0 %v14285_v22  ;;  %13328 = vmatprep.subr.bf16.mxu1 %v14129_v6 }
 0x2ed   : > { %13292 = vmatprep.subr.bf16.mxu0 %v14127_v5 }
 0x2ee   : > { %12475 = vmatmul.mubr.msk.f32.gmra.mrb[16].mxu1 %vm548_vm0, %v14178_v34 }
 0x2ef   : > { %12467 = vmatmul.mubr.msk.f32.vlgmr.msra.gmra.mrb[20].mxu0 %vm678_vm8, %v12389_v3  ;;  %12477 = vmatprep.mubr.msk.f32.mxu1 %vm548_vm0, %v14184_v35 }
 0x2f0   : > { %13294 = vmatpush3.bf16.msra.mxu0 %v14127_v5  ;;  %13330 = vmatpush3.bf16.msra.mxu1 %v14129_v6 }
 0x2f1   : > { %13296 = vmatprep.subr.bf16.mxu0 %v14129_v6  ;;  %13332 = vmatprep.subr.bf16.mxu1 %v14148_v21 }
 0x2f2   : > { %12478 = vmatmul.mubr.msk.f32.gmra.mrb[18].mxu1 %vm548_vm0, %v14194_v36 }
 0x2f3   : > { %12480 = vmatprep.mubr.msk.f32.mxu1 %vm548_vm0, %v14200_v37 }
 0x2f4   : > { %13298 = vmatpush3.bf16.msra.mxu0 %v14129_v6  ;;  %13334 = vmatpush3.bf16.msra.mxu1 %v14148_v21 }
 0x2f5   : > { %13300 = vmatprep.subr.bf16.mxu0 %v14148_v21  ;;  %13336 = vmatprep.subr.bf16.mxu1 %v14221_v41 }
 0x2f6   : > { %12481 = vmatmul.mubr.msk.f32.gmra.mrb[20].mxu1 %vm548_vm0, %v14210_v38 }
 0x2f8   : > { %13302 = vmatpush3.bf16.msra.mxu0 %v14148_v21  ;;  %13338 = vmatpush3.bf16.msra.mxu1 %v14221_v41 }
 0x2f9   : > { %13304 = vmatprep.subr.bf16.mxu0 %v14221_v41  ;;  %13340 = vmatprep.subr.bf16.mxu1 %v14233_v44 }
 0x2fc   : > { %13306 = vmatpush3.bf16.msra.mxu0 %v14221_v41 }
 0x2fd   : > { %13308 = vmatprep.subr.bf16.mxu0 %v14233_v44 }
 0x3b9   : > { %v12430_v26 = vpop.f32.mrb[12].mxu1 }
 0x3ba   : > { %v14531_v39 = vadd.f32 %v12430_v26, %v14341_v29  ;;  %v1794_v40 = vpop.f32.mrb[13].mxu1  ;;  %v2480_v26 = vsel %vm542_vm6, %v2479_v13, %v2478_v14 }
 0x3bb   : > { %v14535_v45 = vadd.f32 %v1794_v40, %v14338_v27  ;;  %v2482_v28 = vsel %vm545_vm7, %v2481_v25, %v2480_v26 }
 0x3bd   : > { %v12473_v52 = vpop.f32.mrb[14].mxu1 }
 0x3be   : > { %v2076_v55 = vpop.f32.mrb[15].mxu1 }
 0x3c1   : > { %v12476_v59 = vpop.f32.mrb[16].mxu1 }
 0x3c2   : > { %v2086_v60 = vpop.f32.mrb[17].mxu1  ;;  %v14544_v63 = vpop.f32.mrb[20].mxu0 }
 0x3c3   : > { %12499 = vmatprep.mubr.msk.f32.mxu0 %vm678_vm8, %v2086_v60  ;;  %v14548_v3 = vpop.f32.mrb[21].mxu0  ;;  %v11267_v60 = vld [vmem:[%s14125_s20 + $0x2e] sm:$0x1] }
 0x3c4   : > { %12500 = vmatmul.mubr.msk.f32.vlgmr.msra.gmra.mrb[22].mxu0 %vm678_vm8, %v12476_v59  ;;  %v14617_v30 = vadd.f32 %v14548_v3, %v14338_v27  ;;  %v2945_v59 = vrot.slane %v11216_v50, 6  ;;  %v2947_v3 = vrot.slane %v11217_v58, 5 }
 0x3c5   : > { %13310 = vmatpush3.bf16.msra.mxu0 %v14233_v44  ;;  %12518 = vmatprep.mubr.msk.f32.mxu0 %vm678_vm8, %v2076_v55  ;;  %v12479_v8 = vpop.f32.mrb[18].mxu1 }
 0x3c6   : > { %13312 = vmatprep.subr.bf16.mxu0 %v14256_v1  ;;  %v2096_v10 = vpop.f32.mrb[19].mxu1 }
 0x3c9   : > { %13314 = vmatpush3.bf16.msra.mxu0 %v14256_v1  ;;  %v12482_v15 = vpop.f32.mrb[20].mxu1 }
 0x3ca   : > { %13316 = vmatprep.subr.bf16.mxu0 %v14272_v12  ;;  %v2106_v16 = vpop.f32.mrb[21].mxu1 }
 0x3cb   : > { %12537 = vmatprep.mubr.msk.f32.mxu1 %vm678_vm8, %v2106_v16  ;;  %v2951_v16 = vrot.slane %v11219_v9, 3 }
 0x3cc   : > { %12538 = vmatmul.mubr.msk.f32.vlgmr.msra.gmra.mrb[22].mxu1 %vm678_vm8, %v12482_v15  ;;  %v11220_v15 = vld [vmem:[%s14125_s20 + $0x34] sm:$0x1] }
 0x3cd   : > { %13318 = vmatpush3.bf16.msra.mxu0 %v14272_v12  ;;  %13342 = vmatpush3.bf16.msra.mxu1 %v14233_v44 }
 0x3ce   : > { %13320 = vmatprep.subr.bf16.mxu0 %v14285_v22  ;;  %13344 = vmatprep.subr.bf16.mxu1 %v14256_v1 }
 0x3cf   : > { %12556 = vmatprep.mubr.msk.f32.mxu1 %vm678_vm8, %v2096_v10  ;;  %v2949_v10 = vrot.slane %v11218_v2, 4  ;;  %v11238_v2 = vld [vmem:[%s14125_s20 + $0x5] sm:$0x1] }
 0x3d1   : > { %13322 = vmatpush3.bf16.msra.mxu0 %v14285_v22  ;;  %13346 = vmatpush3.bf16.msra.mxu1 %v14256_v1 }
 0x3d2   : > { %12559 = vmatprep.subr.mxu0 %v2482_v28  ;;  %13348 = vmatprep.subr.bf16.mxu1 %v14272_v12 }
 0x3d4   : > { %12519 = vmatmul.mubr.msk.f32.vlgmr.msra.gmra.mrb[22].mxu0 %vm678_vm8, %v12473_v52  ;;  %v2943_v52 = vrot.slane %v11215_v43, 7  ;;  %v11221_v43 = vld [vmem:[%s14125_s20 + $0x3c] sm:$0x1] }
 0x3d5   : > { %12560 = vmatpush3.msra.mxu0 %v2482_v28  ;;  %12561 = vmatprep.mubr.msk.f32.mxu0 %vm548_vm0, %v14103_v0  ;;  %v14613_v0 = vadd.f32 %v14544_v63, %v14341_v29 }
 0x3d6   : > { %13350 = vmatpush3.bf16.msra.mxu1 %v14272_v12  ;;  %13388 = vmatprep.subr.bf16.mxu0 %v14127_v5  ;;  %v2944_v62 = vsel %vm527_vm1, %v2943_v52, %v11214_v56  ;;  %v2955_v56 = vrot.slane %v11221_v43, 1 }
 0x3d7   : > { %13352 = vmatprep.subr.bf16.mxu1 %v14285_v22  ;;  %v2946_v4 = vsel %vm530_vm2, %v2945_v59, %v2944_v62  ;;  %v14669_v62 = vld [vmem:[%s19386_s5] sm:$0xff] }
 0x3d8   : > { %12562 = vmatmul.mubr.msk.f32.vlgmr.msra.gmra.mrb[24].mxu0 %vm548_vm0, %v14162_v32  ;;  %v2948_v13 = vsel %vm533_vm3, %v2947_v3, %v2946_v4  ;;  %v11241_v4 = vld [vmem:[%s14125_s20 + $0x1d] sm:$0x1] }
 0x3d9   : > { %12564 = vmatprep.mubr.msk.f32.mxu0 %vm548_vm0, %v14168_v33  ;;  %13390 = vmatpush3.bf16.msra.mxu0 %v14127_v5  ;;  %v2950_v26 = vsel %vm536_vm4, %v2949_v10, %v2948_v13  ;;  %v11242_v13 = vld [vmem:[%s14125_s20 + $0x25] sm:$0x1] }
 0x3da   : > { %13354 = vmatpush3.bf16.msra.mxu1 %v14285_v22  ;;  %13392 = vmatprep.subr.bf16.mxu0 %v14129_v6  ;;  %v2952_v50 = vsel %vm539_vm5, %v2951_v16, %v2950_v26  ;;  %v11243_v26 = vld [vmem:[%s14125_s20 + $0x2d] sm:$0x1] }
 0x3db   : > { %13356 = vmatprep.subr.bf16.mxu1 %v14127_v5 }
 0x3dc   : > { %12565 = vmatmul.mubr.msk.f32.gmra.mrb[26].mxu0 %vm548_vm0, %v14178_v34 }
 0x3dd   : > { %12557 = vmatmul.mubr.msk.f32.vlgmr.msra.gmra.mrb[22].mxu1 %vm678_vm8, %v12479_v8  ;;  %12567 = vmatprep.mubr.msk.f32.mxu0 %vm548_vm0, %v14184_v35 }
 0x3de   : > { %13358 = vmatpush3.bf16.msra.mxu1 %v14127_v5  ;;  %13394 = vmatpush3.bf16.msra.mxu0 %v14129_v6 }
 0x3df   : > { %13360 = vmatprep.subr.bf16.mxu1 %v14129_v6  ;;  %13396 = vmatprep.subr.bf16.mxu0 %v14148_v21 }
 0x3e0   : > { %12568 = vmatmul.mubr.msk.f32.gmra.mrb[28].mxu0 %vm548_vm0, %v14194_v36 }
 0x3e1   : > { %12570 = vmatprep.mubr.msk.f32.mxu0 %vm548_vm0, %v14200_v37 }
 0x3e2   : > { %13362 = vmatpush3.bf16.msra.mxu1 %v14129_v6  ;;  %13398 = vmatpush3.bf16.msra.mxu0 %v14148_v21 }
 0x3e3   : > { %13364 = vmatprep.subr.bf16.mxu1 %v14148_v21  ;;  %13400 = vmatprep.subr.bf16.mxu0 %v14221_v41 }
 0x3e4   : > { %12571 = vmatmul.mubr.msk.f32.gmra.mrb[30].mxu0 %vm548_vm0, %v14210_v38 }
 0x3e6   : > { %13366 = vmatpush3.bf16.msra.mxu1 %v14148_v21  ;;  %13402 = vmatpush3.bf16.msra.mxu0 %v14221_v41 }
 0x3e7   : > { %13368 = vmatprep.subr.bf16.mxu1 %v14221_v41  ;;  %13404 = vmatprep.subr.bf16.mxu0 %v14233_v44 }
 0x3ea   : > { %13370 = vmatpush3.bf16.msra.mxu1 %v14221_v41 }
 0x3eb   : > { %13372 = vmatprep.subr.bf16.mxu1 %v14233_v44 }
 0x4a7   : > { %v12520_v48 = vpop.f32.mrb[22].mxu0 }
 0x4a8   : > { %v14624_v54 = vadd.f32 %v12520_v48, %v14341_v29  ;;  %v2268_v55 = vpop.f32.mrb[23].mxu0  ;;  %v2953_v48 = vrot.slane %v11220_v15, 2 }
 0x4a9   : > { %v14628_v57 = vadd.f32 %v2268_v55, %v14338_v27 }
 0x4aa   : > { %v2954_v58 = vsel %vm542_vm6, %v2953_v48, %v2952_v50 }
 0x4ab   : > { %v12563_v61 = vpop.f32.mrb[24].mxu0  ;;  %v2956_v59 = vsel %vm545_vm7, %v2955_v56, %v2954_v58 }
 0x4ac   : > { %v2550_v63 = vpop.f32.mrb[25].mxu0 }
 0x4af   : > { %v12566_v7 = vpop.f32.mrb[26].mxu0 }
 0x4b0   : > { %v2560_v8 = vpop.f32.mrb[27].mxu0  ;;  %v14637_v11 = vpop.f32.mrb[22].mxu1 }
 0x4b1   : > { %12589 = vmatprep.mubr.msk.f32.mxu1 %vm678_vm8, %v2560_v8  ;;  %v14641_v14 = vpop.f32.mrb[23].mxu1 }
 0x4b2   : > { %12590 = vmatmul.mubr.msk.f32.vlgmr.msra.gmra.mrb[24].mxu1 %vm678_vm8, %v12566_v7 }
 0x4b3   : > { %13374 = vmatpush3.bf16.msra.mxu1 %v14233_v44  ;;  %12608 = vmatprep.mubr.msk.f32.mxu1 %vm678_vm8, %v2550_v63  ;;  %v12569_v25 = vpop.f32.mrb[28].mxu0 }
 0x4b4   : > { %13376 = vmatprep.subr.bf16.mxu1 %v14256_v1  ;;  %v2570_v28 = vpop.f32.mrb[29].mxu0 }
 0x4b7   : > { %13378 = vmatpush3.bf16.msra.mxu1 %v14256_v1  ;;  %v12572_v52 = vpop.f32.mrb[30].mxu0 }
 0x4b8   : > { %13380 = vmatprep.subr.bf16.mxu1 %v14272_v12  ;;  %v2580_v55 = vpop.f32.mrb[31].mxu0 }
 0x4b9   : > { %12627 = vmatprep.mubr.msk.f32.mxu0 %vm678_vm8, %v2580_v55  ;;  %v3425_v55 = vrot.slane %v11243_v26, 3 }
 0x4ba   : > { %12628 = vmatmul.mubr.msk.f32.vlgmr.msra.gmra.mrb[32].mxu0 %vm678_vm8, %v12572_v52  ;;  %v11244_v52 = vld [vmem:[%s14125_s20 + $0x35] sm:$0x1] }
 0x4bb   : > { %13382 = vmatpush3.bf16.msra.mxu1 %v14272_v12  ;;  %13406 = vmatpush3.bf16.msra.mxu0 %v14233_v44 }
 0x4bc   : > { %13384 = vmatprep.subr.bf16.mxu1 %v14285_v22  ;;  %13408 = vmatprep.subr.bf16.mxu0 %v14256_v1 }
 0x4bd   : > { %12646 = vmatprep.mubr.msk.f32.mxu0 %vm678_vm8, %v2570_v28  ;;  %v3423_v28 = vrot.slane %v11242_v13, 4  ;;  %v14798_v13 = vld [vmem:[%s19386_s5 + $0x20] sm:$0xff] }
 0x4bf   : > { %13386 = vmatpush3.bf16.msra.mxu1 %v14285_v22  ;;  %13410 = vmatpush3.bf16.msra.mxu0 %v14256_v1 }
 0x4c0   : > { %12649 = vmatprep.subr.mxu1 %v2956_v59  ;;  %13412 = vmatprep.subr.bf16.mxu0 %v14272_v12 }
 0x4c2   : > { %12609 = vmatmul.mubr.msk.f32.vlgmr.msra.gmra.mrb[24].mxu1 %vm678_vm8, %v12563_v61 }
 0x4c3   : > { %12650 = vmatpush3.msra.mxu1 %v2956_v59  ;;  %12651 = vmatprep.mubr.msk.f32.mxu1 %vm548_vm0, %v14669_v62 }
 0x4c4   : > { %13414 = vmatpush3.bf16.msra.mxu0 %v14272_v12  ;;  %13452 = vmatprep.subr.bf16.mxu1 %v14127_v5 }
 0x4c5   : > { %13416 = vmatprep.subr.bf16.mxu0 %v14285_v22 }
 0x4c6   : > { %12652 = vmatmul.mubr.msk.f32.vlgmr.msra.gmra.mrb[26].mxu1 %vm548_vm0, %v14162_v32  ;;  %v14711_v32 = vadd.f32 %v14637_v11, %v14341_v29 }
 0x4c7   : > { %12654 = vmatprep.mubr.msk.f32.mxu1 %vm548_vm0, %v14168_v33  ;;  %13454 = vmatpush3.bf16.msra.mxu1 %v14127_v5  ;;  %v14715_v33 = vadd.f32 %v14641_v14, %v14338_v27  ;;  %v3421_v14 = vrot.slane %v11241_v4, 5 }
 0x4c8   : > { %13418 = vmatpush3.bf16.msra.mxu0 %v14285_v22  ;;  %13456 = vmatprep.subr.bf16.mxu1 %v14129_v6 }
 0x4c9   : > { %13420 = vmatprep.subr.bf16.mxu0 %v14127_v5 }
 0x4ca   : > { %12655 = vmatmul.mubr.msk.f32.gmra.mrb[28].mxu1 %vm548_vm0, %v14178_v34 }
 0x4cb   : > { %12647 = vmatmul.mubr.msk.f32.vlgmr.msra.gmra.mrb[32].mxu0 %vm678_vm8, %v12569_v25  ;;  %12657 = vmatprep.mubr.msk.f32.mxu1 %vm548_vm0, %v14184_v35  ;;  %v11239_v35 = vld [vmem:[%s14125_s20 + $0xd] sm:$0x1] }
 0x4cc   : > { %13422 = vmatpush3.bf16.msra.mxu0 %v14127_v5  ;;  %13458 = vmatpush3.bf16.msra.mxu1 %v14129_v6 }
 0x4cd   : > { %13424 = vmatprep.subr.bf16.mxu0 %v14129_v6  ;;  %13460 = vmatprep.subr.bf16.mxu1 %v14148_v21 }
 0x4ce   : > { %12658 = vmatmul.mubr.msk.f32.gmra.mrb[30].mxu1 %vm548_vm0, %v14194_v36 }
 0x4cf   : > { %12660 = vmatprep.mubr.msk.f32.mxu1 %vm548_vm0, %v14200_v37  ;;  %v11240_v37 = vld [vmem:[%s14125_s20 + $0x15] sm:$0x1] }
 0x4d0   : > { %13426 = vmatpush3.bf16.msra.mxu0 %v14129_v6  ;;  %13462 = vmatpush3.bf16.msra.mxu1 %v14148_v21  ;;  %v3419_v7 = vrot.slane %v11240_v37, 6 }
 0x4d1   : > { %13428 = vmatprep.subr.bf16.mxu0 %v14148_v21  ;;  %13464 = vmatprep.subr.bf16.mxu1 %v14221_v41 }
 0x4d2   : > { %12661 = vmatmul.mubr.msk.f32.gmra.mrb[32].mxu1 %vm548_vm0, %v14210_v38  ;;  %v3417_v38 = vrot.slane %v11239_v35, 7  ;;  %v11245_v35 = vld [vmem:[%s14125_s20 + $0x3d] sm:$0x1] }
 0x4d4   : > { %13430 = vmatpush3.bf16.msra.mxu0 %v14148_v21  ;;  %13466 = vmatpush3.bf16.msra.mxu1 %v14221_v41  ;;  %v3418_v10 = vsel %vm527_vm1, %v3417_v38, %v11238_v2  ;;  %v3429_v2 = vrot.slane %v11245_v35, 1  ;;  %v11262_v35 = vld [vmem:[%s14125_s20 + $0x6] sm:$0x1] }
 0x4d5   : > { %13432 = vmatprep.subr.bf16.mxu0 %v14221_v41  ;;  %13468 = vmatprep.subr.bf16.mxu1 %v14233_v44  ;;  %v3420_v15 = vsel %vm530_vm2, %v3419_v7, %v3418_v10  ;;  %v14772_v10 = vld [vmem:[%s19386_s5 + $0x8] sm:$0xff] }
 0x4d6   : > { %v3422_v48 = vsel %vm533_vm3, %v3421_v14, %v3420_v15  ;;  %v14809_v14 = vld [vmem:[%s19386_s5 + $0x28] sm:$0xff]  ;;  %v14816_v15 = vld [vmem:[%s19386_s5 + $0x30] sm:$0xff] }
 0x4d7   : > { %v3424_v58 = vsel %vm536_vm4, %v3423_v28, %v3422_v48  ;;  %v11263_v48 = vld [vmem:[%s14125_s20 + $0xe] sm:$0x1] }
 0x4d8   : > { %13434 = vmatpush3.bf16.msra.mxu0 %v14221_v41  ;;  %v3426_v37 = vsel %vm539_vm5, %v3425_v55, %v3424_v58  ;;  %v11264_v55 = vld [vmem:[%s14125_s20 + $0x16] sm:$0x1] }
 0x4d9   : > { %13436 = vmatprep.subr.bf16.mxu0 %v14233_v44 }
 0x595   : > { %v12610_v36 = vpop.f32.mrb[24].mxu1 }
 0x596   : > { %v14722_v61 = vadd.f32 %v12610_v36, %v14341_v29  ;;  %v2742_v63 = vpop.f32.mrb[25].mxu1  ;;  %v3427_v36 = vrot.slane %v11244_v52, 2 }
 0x597   : > { %v14726_v3 = vadd.f32 %v2742_v63, %v14338_v27 }
 0x598   : > { %v3428_v4 = vsel %vm542_vm6, %v3427_v36, %v3426_v37  ;;  %v11265_v36 = vld [vmem:[%s14125_s20 + $0x1e] sm:$0x1] }
 0x599   : > { %v12653_v9 = vpop.f32.mrb[26].mxu1  ;;  %v3430_v7 = vsel %vm545_vm7, %v3429_v2, %v3428_v4  ;;  %v11266_v4 = vld [vmem:[%s14125_s20 + $0x26] sm:$0x1] }
 0x59a   : > { %v3024_v11 = vpop.f32.mrb[27].mxu1 }
 0x59d   : > { %v12656_v16 = vpop.f32.mrb[28].mxu1 }
 0x59e   : > { %v3034_v25 = vpop.f32.mrb[29].mxu1  ;;  %v14735_v43 = vpop.f32.mrb[32].mxu0 }
 0x59f   : > { %12679 = vmatprep.mubr.msk.f32.mxu0 %vm678_vm8, %v3034_v25  ;;  %v14739_v50 = vpop.f32.mrb[33].mxu0  ;;  %v14839_v25 = vadd.f32 %v14735_v43, %v14341_v29 }
 0x5a0   : > { %12680 = vmatmul.mubr.msk.f32.vlgmr.msra.gmra.mrb[34].mxu0 %vm678_vm8, %v12656_v16  ;;  %v14827_v16 = vld [vmem:[%s19386_s5 + $0x38] sm:$0xff]  ;;  %v14843_v26 = vadd.f32 %v14739_v50, %v14338_v27  ;;  %v3893_v50 = vrot.slane %v11264_v55, 6 }
 0x5a1   : > { %13438 = vmatpush3.bf16.msra.mxu0 %v14233_v44  ;;  %12698 = vmatprep.mubr.msk.f32.mxu0 %vm678_vm8, %v3024_v11  ;;  %v12659_v56 = vpop.f32.mrb[30].mxu1  ;;  %v14790_v11 = vld [vmem:[%s19386_s5 + $0x18] sm:$0xff] }
 0x5a2   : > { %13440 = vmatprep.subr.bf16.mxu0 %v14256_v1  ;;  %v3044_v59 = vpop.f32.mrb[31].mxu1 }
 0x5a5   : > { %13442 = vmatpush3.bf16.msra.mxu0 %v14256_v1  ;;  %v12662_v38 = vpop.f32.mrb[32].mxu1 }
 0x5a6   : > { %13444 = vmatprep.subr.bf16.mxu0 %v14272_v12  ;;  %v3054_v63 = vpop.f32.mrb[33].mxu1 }
 0x5a7   : > { %12717 = vmatprep.mubr.msk.f32.mxu1 %vm678_vm8, %v3054_v63 }
 0x5a8   : > { %12718 = vmatmul.mubr.msk.f32.vlgmr.msra.gmra.mrb[34].mxu1 %vm678_vm8, %v12662_v38 }
 0x5a9   : > { %13446 = vmatpush3.bf16.msra.mxu0 %v14272_v12  ;;  %13470 = vmatpush3.bf16.msra.mxu1 %v14233_v44 }
 0x5aa   : > { %13448 = vmatprep.subr.bf16.mxu0 %v14285_v22  ;;  %13472 = vmatprep.subr.bf16.mxu1 %v14256_v1 }
 0x5ab   : > { %12736 = vmatprep.mubr.msk.f32.mxu1 %vm678_vm8, %v3044_v59 }
 0x5ad   : > { %13450 = vmatpush3.bf16.msra.mxu0 %v14285_v22  ;;  %13474 = vmatpush3.bf16.msra.mxu1 %v14256_v1 }
 0x5ae   : > { %12739 = vmatprep.subr.mxu0 %v3430_v7  ;;  %13476 = vmatprep.subr.bf16.mxu1 %v14272_v12 }
 0x5b0   : > { %12699 = vmatmul.mubr.msk.f32.vlgmr.msra.gmra.mrb[34].mxu0 %vm678_vm8, %v12653_v9  ;;  %v14779_v9 = vld [vmem:[%s19386_s5 + $0x10] sm:$0xff] }
 0x5b1   : > { %12740 = vmatpush3.msra.mxu0 %v3430_v7  ;;  %12741 = vmatprep.mubr.msk.f32.mxu0 %vm548_vm0, %v14669_v62  ;;  %v3895_v7 = vrot.slane %v11265_v36, 5 }
 0x5b2   : > { %13478 = vmatpush3.bf16.msra.mxu1 %v14272_v12  ;;  %13516 = vmatprep.subr.bf16.mxu0 %v14127_v5 }
 0x5b3   : > { %13480 = vmatprep.subr.bf16.mxu1 %v14285_v22 }
 0x5b4   : > { %12742 = vmatmul.mubr.msk.f32.vlgmr.msra.gmra.mrb[36].mxu0 %vm548_vm0, %v14772_v10 }
 0x5b5   : > { %12744 = vmatprep.mubr.msk.f32.mxu0 %vm548_vm0, %v14779_v9  ;;  %13518 = vmatpush3.bf16.msra.mxu0 %v14127_v5 }
 0x5b6   : > { %13482 = vmatpush3.bf16.msra.mxu1 %v14285_v22  ;;  %13520 = vmatprep.subr.bf16.mxu0 %v14129_v6 }
 0x5b7   : > { %13484 = vmatprep.subr.bf16.mxu1 %v14127_v5 }
 0x5b8   : > { %12745 = vmatmul.mubr.msk.f32.gmra.mrb[38].mxu0 %vm548_vm0, %v14790_v11 }
 0x5b9   : > { %12737 = vmatmul.mubr.msk.f32.vlgmr.msra.gmra.mrb[34].mxu1 %vm678_vm8, %v12659_v56  ;;  %12747 = vmatprep.mubr.msk.f32.mxu0 %vm548_vm0, %v14798_v13  ;;  %v3891_v56 = vrot.slane %v11263_v48, 7 }
 0x5ba   : > { %13486 = vmatpush3.bf16.msra.mxu1 %v14127_v5  ;;  %13522 = vmatpush3.bf16.msra.mxu0 %v14129_v6 }
 0x5bb   : > { %13488 = vmatprep.subr.bf16.mxu1 %v14129_v6  ;;  %13524 = vmatprep.subr.bf16.mxu0 %v14148_v21  ;;  %v3892_v63 = vsel %vm527_vm1, %v3891_v56, %v11262_v35  ;;  %v11268_v56 = vld [vmem:[%s14125_s20 + $0x36] sm:$0x1]  ;;  %v3899_v35 = vrot.slane %v11267_v60, 3 }
 0x5bc   : > { %12748 = vmatmul.mubr.msk.f32.gmra.mrb[40].mxu0 %vm548_vm0, %v14809_v14  ;;  %v3894_v48 = vsel %vm530_vm2, %v3893_v50, %v3892_v63 }
 0x5bd   : > { %12750 = vmatprep.mubr.msk.f32.mxu0 %vm548_vm0, %v14816_v15  ;;  %v3896_v55 = vsel %vm533_vm3, %v3895_v7, %v3894_v48 }
 0x5be   : > { %13490 = vmatpush3.bf16.msra.mxu1 %v14129_v6  ;;  %13526 = vmatpush3.bf16.msra.mxu0 %v14148_v21 }
 0x5bf   : > { %13492 = vmatprep.subr.bf16.mxu1 %v14148_v21  ;;  %13528 = vmatprep.subr.bf16.mxu0 %v14221_v41 }
 0x5c0   : > { %12751 = vmatmul.mubr.msk.f32.gmra.mrb[42].mxu0 %vm548_vm0, %v14827_v16 }
 0x5c2   : > { %13494 = vmatpush3.bf16.msra.mxu1 %v14148_v21  ;;  %13530 = vmatpush3.bf16.msra.mxu0 %v14221_v41 }
 0x5c3   : > { %13496 = vmatprep.subr.bf16.mxu1 %v14221_v41  ;;  %13532 = vmatprep.subr.bf16.mxu0 %v14233_v44 }
 0x5c6   : > { %13498 = vmatpush3.bf16.msra.mxu1 %v14221_v41 }
 0x5c7   : > { %13500 = vmatprep.subr.bf16.mxu1 %v14233_v44 }
 0x683   : > { %v12700_v52 = vpop.f32.mrb[34].mxu0 }
 0x684   : > { %v14850_v58 = vadd.f32 %v12700_v52, %v14341_v29  ;;  %v3216_v59 = vpop.f32.mrb[35].mxu0 }
 0x685   : > { %v14854_v43 = vadd.f32 %v3216_v59, %v14338_v27  ;;  %v3897_v59 = vrot.slane %v11266_v4, 4  ;;  %v11269_v4 = vld [vmem:[%s14125_s20 + $0x3e] sm:$0x1] }
 0x686   : > { %v3903_v34 = vrot.slane %v11269_v4, 1  ;;  %v11286_v4 = vld [vmem:[%s14125_s20 + $0x7] sm:$0x1] }
 0x687   : > { %v12743_v38 = vpop.f32.mrb[36].mxu0  ;;  %v3898_v50 = vsel %vm536_vm4, %v3897_v59, %v3896_v55  ;;  %v11287_v55 = vld [vmem:[%s14125_s20 + $0xf] sm:$0x1] }
 0x688   : > { %v3498_v2 = vpop.f32.mrb[37].mxu0  ;;  %v3900_v7 = vsel %vm539_vm5, %v3899_v35, %v3898_v50  ;;  %v11288_v35 = vld [vmem:[%s14125_s20 + $0x17] sm:$0x1] }
 0x68b   : > { %v12746_v52 = vpop.f32.mrb[38].mxu0 }
 0x68c   : > { %v3508_v8 = vpop.f32.mrb[39].mxu0  ;;  %v14863_v28 = vpop.f32.mrb[34].mxu1 }
 0x68d   : > { %12769 = vmatprep.mubr.msk.f32.mxu1 %vm678_vm8, %v3508_v8  ;;  %v14867_v37 = vpop.f32.mrb[35].mxu1  ;;  %v3901_v8 = vrot.slane %v11268_v56, 2 }
 0x68e   : > { %12770 = vmatmul.mubr.msk.f32.vlgmr.msra.gmra.mrb[36].mxu1 %vm678_vm8, %v12746_v52 }
 0x68f   : > { %13502 = vmatpush3.bf16.msra.mxu1 %v14233_v44  ;;  %12788 = vmatprep.mubr.msk.f32.mxu1 %vm678_vm8, %v3498_v2  ;;  %v12749_v36 = vpop.f32.mrb[40].mxu0  ;;  %v3902_v60 = vsel %vm542_vm6, %v3901_v8, %v3900_v7  ;;  %v11289_v8 = vld [vmem:[%s14125_s20 + $0x1f] sm:$0x1] }
 0x690   : > { %13504 = vmatprep.subr.bf16.mxu1 %v14256_v1  ;;  %v3518_v63 = vpop.f32.mrb[41].mxu0  ;;  %v3904_v2 = vsel %vm545_vm7, %v3903_v34, %v3902_v60  ;;  %v14932_v34 = vadd.f32 %v14863_v28, %v14341_v29 }
 0x693   : > { %13506 = vmatpush3.bf16.msra.mxu1 %v14256_v1  ;;  %v12752_v48 = vpop.f32.mrb[42].mxu0 }
 0x694   : > { %13508 = vmatprep.subr.bf16.mxu1 %v14272_v12  ;;  %v3528_v52 = vpop.f32.mrb[43].mxu0 }
 0x695   : > { %12807 = vmatprep.mubr.msk.f32.mxu0 %vm678_vm8, %v3528_v52 }
 0x696   : > { %12808 = vmatmul.mubr.msk.f32.vlgmr.msra.gmra.mrb[44].mxu0 %vm678_vm8, %v12752_v48 }
 0x697   : > { %13510 = vmatpush3.bf16.msra.mxu1 %v14272_v12  ;;  %13534 = vmatpush3.bf16.msra.mxu0 %v14233_v44 }
 0x698   : > { %13512 = vmatprep.subr.bf16.mxu1 %v14285_v22  ;;  %13536 = vmatprep.subr.bf16.mxu0 %v14256_v1 }
 0x699   : > { %12826 = vmatprep.mubr.msk.f32.mxu0 %vm678_vm8, %v3518_v63 }
 0x69b   : > { %13514 = vmatpush3.bf16.msra.mxu1 %v14285_v22  ;;  %13538 = vmatpush3.bf16.msra.mxu0 %v14256_v1 }
 0x69c   : > { %12829 = vmatprep.subr.mxu1 %v3904_v2  ;;  %13540 = vmatprep.subr.bf16.mxu0 %v14272_v12 }
 0x69e   : > { %12789 = vmatmul.mubr.msk.f32.vlgmr.msra.gmra.mrb[36].mxu1 %vm678_vm8, %v12743_v38  ;;  %v14936_v38 = vadd.f32 %v14867_v37, %v14338_v27  ;;  %v4367_v37 = vrot.slane %v11288_v35, 6 }
 0x69f   : > { %12830 = vmatpush3.msra.mxu1 %v3904_v2  ;;  %12831 = vmatprep.mubr.msk.f32.mxu1 %vm548_vm0, %v14669_v62  ;;  %v11290_v2 = vld [vmem:[%s14125_s20 + $0x27] sm:$0x1] }
 0x6a0   : > { %13542 = vmatpush3.bf16.msra.mxu0 %v14272_v12  ;;  %13580 = vmatprep.subr.bf16.mxu1 %v14127_v5 }
 0x6a1   : > { %13544 = vmatprep.subr.bf16.mxu0 %v14285_v22 }
 0x6a2   : > { %12832 = vmatmul.mubr.msk.f32.vlgmr.msra.gmra.mrb[38].mxu1 %vm548_vm0, %v14772_v10 }
 0x6a3   : > { %12834 = vmatprep.mubr.msk.f32.mxu1 %vm548_vm0, %v14779_v9  ;;  %13582 = vmatpush3.bf16.msra.mxu1 %v14127_v5 }
 0x6a4   : > { %13546 = vmatpush3.bf16.msra.mxu0 %v14285_v22  ;;  %13584 = vmatprep.subr.bf16.mxu1 %v14129_v6 }
 0x6a5   : > { %13548 = vmatprep.subr.bf16.mxu0 %v14127_v5 }
 0x6a6   : > { %12835 = vmatmul.mubr.msk.f32.gmra.mrb[40].mxu1 %vm548_vm0, %v14790_v11 }
 0x6a7   : > { %12827 = vmatmul.mubr.msk.f32.vlgmr.msra.gmra.mrb[44].mxu0 %vm678_vm8, %v12749_v36  ;;  %12837 = vmatprep.mubr.msk.f32.mxu1 %vm548_vm0, %v14798_v13  ;;  %v4365_v36 = vrot.slane %v11287_v55, 7  ;;  %v4369_v55 = vrot.slane %v11289_v8, 5 }
 0x6a8   : > { %13550 = vmatpush3.bf16.msra.mxu0 %v14127_v5  ;;  %13586 = vmatpush3.bf16.msra.mxu1 %v14129_v6 }
 0x6a9   : > { %13552 = vmatprep.subr.bf16.mxu0 %v14129_v6  ;;  %13588 = vmatprep.subr.bf16.mxu1 %v14148_v21  ;;  %v4366_v52 = vsel %vm527_vm1, %v4365_v36, %v11286_v4  ;;  %v11292_v36 = vld [vmem:[%s14125_s20 + $0x37] sm:$0x1]  ;;  %v4373_v4 = vrot.slane %v11291_v47, 3 }
 0x6aa   : > { %12838 = vmatmul.mubr.msk.f32.gmra.mrb[42].mxu1 %vm548_vm0, %v14809_v14 }
 0x6ab   : > { %12840 = vmatprep.mubr.msk.f32.mxu1 %vm548_vm0, %v14816_v15 }
 0x6ac   : > { %13554 = vmatpush3.bf16.msra.mxu0 %v14129_v6  ;;  %13590 = vmatpush3.bf16.msra.mxu1 %v14148_v21 }
 0x6ad   : > { %13556 = vmatprep.subr.bf16.mxu0 %v14148_v21  ;;  %13592 = vmatprep.subr.bf16.mxu1 %v14221_v41 }
 0x6ae   : > { %12841 = vmatmul.mubr.msk.f32.gmra.mrb[44].mxu1 %vm548_vm0, %v14827_v16 }
 0x6b0   : > { %13558 = vmatpush3.bf16.msra.mxu0 %v14148_v21  ;;  %13594 = vmatpush3.bf16.msra.mxu1 %v14221_v41 }
 0x6b1   : > { %13560 = vmatprep.subr.bf16.mxu0 %v14221_v41  ;;  %13596 = vmatprep.subr.bf16.mxu1 %v14233_v44 }
 0x6b4   : > { %13562 = vmatpush3.bf16.msra.mxu0 %v14221_v41 }
 0x6b5   : > { %13564 = vmatprep.subr.bf16.mxu0 %v14233_v44 }
 0x771   : > { %v12790_v56 = vpop.f32.mrb[36].mxu1 }
 0x772   : > { %v14943_v50 = vadd.f32 %v12790_v56, %v14341_v29  ;;  %v3690_v63 = vpop.f32.mrb[37].mxu1  ;;  %v4368_v56 = vsel %vm530_vm2, %v4367_v37, %v4366_v52 }
 0x773   : > { %v14947_v28 = vadd.f32 %v3690_v63, %v14338_v27  ;;  %v4371_v63 = vrot.slane %v11290_v2, 4  ;;  %v4370_v35 = vsel %vm533_vm3, %v4369_v55, %v4368_v56  ;;  %v11293_v2 = vld [vmem:[%s14125_s20 + $0x3f] sm:$0x1] }
 0x774   : > { %v4377_v19 = vrot.slane %v11293_v2, 1 }
 0x775   : > { %19500 = vst [vmem:[#allocation3_spill] sm:$0xff] %v14947_v28  ;;  %v12833_v48 = vpop.f32.mrb[38].mxu1  ;;  %v4372_v37 = vsel %vm536_vm4, %v4371_v63, %v4370_v35  ;;  %v8361_v35 = vld [vmem:[%s19390_s9] sm:$0xff] }
 0x776   : > { %v3972_v60 = vpop.f32.mrb[39].mxu1  ;;  %v4374_v55 = vsel %vm539_vm5, %v4373_v4, %v4372_v37  ;;  %8365 = vperm.xlu0 %13927, %v8361_v35   ;;  %v11314_v35 = vld [vmem:[%s14125_s20 + $0x27] sm:$0x1] }
 0x779   : > { %v12836_v59 = vpop.f32.mrb[40].mxu1 }
 0x77a   : > { %v3982_v51 = vpop.f32.mrb[41].mxu1  ;;  %v14956_v40 = vpop.f32.mrb[44].mxu0 }
 0x77b   : > { %12859 = vmatprep.mubr.msk.f32.mxu0 %vm678_vm8, %v3982_v51  ;;  %v14960_v7 = vpop.f32.mrb[45].mxu0  ;;  %v4375_v51 = vrot.slane %v11292_v36, 2  ;;  %v11311_v36 = vld [vmem:[%s14125_s20 + $0xf] sm:$0x1] }
 0x77c   : > { %12860 = vmatmul.mubr.msk.f32.vlgmr.msra.gmra.mrb[46].mxu0 %vm678_vm8, %v12836_v59  ;;  %v4839_v37 = vrot.slane %v11311_v36, 7 }
 0x77d   : > { %13566 = vmatpush3.bf16.msra.mxu0 %v14233_v44  ;;  %12878 = vmatprep.mubr.msk.f32.mxu0 %vm678_vm8, %v3972_v60  ;;  %v12839_v8 = vpop.f32.mrb[42].mxu1  ;;  %v4376_v47 = vsel %vm542_vm6, %v4375_v51, %v4374_v55  ;;  %v11313_v51 = vld [vmem:[%s14125_s20 + $0x1f] sm:$0x1] }
 0x77e   : > { %13568 = vmatprep.subr.bf16.mxu0 %v14256_v1  ;;  %v3992_v52 = vpop.f32.mrb[43].mxu1  ;;  %v4378_v60 = vsel %vm545_vm7, %v4377_v19, %v4376_v47  ;;  %v15025_v19 = vadd.f32 %v14956_v40, %v14341_v29  ;;  %v4843_v36 = vrot.slane %v11313_v51, 5 }
 0x781   : > { %13570 = vmatpush3.bf16.msra.mxu0 %v14256_v1  ;;  %v12842_v56 = vpop.f32.mrb[44].mxu1 }
 0x782   : > { %13572 = vmatprep.subr.bf16.mxu0 %v14272_v12  ;;  %v4002_v59 = vpop.f32.mrb[45].mxu1 }
 0x783   : > { %12897 = vmatprep.mubr.msk.f32.mxu1 %vm678_vm8, %v4002_v59 }
 0x784   : > { %12898 = vmatmul.mubr.msk.f32.vlgmr.msra.gmra.mrb[46].mxu1 %vm678_vm8, %v12842_v56 }
 0x785   : > { %13574 = vmatpush3.bf16.msra.mxu0 %v14272_v12  ;;  %13598 = vmatpush3.bf16.msra.mxu1 %v14233_v44 }
 0x786   : > { %13576 = vmatprep.subr.bf16.mxu0 %v14285_v22  ;;  %13600 = vmatprep.subr.bf16.mxu1 %v14256_v1 }
 0x787   : > { %12916 = vmatprep.mubr.msk.f32.mxu1 %vm678_vm8, %v3992_v52 }
 0x789   : > { %13578 = vmatpush3.bf16.msra.mxu0 %v14285_v22  ;;  %13602 = vmatpush3.bf16.msra.mxu1 %v14256_v1 }
 0x78a   : > { %12919 = vmatprep.subr.mxu0 %v4378_v60  ;;  %13604 = vmatprep.subr.bf16.mxu1 %v14272_v12 }
 0x78c   : > { %12879 = vmatmul.mubr.msk.f32.vlgmr.msra.gmra.mrb[46].mxu0 %vm678_vm8, %v12833_v48  ;;  %v15029_v48 = vadd.f32 %v14960_v7, %v14338_v27  ;;  %v11310_v7 = vld [vmem:[%s14125_s20 + $0x7] sm:$0x1] }
 0x78d   : > { %12920 = vmatpush3.msra.mxu0 %v4378_v60  ;;  %12921 = vmatprep.mubr.msk.f32.mxu0 %vm548_vm0, %v14669_v62  ;;  %v4840_v47 = vsel %vm527_vm1, %v4839_v37, %v11310_v7  ;;  %v11316_v37 = vld [vmem:[%s14125_s20 + $0x37] sm:$0x1]  ;;  %v4847_v7 = vrot.slane %v11315_v24, 3 }
 0x78e   : > { %13606 = vmatpush3.bf16.msra.mxu1 %v14272_v12  ;;  %13644 = vmatprep.subr.bf16.mxu0 %v14127_v5 }
 0x78f   : > { %13608 = vmatprep.subr.bf16.mxu1 %v14285_v22 }
 0x790   : > { %12922 = vmatmul.mubr.msk.f32.vlgmr.msra.gmra.mrb[48].mxu0 %vm548_vm0, %v14772_v10 }
 0x791   : > { %12924 = vmatprep.mubr.msk.f32.mxu0 %vm548_vm0, %v14779_v9  ;;  %13646 = vmatpush3.bf16.msra.mxu0 %v14127_v5 }
 0x792   : > { %13610 = vmatpush3.bf16.msra.mxu1 %v14285_v22  ;;  %13648 = vmatprep.subr.bf16.mxu0 %v14129_v6 }
 0x793   : > { %13612 = vmatprep.subr.bf16.mxu1 %v14127_v5 }
 0x794   : > { %12925 = vmatmul.mubr.msk.f32.gmra.mrb[50].mxu0 %vm548_vm0, %v14790_v11 }
 0x795   : > { %12927 = vmatprep.mubr.msk.f32.mxu0 %vm548_vm0, %v14798_v13  ;;  %12917 = vmatmul.mubr.msk.f32.vlgmr.msra.gmra.mrb[46].mxu1 %vm678_vm8, %v12839_v8  ;;  %v11312_v8 = vld [vmem:[%s14125_s20 + $0x17] sm:$0x1] }
 0x796   : > { %13614 = vmatpush3.bf16.msra.mxu1 %v14127_v5  ;;  %13650 = vmatpush3.bf16.msra.mxu0 %v14129_v6  ;;  %v4841_v55 = vrot.slane %v11312_v8, 6 }
 0x797   : > { %13616 = vmatprep.subr.bf16.mxu1 %v14129_v6  ;;  %13652 = vmatprep.subr.bf16.mxu0 %v14148_v21 }
 0x798   : > { %12928 = vmatmul.mubr.msk.f32.gmra.mrb[52].mxu0 %vm548_vm0, %v14809_v14 }
 0x799   : > { %12930 = vmatprep.mubr.msk.f32.mxu0 %vm548_vm0, %v14816_v15 }
 0x79a   : > { %13618 = vmatpush3.bf16.msra.mxu1 %v14129_v6  ;;  %13654 = vmatpush3.bf16.msra.mxu0 %v14148_v21 }
 0x79b   : > { %13620 = vmatprep.subr.bf16.mxu1 %v14148_v21  ;;  %13656 = vmatprep.subr.bf16.mxu0 %v14221_v41 }
 0x79c   : > { %12931 = vmatmul.mubr.msk.f32.gmra.mrb[54].mxu0 %vm548_vm0, %v14827_v16 }
 0x79e   : > { %13622 = vmatpush3.bf16.msra.mxu1 %v14148_v21  ;;  %13658 = vmatpush3.bf16.msra.mxu0 %v14221_v41 }
 0x79f   : > { %13624 = vmatprep.subr.bf16.mxu1 %v14221_v41  ;;  %13660 = vmatprep.subr.bf16.mxu0 %v14233_v44 }
 0x7a2   : > { %13626 = vmatpush3.bf16.msra.mxu1 %v14221_v41 }
 0x7a3   : > { %13628 = vmatprep.subr.bf16.mxu1 %v14233_v44 }
 0x85f   : > { %v12880_v4 = vpop.f32.mrb[46].mxu0 }
 0x860   : > { %v15039_v40 = vadd.f32 %v12880_v4, %v14341_v29  ;;  %v4164_v52 = vpop.f32.mrb[47].mxu0  ;;  %v4842_v4 = vsel %vm530_vm2, %v4841_v55, %v4840_v47 }
 0x861   : > { %v15043_v2 = vadd.f32 %v4164_v52, %v14338_v27  ;;  %v4845_v52 = vrot.slane %v11314_v35, 4  ;;  %v4844_v8 = vsel %vm533_vm3, %v4843_v36, %v4842_v4  ;;  %v11317_v35 = vld [vmem:[%s14125_s20 + $0x3f] sm:$0x1] }
 0x863   : > { %19501 = vst [vmem:[#allocation4_spill] sm:$0xff] %v15043_v2  ;;  %v12923_v59 = vpop.f32.mrb[48].mxu0  ;;  %v4846_v55 = vsel %vm536_vm4, %v4845_v52, %v4844_v8  ;;  %v4851_v2 = vrot.slane %v11317_v35, 1 }
 0x864   : > { %v4446_v60 = vpop.f32.mrb[49].mxu0  ;;  %v4848_v36 = vsel %vm539_vm5, %v4847_v7, %v4846_v55  ;;  %v5360_v55 = vld [vmem:[%s19383_s2 + $0x8] sm:$0xff] }
 0x865   : > { %v5364_v35 = vmul.f32 0.0, %v5360_v55  ;;  %v5299_v55 = vld [vmem:[%s15184_s30 + $0x20] sm:$0xff] }
 0x867   : > { %v12926_v63 = vpop.f32.mrb[50].mxu0 }
 0x868   : > { %v4456_v53 = vpop.f32.mrb[51].mxu0  ;;  %v15052_v28 = vpop.f32.mrb[46].mxu1 }
 0x869   : > { %12949 = vmatprep.mubr.msk.f32.mxu1 %vm678_vm8, %v4456_v53  ;;  %v15056_v56 = vpop.f32.mrb[47].mxu1  ;;  %v4849_v53 = vrot.slane %v11316_v37, 2 }
 0x86a   : > { %12950 = vmatmul.mubr.msk.f32.vlgmr.msra.gmra.mrb[48].mxu1 %vm678_vm8, %v12926_v63 }
 0x86b   : > { %13630 = vmatpush3.bf16.msra.mxu1 %v14233_v44  ;;  %12968 = vmatprep.mubr.msk.f32.mxu1 %vm678_vm8, %v4446_v60  ;;  %v12929_v51 = vpop.f32.mrb[52].mxu0  ;;  %v4850_v24 = vsel %vm542_vm6, %v4849_v53, %v4848_v36  ;;  %v5359_v36 = vld [vmem:[%s19383_s2] sm:$0xff] }
 0x86c   : > { %13632 = vmatprep.subr.bf16.mxu1 %v14256_v1  ;;  %v4466_v47 = vpop.f32.mrb[53].mxu0  ;;  %v4852_v60 = vsel %vm545_vm7, %v4851_v2, %v4850_v24  ;;  %v19502_v24 = vpack.c.bf16 %v14429_v20, %v14431_v23  ;;  %v19396_v23 = vmov 0.0  }
 0x86f   : > { %13634 = vmatpush3.bf16.msra.mxu1 %v14256_v1  ;;  %v12932_v4 = vpop.f32.mrb[54].mxu0 }
 0x870   : > { %13636 = vmatprep.subr.bf16.mxu1 %v14272_v12  ;;  %v4476_v63 = vpop.f32.mrb[55].mxu0 }
 0x871   : > { %12987 = vmatprep.mubr.msk.f32.mxu0 %vm678_vm8, %v4476_v63 }
 0x872   : > { %12988 = vmatmul.mubr.msk.f32.vlgmr.msra.gmra.mrb[56].mxu0 %vm678_vm8, %v12932_v4  ;;  %v5361_v4 = vld [vmem:[%s19383_s2 + $0x10] sm:$0xff] }
 0x873   : > { %13638 = vmatpush3.bf16.msra.mxu1 %v14272_v12  ;;  %13662 = vmatpush3.bf16.msra.mxu0 %v14233_v44  ;;  %v5365_v63 = vmul.f32 0.0, %v5361_v4  ;;  %v15349_v4 = vld [vmem:[%s19389_s8 + $0x58] sm:$0xff] }
 0x874   : > { %13640 = vmatprep.subr.bf16.mxu1 %v14285_v22  ;;  %13664 = vmatprep.subr.bf16.mxu0 %v14256_v1 }
 0x875   : > { %13006 = vmatprep.mubr.msk.f32.mxu0 %vm678_vm8, %v4466_v47  ;;  %v5362_v47 = vld [vmem:[%s19383_s2 + $0x18] sm:$0xff] }
 0x876   : > { %v5366_v53 = vmul.f32 0.0, %v5362_v47  ;;  %v5315_v47 = vld [vmem:[%s15184_s30 + $0xa0] sm:$0xff] }
 0x877   : > { %13642 = vmatpush3.bf16.msra.mxu1 %v14285_v22  ;;  %13666 = vmatpush3.bf16.msra.mxu0 %v14256_v1 }
 0x878   : > { %13009 = vmatprep.subr.mxu1 %v4852_v60  ;;  %13668 = vmatprep.subr.bf16.mxu0 %v14272_v12 }
 0x87a   : > { %12969 = vmatmul.mubr.msk.f32.vlgmr.msra.gmra.mrb[48].mxu1 %vm678_vm8, %v12923_v59 }
 0x87b   : > { %13010 = vmatpush3.msra.mxu1 %v4852_v60  ;;  %13011 = vmatprep.mubr.msk.f32.mxu1 %vm548_vm0, %v14669_v62  ;;  %v13743_v60 = vpack.c.bf16 %v5366_v53, %v5364_v35  ;;  %v19510_v35 = vpack.c.bf16 %v14624_v54, %v14628_v57  ;;  %v15268_v54 = vld [vmem:[%s19389_s8 + $0x20] sm:$0xff]  ;;  %v19511_v57 = vpack.c.bf16 %v14932_v34, %v14936_v38  ;;  %v15305_v34 = vld [vmem:[%s19389_s8 + $0x38] sm:$0xff]  ;;  %v15327_v53 = vld [vmem:[%s19389_s8 + $0x48] sm:$0xff] }
 0x87c   : > { %13670 = vmatpush3.bf16.msra.mxu0 %v14272_v12  ;;  %13708 = vmatprep.subr.bf16.mxu1 %v14127_v5  ;;  %v15316_v38 = vld [vmem:[%s19389_s8 + $0x40] sm:$0xff] }
 0x87d   : > { %13672 = vmatprep.subr.bf16.mxu0 %v14285_v22 }
 0x87e   : > { %13012 = vmatmul.mubr.msk.f32.vlgmr.msra.gmra.mrb[50].mxu1 %vm548_vm0, %v14772_v10 }
 0x87f   : > { %13014 = vmatprep.mubr.msk.f32.mxu1 %vm548_vm0, %v14779_v9  ;;  %13710 = vmatpush3.bf16.msra.mxu1 %v14127_v5 }
 0x880   : > { %13674 = vmatpush3.bf16.msra.mxu0 %v14285_v22  ;;  %13712 = vmatprep.subr.bf16.mxu1 %v14129_v6 }
 0x881   : > { %13676 = vmatprep.subr.bf16.mxu0 %v14127_v5 }
 0x882   : > { %13015 = vmatmul.mubr.msk.f32.gmra.mrb[52].mxu1 %vm548_vm0, %v14790_v11 }
 0x883   : > { %13017 = vmatprep.mubr.msk.f32.mxu1 %vm548_vm0, %v14798_v13  ;;  %13007 = vmatmul.mubr.msk.f32.vlgmr.msra.gmra.mrb[56].mxu0 %vm678_vm8, %v12929_v51 }
 0x884   : > { %13678 = vmatpush3.bf16.msra.mxu0 %v14127_v5  ;;  %13714 = vmatpush3.bf16.msra.mxu1 %v14129_v6  ;;  %v15121_v5 = vadd.f32 %v15052_v28, %v14341_v29 }
 0x885   : > { %13680 = vmatprep.subr.bf16.mxu0 %v14129_v6  ;;  %13716 = vmatprep.subr.bf16.mxu1 %v14148_v21 }
 0x886   : > { %13018 = vmatmul.mubr.msk.f32.gmra.mrb[54].mxu1 %vm548_vm0, %v14809_v14 }
 0x887   : > { %13020 = vmatprep.mubr.msk.f32.mxu1 %vm548_vm0, %v14816_v15 }
 0x888   : > { %13682 = vmatpush3.bf16.msra.mxu0 %v14129_v6  ;;  %13718 = vmatpush3.bf16.msra.mxu1 %v14148_v21  ;;  %v15125_v6 = vadd.f32 %v15056_v56, %v14338_v27 }
 0x889   : > { %13684 = vmatprep.subr.bf16.mxu0 %v14148_v21  ;;  %13720 = vmatprep.subr.bf16.mxu1 %v14221_v41 }
 0x88a   : > { %13021 = vmatmul.mubr.msk.f32.gmra.mrb[56].mxu1 %vm548_vm0, %v14827_v16 }
 0x88c   : > { %13686 = vmatpush3.bf16.msra.mxu0 %v14148_v21  ;;  %13722 = vmatpush3.bf16.msra.mxu1 %v14221_v41  ;;  %v13795_v21 = vpack.c.bf16 %v15121_v5, %v15125_v6  ;;  %v5305_v5 = vld [vmem:[%s15184_s30 + $0x50] sm:$0xff] }
 0x88d   : > { %13688 = vmatprep.subr.bf16.mxu0 %v14221_v41  ;;  %13724 = vmatprep.subr.bf16.mxu1 %v14233_v44  ;;  %v5321_v6 = vld [vmem:[%s15184_s30 + $0xd0] sm:$0xff] }
 0x890   : > { %13690 = vmatpush3.bf16.msra.mxu0 %v14221_v41 }
 0x891   : > { %13692 = vmatprep.subr.bf16.mxu0 %v14233_v44 }
 0x94d   : > { %v12970_v62 = vpop.f32.mrb[48].mxu1 }
 0x94e   : > { %v15130_v10 = vadd.f32 %v12970_v62, %v14341_v29  ;;  %v4638_v9 = vpop.f32.mrb[49].mxu1  ;;  %v5296_v62 = vld [vmem:[%s15184_s30 + $0x8] sm:$0xff] }
 0x94f   : > { %v15133_v41 = vadd.f32 %v4638_v9, %v14338_v27  ;;  %v5312_v9 = vld [vmem:[%s15184_s30 + $0x88] sm:$0xff] }
 0x951   : > { %v13805_v11 = vpack.c.bf16 %v15130_v10, %v15133_v41  ;;  %v13013_v13 = vpop.f32.mrb[50].mxu1  ;;  %v5373_v10 = vld [vmem:[%s19384_s3 + $0x10] sm:$0xff] }
 0x952   : > { %v4920_v14 = vpop.f32.mrb[51].mxu1 }
 0x955   : > { %v13016_v15 = vpop.f32.mrb[52].mxu1 }
 0x956   : > { %v4930_v16 = vpop.f32.mrb[53].mxu1  ;;  %v13008_v28 = vpop.f32.mrb[56].mxu0 }
 0x957   : > { %13039 = vmatprep.mubr.msk.f32.mxu0 %vm678_vm8, %v4930_v16  ;;  %v15139_v2 = vadd.f32 %v13008_v28, %v14341_v29  ;;  %v4804_v56 = vpop.f32.mrb[57].mxu0  ;;  %v13751_v16 = vpack.c.bf16 %v5312_v9, %v5296_v62  ;;  %v5311_v28 = vld [vmem:[%s15184_s30 + $0x80] sm:$0xff]  ;;  %v5302_v62 = vld [vmem:[%s15184_s30 + $0x38] sm:$0xff] }
 0x958   : > { %13040 = vmatmul.mubr.msk.f32.vlgmr.msra.gmra.mrb[58].mxu0 %vm678_vm8, %v13016_v15  ;;  %v15143_v59 = vadd.f32 %v4804_v56, %v14338_v27  ;;  %v19505_v15 = vpack.c.bf16 %v14613_v0, %v14617_v30  ;;  %v5313_v56 = vld [vmem:[%s15184_s30 + $0x90] sm:$0xff]  ;;  %v15224_v0 = vld [vmem:[%s19389_s8 + $0x8] sm:$0xff]  ;;  %v5318_v9 = vld [vmem:[%s15184_s30 + $0xb8] sm:$0xff] }
 0x959   : > { %13694 = vmatpush3.bf16.msra.mxu0 %v14233_v44  ;;  %v13019_v52 = vpop.f32.mrb[54].mxu1  ;;  %13058 = vmatprep.mubr.msk.f32.mxu0 %vm678_vm8, %v4920_v14  ;;  %v5314_v14 = vld [vmem:[%s15184_s30 + $0x98] sm:$0xff] }
 0x95a   : > { %v4940_v8 = vpop.f32.mrb[55].mxu1  ;;  %13696 = vmatprep.subr.bf16.mxu0 %v14256_v1  ;;  %v13803_v37 = vpack.c.bf16 %v15139_v2, %v15143_v59 }
 0x95d   : > { %13698 = vmatpush3.bf16.msra.mxu0 %v14256_v1  ;;  %v13022_v7 = vpop.f32.mrb[56].mxu1 }
 0x95e   : > { %v4950_v51 = vpop.f32.mrb[57].mxu1  ;;  %13700 = vmatprep.subr.bf16.mxu0 %v14272_v12 }
 0x95f   : > { %13077 = vmatprep.mubr.msk.f32.mxu1 %vm678_vm8, %v4950_v51 }
 0x960   : > { %13078 = vmatmul.mubr.msk.f32.vlgmr.msra.gmra.mrb[58].mxu1 %vm678_vm8, %v13022_v7  ;;  %v19509_v7 = vpack.c.bf16 %v14839_v25, %v14843_v26  ;;  %v15283_v25 = vld [vmem:[%s19389_s8 + $0x28] sm:$0xff]  ;;  %v15294_v26 = vld [vmem:[%s19389_s8 + $0x30] sm:$0xff] }
 0x961   : > { %13702 = vmatpush3.bf16.msra.mxu0 %v14272_v12  ;;  %13726 = vmatpush3.bf16.msra.mxu1 %v14233_v44  ;;  %v5363_v44 = vmul.f32 0.0, %v5359_v36  ;;  %v15338_v36 = vld [vmem:[%s19389_s8 + $0x50] sm:$0xff] }
 0x962   : > { %13096 = vmatprep.mubr.msk.f32.mxu1 %vm678_vm8, %v4940_v8  ;;  %13704 = vmatprep.subr.bf16.mxu0 %v14285_v22 }
 0x963   : > { %13728 = vmatprep.subr.bf16.mxu1 %v14256_v1  ;;  %v13745_v20 = vpack.c.bf16 %v5365_v63, %v5363_v44  ;;  %v15360_v44 = vld [vmem:[%s19389_s8 + $0x60] sm:$0xff]  ;;  %v15371_v63 = vld [vmem:[%s19389_s8 + $0x68] sm:$0xff] }
 0x965   : > { %13706 = vmatpush3.bf16.msra.mxu0 %v14285_v22  ;;  %13730 = vmatpush3.bf16.msra.mxu1 %v14256_v1  ;;  %v19503_v1 = vpack.c.bf16 %v14347_v46, %v14350_v49  ;;  %v5295_v46 = vld [vmem:[%s15184_s30] sm:$0xff]  ;;  %v19504_v49 = vpack.c.bf16 %v14520_v17, %v14524_v18  ;;  %v19506_v17 = vpack.c.bf16 %v14438_v31, %v14442_v42  ;;  %v5300_v31 = vld [vmem:[%s15184_s30 + $0x28] sm:$0xff] }
 0x966   : > { %13740 = vmatprep.subr.bf16.mxu0 %v19502_v24  ;;  %13732 = vmatprep.subr.bf16.mxu1 %v14272_v12  ;;  %v19507_v18 = vpack.c.bf16 %v14531_v39, %v14535_v45  ;;  %v13753_v30 = vpack.c.bf16 %v5311_v28, %v5295_v46  ;;  %v5316_v42 = vld [vmem:[%s15184_s30 + $0xa8] sm:$0xff]  ;;  %v15235_v39 = vld [vmem:[%s19389_s8 + $0x10] sm:$0xff]  ;;  %v19508_v45 = vpack.c.bf16 %v14711_v32, %v14715_v33  ;;  %v15257_v32 = vld [vmem:[%s19389_s8 + $0x18] sm:$0xff] }
 0x967   : > { %v13767_v51 = vpack.c.bf16 %v5316_v42, %v5300_v31  ;;  %v13769_v33 = vpack.c.bf16 %v5315_v47, %v5299_v55  ;;  %v15382_v24 = vld [vmem:[%s19389_s8 + $0x70] sm:$0xff]  ;;  %v5320_v28 = vld [vmem:[%s15184_s30 + $0xc8] sm:$0xff]  ;;  %v5307_v42 = vld [vmem:[%s15184_s30 + $0x60] sm:$0xff] }
 0x968   : > { %13059 = vmatmul.mubr.msk.f32.vlgmr.msra.gmra.mrb[58].mxu0 %vm678_vm8, %v13013_v13  ;;  %v5298_v13 = vld [vmem:[%s15184_s30 + $0x18] sm:$0xff]  ;;  %v5317_v46 = vld [vmem:[%s15184_s30 + $0xb0] sm:$0xff]  ;;  %v5324_v31 = vld [vmem:[%s15184_s30 + $0xe8] sm:$0xff] }
 0x969   : > { %13734 = vmatpush3.bf16.msra.mxu1 %v14272_v12  ;;  %13742 = vmatpush1.bf16.msra.mxu0 %v19503_v1  ;;  %v15200_v12 = vld [vmem:[%s19389_s8] sm:$0xff]  ;;  %v13759_v8 = vpack.c.bf16 %v5314_v14, %v5298_v13  ;;  %v13775_v13 = vpack.c.bf16 %v5318_v9, %v5302_v62  ;;  %v5301_v14 = vld [vmem:[%s15184_s30 + $0x30] sm:$0xff]  ;;  %v5310_v9 = vld [vmem:[%s15184_s30 + $0x78] sm:$0xff] }
 0x96a   : > { %13736 = vmatprep.subr.bf16.mxu1 %v14285_v22  ;;  %13744 = vmatprep.subr.bf16.mxu0 %v13743_v60  ;;  %v15393_v60 = vld [vmem:[%s19389_s8 + $0x78] sm:$0xff]  ;;  %v15404_v1 = vld [vmem:[%s19389_s8 + $0x80] sm:$0xff] }
 0x96b   : > { %5681 = vmatprep.mubr.f32.mxu0 %v19396_v23 }
 0x96d   : > { %13738 = vmatpush3.bf16.msra.mxu1 %v14285_v22  ;;  %13746 = vmatpush1.bf16.msra.mxu0 %v13745_v20  ;;  %v5297_v22 = vld [vmem:[%s15184_s30 + $0x10] sm:$0xff]  ;;  %v15415_v20 = vld [vmem:[%s19389_s8 + $0x88] sm:$0xff] }
 0x96e   : > { %13748 = vmatprep.subr.bf16.mxu1 %v19504_v49  ;;  %13756 = vmatprep.subr.bf16.mxu0 %v19505_v15  ;;  %v19512_v49 = vpack.c.bf16 %v14722_v61, %v14726_v3  ;;  %v13777_v15 = vpack.c.bf16 %v5317_v46, %v5301_v14  ;;  %v19513_v61 = vpack.c.bf16 %v15025_v19, %v15029_v48  ;;  %v5322_v19 = vld [vmem:[%s15184_s30 + $0xd8] sm:$0xff] }
 0x970   : > { %13097 = vmatmul.mubr.msk.f32.vlgmr.msra.gmra.mrb[58].mxu1 %vm678_vm8, %v13019_v52  ;;  %11344 = vmatmul.mubr.msk.f32.vlgmr.msra.gmra.mrb[60].mxu0 %vm5562_vm9, %v15200_v12  ;;  %v13761_v52 = vpack.c.bf16 %v5313_v56, %v5297_v22  ;;  %v5303_v22 = vld [vmem:[%s15184_s30 + $0x40] sm:$0xff] }
 0x971   : > { %13750 = vmatpush1.bf16.msra.mxu1 %v19506_v17  ;;  %13758 = vmatpush1.bf16.msra.mxu0 %v19507_v18  ;;  %v5319_v56 = vld [vmem:[%s15184_s30 + $0xc0] sm:$0xff] }
 0x972   : > { %5687 = vmatprep.mubr.f32.mxu0 %v19396_v23  ;;  %13752 = vmatprep.subr.bf16.mxu1 %v13751_v16  ;;  %v5304_v16 = vld [vmem:[%s15184_s30 + $0x48] sm:$0xff]  ;;  %v13785_v17 = vpack.c.bf16 %v5319_v56, %v5303_v22  ;;  %v5325_v22 = vld [vmem:[%s15184_s30 + $0xf0] sm:$0xff] }
 0x973   : > { %13760 = vmatprep.subr.bf16.mxu0 %v13759_v8  ;;  %5854 = vmatprep.mubr.f32.mxu1 %v19396_v23  ;;  %v13783_v3 = vpack.c.bf16 %v5320_v28, %v5304_v16  ;;  %v19514_v8 = vpack.c.bf16 %v14850_v58, %v14854_v43  ;;  %v8362_v58 = vld [vmem:[%s19390_s9 + $0x8] sm:$0xff]  ;;  %v5306_v43 = vld [vmem:[%s15184_s30 + $0x58] sm:$0xff] }
 0x974   : > { %11345 = vmatmul.mubr.msk.f32.gmra.mrb[62].mxu0 %vm5562_vm9, %v15224_v0  ;;  %8370 = vperm.xlu1 %13928, %v8362_v58   ;;  %v13791_v48 = vpack.c.bf16 %v5322_v19, %v5306_v43  ;;  %v5372_v56 = vld [vmem:[%s19384_s3 + $0x8] sm:$0xff] }
 0x975   : > { %13754 = vmatpush1.bf16.msra.mxu1 %v13753_v30  ;;  %13762 = vmatpush1.bf16.msra.mxu0 %v13761_v52  ;;  %v13793_v30 = vpack.c.bf16 %v5321_v6, %v5305_v5  ;;  %v5308_v52 = vld [vmem:[%s15184_s30 + $0x68] sm:$0xff]  ;;  %v5376_v43 = vmul.f32 0.0, %v5372_v56  ;;  %v5371_v6 = vld [vmem:[%s19384_s3] sm:$0xff] }
 0x976   : > { %13764 = vmatprep.subr.bf16.mxu1 %v19508_v45  ;;  %13772 = vmatprep.subr.bf16.mxu0 %v19509_v7  ;;  %v5323_v45 = vld [vmem:[%s15184_s30 + $0xe0] sm:$0xff]  ;;  %v19517_v7 = vld [vmem:[#allocation4_spill] sm:$0xff] }
 0x977   : > { %5693 = vmatprep.mubr.f32.mxu0 %v19396_v23  ;;  %v13801_v2 = vpack.c.bf16 %v5323_v45, %v5307_v42 }
 0x978   : > { %11346 = vmatmul.mubr.msk.f32.gmra.mrb[64].mxu0 %vm5562_vm9, %v15235_v39  ;;  %11362 = vmatmul.mubr.msk.f32.vlgmr.msra.gmra.mrb[60].mxu1 %vm5562_vm9, %v15200_v12 }
 0x979   : > { %13766 = vmatpush1.bf16.msra.mxu1 %v19510_v35  ;;  %5699 = vmatprep.mubr.f32.mxu0 %v19396_v23 }
 0x97a   : > { %5860 = vmatprep.mubr.f32.mxu1 %v19396_v23  ;;  %13768 = vmatprep.subr.bf16.mxu1 %v13767_v51  ;;  %v19518_v51 = vpack.c.bf16 %v15039_v40, %v19517_v7 }
 0x97c   : > { %11347 = vmatmul.mubr.msk.f32.gmra.mrb[66].mxu0 %vm5562_vm9, %v15257_v32  ;;  %11363 = vmatmul.mubr.msk.f32.gmra.mrb[62].mxu1 %vm5562_vm9, %v15224_v0 }
 0x97d   : > { %13770 = vmatpush1.bf16.msra.mxu1 %v13769_v33  ;;  %5705 = vmatprep.mubr.f32.mxu0 %v19396_v23 }
 0x97e   : > { %13780 = vmatprep.subr.bf16.mxu1 %v19511_v57  ;;  %5866 = vmatprep.mubr.f32.mxu1 %v19396_v23 }
 0x980   : > { %11348 = vmatmul.mubr.msk.f32.gmra.mrb[68].mxu0 %vm5562_vm9, %v15268_v54  ;;  %11364 = vmatmul.mubr.msk.f32.gmra.mrb[64].mxu1 %vm5562_vm9, %v15235_v39 }
 0x981   : > { %5711 = vmatprep.mubr.f32.mxu0 %v19396_v23  ;;  %5872 = vmatprep.mubr.f32.mxu1 %v19396_v23 }
 0x984   : > { %11349 = vmatmul.mubr.msk.f32.gmra.mrb[70].mxu0 %vm5562_vm9, %v15283_v25  ;;  %11365 = vmatmul.mubr.msk.f32.gmra.mrb[66].mxu1 %vm5562_vm9, %v15257_v32 }
 0x985   : > { %5717 = vmatprep.mubr.f32.mxu0 %v19396_v23  ;;  %5878 = vmatprep.mubr.f32.mxu1 %v19396_v23 }
 0x988   : > { %11350 = vmatmul.mubr.msk.f32.gmra.mrb[72].mxu0 %vm5562_vm9, %v15294_v26  ;;  %11366 = vmatmul.mubr.msk.f32.gmra.mrb[68].mxu1 %vm5562_vm9, %v15268_v54 }
 0x989   : > { %5723 = vmatprep.mubr.f32.mxu0 %v19396_v23  ;;  %5884 = vmatprep.mubr.f32.mxu1 %v19396_v23 }
 0x98c   : > { %11351 = vmatmul.mubr.msk.f32.gmra.mrb[74].mxu0 %vm5562_vm9, %v15305_v34  ;;  %11367 = vmatmul.mubr.msk.f32.gmra.mrb[70].mxu1 %vm5562_vm9, %v15283_v25 }
 0x98d   : > { %5729 = vmatprep.mubr.f32.mxu0 %v19396_v23  ;;  %5890 = vmatprep.mubr.f32.mxu1 %v19396_v23 }
 0x990   : > { %11352 = vmatmul.mubr.msk.f32.gmra.mrb[76].mxu0 %vm5562_vm9, %v15316_v38  ;;  %11368 = vmatmul.mubr.msk.f32.gmra.mrb[72].mxu1 %vm5562_vm9, %v15294_v26 }
 0x991   : > { %5735 = vmatprep.mubr.f32.mxu0 %v19396_v23  ;;  %5896 = vmatprep.mubr.f32.mxu1 %v19396_v23 }
 0x994   : > { %11353 = vmatmul.mubr.msk.f32.gmra.mrb[78].mxu0 %vm5562_vm9, %v15327_v53  ;;  %11369 = vmatmul.mubr.msk.f32.gmra.mrb[74].mxu1 %vm5562_vm9, %v15305_v34 }
 0x995   : > { %5741 = vmatprep.mubr.f32.mxu0 %v19396_v23  ;;  %5902 = vmatprep.mubr.f32.mxu1 %v19396_v23 }
 0x998   : > { %11354 = vmatmul.mubr.msk.f32.gmra.mrb[80].mxu0 %vm5562_vm9, %v15338_v36  ;;  %11370 = vmatmul.mubr.msk.f32.gmra.mrb[76].mxu1 %vm5562_vm9, %v15316_v38 }
 0x999   : > { %5747 = vmatprep.mubr.f32.mxu0 %v19396_v23  ;;  %5908 = vmatprep.mubr.f32.mxu1 %v19396_v23 }
 0x99c   : > { %11355 = vmatmul.mubr.msk.f32.gmra.mrb[82].mxu0 %vm5562_vm9, %v15349_v4  ;;  %11371 = vmatmul.mubr.msk.f32.gmra.mrb[78].mxu1 %vm5562_vm9, %v15327_v53 }
 0x99d   : > { %5753 = vmatprep.mubr.f32.mxu0 %v19396_v23  ;;  %5914 = vmatprep.mubr.f32.mxu1 %v19396_v23 }
 0x9a0   : > { %11356 = vmatmul.mubr.msk.f32.gmra.mrb[84].mxu0 %vm5562_vm9, %v15360_v44  ;;  %11372 = vmatmul.mubr.msk.f32.gmra.mrb[80].mxu1 %vm5562_vm9, %v15338_v36 }
 0x9a1   : > { %5759 = vmatprep.mubr.f32.mxu0 %v19396_v23  ;;  %5920 = vmatprep.mubr.f32.mxu1 %v19396_v23 }
 0x9a4   : > { %11357 = vmatmul.mubr.msk.f32.gmra.mrb[86].mxu0 %vm5562_vm9, %v15371_v63  ;;  %11373 = vmatmul.mubr.msk.f32.gmra.mrb[82].mxu1 %vm5562_vm9, %v15349_v4 }
 0x9a5   : > { %5765 = vmatprep.mubr.f32.mxu0 %v19396_v23  ;;  %5926 = vmatprep.mubr.f32.mxu1 %v19396_v23 }
 0x9a8   : > { %11358 = vmatmul.mubr.msk.f32.gmra.mrb[88].mxu0 %vm5562_vm9, %v15382_v24  ;;  %11374 = vmatmul.mubr.msk.f32.gmra.mrb[84].mxu1 %vm5562_vm9, %v15360_v44 }
 0x9a9   : > { %5771 = vmatprep.mubr.f32.mxu0 %v19396_v23  ;;  %5932 = vmatprep.mubr.f32.mxu1 %v19396_v23 }
 0x9ac   : > { %11359 = vmatmul.mubr.msk.f32.gmra.mrb[90].mxu0 %vm5562_vm9, %v15393_v60  ;;  %11375 = vmatmul.mubr.msk.f32.gmra.mrb[86].mxu1 %vm5562_vm9, %v15371_v63 }
 0x9ad   : > { %5777 = vmatprep.mubr.f32.mxu0 %v19396_v23  ;;  %5938 = vmatprep.mubr.f32.mxu1 %v19396_v23 }
 0x9b0   : > { %11360 = vmatmul.mubr.msk.f32.gmra.mrb[92].mxu0 %vm5562_vm9, %v15404_v1  ;;  %11376 = vmatmul.mubr.msk.f32.gmra.mrb[88].mxu1 %vm5562_vm9, %v15382_v24 }
 0x9b1   : > { %5783 = vmatprep.mubr.f32.mxu0 %v19396_v23  ;;  %5944 = vmatprep.mubr.f32.mxu1 %v19396_v23 }
 0x9b4   : > { %11361 = vmatmul.mubr.msk.f32.gmra.mrb[94].mxu0 %vm5562_vm9, %v15415_v20  ;;  %11377 = vmatmul.mubr.msk.f32.gmra.mrb[90].mxu1 %vm5562_vm9, %v15393_v60 }
 0x9b5   : > { %5950 = vmatprep.mubr.f32.mxu1 %v19396_v23  ;;  %6027 = vmatprep.mubr.f32.mxu0 %v19396_v23 }
 0x9b8   : > { %11378 = vmatmul.mubr.msk.f32.gmra.mrb[92].mxu1 %vm5562_vm9, %v15404_v1  ;;  %11380 = vmatmul.mubr.msk.f32.vlgmr.msra.gmra.mrb[96].mxu0 %vm5562_vm9, %v15200_v12 }
 0x9b9   : > { %13774 = vmatpush1.bf16.msra.mxu0 %v19512_v49  ;;  %5956 = vmatprep.mubr.f32.mxu1 %v19396_v23 }
 0x9ba   : > { %6033 = vmatprep.mubr.f32.mxu0 %v19396_v23  ;;  %13776 = vmatprep.subr.bf16.mxu0 %v13775_v13  ;;  %v5326_v13 = vld [vmem:[%s15184_s30 + $0xf8] sm:$0xff] }
 0x9bb   : > { %v13807_v28 = vpack.c.bf16 %v5326_v13, %v5310_v9 }
 0x9bc   : > { %11379 = vmatmul.mubr.msk.f32.gmra.mrb[94].mxu1 %vm5562_vm9, %v15415_v20  ;;  %11381 = vmatmul.mubr.msk.f32.gmra.mrb[98].mxu0 %vm5562_vm9, %v15224_v0 }
 0x9bd   : > { %13778 = vmatpush1.bf16.msra.mxu0 %v13777_v15  ;;  %6039 = vmatprep.mubr.f32.mxu0 %v19396_v23 }
 0x9be   : > { %13788 = vmatprep.subr.bf16.mxu0 %v19513_v61  ;;  %6200 = vmatprep.mubr.f32.mxu1 %v19396_v23  ;;  %v5309_v61 = vld [vmem:[%s15184_s30 + $0x70] sm:$0xff] }
 0x9bf   : > { %v13809_v58 = vpack.c.bf16 %v5325_v22, %v5309_v61 }
 0x9c0   : > { %11382 = vmatmul.mubr.msk.f32.gmra.mrb[100].mxu0 %vm5562_vm9, %v15235_v39  ;;  %11398 = vmatmul.mubr.msk.f32.vlgmr.msra.gmra.mrb[96].mxu1 %vm5562_vm9, %v15200_v12 }
 0x9c1   : > { %13782 = vmatpush1.bf16.msra.mxu1 %v19514_v8  ;;  %6045 = vmatprep.mubr.f32.mxu0 %v19396_v23  ;;  %v5374_v8 = vld [vmem:[%s19384_s3 + $0x18] sm:$0xff] }
 0x9c2   : > { %6206 = vmatprep.mubr.f32.mxu1 %v19396_v23  ;;  %13784 = vmatprep.subr.bf16.mxu1 %v13783_v3  ;;  %v5378_v19 = vmul.f32 0.0, %v5374_v8 }
 0x9c4   : > { %11383 = vmatmul.mubr.msk.f32.gmra.mrb[102].mxu0 %vm5562_vm9, %v15257_v32  ;;  %11399 = vmatmul.mubr.msk.f32.gmra.mrb[98].mxu1 %vm5562_vm9, %v15224_v0 }
 0x9c5   : > { %13786 = vmatpush1.bf16.msra.mxu1 %v13785_v17  ;;  %6051 = vmatprep.mubr.f32.mxu0 %v19396_v23 }
 0x9c6   : > { %13796 = vmatprep.subr.bf16.mxu1 %v13795_v21  ;;  %6212 = vmatprep.mubr.f32.mxu1 %v19396_v23  ;;  %v19515_v21 = vld [vmem:[#allocation3_spill] sm:$0xff] }
 0x9c7   : > { %v19516_v18 = vpack.c.bf16 %v14943_v50, %v19515_v21  ;;  %v13799_v50 = vpack.c.bf16 %v5324_v31, %v5308_v52  ;;  %v13815_v21 = vpack.c.bf16 %v5378_v19, %v5376_v43 }
 0x9c8   : > { %11384 = vmatmul.mubr.msk.f32.gmra.mrb[104].mxu0 %vm5562_vm9, %v15268_v54  ;;  %11400 = vmatmul.mubr.msk.f32.gmra.mrb[100].mxu1 %vm5562_vm9, %v15235_v39 }
 0x9c9   : > { %6057 = vmatprep.mubr.f32.mxu0 %v19396_v23  ;;  %6218 = vmatprep.mubr.f32.mxu1 %v19396_v23 }
 0x9cc   : > { %11385 = vmatmul.mubr.msk.f32.gmra.mrb[106].mxu0 %vm5562_vm9, %v15283_v25  ;;  %11401 = vmatmul.mubr.msk.f32.gmra.mrb[102].mxu1 %vm5562_vm9, %v15257_v32 }
 0x9cd   : > { %6063 = vmatprep.mubr.f32.mxu0 %v19396_v23  ;;  %6224 = vmatprep.mubr.f32.mxu1 %v19396_v23 }
 0x9d0   : > { %11386 = vmatmul.mubr.msk.f32.gmra.mrb[108].mxu0 %vm5562_vm9, %v15294_v26  ;;  %11402 = vmatmul.mubr.msk.f32.gmra.mrb[104].mxu1 %vm5562_vm9, %v15268_v54 }
 0x9d1   : > { %6069 = vmatprep.mubr.f32.mxu0 %v19396_v23  ;;  %6230 = vmatprep.mubr.f32.mxu1 %v19396_v23 }
 0x9d4   : > { %11387 = vmatmul.mubr.msk.f32.gmra.mrb[110].mxu0 %vm5562_vm9, %v15305_v34  ;;  %11403 = vmatmul.mubr.msk.f32.gmra.mrb[106].mxu1 %vm5562_vm9, %v15283_v25 }
 0x9d5   : > { %6075 = vmatprep.mubr.f32.mxu0 %v19396_v23  ;;  %6236 = vmatprep.mubr.f32.mxu1 %v19396_v23 }
 0x9d8   : > { %11388 = vmatmul.mubr.msk.f32.gmra.mrb[112].mxu0 %vm5562_vm9, %v15316_v38  ;;  %11404 = vmatmul.mubr.msk.f32.gmra.mrb[108].mxu1 %vm5562_vm9, %v15294_v26 }
 0x9d9   : > { %6081 = vmatprep.mubr.f32.mxu0 %v19396_v23  ;;  %6242 = vmatprep.mubr.f32.mxu1 %v19396_v23 }
 0x9dc   : > { %11389 = vmatmul.mubr.msk.f32.gmra.mrb[114].mxu0 %vm5562_vm9, %v15327_v53  ;;  %11405 = vmatmul.mubr.msk.f32.gmra.mrb[110].mxu1 %vm5562_vm9, %v15305_v34 }
 0x9dd   : > { %6087 = vmatprep.mubr.f32.mxu0 %v19396_v23  ;;  %6248 = vmatprep.mubr.f32.mxu1 %v19396_v23 }
 0x9e0   : > { %11390 = vmatmul.mubr.msk.f32.gmra.mrb[116].mxu0 %vm5562_vm9, %v15338_v36  ;;  %11406 = vmatmul.mubr.msk.f32.gmra.mrb[112].mxu1 %vm5562_vm9, %v15316_v38 }
 0x9e1   : > { %6093 = vmatprep.mubr.f32.mxu0 %v19396_v23  ;;  %6254 = vmatprep.mubr.f32.mxu1 %v19396_v23 }
 0x9e4   : > { %11391 = vmatmul.mubr.msk.f32.gmra.mrb[118].mxu0 %vm5562_vm9, %v15349_v4  ;;  %11407 = vmatmul.mubr.msk.f32.gmra.mrb[114].mxu1 %vm5562_vm9, %v15327_v53 }
 0x9e5   : > { %6099 = vmatprep.mubr.f32.mxu0 %v19396_v23  ;;  %6260 = vmatprep.mubr.f32.mxu1 %v19396_v23 }
 0x9e8   : > { %11392 = vmatmul.mubr.msk.f32.gmra.mrb[120].mxu0 %vm5562_vm9, %v15360_v44  ;;  %11408 = vmatmul.mubr.msk.f32.gmra.mrb[116].mxu1 %vm5562_vm9, %v15338_v36 }
 0x9e9   : > { %6105 = vmatprep.mubr.f32.mxu0 %v19396_v23  ;;  %6266 = vmatprep.mubr.f32.mxu1 %v19396_v23 }
 0x9ec   : > { %11393 = vmatmul.mubr.msk.f32.gmra.mrb[122].mxu0 %vm5562_vm9, %v15371_v63  ;;  %11409 = vmatmul.mubr.msk.f32.gmra.mrb[118].mxu1 %vm5562_vm9, %v15349_v4 }
 0x9ed   : > { %6111 = vmatprep.mubr.f32.mxu0 %v19396_v23  ;;  %6272 = vmatprep.mubr.f32.mxu1 %v19396_v23 }
 0x9f0   : > { %11394 = vmatmul.mubr.msk.f32.gmra.mrb[124].mxu0 %vm5562_vm9, %v15382_v24  ;;  %11410 = vmatmul.mubr.msk.f32.gmra.mrb[120].mxu1 %vm5562_vm9, %v15360_v44 }
 0x9f1   : > { %6117 = vmatprep.mubr.f32.mxu0 %v19396_v23  ;;  %6278 = vmatprep.mubr.f32.mxu1 %v19396_v23 }
 0x9f4   : > { %11395 = vmatmul.mubr.msk.f32.gmra.mrb[126].mxu0 %vm5562_vm9, %v15393_v60  ;;  %11411 = vmatmul.mubr.msk.f32.gmra.mrb[122].mxu1 %vm5562_vm9, %v15371_v63 }
 0x9f5   : > { %6123 = vmatprep.mubr.f32.mxu0 %v19396_v23  ;;  %6284 = vmatprep.mubr.f32.mxu1 %v19396_v23 }
 0x9f8   : > { %11396 = vmatmul.mubr.msk.f32.gmra.mrb[128].mxu0 %vm5562_vm9, %v15404_v1  ;;  %11412 = vmatmul.mubr.msk.f32.gmra.mrb[124].mxu1 %vm5562_vm9, %v15382_v24 }
 0x9f9   : > { %6129 = vmatprep.mubr.f32.mxu0 %v19396_v23  ;;  %6290 = vmatprep.mubr.f32.mxu1 %v19396_v23 }
 0x9fc   : > { %11397 = vmatmul.mubr.msk.f32.gmra.mrb[130].mxu0 %vm5562_vm9, %v15415_v20  ;;  %11413 = vmatmul.mubr.msk.f32.gmra.mrb[126].mxu1 %vm5562_vm9, %v15393_v60 }
 0x9fd   : > { %6296 = vmatprep.mubr.f32.mxu1 %v19396_v23  ;;  %6373 = vmatprep.mubr.f32.mxu0 %v19396_v23 }
 0xa00   : > { %11414 = vmatmul.mubr.msk.f32.gmra.mrb[128].mxu1 %vm5562_vm9, %v15404_v1  ;;  %11416 = vmatmul.mubr.msk.f32.vlgmr.msra.gmra.mrb[132].mxu0 %vm5562_vm9, %v15200_v12 }
 0xa01   : > { %13790 = vmatpush1.bf16.msra.mxu0 %v19516_v18  ;;  %6302 = vmatprep.mubr.f32.mxu1 %v19396_v23  ;;  %v5375_v18 = vmul.f32 0.0, %v5371_v6 }
 0xa02   : > { %6379 = vmatprep.mubr.f32.mxu0 %v19396_v23  ;;  %13792 = vmatprep.subr.bf16.mxu0 %v13791_v48 }
 0xa04   : > { %11415 = vmatmul.mubr.msk.f32.gmra.mrb[130].mxu1 %vm5562_vm9, %v15415_v20  ;;  %11417 = vmatmul.mubr.msk.f32.gmra.mrb[134].mxu0 %vm5562_vm9, %v15224_v0 }
 0xa05   : > { %13794 = vmatpush1.bf16.msra.mxu0 %v13793_v30  ;;  %6385 = vmatprep.mubr.f32.mxu0 %v19396_v23  ;;  %v5377_v30 = vmul.f32 0.0, %v5373_v10 }
 0xa06   : > { %13804 = vmatprep.subr.bf16.mxu0 %v13803_v37  ;;  %6546 = vmatprep.mubr.f32.mxu1 %v19396_v23 }
 0xa07   : > { %v13817_v45 = vpack.c.bf16 %v5377_v30, %v5375_v18 }
 0xa08   : > { %11418 = vmatmul.mubr.msk.f32.gmra.mrb[136].mxu0 %vm5562_vm9, %v15235_v39  ;;  %11434 = vmatmul.mubr.msk.f32.vlgmr.msra.gmra.mrb[132].mxu1 %vm5562_vm9, %v15200_v12 }
 0xa09   : > { %13798 = vmatpush1.bf16.msra.mxu1 %v19518_v51  ;;  %6391 = vmatprep.mubr.f32.mxu0 %v19396_v23 }
 0xa0a   : > { %6552 = vmatprep.mubr.f32.mxu1 %v19396_v23  ;;  %13800 = vmatprep.subr.bf16.mxu1 %v13799_v50 }
 0xa0c   : > { %11419 = vmatmul.mubr.msk.f32.gmra.mrb[138].mxu0 %vm5562_vm9, %v15257_v32  ;;  %11435 = vmatmul.mubr.msk.f32.gmra.mrb[134].mxu1 %vm5562_vm9, %v15224_v0 }
 0xa0d   : > { %6397 = vmatprep.mubr.f32.mxu0 %v19396_v23  ;;  %6558 = vmatprep.mubr.f32.mxu1 %v19396_v23 }
 0xa0e   : > { %13802 = vmatpush1.bf16.msra.mxu1 %v13801_v2 }
 0xa10   : > { %11420 = vmatmul.mubr.msk.f32.gmra.mrb[140].mxu0 %vm5562_vm9, %v15268_v54  ;;  %11436 = vmatmul.mubr.msk.f32.gmra.mrb[136].mxu1 %vm5562_vm9, %v15235_v39 }
 0xa11   : > { %6403 = vmatprep.mubr.f32.mxu0 %v19396_v23  ;;  %6564 = vmatprep.mubr.f32.mxu1 %v19396_v23 }
 0xa14   : > { %11421 = vmatmul.mubr.msk.f32.gmra.mrb[142].mxu0 %vm5562_vm9, %v15283_v25  ;;  %11437 = vmatmul.mubr.msk.f32.gmra.mrb[138].mxu1 %vm5562_vm9, %v15257_v32 }
 0xa15   : > { %6409 = vmatprep.mubr.f32.mxu0 %v19396_v23  ;;  %6570 = vmatprep.mubr.f32.mxu1 %v19396_v23 }
 0xa18   : > { %11422 = vmatmul.mubr.msk.f32.gmra.mrb[144].mxu0 %vm5562_vm9, %v15294_v26  ;;  %11438 = vmatmul.mubr.msk.f32.gmra.mrb[140].mxu1 %vm5562_vm9, %v15268_v54 }
 0xa19   : > { %6415 = vmatprep.mubr.f32.mxu0 %v19396_v23  ;;  %6576 = vmatprep.mubr.f32.mxu1 %v19396_v23 }
 0xa1c   : > { %11423 = vmatmul.mubr.msk.f32.gmra.mrb[146].mxu0 %vm5562_vm9, %v15305_v34  ;;  %11439 = vmatmul.mubr.msk.f32.gmra.mrb[142].mxu1 %vm5562_vm9, %v15283_v25 }
 0xa1d   : > { %6421 = vmatprep.mubr.f32.mxu0 %v19396_v23  ;;  %6582 = vmatprep.mubr.f32.mxu1 %v19396_v23 }
 0xa20   : > { %11424 = vmatmul.mubr.msk.f32.gmra.mrb[148].mxu0 %vm5562_vm9, %v15316_v38  ;;  %11440 = vmatmul.mubr.msk.f32.gmra.mrb[144].mxu1 %vm5562_vm9, %v15294_v26 }
 0xa21   : > { %6427 = vmatprep.mubr.f32.mxu0 %v19396_v23  ;;  %6588 = vmatprep.mubr.f32.mxu1 %v19396_v23 }
 0xa24   : > { %11425 = vmatmul.mubr.msk.f32.gmra.mrb[150].mxu0 %vm5562_vm9, %v15327_v53  ;;  %11441 = vmatmul.mubr.msk.f32.gmra.mrb[146].mxu1 %vm5562_vm9, %v15305_v34 }
 0xa25   : > { %6433 = vmatprep.mubr.f32.mxu0 %v19396_v23  ;;  %6594 = vmatprep.mubr.f32.mxu1 %v19396_v23 }
 0xa28   : > { %11426 = vmatmul.mubr.msk.f32.gmra.mrb[152].mxu0 %vm5562_vm9, %v15338_v36  ;;  %11442 = vmatmul.mubr.msk.f32.gmra.mrb[148].mxu1 %vm5562_vm9, %v15316_v38 }
 0xa29   : > { %6439 = vmatprep.mubr.f32.mxu0 %v19396_v23  ;;  %6600 = vmatprep.mubr.f32.mxu1 %v19396_v23 }
 0xa2c   : > { %11427 = vmatmul.mubr.msk.f32.gmra.mrb[154].mxu0 %vm5562_vm9, %v15349_v4  ;;  %11443 = vmatmul.mubr.msk.f32.gmra.mrb[150].mxu1 %vm5562_vm9, %v15327_v53 }
 0xa2d   : > { %6445 = vmatprep.mubr.f32.mxu0 %v19396_v23  ;;  %6606 = vmatprep.mubr.f32.mxu1 %v19396_v23 }
 0xa30   : > { %11428 = vmatmul.mubr.msk.f32.gmra.mrb[156].mxu0 %vm5562_vm9, %v15360_v44  ;;  %11444 = vmatmul.mubr.msk.f32.gmra.mrb[152].mxu1 %vm5562_vm9, %v15338_v36 }
 0xa31   : > { %6451 = vmatprep.mubr.f32.mxu0 %v19396_v23  ;;  %6612 = vmatprep.mubr.f32.mxu1 %v19396_v23 }
 0xa34   : > { %11429 = vmatmul.mubr.msk.f32.gmra.mrb[158].mxu0 %vm5562_vm9, %v15371_v63  ;;  %11445 = vmatmul.mubr.msk.f32.gmra.mrb[154].mxu1 %vm5562_vm9, %v15349_v4 }
 0xa35   : > { %6457 = vmatprep.mubr.f32.mxu0 %v19396_v23  ;;  %6618 = vmatprep.mubr.f32.mxu1 %v19396_v23 }
 0xa38   : > { %11430 = vmatmul.mubr.msk.f32.gmra.mrb[160].mxu0 %vm5562_vm9, %v15382_v24  ;;  %11446 = vmatmul.mubr.msk.f32.gmra.mrb[156].mxu1 %vm5562_vm9, %v15360_v44 }
 0xa39   : > { %6463 = vmatprep.mubr.f32.mxu0 %v19396_v23  ;;  %6624 = vmatprep.mubr.f32.mxu1 %v19396_v23 }
 0xa3b   : > { %v13060_v40 = vpop.f32.mrb[58].mxu0 }
 0xa3c   : > { %v5122_v59 = vadd.f32 %v13060_v40, %v14341_v29  ;;  %v5112_v37 = vpop.f32.mrb[59].mxu0  ;;  %11431 = vmatmul.mubr.msk.f32.gmra.mrb[162].mxu0 %vm5562_vm9, %v15393_v60  ;;  %11447 = vmatmul.mubr.msk.f32.gmra.mrb[158].mxu1 %vm5562_vm9, %v15371_v63 }
 0xa3d   : > { %v5121_v55 = vadd.f32 %v5112_v37, %v14338_v27  ;;  %6469 = vmatprep.mubr.f32.mxu0 %v19396_v23  ;;  %6630 = vmatprep.mubr.f32.mxu1 %v19396_v23 }
 0xa3e   : > { %v5124_v47 = vmul.f32 0.0, %v5122_v59 }
 0xa3f   : > { %v5123_v35 = vmul.f32 0.0, %v5121_v55 }
 0xa40   : > { %11432 = vmatmul.mubr.msk.f32.gmra.mrb[164].mxu0 %vm5562_vm9, %v15404_v1  ;;  %11448 = vmatmul.mubr.msk.f32.gmra.mrb[160].mxu1 %vm5562_vm9, %v15382_v24 }
 0xa41   : > { %v13813_v33 = vpack.c.bf16 %v5124_v47, %v5123_v35  ;;  %6475 = vmatprep.mubr.f32.mxu0 %v19396_v23  ;;  %6636 = vmatprep.mubr.f32.mxu1 %v19396_v23 }
 0xa43   : > { %v13098_v57 = vpop.f32.mrb[58].mxu1  ;;  %v15675_v62 = vpop.f32.mrb[60].mxu0 }
 0xa44   : > { %v5290_v14 = vadd.f32 %v13098_v57, %v14341_v29  ;;  %v5280_v46 = vpop.f32.mrb[59].mxu1  ;;  %11433 = vmatmul.mubr.msk.f32.gmra.mrb[166].mxu0 %vm5562_vm9, %v15415_v20  ;;  %11449 = vmatmul.mubr.msk.f32.gmra.mrb[162].mxu1 %vm5562_vm9, %v15393_v60  ;;  %v15684_v49 = vpop.f32.mrb[61].mxu0 }
 0xa45   : > { %v5289_v15 = vadd.f32 %v5280_v46, %v14338_v27  ;;  %6642 = vmatprep.mubr.f32.mxu1 %v19396_v23  ;;  %6719 = vmatprep.mubr.f32.mxu0 %v19396_v23 }
 0xa46   : > { %v5292_v16 = vmul.f32 0.0, %v5290_v14 }
 0xa47   : > { %v5291_v3 = vmul.f32 0.0, %v5289_v15  ;;  %v15690_v29 = vpop.f32.mrb[62].mxu0 }
 0xa48   : > { %11450 = vmatmul.mubr.msk.f32.gmra.mrb[164].mxu1 %vm5562_vm9, %v15404_v1  ;;  %11452 = vmatmul.mubr.msk.f32.vlgmr.msra.gmra.mrb[168].mxu0 %vm5562_vm9, %v15200_v12  ;;  %v15703_v27 = vpop.f32.mrb[63].mxu0 }
 0xa49   : > { %13806 = vmatpush1.bf16.msra.mxu0 %v13805_v11  ;;  %6648 = vmatprep.mubr.f32.mxu1 %v19396_v23  ;;  %v13811_v17 = vpack.c.bf16 %v5292_v16, %v5291_v3 }
 0xa4a   : > { %6725 = vmatprep.mubr.f32.mxu0 %v19396_v23  ;;  %13808 = vmatprep.subr.bf16.mxu0 %v13807_v28 }
 0xa4b   : > { %v15710_v48 = vpop.f32.mrb[60].mxu1  ;;  %13812 = vmatprep.subr.bf16.mxu1 %v13811_v17  ;;  %v15712_v5 = vpop.f32.mrb[64].mxu0 }
 0xa4c   : > { %v15720_v41 = vpop.f32.mrb[61].mxu1  ;;  %11451 = vmatmul.mubr.msk.f32.gmra.mrb[166].mxu1 %vm5562_vm9, %v15415_v20  ;;  %11453 = vmatmul.mubr.msk.f32.gmra.mrb[170].mxu0 %vm5562_vm9, %v15224_v0  ;;  %v15726_v11 = vpop.f32.mrb[65].mxu0 }
 0xa4d   : > { %6731 = vmatprep.mubr.f32.mxu0 %v19396_v23  ;;  %6892 = vmatprep.mubr.f32.mxu1 %v19396_v23 }
 0xa4e   : > { %13810 = vmatpush1.bf16.msra.mxu0 %v13809_v58 }
 0xa4f   : > { %v15730_v52 = vpop.f32.mrb[62].mxu1  ;;  %v15732_v31 = vpop.f32.mrb[66].mxu0 }
 0xa50   : > { %v15734_v50 = vpop.f32.mrb[63].mxu1  ;;  %11454 = vmatmul.mubr.msk.f32.gmra.mrb[172].mxu0 %vm5562_vm9, %v15235_v39  ;;  %11470 = vmatmul.mubr.msk.f32.vlgmr.msra.gmra.mrb[168].mxu1 %vm5562_vm9, %v15200_v12  ;;  %v15740_v42 = vpop.f32.mrb[67].mxu0 }
 0xa51   : > { %13814 = vmatpush1.bf16.msra.mxu1 %v13813_v33  ;;  %6737 = vmatprep.mubr.f32.mxu0 %v19396_v23 }
 0xa52   : > { %6898 = vmatprep.mubr.f32.mxu1 %v19396_v23  ;;  %13816 = vmatprep.subr.bf16.mxu1 %v13815_v21 }
 0xa53   : > { %v15744_v7 = vpop.f32.mrb[64].mxu1  ;;  %v15746_v51 = vpop.f32.mrb[68].mxu0 }
 0xa54   : > { %v15748_v2 = vpop.f32.mrb[65].mxu1  ;;  %11455 = vmatmul.mubr.msk.f32.gmra.mrb[174].mxu0 %vm5562_vm9, %v15257_v32  ;;  %11471 = vmatmul.mubr.msk.f32.gmra.mrb[170].mxu1 %vm5562_vm9, %v15224_v0  ;;  %v15754_v12 = vpop.f32.mrb[69].mxu0 }
 0xa55   : > { %6743 = vmatprep.mubr.f32.mxu0 %v19396_v23  ;;  %6904 = vmatprep.mubr.f32.mxu1 %v19396_v23 }
 0xa56   : > { %13818 = vmatpush1.bf16.msra.mxu1 %v13817_v45 }
 0xa57   : > { %v15758_v40 = vpop.f32.mrb[66].mxu1  ;;  %v15760_v59 = vpop.f32.mrb[70].mxu0 }
 0xa58   : > { %v15762_v37 = vpop.f32.mrb[67].mxu1  ;;  %11456 = vmatmul.mubr.msk.f32.gmra.mrb[176].mxu0 %vm5562_vm9, %v15268_v54  ;;  %11472 = vmatmul.mubr.msk.f32.gmra.mrb[172].mxu1 %vm5562_vm9, %v15235_v39  ;;  %v15768_v0 = vpop.f32.mrb[71].mxu0 }
 0xa59   : > { %6749 = vmatprep.mubr.f32.mxu0 %v19396_v23  ;;  %6910 = vmatprep.mubr.f32.mxu1 %v19396_v23 }
 0xa5b   : > { %v15772_v55 = vpop.f32.mrb[68].mxu1  ;;  %v15774_v47 = vpop.f32.mrb[72].mxu0 }
 0xa5c   : > { %19519 = vst [vmem:[#allocation3_spill] sm:$0xff] %v15774_v47  ;;  %v15776_v35 = vpop.f32.mrb[69].mxu1  ;;  %11457 = vmatmul.mubr.msk.f32.gmra.mrb[178].mxu0 %vm5562_vm9, %v15283_v25  ;;  %11473 = vmatmul.mubr.msk.f32.gmra.mrb[174].mxu1 %vm5562_vm9, %v15257_v32  ;;  %v5721_v33 = vpop.f32.mrb[73].mxu0 }
 0xa5d   : > { %6755 = vmatprep.mubr.f32.mxu0 %v19396_v23  ;;  %6916 = vmatprep.mubr.f32.mxu1 %v19396_v23  ;;  %v15785_v39 = vadd.f32 %v5721_v33, %v15675_v62 }
 0xa5f   : > { %v15787_v57 = vpop.f32.mrb[70].mxu1  ;;  %v15789_v9 = vpop.f32.mrb[74].mxu0 }
 0xa60   : > { %19520 = vst [vmem:[#allocation4_spill] sm:$0xff] %v15789_v9  ;;  %v15791_v13 = vpop.f32.mrb[71].mxu1  ;;  %11458 = vmatmul.mubr.msk.f32.gmra.mrb[180].mxu0 %vm5562_vm9, %v15294_v26  ;;  %11474 = vmatmul.mubr.msk.f32.gmra.mrb[176].mxu1 %vm5562_vm9, %v15268_v54  ;;  %v5727_v32 = vpop.f32.mrb[75].mxu0 }
 0xa61   : > { %6761 = vmatprep.mubr.f32.mxu0 %v19396_v23  ;;  %6922 = vmatprep.mubr.f32.mxu1 %v19396_v23  ;;  %v15800_v62 = vadd.f32 %v5727_v32, %v15690_v29 }
 0xa63   : > { %v5892_v14 = vpop.f32.mrb[72].mxu1  ;;  %v15802_v46 = vpop.f32.mrb[76].mxu0 }
 0xa64   : > { %19521 = vst [vmem:[#allocation5_spill] sm:$0xff] %v15802_v46  ;;  %v15805_v15 = vadd.f32 %v5892_v14, %v15684_v49  ;;  %v5894_v16 = vpop.f32.mrb[73].mxu1  ;;  %11459 = vmatmul.mubr.msk.f32.gmra.mrb[182].mxu0 %vm5562_vm9, %v15305_v34  ;;  %11475 = vmatmul.mubr.msk.f32.gmra.mrb[178].mxu1 %vm5562_vm9, %v15283_v25  ;;  %v5733_v54 = vpop.f32.mrb[77].mxu0 }
 0xa65   : > { %v15812_v28 = vadd.f32 %v5894_v16, %v15710_v48  ;;  %6767 = vmatprep.mubr.f32.mxu0 %v19396_v23  ;;  %6928 = vmatprep.mubr.f32.mxu1 %v19396_v23  ;;  %v15817_v61 = vadd.f32 %v5733_v54, %v15712_v5 }
 0xa67   : > { %v5898_v49 = vpop.f32.mrb[74].mxu1  ;;  %v15819_v3 = vpop.f32.mrb[78].mxu0 }
 0xa68   : > { %19522 = vst [vmem:[#allocation6_spill] sm:$0xff] %v15819_v3  ;;  %v15822_v29 = vadd.f32 %v5898_v49, %v15703_v27  ;;  %v5900_v22 = vpop.f32.mrb[75].mxu1  ;;  %11460 = vmatmul.mubr.msk.f32.gmra.mrb[184].mxu0 %vm5562_vm9, %v15316_v38  ;;  %11476 = vmatmul.mubr.msk.f32.gmra.mrb[180].mxu1 %vm5562_vm9, %v15294_v26  ;;  %v5739_v25 = vpop.f32.mrb[79].mxu0 }
 0xa69   : > { %v15829_v56 = vadd.f32 %v5900_v22, %v15730_v52  ;;  %6773 = vmatprep.mubr.f32.mxu0 %v19396_v23  ;;  %6934 = vmatprep.mubr.f32.mxu1 %v19396_v23  ;;  %v15834_v8 = vadd.f32 %v5739_v25, %v15732_v31 }
 0xa6b   : > { %v5904_v27 = vpop.f32.mrb[76].mxu1  ;;  %v15836_v17 = vpop.f32.mrb[80].mxu0 }
 0xa6c   : > { %19523 = vst [vmem:[#allocation7_spill] sm:$0xff] %v15836_v17  ;;  %v15839_v58 = vadd.f32 %v5904_v27, %v15726_v11  ;;  %v5906_v43 = vpop.f32.mrb[77].mxu1  ;;  %11461 = vmatmul.mubr.msk.f32.gmra.mrb[186].mxu0 %vm5562_vm9, %v15327_v53  ;;  %11477 = vmatmul.mubr.msk.f32.gmra.mrb[182].mxu1 %vm5562_vm9, %v15305_v34  ;;  %v5745_v26 = vpop.f32.mrb[81].mxu0 }
 0xa6d   : > { %v15846_v19 = vadd.f32 %v5906_v43, %v15744_v7  ;;  %6779 = vmatprep.mubr.f32.mxu0 %v19396_v23  ;;  %6940 = vmatprep.mubr.f32.mxu1 %v19396_v23  ;;  %v15851_v48 = vadd.f32 %v5745_v26, %v15746_v51 }
 0xa6f   : > { %v5910_v5 = vpop.f32.mrb[78].mxu1  ;;  %v15853_v6 = vpop.f32.mrb[82].mxu0 }
 0xa70   : > { %19524 = vst [vmem:[#allocation8_spill] sm:$0xff] %v15853_v6  ;;  %v15856_v10 = vadd.f32 %v5910_v5, %v15740_v42  ;;  %v5912_v11 = vpop.f32.mrb[79].mxu1  ;;  %11462 = vmatmul.mubr.msk.f32.gmra.mrb[188].mxu0 %vm5562_vm9, %v15338_v36  ;;  %11478 = vmatmul.mubr.msk.f32.gmra.mrb[184].mxu1 %vm5562_vm9, %v15316_v38  ;;  %v5751_v34 = vpop.f32.mrb[83].mxu0 }
 0xa71   : > { %v15863_v21 = vadd.f32 %v5912_v11, %v15758_v40  ;;  %6785 = vmatprep.mubr.f32.mxu0 %v19396_v23  ;;  %6946 = vmatprep.mubr.f32.mxu1 %v19396_v23  ;;  %v15868_v18 = vadd.f32 %v5751_v34, %v15760_v59 }
 0xa73   : > { %v5916_v30 = vpop.f32.mrb[80].mxu1  ;;  %v15870_v52 = vpop.f32.mrb[84].mxu0 }
 0xa74   : > { %19525 = vst [vmem:[#allocation9_spill] sm:$0xff] %v15870_v52  ;;  %v15873_v31 = vadd.f32 %v5916_v30, %v15754_v12  ;;  %v5918_v42 = vpop.f32.mrb[81].mxu1  ;;  %11463 = vmatmul.mubr.msk.f32.gmra.mrb[190].mxu0 %vm5562_vm9, %v15349_v4  ;;  %11479 = vmatmul.mubr.msk.f32.gmra.mrb[186].mxu1 %vm5562_vm9, %v15327_v53  ;;  %v15879_v38 = vpop.f32.mrb[85].mxu0 }
 0xa75   : > { %19526 = vst [vmem:[#allocation10_spill] sm:$0xff] %v15879_v38  ;;  %v15882_v45 = vadd.f32 %v5918_v42, %v15772_v55  ;;  %6791 = vmatprep.mubr.f32.mxu0 %v19396_v23  ;;  %6952 = vmatprep.mubr.f32.mxu1 %v19396_v23 }
 0xa77   : > { %v5922_v7 = vpop.f32.mrb[82].mxu1  ;;  %v15886_v51 = vpop.f32.mrb[86].mxu0 }
 0xa78   : > { %19527 = vst [vmem:[#allocation11_spill] sm:$0xff] %v15886_v51  ;;  %v15889_v12 = vadd.f32 %v5922_v7, %v15768_v0  ;;  %v5924_v40 = vpop.f32.mrb[83].mxu1  ;;  %11464 = vmatmul.mubr.msk.f32.gmra.mrb[192].mxu0 %vm5562_vm9, %v15360_v44  ;;  %11480 = vmatmul.mubr.msk.f32.gmra.mrb[188].mxu1 %vm5562_vm9, %v15338_v36  ;;  %v15895_v53 = vpop.f32.mrb[87].mxu0 }
 0xa79   : > { %19528 = vst [vmem:[#allocation12_spill] sm:$0xff] %v15895_v53  ;;  %v15898_v59 = vadd.f32 %v5924_v40, %v15787_v57  ;;  %6797 = vmatprep.mubr.f32.mxu0 %v19396_v23  ;;  %6958 = vmatprep.mubr.f32.mxu1 %v19396_v23 }
 0xa7b   : > { %v5928_v55 = vpop.f32.mrb[84].mxu1  ;;  %v15902_v33 = vpop.f32.mrb[88].mxu0 }
 0xa7c   : > { %19529 = vst [vmem:[#allocation13_spill] sm:$0xff] %v15902_v33  ;;  %v7388_v0 = vadd.f32 %v15785_v39, %v5928_v55  ;;  %v5930_v32 = vpop.f32.mrb[85].mxu1  ;;  %11465 = vmatmul.mubr.msk.f32.gmra.mrb[194].mxu0 %vm5562_vm9, %v15371_v63  ;;  %11481 = vmatmul.mubr.msk.f32.gmra.mrb[190].mxu1 %vm5562_vm9, %v15349_v4  ;;  %v15909_v36 = vpop.f32.mrb[89].mxu0 }
 0xa7d   : > { %19530 = vst [vmem:[#allocation14_spill] sm:$0xff] %v15909_v36  ;;  %v7389_v57 = vadd.f32 %v15805_v15, %v5930_v32  ;;  %6803 = vmatprep.mubr.f32.mxu0 %v19396_v23  ;;  %6964 = vmatprep.mubr.f32.mxu1 %v19396_v23 }
 0xa7e   : > { %7431 = vrot.lane.b32.xlu0 %v7388_v0, %s14015_s26 }
 0xa7f   : > { %v5934_v14 = vpop.f32.mrb[86].mxu1  ;;  %v15915_v39 = vpop.f32.mrb[90].mxu0 }
 0xa80   : > { %19531 = vst [vmem:[#allocation15_spill] sm:$0xff] %v15915_v39  ;;  %v7408_v16 = vadd.f32 %v15800_v62, %v5934_v14  ;;  %v5936_v54 = vpop.f32.mrb[87].mxu1  ;;  %11466 = vmatmul.mubr.msk.f32.gmra.mrb[196].mxu0 %vm5562_vm9, %v15382_v24  ;;  %11482 = vmatmul.mubr.msk.f32.gmra.mrb[192].mxu1 %vm5562_vm9, %v15360_v44  ;;  %v15922_v4 = vpop.f32.mrb[91].mxu0 }
 0xa81   : > { %19532 = vst [vmem:[#allocation16_spill] sm:$0xff] %v15922_v4  ;;  %v7409_v15 = vadd.f32 %v15822_v29, %v5936_v54  ;;  %6809 = vmatprep.mubr.f32.mxu0 %v19396_v23  ;;  %6970 = vmatprep.mubr.f32.mxu1 %v19396_v23 }
 0xa82   : > { %7435 = vrot.lane.b32.xlu0 %v7389_v57, %s14015_s26  ;;  %7433 = vrot.lane.b32.xlu1 %v7408_v16, %s14015_s26 }
 0xa83   : > { %v5940_v62 = vpop.f32.mrb[88].mxu1  ;;  %v15929_v49 = vpop.f32.mrb[92].mxu0 }
 0xa84   : > { %19533 = vst [vmem:[#allocation17_spill] sm:$0xff] %v15929_v49  ;;  %v15932_v22 = vadd.f32 %v15817_v61, %v5940_v62  ;;  %v5942_v25 = vpop.f32.mrb[89].mxu1  ;;  %11467 = vmatmul.mubr.msk.f32.gmra.mrb[198].mxu0 %vm5562_vm9, %v15393_v60  ;;  %11483 = vmatmul.mubr.msk.f32.gmra.mrb[194].mxu1 %vm5562_vm9, %v15371_v63  ;;  %v15938_v44 = vpop.f32.mrb[93].mxu0 }
 0xa85   : > { %19535 = vst [vmem:[#allocation19_spill] sm:$0xff] %v15938_v44  ;;  %v15941_v29 = vadd.f32 %v15839_v58, %v5942_v25  ;;  %6815 = vmatprep.mubr.f32.mxu0 %v19396_v23  ;;  %6976 = vmatprep.mubr.f32.mxu1 %v19396_v23  ;;  %v13940_v25 = vld [vmem:[%s19389_s8 + $0x18] sm:$0xff] }
 0xa86   : > { %19534 = vst [vmem:[#allocation18_spill] sm:$0xff] %v15932_v22  ;;  %7437 = vrot.lane.b32.xlu1 %v7409_v15, %s14015_s26 }
 0xa87   : > { %v5946_v61 = vpop.f32.mrb[90].mxu1  ;;  %v15946_v27 = vpop.f32.mrb[94].mxu0 }
 0xa88   : > { %19536 = vst [vmem:[#allocation20_spill] sm:$0xff] %v15946_v27  ;;  %v15949_v43 = vadd.f32 %v15834_v8, %v5946_v61  ;;  %v5948_v26 = vpop.f32.mrb[91].mxu1  ;;  %11468 = vmatmul.mubr.msk.f32.gmra.mrb[200].mxu0 %vm5562_vm9, %v15404_v1  ;;  %11484 = vmatmul.mubr.msk.f32.gmra.mrb[196].mxu1 %vm5562_vm9, %v15382_v24  ;;  %v15955_v63 = vpop.f32.mrb[95].mxu0 }
 0xa89   : > { %19538 = vst [vmem:[#allocation22_spill] sm:$0xff] %v15955_v63  ;;  %v15958_v58 = vadd.f32 %v15856_v10, %v5948_v26  ;;  %6821 = vmatprep.mubr.f32.mxu0 %v19396_v23  ;;  %6982 = vmatprep.mubr.f32.mxu1 %v19396_v23 }
 0xa8a   : > { %19537 = vst [vmem:[#allocation21_spill] sm:$0xff] %v15949_v43 }
 0xa8b   : > { %v5952_v5 = vpop.f32.mrb[92].mxu1  ;;  %v15962_v11 = vpop.f32.mrb[96].mxu0 }
 0xa8c   : > { %v7901_v8 = vadd.f32 %v15851_v48, %v5952_v5  ;;  %v5954_v34 = vpop.f32.mrb[93].mxu1  ;;  %11469 = vmatmul.mubr.msk.f32.gmra.mrb[202].mxu0 %vm5562_vm9, %v15415_v20  ;;  %11485 = vmatmul.mubr.msk.f32.gmra.mrb[198].mxu1 %vm5562_vm9, %v15393_v60  ;;  %v15969_v24 = vpop.f32.mrb[97].mxu0  ;;  %v13937_v60 = vld [vmem:[%s19389_s8] sm:$0xff] }
 0xa8d   : > { %v7902_v10 = vadd.f32 %v15873_v31, %v5954_v34  ;;  %6988 = vmatprep.mubr.f32.mxu1 %v19396_v23  ;;  %7065 = vmatprep.mubr.f32.mxu0 %v19396_v23  ;;  %v13941_v34 = vld [vmem:[%s19389_s8 + $0x20] sm:$0xff] }
 0xa8e   : > { %7944 = vrot.lane.b32.xlu0 %v7901_v8, %s14016_s28 }
 0xa8f   : > { %v5958_v30 = vpop.f32.mrb[94].mxu1  ;;  %v15975_v48 = vpop.f32.mrb[98].mxu0 }
 0xa90   : > { %v7921_v42 = vadd.f32 %v15868_v18, %v5958_v30  ;;  %v5960_v7 = vpop.f32.mrb[95].mxu1  ;;  %11486 = vmatmul.mubr.msk.f32.gmra.mrb[200].mxu1 %vm5562_vm9, %v15404_v1  ;;  %11488 = vmatmul.mubr.msk.f32.vlgmr.msra.gmra.mrb[204].mxu0 %vm5562_vm9, %v13937_v60  ;;  %v15984_v31 = vpop.f32.mrb[99].mxu0 }
 0xa91   : > { %v7922_v40 = vadd.f32 %v15889_v12, %v5960_v7  ;;  %6994 = vmatprep.mubr.f32.mxu1 %v19396_v23  ;;  %7071 = vmatprep.mubr.f32.mxu0 %v19396_v23  ;;  %v13938_v12 = vld [vmem:[%s19389_s8 + $0x8] sm:$0xff] }
 0xa92   : > { %7948 = vrot.lane.b32.xlu0 %v7902_v10, %s14016_s28  ;;  %7946 = vrot.lane.b32.xlu1 %v7921_v42, %s14016_s28 }
 0xa93   : > { %v15991_v18 = vpop.f32.mrb[96].mxu1  ;;  %v15993_v1 = vpop.f32.mrb[100].mxu0 }
 0xa94   : > { %v15995_v55 = vpop.f32.mrb[97].mxu1  ;;  %11487 = vmatmul.mubr.msk.f32.gmra.mrb[202].mxu1 %vm5562_vm9, %v15415_v20  ;;  %11489 = vmatmul.mubr.msk.f32.gmra.mrb[206].mxu0 %vm5562_vm9, %v13938_v12  ;;  %v16003_v0 = vpop.f32.mrb[101].mxu0  ;;  %v13939_v20 = vld [vmem:[%s19389_s8 + $0x10] sm:$0xff] }
 0xa95   : > { %7077 = vmatprep.mubr.f32.mxu0 %v19396_v23  ;;  %7238 = vmatprep.mubr.f32.mxu1 %v19396_v23 }
 0xa96   : > { %7950 = vrot.lane.b32.xlu1 %v7922_v40, %s14016_s28  ;;  %v13942_v40 = vld [vmem:[%s19389_s8 + $0x28] sm:$0xff] }
 0xa97   : > { %v16008_v32 = vpop.f32.mrb[98].mxu1  ;;  %v16010_v57 = vpop.f32.mrb[102].mxu0 }
 0xa98   : > { %v16012_v14 = vpop.f32.mrb[99].mxu1  ;;  %11490 = vmatmul.mubr.msk.f32.gmra.mrb[208].mxu0 %vm5562_vm9, %v13939_v20  ;;  %11506 = vmatmul.mubr.msk.f32.vlgmr.msra.gmra.mrb[204].mxu1 %vm5562_vm9, %v13937_v60  ;;  %v16019_v16 = vpop.f32.mrb[103].mxu0 }
 0xa99   : > { %7083 = vmatprep.mubr.f32.mxu0 %v19396_v23  ;;  %7244 = vmatprep.mubr.f32.mxu1 %v19396_v23 }
 0xa9b   : > { %v16023_v54 = vpop.f32.mrb[100].mxu1  ;;  %v16025_v15 = vpop.f32.mrb[104].mxu0 }
 0xa9c   : > { %v16027_v62 = vpop.f32.mrb[101].mxu1  ;;  %11491 = vmatmul.mubr.msk.f32.gmra.mrb[210].mxu0 %vm5562_vm9, %v13940_v25  ;;  %11507 = vmatmul.mubr.msk.f32.gmra.mrb[206].mxu1 %vm5562_vm9, %v13938_v12  ;;  %v16034_v61 = vpop.f32.mrb[105].mxu0 }
 0xa9d   : > { %7089 = vmatprep.mubr.f32.mxu0 %v19396_v23  ;;  %7250 = vmatprep.mubr.f32.mxu1 %v19396_v23 }
 0xa9f   : > { %v16038_v26 = vpop.f32.mrb[102].mxu1  ;;  %v16040_v5 = vpop.f32.mrb[106].mxu0 }
 0xaa0   : > { %v16042_v8 = vpop.f32.mrb[103].mxu1  ;;  %11492 = vmatmul.mubr.msk.f32.gmra.mrb[212].mxu0 %vm5562_vm9, %v13941_v34  ;;  %11508 = vmatmul.mubr.msk.f32.gmra.mrb[208].mxu1 %vm5562_vm9, %v13939_v20  ;;  %v16049_v10 = vpop.f32.mrb[107].mxu0 }
 0xaa1   : > { %7095 = vmatprep.mubr.f32.mxu0 %v19396_v23  ;;  %7256 = vmatprep.mubr.f32.mxu1 %v19396_v23 }
 0xaa3   : > { %v6065_v30 = vpop.f32.mrb[108].mxu0  ;;  %v16053_v42 = vpop.f32.mrb[104].mxu1 }
 0xaa4   : > { %v16056_v7 = vadd.f32 %v6065_v30, %v15720_v41  ;;  %v16058_v60 = vpop.f32.mrb[105].mxu1  ;;  %11493 = vmatmul.mubr.msk.f32.gmra.mrb[214].mxu0 %vm5562_vm9, %v13942_v40  ;;  %11509 = vmatmul.mubr.msk.f32.gmra.mrb[210].mxu1 %vm5562_vm9, %v13940_v25  ;;  %v6067_v12 = vpop.f32.mrb[109].mxu0  ;;  %v13943_v25 = vld [vmem:[%s19389_s8 + $0x30] sm:$0xff] }
 0xaa5   : > { %v16066_v20 = vadd.f32 %v6067_v12, %v15962_v11  ;;  %7101 = vmatprep.mubr.f32.mxu0 %v19396_v23  ;;  %7262 = vmatprep.mubr.f32.mxu1 %v19396_v23 }
 0xaa7   : > { %v6071_v41 = vpop.f32.mrb[110].mxu0  ;;  %v16070_v30 = vpop.f32.mrb[106].mxu1 }
 0xaa8   : > { %v16073_v43 = vadd.f32 %v6071_v41, %v15734_v50  ;;  %v16075_v22 = vpop.f32.mrb[107].mxu1  ;;  %11494 = vmatmul.mubr.msk.f32.gmra.mrb[216].mxu0 %vm5562_vm9, %v13943_v25  ;;  %11510 = vmatmul.mubr.msk.f32.gmra.mrb[212].mxu1 %vm5562_vm9, %v13941_v34  ;;  %v6073_v11 = vpop.f32.mrb[111].mxu0  ;;  %v13944_v34 = vld [vmem:[%s19389_s8 + $0x38] sm:$0xff] }
 0xaa9   : > { %v16083_v12 = vadd.f32 %v6073_v11, %v15975_v48  ;;  %7107 = vmatprep.mubr.f32.mxu0 %v19396_v23  ;;  %7268 = vmatprep.mubr.f32.mxu1 %v19396_v23 }
 0xaab   : > { %v6077_v50 = vpop.f32.mrb[112].mxu0  ;;  %v6238_v41 = vpop.f32.mrb[108].mxu1 }
 0xaac   : > { %v16088_v27 = vadd.f32 %v6077_v50, %v15748_v2  ;;  %v16091_v49 = vadd.f32 %v6238_v41, %v15969_v24  ;;  %v6240_v39 = vpop.f32.mrb[109].mxu1  ;;  %11495 = vmatmul.mubr.msk.f32.gmra.mrb[218].mxu0 %vm5562_vm9, %v13944_v34  ;;  %11511 = vmatmul.mubr.msk.f32.gmra.mrb[214].mxu1 %vm5562_vm9, %v13942_v40  ;;  %v6079_v48 = vpop.f32.mrb[113].mxu0  ;;  %v19539_v2 = vmov 0.0  }
 0xaad   : > { %v16099_v11 = vadd.f32 %v6240_v39, %v15991_v18  ;;  %v16102_v23 = vadd.f32 %v6079_v48, %v15993_v1  ;;  %7113 = vmatprep.mubr.f32.mxu0 %v19539_v2  ;;  %7274 = vmatprep.mubr.f32.mxu1 %v19539_v2  ;;  %v13945_v39 = vld [vmem:[%s19389_s8 + $0x40] sm:$0xff] }
 0xaaf   : > { %v6083_v24 = vpop.f32.mrb[114].mxu0  ;;  %v6244_v50 = vpop.f32.mrb[110].mxu1 }
 0xab0   : > { %v16107_v41 = vadd.f32 %v6083_v24, %v15762_v37  ;;  %v16110_v33 = vadd.f32 %v6244_v50, %v15984_v31  ;;  %v6246_v40 = vpop.f32.mrb[111].mxu1  ;;  %11496 = vmatmul.mubr.msk.f32.gmra.mrb[220].mxu0 %vm5562_vm9, %v13945_v39  ;;  %11512 = vmatmul.mubr.msk.f32.gmra.mrb[216].mxu1 %vm5562_vm9, %v13943_v25  ;;  %v6085_v18 = vpop.f32.mrb[115].mxu0 }
 0xab1   : > { %v16118_v1 = vadd.f32 %v6246_v40, %v16008_v32  ;;  %v16121_v48 = vadd.f32 %v6085_v18, %v16010_v57  ;;  %7119 = vmatprep.mubr.f32.mxu0 %v19539_v2  ;;  %7280 = vmatprep.mubr.f32.mxu1 %v19539_v2  ;;  %v13946_v32 = vld [vmem:[%s19389_s8 + $0x48] sm:$0xff] }
 0xab3   : > { %v6089_v37 = vpop.f32.mrb[116].mxu0  ;;  %v6250_v31 = vpop.f32.mrb[112].mxu1 }
 0xab4   : > { %v16126_v24 = vadd.f32 %v6089_v37, %v15776_v35  ;;  %v16129_v50 = vadd.f32 %v6250_v31, %v16003_v0  ;;  %v6252_v25 = vpop.f32.mrb[113].mxu1  ;;  %11497 = vmatmul.mubr.msk.f32.gmra.mrb[222].mxu0 %vm5562_vm9, %v13946_v32  ;;  %11513 = vmatmul.mubr.msk.f32.gmra.mrb[218].mxu1 %vm5562_vm9, %v13944_v34  ;;  %v6091_v57 = vpop.f32.mrb[117].mxu0 }
 0xab5   : > { %v16137_v40 = vadd.f32 %v6252_v25, %v16023_v54  ;;  %v16140_v18 = vadd.f32 %v6091_v57, %v16025_v15  ;;  %7125 = vmatprep.mubr.f32.mxu0 %v19539_v2  ;;  %7286 = vmatprep.mubr.f32.mxu1 %v19539_v2  ;;  %v13947_v54 = vld [vmem:[%s19389_s8 + $0x50] sm:$0xff] }
 0xab7   : > { %v6095_v35 = vpop.f32.mrb[118].mxu0  ;;  %v6256_v0 = vpop.f32.mrb[114].mxu1 }
 0xab8   : > { %v16145_v37 = vadd.f32 %v6095_v35, %v15791_v13  ;;  %v16148_v31 = vadd.f32 %v6256_v0, %v16019_v16  ;;  %v6258_v34 = vpop.f32.mrb[115].mxu1  ;;  %11498 = vmatmul.mubr.msk.f32.gmra.mrb[224].mxu0 %vm5562_vm9, %v13947_v54  ;;  %11514 = vmatmul.mubr.msk.f32.gmra.mrb[220].mxu1 %vm5562_vm9, %v13945_v39  ;;  %v6097_v15 = vpop.f32.mrb[119].mxu0 }
 0xab9   : > { %v16156_v25 = vadd.f32 %v6258_v34, %v16038_v26  ;;  %v16159_v57 = vadd.f32 %v6097_v15, %v16040_v5  ;;  %7131 = vmatprep.mubr.f32.mxu0 %v19539_v2  ;;  %7292 = vmatprep.mubr.f32.mxu1 %v19539_v2  ;;  %v13948_v26 = vld [vmem:[%s19389_s8 + $0x58] sm:$0xff] }
 0xabb   : > { %v6101_v13 = vpop.f32.mrb[120].mxu0  ;;  %v6262_v16 = vpop.f32.mrb[116].mxu1 }
 0xabc   : > { %v7390_v35 = vadd.f32 %v15812_v28, %v6101_v13  ;;  %v16165_v0 = vadd.f32 %v6262_v16, %v16034_v61  ;;  %v6103_v51 = vpop.f32.mrb[121].mxu0  ;;  %v6264_v39 = vpop.f32.mrb[117].mxu1  ;;  %11499 = vmatmul.mubr.msk.f32.gmra.mrb[226].mxu0 %vm5562_vm9, %v13948_v26  ;;  %11515 = vmatmul.mubr.msk.f32.gmra.mrb[222].mxu1 %vm5562_vm9, %v13946_v32 }
 0xabd   : > { %v16173_v5 = vadd.f32 %v16056_v7, %v6103_v51  ;;  %7137 = vmatprep.mubr.f32.mxu0 %v19539_v2  ;;  %7298 = vmatprep.mubr.f32.mxu1 %v19539_v2  ;;  %v16178_v28 = vadd.f32 %v6264_v39, %v16053_v42  ;;  %v13949_v51 = vld [vmem:[%s19389_s8 + $0x60] sm:$0xff] }
 0xabe   : > { %7439 = vrot.lane.b32.xlu0 %v7390_v35, %s14015_s26 }
 0xabf   : > { %19540 = vst [vmem:[#allocation23_spill] sm:$0xff] %v16173_v5  ;;  %v6107_v61 = vpop.f32.mrb[122].mxu0  ;;  %v6268_v34 = vpop.f32.mrb[118].mxu1 }
 0xac0   : > { %v7410_v15 = vadd.f32 %v15829_v56, %v6107_v61  ;;  %v16183_v13 = vadd.f32 %v6268_v34, %v16049_v10  ;;  %v6109_v32 = vpop.f32.mrb[123].mxu0  ;;  %v6270_v16 = vpop.f32.mrb[119].mxu1  ;;  %11500 = vmatmul.mubr.msk.f32.gmra.mrb[228].mxu0 %vm5562_vm9, %v13949_v51  ;;  %11516 = vmatmul.mubr.msk.f32.gmra.mrb[224].mxu1 %vm5562_vm9, %v13947_v54  ;;  %v13950_v61 = vld [vmem:[%s19389_s8 + $0x68] sm:$0xff] }
 0xac1   : > { %v16191_v42 = vadd.f32 %v16073_v43, %v6109_v32  ;;  %7143 = vmatprep.mubr.f32.mxu0 %v19539_v2  ;;  %7304 = vmatprep.mubr.f32.mxu1 %v19539_v2  ;;  %v16196_v56 = vadd.f32 %v6270_v16, %v16070_v30 }
 0xac2   : > { %7441 = vrot.lane.b32.xlu1 %v7410_v15, %s14015_s26 }
 0xac3   : > { %19541 = vst [vmem:[#allocation24_spill] sm:$0xff] %v16191_v42  ;;  %v6113_v10 = vpop.f32.mrb[124].mxu0  ;;  %v6274_v7 = vpop.f32.mrb[120].mxu1 }
 0xac4   : > { %v16200_v35 = vadd.f32 %v15846_v19, %v6113_v10  ;;  %v16203_v39 = vadd.f32 %v16066_v20, %v6274_v7  ;;  %v6115_v54 = vpop.f32.mrb[125].mxu0  ;;  %v6276_v43 = vpop.f32.mrb[121].mxu1  ;;  %11501 = vmatmul.mubr.msk.f32.gmra.mrb[230].mxu0 %vm5562_vm9, %v13950_v61  ;;  %11517 = vmatmul.mubr.msk.f32.gmra.mrb[226].mxu1 %vm5562_vm9, %v13948_v26 }
 0xac5   : > { %v16211_v30 = vadd.f32 %v16088_v27, %v6115_v54  ;;  %v16214_v34 = vadd.f32 %v16091_v49, %v6276_v43  ;;  %7149 = vmatprep.mubr.f32.mxu0 %v19539_v2  ;;  %7310 = vmatprep.mubr.f32.mxu1 %v19539_v2  ;;  %v13951_v27 = vld [vmem:[%s19389_s8 + $0x70] sm:$0xff] }
 0xac6   : > { %19542 = vst [vmem:[#allocation25_spill] sm:$0xff] %v16203_v39 }
 0xac7   : > { %19543 = vst [vmem:[#allocation26_spill] sm:$0xff] %v16211_v30  ;;  %19544 = vst [vmem:[#allocation27_spill] sm:$0xff] %v16214_v34  ;;  %v6119_v19 = vpop.f32.mrb[126].mxu0  ;;  %v6280_v20 = vpop.f32.mrb[122].mxu1 }
 0xac8   : > { %v16219_v15 = vadd.f32 %v15863_v21, %v6119_v19  ;;  %v16222_v32 = vadd.f32 %v16083_v12, %v6280_v20  ;;  %v6121_v16 = vpop.f32.mrb[127].mxu0  ;;  %v6282_v26 = vpop.f32.mrb[123].mxu1  ;;  %11502 = vmatmul.mubr.msk.f32.gmra.mrb[232].mxu0 %vm5562_vm9, %v13951_v27  ;;  %11518 = vmatmul.mubr.msk.f32.gmra.mrb[228].mxu1 %vm5562_vm9, %v13949_v51 }
 0xac9   : > { %v16230_v49 = vadd.f32 %v16107_v41, %v6121_v16  ;;  %v16233_v10 = vadd.f32 %v16110_v33, %v6282_v26  ;;  %7155 = vmatprep.mubr.f32.mxu0 %v19539_v2  ;;  %7316 = vmatprep.mubr.f32.mxu1 %v19539_v2  ;;  %v13952_v41 = vld [vmem:[%s19389_s8 + $0x78] sm:$0xff] }
 0xaca   : > { %19545 = vst [vmem:[#allocation28_spill] sm:$0xff] %v16222_v32 }
 0xacb   : > { %19546 = vst [vmem:[#allocation29_spill] sm:$0xff] %v16230_v49  ;;  %19547 = vst [vmem:[#allocation30_spill] sm:$0xff] %v16233_v10  ;;  %v6125_v21 = vpop.f32.mrb[128].mxu0  ;;  %v6286_v12 = vpop.f32.mrb[124].mxu1 }
 0xacc   : > { %v7903_v7 = vadd.f32 %v15882_v45, %v6125_v21  ;;  %v16239_v54 = vadd.f32 %v16102_v23, %v6286_v12  ;;  %v6127_v43 = vpop.f32.mrb[129].mxu0  ;;  %v6288_v19 = vpop.f32.mrb[125].mxu1  ;;  %11503 = vmatmul.mubr.msk.f32.gmra.mrb[234].mxu0 %vm5562_vm9, %v13952_v41  ;;  %11519 = vmatmul.mubr.msk.f32.gmra.mrb[230].mxu1 %vm5562_vm9, %v13950_v61 }
 0xacd   : > { %v7904_v33 = vadd.f32 %v16126_v24, %v6127_v43  ;;  %v16248_v51 = vadd.f32 %v16129_v50, %v6288_v19  ;;  %7161 = vmatprep.mubr.f32.mxu0 %v19539_v2  ;;  %7322 = vmatprep.mubr.f32.mxu1 %v19539_v2  ;;  %v13953_v24 = vld [vmem:[%s19389_s8 + $0x80] sm:$0xff] }
 0xace   : > { %19548 = vst [vmem:[#allocation31_spill] sm:$0xff] %v16239_v54  ;;  %7952 = vrot.lane.b32.xlu0 %v7903_v7, %s14016_s28 }
 0xacf   : > { %19549 = vst [vmem:[#allocation32_spill] sm:$0xff] %v16248_v51  ;;  %v6131_v23 = vpop.f32.mrb[130].mxu0  ;;  %v6292_v45 = vpop.f32.mrb[126].mxu1 }
 0xad0   : > { %v7923_v20 = vadd.f32 %v15898_v59, %v6131_v23  ;;  %v16255_v16 = vadd.f32 %v16121_v48, %v6292_v45  ;;  %v6133_v26 = vpop.f32.mrb[131].mxu0  ;;  %v6294_v61 = vpop.f32.mrb[127].mxu1  ;;  %11504 = vmatmul.mubr.msk.f32.gmra.mrb[236].mxu0 %vm5562_vm9, %v13953_v24  ;;  %11520 = vmatmul.mubr.msk.f32.gmra.mrb[232].mxu1 %vm5562_vm9, %v13951_v27 }
 0xad1   : > { %v7924_v50 = vadd.f32 %v16145_v37, %v6133_v26  ;;  %v16264_v21 = vadd.f32 %v16148_v31, %v6294_v61  ;;  %7167 = vmatprep.mubr.f32.mxu0 %v19539_v2  ;;  %7328 = vmatprep.mubr.f32.mxu1 %v19539_v2  ;;  %v13954_v37 = vld [vmem:[%s19389_s8 + $0x88] sm:$0xff] }
 0xad2   : > { %19550 = vst [vmem:[#allocation33_spill] sm:$0xff] %v16255_v16  ;;  %7956 = vrot.lane.b32.xlu0 %v7904_v33, %s14016_s28  ;;  %7954 = vrot.lane.b32.xlu1 %v7923_v20, %s14016_s28 }
 0xad3   : > { %19551 = vst [vmem:[#allocation34_spill] sm:$0xff] %v16264_v21  ;;  %v6298_v59 = vpop.f32.mrb[128].mxu1  ;;  %v6375_v48 = vpop.f32.mrb[132].mxu0 }
 0xad4   : > { %v16271_v12 = vadd.f32 %v16140_v18, %v6298_v59  ;;  %v6300_v7 = vpop.f32.mrb[129].mxu1  ;;  %11505 = vmatmul.mubr.msk.f32.gmra.mrb[238].mxu0 %vm5562_vm9, %v13954_v37  ;;  %v6377_v31 = vpop.f32.mrb[133].mxu0  ;;  %11521 = vmatmul.mubr.msk.f32.gmra.mrb[234].mxu1 %vm5562_vm9, %v13952_v41 }
 0xad5   : > { %v16279_v27 = vadd.f32 %v16165_v0, %v6300_v7  ;;  %7334 = vmatprep.mubr.f32.mxu1 %v19539_v2  ;;  %8780 = vmatprep.mubr.f32.mxu0 %v19539_v2 }
 0xad6   : > { %19552 = vst [vmem:[#allocation35_spill] sm:$0xff] %v16271_v12  ;;  %7958 = vrot.lane.b32.xlu1 %v7924_v50, %s14016_s28 }
 0xad7   : > { %19553 = vst [vmem:[#allocation36_spill] sm:$0xff] %v16279_v27  ;;  %v6304_v18 = vpop.f32.mrb[130].mxu1  ;;  %v6381_v43 = vpop.f32.mrb[134].mxu0 }
 0xad8   : > { %v16285_v19 = vadd.f32 %v16159_v57, %v6304_v18  ;;  %v6306_v33 = vpop.f32.mrb[131].mxu1  ;;  %v6383_v23 = vpop.f32.mrb[135].mxu0  ;;  %11522 = vmatmul.mubr.msk.f32.gmra.mrb[236].mxu1 %vm5562_vm9, %v13953_v24 }
 0xad9   : > { %v16289_v41 = vadd.f32 %v16183_v13, %v6306_v33  ;;  %7340 = vmatprep.mubr.f32.mxu1 %v19539_v2 }
 0xada   : > { %19554 = vst [vmem:[#allocation37_spill] sm:$0xff] %v16285_v19 }
 0xadb   : > { %19555 = vst [vmem:[#allocation38_spill] sm:$0xff] %v16289_v41  ;;  %v6548_v0 = vpop.f32.mrb[132].mxu1  ;;  %v6387_v45 = vpop.f32.mrb[136].mxu0 }
 0xadc   : > { %v16292_v20 = vpop.f32.mrb[133].mxu1  ;;  %v6389_v26 = vpop.f32.mrb[137].mxu0  ;;  %11523 = vmatmul.mubr.msk.f32.gmra.mrb[238].mxu1 %vm5562_vm9, %v13954_v37 }
 0xadd   : > { %8927 = vmatprep.mubr.f32.mxu1 %v19539_v2 }
 0xadf   : > { %v6554_v57 = vpop.f32.mrb[134].mxu1  ;;  %v6393_v61 = vpop.f32.mrb[138].mxu0 }
 0xae0   : > { %v16296_v50 = vpop.f32.mrb[135].mxu1  ;;  %v6395_v59 = vpop.f32.mrb[139].mxu0 }
 0xae3   : > { %v6560_v24 = vpop.f32.mrb[136].mxu1  ;;  %v6399_v7 = vpop.f32.mrb[140].mxu0 }
 0xae4   : > { %v16298_v13 = vpop.f32.mrb[137].mxu1  ;;  %v6401_v18 = vpop.f32.mrb[141].mxu0 }
 0xae7   : > { %v6566_v33 = vpop.f32.mrb[138].mxu1  ;;  %v6405_v21 = vpop.f32.mrb[142].mxu0 }
 0xae8   : > { %v16300_v16 = vpop.f32.mrb[139].mxu1  ;;  %v6407_v51 = vpop.f32.mrb[143].mxu0 }
 0xaeb   : > { %v6411_v49 = vpop.f32.mrb[144].mxu0  ;;  %v6572_v54 = vpop.f32.mrb[140].mxu1 }
 0xaec   : > { %v7355_v37 = vadd.f32 %v6411_v49, %v15995_v55  ;;  %v16303_v30 = vpop.f32.mrb[141].mxu1  ;;  %v6413_v41 = vpop.f32.mrb[145].mxu0 }
 0xaed   : > { %v7356_v19 = vadd.f32 %v6413_v41, %v6375_v48 }
 0xaef   : > { %v6417_v27 = vpop.f32.mrb[146].mxu0  ;;  %v6578_v12 = vpop.f32.mrb[142].mxu1 }
 0xaf0   : > { %v7375_v10 = vadd.f32 %v6417_v27, %v16012_v14  ;;  %v16306_v32 = vpop.f32.mrb[143].mxu1  ;;  %v6419_v34 = vpop.f32.mrb[147].mxu0 }
 0xaf1   : > { %v7376_v42 = vadd.f32 %v6419_v34, %v6381_v43 }
 0xaf3   : > { %v6423_v39 = vpop.f32.mrb[148].mxu0  ;;  %v6584_v5 = vpop.f32.mrb[144].mxu1 }
 0xaf4   : > { %v7788_v52 = vadd.f32 %v6423_v39, %v16027_v62  ;;  %v7357_v63 = vadd.f32 %v6584_v5, %v6377_v31  ;;  %v6586_v6 = vpop.f32.mrb[145].mxu1  ;;  %v6425_v44 = vpop.f32.mrb[149].mxu0 }
 0xaf5   : > { %v16309_v55 = vadd.f32 %v6586_v6, %v6548_v0  ;;  %v7789_v49 = vadd.f32 %v6425_v44, %v6387_v45 }
 0xaf7   : > { %v6429_v17 = vpop.f32.mrb[150].mxu0  ;;  %v6590_v48 = vpop.f32.mrb[146].mxu1 }
 0xaf8   : > { %v7808_v41 = vadd.f32 %v6429_v17, %v16042_v8  ;;  %v7377_v4 = vadd.f32 %v6590_v48, %v6383_v23  ;;  %v6592_v14 = vpop.f32.mrb[147].mxu1  ;;  %v6431_v27 = vpop.f32.mrb[151].mxu0 }
 0xaf9   : > { %v7809_v3 = vadd.f32 %v6431_v27, %v6393_v61  ;;  %v16312_v36 = vadd.f32 %v6592_v14, %v6554_v57 }
 0xafb   : > { %v6435_v34 = vpop.f32.mrb[152].mxu0  ;;  %v6596_v43 = vpop.f32.mrb[148].mxu1 }
 0xafc   : > { %v7790_v46 = vadd.f32 %v6596_v43, %v6389_v26  ;;  %v6598_v62 = vpop.f32.mrb[149].mxu1  ;;  %v6437_v5 = vpop.f32.mrb[153].mxu0  ;;  %v7868_v39 = vadd.f32 %v6435_v34, %v16058_v60 }
 0xafd   : > { %v7869_v6 = vadd.f32 %v6437_v5, %v6399_v7  ;;  %v16315_v31 = vadd.f32 %v6598_v62, %v6560_v24 }
 0xaff   : > { %v6441_v44 = vpop.f32.mrb[154].mxu0  ;;  %v6602_v0 = vpop.f32.mrb[150].mxu1 }
 0xb00   : > { %v7810_v45 = vadd.f32 %v6602_v0, %v6395_v59  ;;  %v6604_v17 = vpop.f32.mrb[151].mxu1  ;;  %v7888_v8 = vadd.f32 %v6441_v44, %v16075_v22  ;;  %v6443_v23 = vpop.f32.mrb[155].mxu0 }
 0xb01   : > { %v16318_v61 = vadd.f32 %v6604_v17, %v6566_v33  ;;  %v7889_v57 = vadd.f32 %v6443_v23, %v6405_v21 }
 0xb03   : > { %v6447_v48 = vpop.f32.mrb[156].mxu0  ;;  %v6608_v14 = vpop.f32.mrb[152].mxu1 }
 0xb04   : > { %v16321_v26 = vadd.f32 %v16099_v11, %v6447_v48  ;;  %v6610_v27 = vpop.f32.mrb[153].mxu1  ;;  %v7870_v60 = vadd.f32 %v6608_v14, %v6401_v18  ;;  %v6449_v7 = vpop.f32.mrb[157].mxu0 }
 0xb05   : > { %v16323_v24 = vadd.f32 %v6610_v27, %v6572_v54  ;;  %v16325_v34 = vadd.f32 %v7355_v37, %v6449_v7 }
 0xb06   : > { %19556 = vst [vmem:[#allocation39_spill] sm:$0xff] %v16321_v26 }
 0xb07   : > { %19557 = vst [vmem:[#allocation40_spill] sm:$0xff] %v16323_v24  ;;  %19558 = vst [vmem:[#allocation41_spill] sm:$0xff] %v16325_v34  ;;  %v6453_v59 = vpop.f32.mrb[158].mxu0  ;;  %v6614_v43 = vpop.f32.mrb[154].mxu1 }
 0xb08   : > { %v16328_v22 = vadd.f32 %v16118_v1, %v6453_v59  ;;  %v6616_v33 = vpop.f32.mrb[155].mxu1  ;;  %v6455_v62 = vpop.f32.mrb[159].mxu0  ;;  %v7890_v21 = vadd.f32 %v6614_v43, %v6407_v51 }
 0xb09   : > { %v16330_v5 = vadd.f32 %v7375_v10, %v6455_v62  ;;  %v16332_v44 = vadd.f32 %v6616_v33, %v6578_v12 }
 0xb0a   : > { %19559 = vst [vmem:[#allocation42_spill] sm:$0xff] %v16328_v22 }
 0xb0b   : > { %19560 = vst [vmem:[#allocation43_spill] sm:$0xff] %v16330_v5  ;;  %19561 = vst [vmem:[#allocation44_spill] sm:$0xff] %v16332_v44  ;;  %v6459_v11 = vpop.f32.mrb[160].mxu0  ;;  %v6620_v0 = vpop.f32.mrb[156].mxu1 }
 0xb0c   : > { %v16335_v18 = vadd.f32 %v16137_v40, %v6459_v11  ;;  %v16337_v54 = vadd.f32 %v7356_v19, %v6620_v0  ;;  %v6461_v37 = vpop.f32.mrb[161].mxu0  ;;  %v6622_v17 = vpop.f32.mrb[157].mxu1 }
 0xb0d   : > { %v16339_v23 = vadd.f32 %v7788_v52, %v6461_v37  ;;  %v16341_v1 = vadd.f32 %v7357_v63, %v6622_v17 }
 0xb0e   : > { %19562 = vst [vmem:[#allocation45_spill] sm:$0xff] %v16335_v18  ;;  %19563 = vst [vmem:[#allocation46_spill] sm:$0xff] %v16337_v54 }
 0xb0f   : > { %19564 = vst [vmem:[#allocation47_spill] sm:$0xff] %v16339_v23  ;;  %19565 = vst [vmem:[#allocation48_spill] sm:$0xff] %v16341_v1  ;;  %v6465_v48 = vpop.f32.mrb[162].mxu0  ;;  %v6626_v14 = vpop.f32.mrb[158].mxu1 }
 0xb10   : > { %v16344_v10 = vadd.f32 %v16156_v25, %v6465_v48  ;;  %v16346_v51 = vadd.f32 %v7376_v42, %v6626_v14  ;;  %v6467_v12 = vpop.f32.mrb[163].mxu0  ;;  %v6628_v27 = vpop.f32.mrb[159].mxu1 }
 0xb11   : > { %v16348_v7 = vadd.f32 %v7808_v41, %v6467_v12  ;;  %v16350_v40 = vadd.f32 %v7377_v4, %v6628_v27  ;;  %v16376_v27 = vpop.permute.xlu0 %8365 }
 0xb12   : > { %19566 = vst [vmem:[#allocation49_spill] sm:$0xff] %v16344_v10  ;;  %19567 = vst [vmem:[#allocation50_spill] sm:$0xff] %v16346_v51 }
 0xb13   : > { %19568 = vst [vmem:[#allocation51_spill] sm:$0xff] %v16348_v7  ;;  %19569 = vst [vmem:[#allocation52_spill] sm:$0xff] %v16350_v40  ;;  %v6471_v19 = vpop.f32.mrb[164].mxu0  ;;  %v6632_v59 = vpop.f32.mrb[160].mxu1 }
 0xb14   : > { %v16353_v52 = vadd.f32 %v16178_v28, %v6471_v19  ;;  %v16355_v63 = vadd.f32 %v7789_v49, %v6632_v59  ;;  %v6473_v43 = vpop.f32.mrb[165].mxu0  ;;  %v6634_v33 = vpop.f32.mrb[161].mxu1  ;;  %19580 = vst [vmem:[#allocation63_spill] sm:$0xff] %v16376_v27 }
 0xb15   : > { %v16357_v62 = vadd.f32 %v7868_v39, %v6473_v43  ;;  %v16359_v25 = vadd.f32 %v7790_v46, %v6634_v33  ;;  %v16384_v43 = vpop.permute.xlu1 %8370 }
 0xb16   : > { %19570 = vst [vmem:[#allocation53_spill] sm:$0xff] %v16353_v52  ;;  %19571 = vst [vmem:[#allocation54_spill] sm:$0xff] %v16355_v63 }
 0xb17   : > { %19572 = vst [vmem:[#allocation55_spill] sm:$0xff] %v16357_v62  ;;  %19573 = vst [vmem:[#allocation56_spill] sm:$0xff] %v16359_v25  ;;  %v6477_v42 = vpop.f32.mrb[166].mxu0  ;;  %v6638_v11 = vpop.f32.mrb[162].mxu1 }
 0xb18   : > { %v16362_v41 = vadd.f32 %v16196_v56, %v6477_v42  ;;  %v16364_v4 = vadd.f32 %v7809_v3, %v6638_v11  ;;  %v6479_v0 = vpop.f32.mrb[167].mxu0  ;;  %v6640_v37 = vpop.f32.mrb[163].mxu1  ;;  %19583 = vst [vmem:[#allocation66_spill] sm:$0xff] %v16384_v43 }
 0xb19   : > { %v16366_v17 = vadd.f32 %v7888_v8, %v6479_v0  ;;  %v16368_v28 = vadd.f32 %v7810_v45, %v6640_v37 }
 0xb1a   : > { %19574 = vst [vmem:[#allocation57_spill] sm:$0xff] %v16362_v41  ;;  %19575 = vst [vmem:[#allocation58_spill] sm:$0xff] %v16364_v4 }
 0xb1b   : > { %19576 = vst [vmem:[#allocation59_spill] sm:$0xff] %v16366_v17  ;;  %19577 = vst [vmem:[#allocation60_spill] sm:$0xff] %v16368_v28  ;;  %v6644_v49 = vpop.f32.mrb[164].mxu1  ;;  %v6721_v48 = vpop.f32.mrb[168].mxu0 }
 0xb1c   : > { %v16370_v14 = vadd.f32 %v7869_v6, %v6644_v49  ;;  %v6646_v39 = vpop.f32.mrb[165].mxu1  ;;  %v16372_v46 = vpop.f32.mrb[169].mxu0 }
 0xb1d   : > { %v16374_v12 = vadd.f32 %v7870_v60, %v6646_v39  ;;  %v16386_v6 = vpop.permute.xlu0 %7431 }
 0xb1e   : > { %19578 = vst [vmem:[#allocation61_spill] sm:$0xff] %v16370_v14  ;;  %19584 = vst [vmem:[#allocation67_spill] sm:$0xff] %v16386_v6  ;;  %v5384_v14 = vld [vmem:[%s19385_s4 + $0x8] sm:$0xff] }
 0xb1f   : > { %19579 = vst [vmem:[#allocation62_spill] sm:$0xff] %v16374_v12  ;;  %v6650_v56 = vpop.f32.mrb[166].mxu1  ;;  %v6727_v3 = vpop.f32.mrb[170].mxu0 }
 0xb20   : > { %v16378_v19 = vadd.f32 %v7889_v57, %v6650_v56  ;;  %v6652_v59 = vpop.f32.mrb[167].mxu1  ;;  %v16380_v8 = vpop.f32.mrb[171].mxu0 }
 0xb21   : > { %v16382_v45 = vadd.f32 %v7890_v21, %v6652_v59  ;;  %v7507_v21 = vlaneseq  ;;  %v7436_v39 = vpop.permute.xlu0 %7435  ;;  %v16400_v56 = vpop.permute.xlu1 %7433 }
 0xb22   : > { %19581 = vst [vmem:[#allocation64_spill] sm:$0xff] %v16378_v19  ;;  %19587 = vst [vmem:[#allocation70_spill] sm:$0xff] %v16400_v56 }
 0xb23   : > { %19582 = vst [vmem:[#allocation65_spill] sm:$0xff] %v16382_v45  ;;  %v6894_v33 = vpop.f32.mrb[168].mxu1  ;;  %v6733_v42 = vpop.f32.mrb[172].mxu0  ;;  %v16410_v7 = vshrl.u32 %v7507_v21, 7  ;;  %v16432_v1 = vand.u32 127, %v7507_v21 }
 0xb24   : > { %v16388_v11 = vpop.f32.mrb[169].mxu1  ;;  %v16390_v60 = vpop.f32.mrb[173].mxu0 }
 0xb25   : > { %19585 = vst [vmem:[#allocation68_spill] sm:$0xff] %v16388_v11  ;;  %v16416_v10 = vpop.permute.xlu0 %7944  ;;  %v16423_v19 = vsub.s32 0, %v16410_v7  ;;  %v16425_v12 = vpop.permute.xlu1 %7437  ;;  %v16445_v62 = vsub.s32 4, %v16410_v7  ;;  %vm7509_vm10 = vcmp.lt.s32.totalorder %v16432_v1, 1  ;;  %vm8020_vm11 = vcmp.lt.s32.totalorder %v16432_v1, 127 }
 0xb26   : > { %19589 = vst [vmem:[#allocation72_spill] sm:$0xff] %v16416_v10 }
 0xb27   : > { %v16392_v0 = vpop.f32.mrb[170].mxu1  ;;  %v16394_v37 = vpop.f32.mrb[174].mxu0  ;;  %v7571_v17 = vrot.slane %v5384_v14, %v16423_v19  ;;  %19594 = vst [vmem:[#allocation77_spill] sm:$0xff] %v16445_v62 }
 0xb28   : > { %v16396_v57 = vpop.f32.mrb[171].mxu1  ;;  %v16398_v49 = vpop.f32.mrb[175].mxu0 }
 0xb29   : > { %19586 = vst [vmem:[#allocation69_spill] sm:$0xff] %v16396_v57  ;;  %v16440_v34 = vpop.permute.xlu0 %7948  ;;  %v16442_v41 = vpop.permute.xlu1 %7946 }
 0xb2a   : > { %19592 = vst [vmem:[#allocation75_spill] sm:$0xff] %v16440_v34  ;;  %19593 = vst [vmem:[#allocation76_spill] sm:$0xff] %v16442_v41 }
 0xb2b   : > { %v16402_v59 = vpop.f32.mrb[172].mxu1  ;;  %v16404_v28 = vpop.f32.mrb[176].mxu0 }
 0xb2c   : > { %v16406_v4 = vpop.f32.mrb[173].mxu1  ;;  %v16408_v25 = vpop.f32.mrb[177].mxu0 }
 0xb2d   : > { %19588 = vst [vmem:[#allocation71_spill] sm:$0xff] %v16406_v4  ;;  %v11335_v4 = vrot.slane %v5384_v14, 9  ;;  %v16484_v38 = vpop.permute.xlu1 %7950 }
 0xb2f   : > { %v16412_v63 = vpop.f32.mrb[174].mxu1  ;;  %v16414_v23 = vpop.f32.mrb[178].mxu0 }
 0xb30   : > { %v16418_v18 = vpop.f32.mrb[175].mxu1  ;;  %v16420_v45 = vpop.f32.mrb[179].mxu0 }
 0xb31   : > { %19590 = vst [vmem:[#allocation73_spill] sm:$0xff] %v16418_v18  ;;  %v5405_v18 = vsub.f32 1.0, %v5384_v14  ;;  %v16466_v57 = vpop.permute.xlu0 %7439 }
 0xb32   : > { %19597 = vst [vmem:[#allocation80_spill] sm:$0xff] %v16466_v57 }
 0xb33   : > { %v6757_v40 = vpop.f32.mrb[180].mxu0  ;;  %v16430_v51 = vpop.f32.mrb[176].mxu1  ;;  %v16491_v44 = vsub.f32 %v5405_v18, %v11335_v4 }
 0xb34   : > { %v16435_v10 = vadd.f32 %v6757_v40, %v16292_v20  ;;  %v16437_v5 = vpop.f32.mrb[177].mxu1  ;;  %v6759_v54 = vpop.f32.mrb[181].mxu0  ;;  %v16453_v20 = vsub.s32 1, %v16410_v7 }
 0xb35   : > { %19591 = vst [vmem:[#allocation74_spill] sm:$0xff] %v16437_v5  ;;  %v16447_v52 = vadd.f32 %v6759_v54, %v6721_v48  ;;  %v16463_v54 = vrot.slane %v7571_v17, %v16423_v19  ;;  %v7575_v48 = vrot.slane %v5384_v14, %v16445_v62 }
 0xb36   : > { %v8072_v11 = vrot.slane %v5384_v14, %v16453_v20 }
 0xb37   : > { %v6763_v22 = vpop.f32.mrb[182].mxu0  ;;  %v16449_v21 = vpop.f32.mrb[178].mxu1  ;;  %19596 = vst [vmem:[#allocation79_spill] sm:$0xff] %v16463_v54 }
 0xb38   : > { %v16456_v40 = vadd.f32 %v6763_v22, %v16296_v50  ;;  %v16458_v26 = vpop.f32.mrb[179].mxu1  ;;  %v6765_v5 = vpop.f32.mrb[183].mxu0  ;;  %v7544_v50 = vsel %vm7509_vm10, %v16386_v6, %v7436_v39  ;;  %v16473_v22 = vsub.s32 5, %v16410_v7 }
 0xb39   : > { %19595 = vst [vmem:[#allocation78_spill] sm:$0xff] %v16458_v26  ;;  %v16460_v41 = vadd.f32 %v6765_v5, %v6727_v3  ;;  %v16476_v26 = vsub.s32 2, %v16410_v7  ;;  %v7742_v24 = vmul.f32 %v16463_v54, %v7544_v50 }
 0xb3a   : > { %v8076_v2 = vrot.slane %v5384_v14, %v16473_v22 }
 0xb3b   : > { %v6769_v5 = vpop.f32.mrb[184].mxu0  ;;  %v6930_v3 = vpop.f32.mrb[180].mxu1  ;;  %19598 = vst [vmem:[#allocation81_spill] sm:$0xff] %v16476_v26 }
 0xb3c   : > { %v16479_v17 = vadd.f32 %v6769_v5, %v16298_v13  ;;  %v16482_v62 = vadd.f32 %v6930_v3, %v16372_v46  ;;  %v6932_v53 = vpop.f32.mrb[181].mxu1  ;;  %v6771_v9 = vpop.f32.mrb[185].mxu0  ;;  %v16495_v13 = vrot.slane %v7575_v48, %v16423_v19  ;;  %v16498_v46 = vrot.slane %v8072_v11, %v16453_v20 }
 0xb3d   : > { %v16486_v47 = vadd.f32 %v6932_v53, %v6894_v33  ;;  %v16488_v6 = vadd.f32 %v6771_v9, %v6733_v42  ;;  %v7542_v5 = vsel %vm7509_vm10, %v7436_v39, %v16466_v57  ;;  %v7545_v9 = vsel %vm7509_vm10, %v16400_v56, %v16425_v12  ;;  %v16514_v11 = vpop.permute.xlu1 %7441 }
 0xb3e   : > { %19599 = vst [vmem:[#allocation82_spill] sm:$0xff] %v16495_v13  ;;  %19600 = vst [vmem:[#allocation83_spill] sm:$0xff] %v16498_v46  ;;  %v16523_v3 = vrot.slane %v8076_v2, %v16453_v20  ;;  %v7543_v2 = vsel %vm7509_vm10, %v16425_v12, %v16514_v11 }
 0xb3f   : > { %v6775_v53 = vpop.f32.mrb[186].mxu0  ;;  %v6936_v33 = vpop.f32.mrb[182].mxu1  ;;  %19601 = vst [vmem:[#allocation84_spill] sm:$0xff] %v16514_v11 }
 0xb40   : > { %v16509_v18 = vadd.f32 %v6775_v53, %v16300_v16  ;;  %v16512_v4 = vadd.f32 %v6936_v33, %v16380_v8  ;;  %v6938_v14 = vpop.f32.mrb[183].mxu1  ;;  %v7953_v42 = vpop.permute.xlu0 %7952  ;;  %19602 = vst [vmem:[#allocation85_spill] sm:$0xff] %v16523_v3  ;;  %v8434_v16 = vrot.slane %v16491_v44, %v16476_v26  ;;  %v8283_v8 = vadd.f32 %v15941_v29, %v7742_v24 }
 0xb41   : > { %v16517_v39 = vadd.f32 %v6938_v14, %v16392_v0  ;;  %v8053_v48 = vsel %vm8020_vm11, %v16440_v34, %v7953_v42  ;;  %v6777_v50 = vpop.f32.mrb[187].mxu0  ;;  %v7743_v53 = vmul.f32 %v16495_v13, %v7542_v5  ;;  %v7762_v14 = vmul.f32 %v16463_v54, %v7545_v9 }
 0xb42   : > { %v8243_v33 = vmul.f32 %v16498_v46, %v8053_v48  ;;  %v16531_v0 = vadd.f32 %v6777_v50, %v16394_v37  ;;  %v16535_v34 = vsub.s32 6, %v16410_v7  ;;  %v8534_v12 = vrot.slane %v8434_v16, %v16476_v26 }
 0xb43   : > { %v6781_v57 = vpop.f32.mrb[188].mxu0  ;;  %v6942_v56 = vpop.f32.mrb[184].mxu1 }
 0xb44   : > { %19603 = vst [vmem:[#allocation86_spill] sm:$0xff] %v16535_v34  ;;  %v8323_v29 = vadd.f32 %v8283_v8, %v8243_v33  ;;  %v16542_v24 = vadd.f32 %v6781_v57, %v16303_v30  ;;  %v16545_v5 = vadd.f32 %v6942_v56, %v16390_v60  ;;  %v6944_v37 = vpop.f32.mrb[185].mxu1  ;;  %v16547_v48 = vpop.permute.xlu0 %7956  ;;  %v8284_v30 = vadd.f32 %v16200_v35, %v7743_v53 }
 0xb45   : > { %19604 = vst [vmem:[#allocation87_spill] sm:$0xff] %v16547_v48  ;;  %v16550_v9 = vadd.f32 %v6944_v37, %v16402_v59  ;;  %v8051_v7 = vsel %vm8020_vm11, %v7953_v42, %v16547_v48  ;;  %v7955_v50 = vpop.permute.xlu1 %7954  ;;  %v6783_v54 = vpop.f32.mrb[189].mxu0  ;;  %v8303_v59 = vadd.f32 %v15958_v58, %v7762_v14  ;;  %v7763_v8 = vmul.f32 %v16495_v13, %v7543_v2 }
 0xb46   : > { %v8244_v57 = vmul.f32 %v16523_v3, %v8051_v7  ;;  %v8054_v60 = vsel %vm8020_vm11, %v16484_v38, %v7955_v50  ;;  %v16562_v56 = vadd.f32 %v6783_v54, %v16404_v28  ;;  %v8438_v35 = vrot.slane %v16491_v44, %v16535_v34 }
 0xb47   : > { %v8263_v42 = vmul.f32 %v16498_v46, %v8054_v60  ;;  %v6787_v33 = vpop.f32.mrb[190].mxu0  ;;  %v6948_v37 = vpop.f32.mrb[186].mxu1  ;;  %v8375_v16 = vadd.f32 %v16376_v27, %v8323_v29 }
 0xb48   : > { %v8324_v53 = vadd.f32 %v8284_v30, %v8244_v57  ;;  %v16571_v7 = vadd.f32 %v6787_v33, %v16306_v32  ;;  %v16574_v28 = vadd.f32 %v6948_v37, %v16398_v49  ;;  %v6950_v54 = vpop.f32.mrb[187].mxu1  ;;  %v6789_v58 = vpop.f32.mrb[191].mxu0  ;;  %v8304_v32 = vadd.f32 %v16219_v15, %v7763_v8 }
 0xb49   : > { %v8343_v14 = vadd.f32 %v8303_v59, %v8263_v42  ;;  %v16577_v2 = vadd.f32 %v6950_v54, %v16412_v63  ;;  %v16579_v60 = vpop.permute.xlu1 %7958  ;;  %v16582_v46 = vadd.f32 %v6789_v58, %v16414_v23  ;;  %v8538_v63 = vrot.slane %v8438_v35, %v16476_v26 }
 0xb4a   : > { %19605 = vst [vmem:[#allocation88_spill] sm:$0xff] %v16579_v60  ;;  %v8052_v44 = vsel %vm8020_vm11, %v7955_v50, %v16579_v60  ;;  %v8376_v50 = vadd.f32 %v16376_v27, %v8324_v53  ;;  %v8605_v37 = vmul.f32 %v8534_v12, %v8375_v16 }
 0xb4b   : > { %v8395_v49 = vadd.f32 %v16384_v43, %v8343_v14  ;;  %v8264_v29 = vmul.f32 %v16523_v3, %v8052_v44  ;;  %v6793_v30 = vpop.f32.mrb[192].mxu0  ;;  %v6954_v57 = vpop.f32.mrb[188].mxu1  ;;  %v16723_v3 = vld [vmem:[%s19391_s10 + $0x18] sm:$0xff] }
 0xb4c   : > { %v16592_v59 = vadd.f32 %v16309_v55, %v6793_v30  ;;  %v16595_v23 = vadd.f32 %v6954_v57, %v16408_v25  ;;  %v6795_v42 = vpop.f32.mrb[193].mxu0  ;;  %v6956_v33 = vpop.f32.mrb[189].mxu1 }
 0xb4d   : > { %v8344_v15 = vadd.f32 %v8304_v32, %v8264_v29  ;;  %v16599_v8 = vadd.f32 %v16435_v10, %v6795_v42  ;;  %v16602_v54 = vadd.f32 %v6956_v33, %v16430_v51  ;;  %v8625_v58 = vmul.f32 %v8534_v12, %v8395_v49 }
 0xb4e   : > { %v8606_v51 = vmul.f32 %v8538_v63, %v8376_v50 }
 0xb4f   : > { %v6799_v35 = vpop.f32.mrb[194].mxu0  ;;  %v6960_v14 = vpop.f32.mrb[190].mxu1  ;;  %v8396_v55 = vadd.f32 %v16384_v43, %v8344_v15  ;;  %v13825_v44 = vpack.c.bf16 %v8625_v58, %v8605_v37 }
 0xb50   : > { %v16606_v25 = vadd.f32 %v16312_v36, %v6799_v35  ;;  %v7894_v30 = vadd.f32 %v6960_v14, %v16420_v45  ;;  %v6801_v53 = vpop.f32.mrb[195].mxu0  ;;  %v6962_v16 = vpop.f32.mrb[191].mxu1  ;;  %v19610_v14 = vld [vmem:[#allocation40_spill] sm:$0xff] }
 0xb51   : > { %v16610_v32 = vadd.f32 %v16456_v40, %v6801_v53  ;;  %v16613_v10 = vadd.f32 %v6962_v16, %v16449_v21  ;;  %v8626_v12 = vmul.f32 %v8538_v63, %v8396_v55 }
 0xb53   : > { %v6805_v49 = vpop.f32.mrb[196].mxu0  ;;  %v6966_v29 = vpop.f32.mrb[192].mxu1  ;;  %v13823_v57 = vpack.c.bf16 %v8626_v12, %v8606_v51 }
 0xb54   : > { %v16616_v42 = vadd.f32 %v16315_v31, %v6805_v49  ;;  %v16619_v36 = vadd.f32 %v16447_v52, %v6966_v29  ;;  %v6807_v45 = vpop.f32.mrb[197].mxu0  ;;  %v6968_v33 = vpop.f32.mrb[193].mxu1 }
 0xb55   : > { %v16622_v37 = vadd.f32 %v16479_v17, %v6807_v45  ;;  %v16625_v40 = vadd.f32 %v16482_v62, %v6968_v33  ;;  %13824 = vmatprep.subr.bf16.mxu1 %v13823_v57 }
 0xb56   : > { %19606 = vst [vmem:[#allocation89_spill] sm:$0xff] %v16616_v42  ;;  %13826 = vmatpush1.bf16.msra.mxu1 %v13825_v44 }
 0xb57   : > { %19607 = vst [vmem:[#allocation90_spill] sm:$0xff] %v16622_v37  ;;  %v6811_v21 = vpop.f32.mrb[198].mxu0  ;;  %v6972_v63 = vpop.f32.mrb[194].mxu1 }
 0xb58   : > { %v16628_v50 = vadd.f32 %v16318_v61, %v6811_v21  ;;  %v16631_v31 = vadd.f32 %v16460_v41, %v6972_v63  ;;  %v6813_v52 = vpop.f32.mrb[199].mxu0  ;;  %v6974_v15 = vpop.f32.mrb[195].mxu1 }
 0xb59   : > { %v16634_v58 = vadd.f32 %v16509_v18, %v6813_v52  ;;  %v16637_v17 = vadd.f32 %v16512_v4, %v6974_v15  ;;  %v19613_v4 = vld [vmem:[#allocation44_spill] sm:$0xff] }
 0xb5a   : > { %19608 = vst [vmem:[#allocation91_spill] sm:$0xff] %v16628_v50 }
 0xb5b   : > { %19609 = vst [vmem:[#allocation92_spill] sm:$0xff] %v16634_v58  ;;  %v6817_v62 = vpop.f32.mrb[200].mxu0  ;;  %v6978_v35 = vpop.f32.mrb[196].mxu1 }
 0xb5c   : > { %v16640_v55 = vadd.f32 %v19610_v14, %v6817_v62  ;;  %v16643_v44 = vadd.f32 %v16488_v6, %v6978_v35  ;;  %v6819_v61 = vpop.f32.mrb[201].mxu0  ;;  %v6980_v53 = vpop.f32.mrb[197].mxu1  ;;  %v16691_v14 = vld [vmem:[%s19391_s10 + $0x8] sm:$0xff] }
 0xb5d   : > { %v16646_v41 = vadd.f32 %v16542_v24, %v6819_v61  ;;  %v16649_v16 = vadd.f32 %v16545_v5, %v6980_v53  ;;  %19618 = vst [vmem:[#allocation96_spill] sm:$0xff] %v16691_v14 }
 0xb5e   : > { %19611 = vst [vmem:[#allocation40_spill] sm:$0xff] %v16643_v44 }
 0xb5f   : > { %19612 = vst [vmem:[#allocation93_spill] sm:$0xff] %v16649_v16  ;;  %v6823_v18 = vpop.f32.mrb[202].mxu0  ;;  %v6984_v51 = vpop.f32.mrb[198].mxu1 }
 0xb60   : > { %v16652_v12 = vadd.f32 %v19613_v4, %v6823_v18  ;;  %v16655_v49 = vadd.f32 %v16531_v0, %v6984_v51  ;;  %v6825_v29 = vpop.f32.mrb[203].mxu0  ;;  %v6986_v57 = vpop.f32.mrb[199].mxu1  ;;  %v16673_v0 = vld [vmem:[%s19391_s10] sm:$0xff]  ;;  %v16707_v51 = vld [vmem:[%s19391_s10 + $0x10] sm:$0xff] }
 0xb61   : > { %v16658_v6 = vadd.f32 %v16571_v7, %v6825_v29  ;;  %v16661_v45 = vadd.f32 %v16574_v28, %v6986_v57  ;;  %19616 = vst [vmem:[#allocation95_spill] sm:$0xff] %v16673_v0  ;;  %11542 = vmatmul.mubr.msk.f32.vlgmr.msra.gmra.mrb[240].mxu1 %vm8661_vm12, %v16673_v0  ;;  %v19617_v28 = vmov 0.0   ;;  %19619 = vst [vmem:[#allocation97_spill] sm:$0xff] %v16707_v51  ;;  %v19620_v4 = vld [vmem:[#allocation3_spill] sm:$0xff]  ;;  %v19621_v29 = vld [vmem:[#allocation10_spill] sm:$0xff] }
 0xb62   : > { %19614 = vst [vmem:[#allocation44_spill] sm:$0xff] %v16655_v49  ;;  %8933 = vmatprep.mubr.f32.mxu1 %v19617_v28  ;;  %19622 = vst [vmem:[#allocation3_spill] sm:$0xff] %v16723_v3  ;;  %v19637_v0 = vld [vmem:[#allocation69_spill] sm:$0xff] }
 0xb63   : > { %19615 = vst [vmem:[#allocation94_spill] sm:$0xff] %v16661_v45  ;;  %v6990_v24 = vpop.f32.mrb[200].mxu1  ;;  %v16663_v33 = vpop.f32.mrb[204].mxu0 }
 0xb64   : > { %v16666_v5 = vadd.f32 %v16562_v56, %v6990_v24  ;;  %v6992_v21 = vpop.f32.mrb[201].mxu1  ;;  %v16668_v63 = vpop.f32.mrb[205].mxu0 }
 0xb65   : > { %v16676_v7 = vadd.f32 %v16595_v23, %v6992_v21  ;;  %11543 = vmatmul.mubr.msk.f32.gmra.mrb[242].mxu1 %vm8661_vm12, %v16691_v14 }
 0xb66   : > { %8939 = vmatprep.mubr.f32.mxu1 %v19617_v28 }
 0xb67   : > { %v6996_v52 = vpop.f32.mrb[202].mxu1  ;;  %v16681_v56 = vpop.f32.mrb[206].mxu0 }
 0xb68   : > { %v16684_v15 = vadd.f32 %v16582_v46, %v6996_v52  ;;  %v6998_v62 = vpop.f32.mrb[203].mxu1  ;;  %v16686_v35 = vpop.f32.mrb[207].mxu0 }
 0xb69   : > { %v16693_v23 = vadd.f32 %v7894_v30, %v6998_v62  ;;  %11544 = vmatmul.mubr.msk.f32.gmra.mrb[244].mxu1 %vm8661_vm12, %v16707_v51 }
 0xb6a   : > { %8945 = vmatprep.mubr.f32.mxu1 %v19617_v28 }
 0xb6b   : > { %v16698_v61 = vpop.f32.mrb[204].mxu1  ;;  %v16700_v53 = vpop.f32.mrb[208].mxu0 }
 0xb6c   : > { %v7242_v46 = vpop.f32.mrb[205].mxu1  ;;  %v16702_v18 = vpop.f32.mrb[209].mxu0 }
 0xb6d   : > { %v7347_v30 = vadd.f32 %v7242_v46, %v19620_v4  ;;  %v19623_v46 = vld [vmem:[#allocation4_spill] sm:$0xff]  ;;  %11545 = vmatmul.mubr.msk.f32.gmra.mrb[246].mxu1 %vm8661_vm12, %v16723_v3 }
 0xb6e   : > { %8951 = vmatprep.mubr.f32.mxu1 %v19617_v28  ;;  %v19633_v3 = vld [vmem:[#allocation68_spill] sm:$0xff] }
 0xb6f   : > { %v7387_v57 = vadd.f32 %v7347_v30, %v19621_v29  ;;  %v16714_v24 = vpop.f32.mrb[206].mxu1  ;;  %v16716_v21 = vpop.f32.mrb[210].mxu0  ;;  %v19624_v30 = vld [vmem:[#allocation12_spill] sm:$0xff] }
 0xb70   : > { %v7248_v52 = vpop.f32.mrb[207].mxu1  ;;  %v16718_v62 = vpop.f32.mrb[211].mxu0 }
 0xb71   : > { %v7367_v4 = vadd.f32 %v7248_v52, %v19623_v46  ;;  %7427 = vrot.lane.b32.xlu1 %v7387_v57, %s14015_s26  ;;  %v16740_v52 = vld [vmem:[%s19391_s10 + $0x20] sm:$0xff]  ;;  %v19626_v57 = vld [vmem:[#allocation5_spill] sm:$0xff] }
 0xb72   : > { %19625 = vst [vmem:[#allocation10_spill] sm:$0xff] %v16740_v52  ;;  %11546 = vmatmul.mubr.msk.f32.gmra.mrb[248].mxu1 %vm8661_vm12, %v16740_v52 }
 0xb73   : > { %v7407_v29 = vadd.f32 %v7367_v4, %v19624_v30  ;;  %v16731_v13 = vpop.f32.mrb[208].mxu1  ;;  %v16733_v45 = vpop.f32.mrb[212].mxu0  ;;  %8957 = vmatprep.mubr.f32.mxu1 %v19617_v28  ;;  %v19627_v4 = vld [vmem:[#allocation14_spill] sm:$0xff] }
 0xb74   : > { %v7254_v16 = vpop.f32.mrb[209].mxu1  ;;  %v16735_v49 = vpop.f32.mrb[213].mxu0 }
 0xb75   : > { %v7780_v46 = vadd.f32 %v7254_v16, %v19626_v57  ;;  %7429 = vrot.lane.b32.xlu1 %v7407_v29, %s14015_s26  ;;  %v16759_v16 = vld [vmem:[%s19391_s10 + $0x28] sm:$0xff]  ;;  %v19630_v29 = vld [vmem:[#allocation6_spill] sm:$0xff] }
 0xb76   : > { %19629 = vst [vmem:[#allocation12_spill] sm:$0xff] %v16759_v16  ;;  %11547 = vmatmul.mubr.msk.f32.gmra.mrb[250].mxu1 %vm8661_vm12, %v16759_v16 }
 0xb77   : > { %v16748_v30 = vadd.f32 %v7780_v46, %v19627_v4  ;;  %v16750_v44 = vpop.f32.mrb[210].mxu1  ;;  %v16752_v58 = vpop.f32.mrb[214].mxu0  ;;  %8963 = vmatprep.mubr.f32.mxu1 %v19617_v28  ;;  %v19631_v46 = vld [vmem:[#allocation16_spill] sm:$0xff] }
 0xb78   : > { %v7260_v37 = vpop.f32.mrb[211].mxu1  ;;  %v16754_v50 = vpop.f32.mrb[215].mxu0 }
 0xb79   : > { %19628 = vst [vmem:[#allocation4_spill] sm:$0xff] %v16748_v30  ;;  %v7800_v57 = vadd.f32 %v7260_v37, %v19630_v29  ;;  %v16776_v37 = vld [vmem:[%s19391_s10 + $0x30] sm:$0xff]  ;;  %v19635_v29 = vld [vmem:[#allocation7_spill] sm:$0xff] }
 0xb7a   : > { %19634 = vst [vmem:[#allocation14_spill] sm:$0xff] %v16776_v37  ;;  %11548 = vmatmul.mubr.msk.f32.gmra.mrb[252].mxu1 %vm8661_vm12, %v16776_v37  ;;  %v19641_v37 = vld [vmem:[#allocation71_spill] sm:$0xff] }
 0xb7b   : > { %v16766_v4 = vadd.f32 %v7800_v57, %v19631_v46  ;;  %v7103_v42 = vpop.f32.mrb[216].mxu0  ;;  %v16768_v52 = vpop.f32.mrb[212].mxu1  ;;  %8969 = vmatprep.mubr.f32.mxu1 %v19617_v28  ;;  %v19636_v57 = vld [vmem:[#allocation19_spill] sm:$0xff] }
 0xb7c   : > { %v16771_v51 = vadd.f32 %v7103_v42, %v19633_v3  ;;  %v7266_v60 = vpop.f32.mrb[213].mxu1  ;;  %v7105_v14 = vpop.f32.mrb[217].mxu0 }
 0xb7d   : > { %19632 = vst [vmem:[#allocation5_spill] sm:$0xff] %v16766_v4  ;;  %v7860_v16 = vadd.f32 %v7266_v60, %v19635_v29  ;;  %v16780_v48 = vadd.f32 %v7105_v14, %v16663_v33  ;;  %v16794_v60 = vld [vmem:[%s19391_s10 + $0x38] sm:$0xff]  ;;  %v19639_v33 = vld [vmem:[#allocation8_spill] sm:$0xff] }
 0xb7e   : > { %19638 = vst [vmem:[#allocation6_spill] sm:$0xff] %v16794_v60  ;;  %11549 = vmatmul.mubr.msk.f32.gmra.mrb[254].mxu1 %vm8661_vm12, %v16794_v60 }
 0xb7f   : > { %v7900_v3 = vadd.f32 %v7860_v16, %v19636_v57  ;;  %v7109_v42 = vpop.f32.mrb[218].mxu0  ;;  %v16786_v46 = vpop.f32.mrb[214].mxu1  ;;  %8975 = vmatprep.mubr.f32.mxu1 %v19617_v28  ;;  %v19640_v16 = vld [vmem:[#allocation22_spill] sm:$0xff] }
 0xb80   : > { %v16789_v11 = vadd.f32 %v7109_v42, %v19637_v0  ;;  %v7272_v4 = vpop.f32.mrb[215].mxu1  ;;  %v7111_v30 = vpop.f32.mrb[219].mxu0 }
 0xb81   : > { %v7880_v14 = vadd.f32 %v7272_v4, %v19639_v33  ;;  %v16798_v29 = vadd.f32 %v7111_v30, %v16681_v56  ;;  %v16813_v56 = vld [vmem:[%s19391_s10 + $0x40] sm:$0xff] }
 0xb82   : > { %19642 = vst [vmem:[#allocation16_spill] sm:$0xff] %v16813_v56  ;;  %11550 = vmatmul.mubr.msk.f32.gmra.mrb[0].mxu1 %vm8661_vm12, %v16813_v56 }
 0xb83   : > { %v7920_v0 = vadd.f32 %v7880_v14, %v19640_v16  ;;  %v7115_v57 = vpop.f32.mrb[220].mxu0  ;;  %v7276_v42 = vpop.f32.mrb[216].mxu1  ;;  %8981 = vmatprep.mubr.f32.mxu1 %v19617_v28 }
 0xb84   : > { %v16805_v43 = vadd.f32 %v7115_v57, %v19641_v37  ;;  %v16808_v26 = vadd.f32 %v7276_v42, %v16668_v63  ;;  %v7278_v27 = vpop.f32.mrb[217].mxu1  ;;  %v7117_v4 = vpop.f32.mrb[221].mxu0  ;;  %v19643_v37 = vld [vmem:[#allocation9_spill] sm:$0xff] }
 0xb85   : > { %v7366_v30 = vadd.f32 %v7278_v27, %v16698_v61  ;;  %v16817_v33 = vadd.f32 %v7117_v4, %v16700_v53  ;;  %v19644_v57 = vld [vmem:[#allocation73_spill] sm:$0xff]  ;;  %v16832_v61 = vld [vmem:[%s19391_s10 + $0x48] sm:$0xff] }
 0xb86   : > { %11551 = vmatmul.mubr.msk.f32.gmra.mrb[2].mxu1 %vm8661_vm12, %v16832_v61 }
 0xb87   : > { %v7406_v63 = vadd.f32 %v7366_v30, %v19643_v37  ;;  %v7121_v14 = vpop.f32.mrb[222].mxu0  ;;  %v7282_v16 = vpop.f32.mrb[218].mxu1  ;;  %8987 = vmatprep.mubr.f32.mxu1 %v19617_v28 }
 0xb88   : > { %v16824_v42 = vadd.f32 %v7121_v14, %v19644_v57  ;;  %v16827_v60 = vadd.f32 %v7282_v16, %v16686_v35  ;;  %v7284_v34 = vpop.f32.mrb[219].mxu1  ;;  %v7123_v27 = vpop.f32.mrb[223].mxu0  ;;  %v19645_v35 = vld [vmem:[#allocation11_spill] sm:$0xff]  ;;  %v19646_v16 = vld [vmem:[#allocation74_spill] sm:$0xff] }
 0xb89   : > { %v7386_v53 = vadd.f32 %v7284_v34, %v16714_v24  ;;  %7503 = vrot.lane.b32.xlu0 %v7406_v63, %s14015_s26  ;;  %v16837_v4 = vadd.f32 %v7123_v27, %v16716_v21  ;;  %v16852_v21 = vld [vmem:[%s19391_s10 + $0x50] sm:$0xff] }
 0xb8a   : > { %11552 = vmatmul.mubr.msk.f32.gmra.mrb[4].mxu1 %vm8661_vm12, %v16852_v21 }
 0xb8b   : > { %v7426_v30 = vadd.f32 %v7386_v53, %v19645_v35  ;;  %v7127_v37 = vpop.f32.mrb[224].mxu0  ;;  %v7288_v14 = vpop.f32.mrb[220].mxu1  ;;  %8993 = vmatprep.mubr.f32.mxu1 %v19617_v28 }
 0xb8c   : > { %v16844_v57 = vadd.f32 %v7127_v37, %v19646_v16  ;;  %v16847_v56 = vadd.f32 %v7288_v14, %v16702_v18  ;;  %v7290_v34 = vpop.f32.mrb[221].mxu1  ;;  %v7129_v24 = vpop.f32.mrb[225].mxu0  ;;  %v19647_v18 = vld [vmem:[#allocation13_spill] sm:$0xff]  ;;  %v19649_v14 = vld [vmem:[#allocation78_spill] sm:$0xff] }
 0xb8d   : > { %v7799_v63 = vadd.f32 %v7290_v34, %v16731_v13  ;;  %7940 = vrot.lane.b32.xlu0 %v7900_v3, %s14016_s28  ;;  %7505 = vrot.lane.b32.xlu1 %v7426_v30, %s14015_s26  ;;  %v16858_v27 = vadd.f32 %v7129_v24, %v16733_v45  ;;  %v16875_v45 = vld [vmem:[%s19391_s10 + $0x58] sm:$0xff]  ;;  %v19650_v24 = vld [vmem:[#allocation23_spill] sm:$0xff] }
 0xb8e   : > { %11553 = vmatmul.mubr.msk.f32.gmra.mrb[6].mxu1 %vm8661_vm12, %v16875_v45 }
 0xb8f   : > { %v16863_v53 = vadd.f32 %v7799_v63, %v19647_v18  ;;  %v7133_v35 = vpop.f32.mrb[226].mxu0  ;;  %v7294_v37 = vpop.f32.mrb[222].mxu1  ;;  %8999 = vmatprep.mubr.f32.mxu1 %v19617_v28 }
 0xb90   : > { %v16867_v16 = vadd.f32 %v7133_v35, %v19649_v14  ;;  %v16870_v13 = vadd.f32 %v7294_v37, %v16718_v62  ;;  %v7296_v3 = vpop.f32.mrb[223].mxu1  ;;  %v7135_v30 = vpop.f32.mrb[227].mxu0  ;;  %v19651_v62 = vld [vmem:[#allocation15_spill] sm:$0xff] }
 0xb91   : > { %19648 = vst [vmem:[#allocation68_spill] sm:$0xff] %v16863_v53  ;;  %v7819_v34 = vadd.f32 %v7296_v3, %v16750_v44  ;;  %7443 = vrot.lane.b32.xlu0 %v19650_v24, %s14015_s26  ;;  %7942 = vrot.lane.b32.xlu1 %v7920_v0, %s14016_s28  ;;  %v16882_v63 = vadd.f32 %v7135_v30, %v16752_v58  ;;  %v16899_v58 = vld [vmem:[%s19391_s10 + $0x60] sm:$0xff]  ;;  %v19653_v24 = vld [vmem:[#allocation25_spill] sm:$0xff] }
 0xb92   : > { %11554 = vmatmul.mubr.msk.f32.gmra.mrb[8].mxu1 %vm8661_vm12, %v16899_v58  ;;  %v19662_v53 = vld [vmem:[#allocation35_spill] sm:$0xff] }
 0xb93   : > { %v16887_v18 = vadd.f32 %v7819_v34, %v19651_v62  ;;  %v7139_v35 = vpop.f32.mrb[228].mxu0  ;;  %v7300_v37 = vpop.f32.mrb[224].mxu1  ;;  %9005 = vmatprep.mubr.f32.mxu1 %v19617_v28 }
 0xb94   : > { %v16891_v44 = vadd.f32 %v16486_v47, %v7139_v35  ;;  %v16894_v14 = vadd.f32 %v7300_v37, %v16735_v49  ;;  %v7141_v0 = vpop.f32.mrb[229].mxu0  ;;  %v7302_v3 = vpop.f32.mrb[225].mxu1  ;;  %v19654_v47 = vld [vmem:[#allocation24_spill] sm:$0xff]  ;;  %v19655_v49 = vld [vmem:[#allocation17_spill] sm:$0xff] }
 0xb95   : > { %19652 = vst [vmem:[#allocation7_spill] sm:$0xff] %v16887_v18  ;;  %v16902_v30 = vadd.f32 %v16771_v51, %v7141_v0  ;;  %v7879_v34 = vadd.f32 %v7302_v3, %v16768_v52  ;;  %7447 = vrot.lane.b32.xlu0 %v19653_v24, %s14015_s26  ;;  %7445 = vrot.lane.b32.xlu1 %v19654_v47, %s14015_s26  ;;  %v16924_v24 = vld [vmem:[%s19391_s10 + $0x68] sm:$0xff] }
 0xb96   : > { %11555 = vmatmul.mubr.msk.f32.gmra.mrb[10].mxu1 %vm8661_vm12, %v16924_v24 }
 0xb97   : > { %v16912_v62 = vadd.f32 %v7879_v34, %v19655_v49  ;;  %v7145_v35 = vpop.f32.mrb[230].mxu0  ;;  %v7306_v37 = vpop.f32.mrb[226].mxu1  ;;  %v19656_v49 = vld [vmem:[#allocation27_spill] sm:$0xff]  ;;  %9011 = vmatprep.mubr.f32.mxu1 %v19617_v28 }
 0xb98   : > { %v16916_v51 = vadd.f32 %v16517_v39, %v7145_v35  ;;  %v16919_v52 = vadd.f32 %v7306_v37, %v16754_v50  ;;  %v7147_v0 = vpop.f32.mrb[231].mxu0  ;;  %v7308_v3 = vpop.f32.mrb[227].mxu1  ;;  %v19657_v39 = vld [vmem:[#allocation28_spill] sm:$0xff] }
 0xb99   : > { %v16927_v34 = vadd.f32 %v16789_v11, %v7147_v0  ;;  %v7899_v47 = vadd.f32 %v7308_v3, %v16786_v46  ;;  %7451 = vrot.lane.b32.xlu0 %v19656_v49, %s14015_s26  ;;  %7449 = vrot.lane.b32.xlu1 %v19657_v39, %s14015_s26  ;;  %v19658_v50 = vld [vmem:[#allocation20_spill] sm:$0xff]  ;;  %v16949_v49 = vld [vmem:[%s19391_s10 + $0x70] sm:$0xff] }
 0xb9a   : > { %11556 = vmatmul.mubr.msk.f32.gmra.mrb[12].mxu1 %vm8661_vm12, %v16949_v49 }
 0xb9b   : > { %v16937_v35 = vadd.f32 %v7899_v47, %v19658_v50  ;;  %v7151_v37 = vpop.f32.mrb[232].mxu0  ;;  %v7312_v18 = vpop.f32.mrb[228].mxu1  ;;  %v19659_v50 = vld [vmem:[#allocation30_spill] sm:$0xff]  ;;  %9016 = vmatprep.mubr.f32.mxu1 %v19617_v28 }
 0xb9c   : > { %v16941_v11 = vadd.f32 %v16550_v9, %v7151_v37  ;;  %v16944_v46 = vadd.f32 %v16780_v48, %v7312_v18  ;;  %v7153_v0 = vpop.f32.mrb[233].mxu0  ;;  %v7314_v3 = vpop.f32.mrb[229].mxu1  ;;  %v19660_v9 = vld [vmem:[#allocation39_spill] sm:$0xff] }
 0xb9d   : > { %v16952_v47 = vadd.f32 %v16805_v43, %v7153_v0  ;;  %v16955_v39 = vadd.f32 %v16808_v26, %v7314_v3  ;;  %7453 = vrot.lane.b32.xlu1 %v19659_v50, %s14015_s26  ;;  %7455 = vrot.lane.b32.xlu0 %v19660_v9, %s14015_s26  ;;  %v16973_v3 = vld [vmem:[%s19391_s10 + $0x78] sm:$0xff] }
 0xb9e   : > { %11557 = vmatmul.mubr.msk.f32.gmra.mrb[14].mxu1 %vm8661_vm12, %v16973_v3 }
 0xb9f   : > { %v7157_v48 = vpop.f32.mrb[234].mxu0  ;;  %v7318_v18 = vpop.f32.mrb[230].mxu1  ;;  %9021 = vmatprep.mubr.f32.mxu1 %v19617_v28 }
 0xba0   : > { %v16965_v37 = vadd.f32 %v16577_v2, %v7157_v48  ;;  %v16968_v43 = vadd.f32 %v16798_v29, %v7318_v18  ;;  %v7159_v26 = vpop.f32.mrb[235].mxu0  ;;  %v7320_v0 = vpop.f32.mrb[231].mxu1  ;;  %v19663_v2 = vld [vmem:[#allocation42_spill] sm:$0xff] }
 0xba1   : > { %v16976_v50 = vadd.f32 %v16824_v42, %v7159_v26  ;;  %v16979_v9 = vadd.f32 %v16827_v60, %v7320_v0  ;;  %7960 = vrot.lane.b32.xlu0 %v19662_v53, %s14016_s28  ;;  %7457 = vrot.lane.b32.xlu1 %v19663_v2, %s14015_s26  ;;  %v16997_v53 = vld [vmem:[%s19391_s10 + $0x80] sm:$0xff]  ;;  %v19665_v2 = vld [vmem:[#allocation36_spill] sm:$0xff] }
 0xba2   : > { %11558 = vmatmul.mubr.msk.f32.gmra.mrb[16].mxu1 %vm8661_vm12, %v16997_v53 }
 0xba3   : > { %19661 = vst [vmem:[#allocation19_spill] sm:$0xff] %v16976_v50  ;;  %v7163_v29 = vpop.f32.mrb[236].mxu0  ;;  %v7324_v48 = vpop.f32.mrb[232].mxu1  ;;  %v19666_v50 = vld [vmem:[#allocation37_spill] sm:$0xff]  ;;  %9026 = vmatprep.mubr.f32.mxu1 %v19617_v28 }
 0xba4   : > { %v16989_v18 = vadd.f32 %v16602_v54, %v7163_v29  ;;  %v7165_v42 = vpop.f32.mrb[237].mxu0  ;;  %v16992_v60 = vadd.f32 %v16817_v33, %v7324_v48  ;;  %v7326_v26 = vpop.f32.mrb[233].mxu1 }
 0xba5   : > { %v17000_v0 = vadd.f32 %v16844_v57, %v7165_v42  ;;  %7964 = vrot.lane.b32.xlu0 %v19665_v2, %s14016_s28  ;;  %7962 = vrot.lane.b32.xlu1 %v19666_v50, %s14016_s28  ;;  %v17007_v54 = vadd.f32 %v16847_v56, %v7326_v26  ;;  %v17021_v56 = vld [vmem:[%s19391_s10 + $0x88] sm:$0xff]  ;;  %v19668_v26 = vld [vmem:[#allocation38_spill] sm:$0xff] }
 0xba6   : > { %19664 = vst [vmem:[#allocation69_spill] sm:$0xff] %v16992_v60  ;;  %v19669_v60 = vld [vmem:[#allocation53_spill] sm:$0xff]  ;;  %11559 = vmatmul.mubr.msk.f32.gmra.mrb[18].mxu1 %vm8661_vm12, %v17021_v56 }
 0xba7   : > { %v7169_v33 = vpop.f32.mrb[238].mxu0  ;;  %v7330_v29 = vpop.f32.mrb[234].mxu1  ;;  %9269 = vmatprep.mubr.f32.mxu1 %v19617_v28 }
 0xba8   : > { %v17013_v48 = vadd.f32 %v16613_v10, %v7169_v33  ;;  %v7171_v57 = vpop.f32.mrb[239].mxu0  ;;  %v17016_v42 = vadd.f32 %v16837_v4, %v7330_v29  ;;  %v7332_v2 = vpop.f32.mrb[235].mxu1  ;;  %v19670_v29 = vld [vmem:[#allocation55_spill] sm:$0xff] }
 0xba9   : > { %v17024_v50 = vadd.f32 %v16867_v16, %v7171_v57  ;;  %7966 = vrot.lane.b32.xlu1 %v19668_v26, %s14016_s28  ;;  %7968 = vrot.lane.b32.xlu0 %v19669_v60, %s14016_s28  ;;  %v17031_v10 = vadd.f32 %v16870_v13, %v7332_v2  ;;  %v19671_v57 = vld [vmem:[#allocation57_spill] sm:$0xff] }
 0xbaa   : > { %19667 = vst [vmem:[#allocation8_spill] sm:$0xff] %v17016_v42  ;;  %v19672_v42 = vld [vmem:[#allocation41_spill] sm:$0xff] }
 0xbab   : > { %v7336_v4 = vpop.f32.mrb[236].mxu1 }
 0xbac   : > { %v17037_v33 = vadd.f32 %v16858_v27, %v7336_v4  ;;  %v7338_v16 = vpop.f32.mrb[237].mxu1  ;;  %v19673_v27 = vld [vmem:[#allocation59_spill] sm:$0xff] }
 0xbad   : > { %7972 = vrot.lane.b32.xlu0 %v19670_v29, %s14016_s28  ;;  %7970 = vrot.lane.b32.xlu1 %v19671_v57, %s14016_s28  ;;  %v17044_v60 = vadd.f32 %v16894_v14, %v7338_v16  ;;  %v19674_v29 = vld [vmem:[#allocation46_spill] sm:$0xff]  ;;  %v19675_v14 = vld [vmem:[#allocation43_spill] sm:$0xff]  ;;  %v19676_v16 = vld [vmem:[#allocation48_spill] sm:$0xff] }
 0xbae   : > { %v19680_v57 = vld [vmem:[#allocation62_spill] sm:$0xff] }
 0xbaf   : > { %v7342_v13 = vpop.f32.mrb[238].mxu1 }
 0xbb0   : > { %v17047_v2 = vadd.f32 %v16882_v63, %v7342_v13  ;;  %v7344_v26 = vpop.f32.mrb[239].mxu1  ;;  %v19677_v63 = vld [vmem:[#allocation50_spill] sm:$0xff]  ;;  %v19681_v13 = vld [vmem:[#allocation64_spill] sm:$0xff] }
 0xbb1   : > { %7459 = vrot.lane.b32.xlu0 %v19672_v42, %s14015_s26  ;;  %7974 = vrot.lane.b32.xlu1 %v19673_v27, %s14016_s28  ;;  %v17054_v4 = vadd.f32 %v16919_v52, %v7344_v26  ;;  %v19678_v42 = vld [vmem:[#allocation52_spill] sm:$0xff]  ;;  %v19679_v52 = vld [vmem:[#allocation61_spill] sm:$0xff] }
 0xbb2   : > { %v19682_v26 = vld [vmem:[#allocation65_spill] sm:$0xff] }
 0xbb5   : > { %7463 = vrot.lane.b32.xlu0 %v19674_v29, %s14015_s26  ;;  %7461 = vrot.lane.b32.xlu1 %v19675_v14, %s14015_s26  ;;  %v19687_v14 = vld [vmem:[#allocation18_spill] sm:$0xff] }
 0xbb9   : > { %7467 = vrot.lane.b32.xlu0 %v19676_v16, %s14015_s26  ;;  %7465 = vrot.lane.b32.xlu1 %v19677_v63, %s14015_s26 }
 0xbbd   : > { %7469 = vrot.lane.b32.xlu1 %v19678_v42, %s14015_s26  ;;  %7471 = vrot.lane.b32.xlu0 %v16592_v59, %s14015_s26  ;;  %v5383_v59 = vld [vmem:[%s19385_s4] sm:$0xff]  ;;  %v19688_v42 = vld [vmem:[#allocation76_spill] sm:$0xff] }
 0xbc1   : > { %7976 = vrot.lane.b32.xlu0 %v19679_v52, %s14016_s28  ;;  %7473 = vrot.lane.b32.xlu1 %v16606_v25, %s14015_s26  ;;  %v8056_v52 = vsel %vm8020_vm11, %v19688_v42, %v16484_v38  ;;  %v19692_v38 = vld [vmem:[#allocation63_spill] sm:$0xff] }
 0xbc5   : > { %7980 = vrot.lane.b32.xlu0 %v19680_v57, %s14016_s28  ;;  %7978 = vrot.lane.b32.xlu1 %v19681_v13, %s14016_s28  ;;  %v19689_v57 = vld [vmem:[#allocation70_spill] sm:$0xff] }
 0xbc9   : > { %7982 = vrot.lane.b32.xlu1 %v19682_v26, %s14016_s28  ;;  %7984 = vrot.lane.b32.xlu0 %v16640_v55, %s14016_s28 }
 0xbcd   : > { %7988 = vrot.lane.b32.xlu0 %v16646_v41, %s14016_s28  ;;  %7986 = vrot.lane.b32.xlu1 %v16652_v12, %s14016_s28  ;;  %v19684_v12 = vld [vmem:[#allocation75_spill] sm:$0xff] }
 0xbd1   : > { %7475 = vrot.lane.b32.xlu0 %v16599_v8, %s14015_s26  ;;  %7990 = vrot.lane.b32.xlu1 %v16658_v6, %s14016_s28  ;;  %v19683_v8 = vld [vmem:[#allocation77_spill] sm:$0xff]  ;;  %v19685_v6 = vld [vmem:[#allocation72_spill] sm:$0xff] }
 0xbd2   : > { %v7567_v25 = vrot.slane %v5383_v59, %v19683_v8 }
 0xbd5   : > { %7479 = vrot.lane.b32.xlu0 %v16619_v36, %s14015_s26  ;;  %7477 = vrot.lane.b32.xlu1 %v16610_v32, %s14015_s26  ;;  %v8068_v32 = vrot.slane %v5383_v59, %v16473_v22  ;;  %v7667_v36 = vrot.slane %v7567_v25, %v16423_v19 }
 0xbd7   : > { %v8168_v55 = vrot.slane %v8068_v32, %v16453_v20 }
 0xbd9   : > { %7483 = vrot.lane.b32.xlu0 %v16625_v40, %s14015_s26  ;;  %7481 = vrot.lane.b32.xlu1 %v16631_v31, %s14015_s26  ;;  %v5404_v40 = vsub.f32 1.0, %v5383_v59  ;;  %v11334_v31 = vrot.slane %v5383_v59, 9  ;;  %v8262_v32 = vmul.f32 %v8168_v55, %v8056_v52 }
 0xbdd   : > { %7992 = vrot.lane.b32.xlu0 %v16666_v5, %s14016_s28  ;;  %7485 = vrot.lane.b32.xlu1 %v16637_v17, %s14015_s26  ;;  %v8055_v17 = vsel %vm8020_vm11, %v19685_v6, %v19684_v12  ;;  %v19686_v5 = vld [vmem:[#allocation67_spill] sm:$0xff] }
 0xbde   : > { %v8242_v29 = vmul.f32 %v8168_v55, %v8055_v17  ;;  %v19693_v17 = vld [vmem:[#allocation81_spill] sm:$0xff] }
 0xbe1   : > { %7996 = vrot.lane.b32.xlu0 %v16676_v7, %s14016_s28  ;;  %7994 = vrot.lane.b32.xlu1 %v16684_v15, %s14016_s28  ;;  %v17122_v15 = vsub.f32 %v5404_v40, %v11334_v31  ;;  %v19691_v40 = vld [vmem:[#allocation21_spill] sm:$0xff] }
 0xbe3   : > { %v7428_v41 = vpop.permute.xlu1 %7427 }
 0xbe4   : > { %v7546_v27 = vsel %vm7509_vm10, %v7428_v41, %v19686_v5  ;;  %v19694_v5 = vld [vmem:[#allocation66_spill] sm:$0xff] }
 0xbe5   : > { %v7741_v7 = vmul.f32 %v7667_v36, %v7546_v27  ;;  %7998 = vrot.lane.b32.xlu1 %v16693_v23, %s14016_s28  ;;  %7487 = vrot.lane.b32.xlu0 %v16891_v44, %s14015_s26  ;;  %v19690_v44 = vld [vmem:[#allocation86_spill] sm:$0xff] }
 0xbe6   : > { %v8430_v25 = vrot.slane %v17122_v15, %v19690_v44 }
 0xbe7   : > { %v8282_v16 = vadd.f32 %v19687_v14, %v7741_v7  ;;  %v7430_v63 = vpop.permute.xlu1 %7429  ;;  %v19697_v14 = vld [vmem:[#allocation4_spill] sm:$0xff] }
 0xbe8   : > { %v7547_v13 = vsel %vm7509_vm10, %v7430_v63, %v19689_v57 }
 0xbe9   : > { %v8322_v26 = vadd.f32 %v8282_v16, %v8242_v29  ;;  %v7761_v23 = vmul.f32 %v7667_v36, %v7547_v13  ;;  %7489 = vrot.lane.b32.xlu1 %v16916_v51, %s14015_s26  ;;  %8000 = vrot.lane.b32.xlu0 %v16989_v18, %s14016_s28  ;;  %v8530_v51 = vrot.slane %v8430_v25, %v19693_v17 }
 0xbeb   : > { %v8302_v31 = vadd.f32 %v19691_v40, %v7761_v23  ;;  %v8374_v36 = vadd.f32 %v19692_v38, %v8322_v26  ;;  %v19699_v26 = vld [vmem:[#allocation5_spill] sm:$0xff] }
 0xbed   : > { %v8342_v12 = vadd.f32 %v8302_v31, %v8262_v32  ;;  %8004 = vrot.lane.b32.xlu0 %v17000_v0, %s14016_s28  ;;  %8002 = vrot.lane.b32.xlu1 %v17013_v48, %s14016_s28  ;;  %v8604_v18 = vmul.f32 %v8530_v51, %v8374_v36  ;;  %v7563_v0 = vrot.slane %v5383_v59, %v16423_v19 }
 0xbee   : > { %v8064_v48 = vrot.slane %v5383_v59, %v16453_v20 }
 0xbef   : > { %v8394_v27 = vadd.f32 %v19694_v5, %v8342_v12 }
 0xbf1   : > { %7491 = vrot.lane.b32.xlu0 %v16902_v30, %s14015_s26  ;;  %8006 = vrot.lane.b32.xlu1 %v17024_v50, %s14016_s28  ;;  %v8624_v55 = vmul.f32 %v8530_v51, %v8394_v27  ;;  %v7663_v30 = vrot.slane %v7563_v0, %v16423_v19  ;;  %v10914_v27 = vld [vmem:[%s19392_s11] sm:$0xff] }
 0xbf3   : > { %v13819_v7 = vpack.c.bf16 %v8624_v55, %v8604_v18 }
 0xbf5   : > { %13820 = vmatprep.subr.bf16.mxu0 %v13819_v7  ;;  %7495 = vrot.lane.b32.xlu0 %v16944_v46, %s14015_s26  ;;  %v17219_v7 = vld [vmem:[%s19385_s4 + $0x18] sm:$0xff] }
 0xbf6   : > { %7493 = vrot.lane.b32.xlu1 %v16927_v34, %s14015_s26  ;;  %v8164_v34 = vrot.slane %v8064_v48, %v16453_v20 }
 0xbf9   : > { %7499 = vrot.lane.b32.xlu0 %v16955_v39, %s14015_s26 }
 0xbfa   : > { %7497 = vrot.lane.b32.xlu1 %v16968_v43, %s14015_s26 }
 0xbfb   : > { %v17161_v50 = vpop.permute.xlu0 %7503 }
 0xbfc   : > { %v7548_v46 = vsel %vm7509_vm10, %v17161_v50, %v7428_v41 }
 0xbfd   : > { %v7740_v29 = vmul.f32 %v7663_v30, %v7548_v46  ;;  %8008 = vrot.lane.b32.xlu0 %v17037_v33, %s14016_s28 }
 0xbfe   : > { %7501 = vrot.lane.b32.xlu1 %v16979_v9, %s14015_s26 }
 0xbff   : > { %v17171_v39 = vpop.permute.xlu0 %7940  ;;  %v17173_v59 = vpop.permute.xlu1 %7505  ;;  %v8281_v33 = vadd.f32 %v19697_v14, %v7740_v29  ;;  %v19701_v29 = vld [vmem:[#allocation80_spill] sm:$0xff] }
 0xc00   : > { %19695 = vst [vmem:[#allocation22_spill] sm:$0xff] %v17171_v39  ;;  %19696 = vst [vmem:[#allocation71_spill] sm:$0xff] %v17173_v59  ;;  %v8057_v43 = vsel %vm8020_vm11, %v17171_v39, %v19685_v6  ;;  %v7549_v41 = vsel %vm7509_vm10, %v17173_v59, %v7430_v63  ;;  %v8426_v6 = vrot.slane %v17122_v15, %v19693_v17  ;;  %v5385_v15 = vld [vmem:[%s19385_s4 + $0x10] sm:$0xff] }
 0xc01   : > { %v8241_v16 = vmul.f32 %v8164_v34, %v8057_v43  ;;  %v7760_v52 = vmul.f32 %v7663_v30, %v7549_v41  ;;  %8012 = vrot.lane.b32.xlu0 %v17044_v60, %s14016_s28  ;;  %v10915_v60 = vld [vmem:[%s19392_s11 + $0x8] sm:$0xff]  ;;  %v7583_v12 = vrot.slane %v5385_v15, %v19683_v8  ;;  %v8080_v0 = vrot.slane %v5385_v15, %v16453_v20 }
 0xc02   : > { %8010 = vrot.lane.b32.xlu1 %v17047_v2, %s14016_s28  ;;  %v8526_v31 = vrot.slane %v8426_v6, %v19693_v17  ;;  %v5406_v48 = vsub.f32 1.0, %v5385_v15  ;;  %v7587_v41 = vrot.slane %v17219_v7, %v16423_v19  ;;  %v19704_v6 = vld [vmem:[#allocation84_spill] sm:$0xff] }
 0xc03   : > { %v8321_v9 = vadd.f32 %v8281_v33, %v8241_v16  ;;  %v7444_v57 = vpop.permute.xlu0 %7443  ;;  %v17187_v13 = vpop.permute.xlu1 %7942  ;;  %v8301_v23 = vadd.f32 %v19699_v26, %v7760_v52  ;;  %v17229_v43 = vrot.slane %v7583_v12, %v16423_v19  ;;  %v7591_v52 = vrot.slane %v17219_v7, %v19683_v8 }
 0xc04   : > { %19698 = vst [vmem:[#allocation9_spill] sm:$0xff] %v17187_v13  ;;  %v8058_v63 = vsel %vm8020_vm11, %v17187_v13, %v19688_v42  ;;  %v8084_v26 = vrot.slane %v5385_v15, %v16473_v22 }
 0xc05   : > { %v8261_v25 = vmul.f32 %v8164_v34, %v8058_v63  ;;  %8016 = vrot.lane.b32.xlu0 %v16912_v62, %s14016_s28  ;;  %v8373_v2 = vadd.f32 %v19692_v38, %v8321_v9  ;;  %v7540_v34 = vsel %vm7509_vm10, %v19701_v29, %v7444_v57  ;;  %19702 = vst [vmem:[#allocation11_spill] sm:$0xff] %v17229_v43 }
 0xc06   : > { %8014 = vrot.lane.b32.xlu1 %v17054_v4, %s14016_s28  ;;  %v7579_v4 = vrot.slane %v5385_v15, %v16423_v19  ;;  %v17242_v9 = vrot.slane %v8080_v0, %v16453_v20  ;;  %v17264_v12 = vrot.slane %v7591_v52, %v16423_v19  ;;  %v17271_v0 = vrot.slane %v8084_v26, %v16453_v20  ;;  %v19713_v52 = vld [vmem:[#allocation31_spill] sm:$0xff] }
 0xc07   : > { %v8341_v42 = vadd.f32 %v8301_v23, %v8261_v25  ;;  %v7448_v32 = vpop.permute.xlu0 %7447  ;;  %v7446_v40 = vpop.permute.xlu1 %7445  ;;  %v8603_v18 = vmul.f32 %v8526_v31, %v8373_v2  ;;  %v8088_v23 = vrot.slane %v17219_v7, %v16453_v20  ;;  %v19705_v2 = vld [vmem:[#allocation95_spill] sm:$0xff] }
 0xc08   : > { %v17223_v46 = vrot.slane %v7579_v4, %v16423_v19  ;;  %v7538_v16 = vsel %vm7509_vm10, %v7444_v57, %v7448_v32  ;;  %19703 = vst [vmem:[#allocation74_spill] sm:$0xff] %v17242_v9  ;;  %v7541_v63 = vsel %vm7509_vm10, %v19704_v6, %v7446_v40  ;;  %19707 = vst [vmem:[#allocation78_spill] sm:$0xff] %v17264_v12 }
 0xc09   : > { %v8393_v62 = vadd.f32 %v19694_v5, %v8341_v42  ;;  %10923 = vperm.xlu0 %13927, %v10915_v60   ;;  %v7745_v57 = vmul.f32 %v17229_v43, %v7538_v16  ;;  %v17255_v42 = vrot.slane %v7587_v41, %v16423_v19  ;;  %19709 = vst [vmem:[#allocation23_spill] sm:$0xff] %v17271_v0  ;;  %v5407_v41 = vsub.f32 1.0, %v17219_v7 }
 0xc0a   : > { %8018 = vrot.lane.b32.xlu1 %v16937_v35, %s14016_s28  ;;  %v11336_v35 = vrot.slane %v5385_v15, 9  ;;  %19700 = vst [vmem:[#allocation73_spill] sm:$0xff] %v17223_v46  ;;  %v7744_v60 = vmul.f32 %v17223_v46, %v7540_v34  ;;  %v7764_v15 = vmul.f32 %v17223_v46, %v7541_v63  ;;  %v19712_v34 = vld [vmem:[#allocation96_spill] sm:$0xff]  ;;  %v11337_v16 = vrot.slane %v17219_v7, 9 }
 0xc0b   : > { %v7452_v36 = vpop.permute.xlu0 %7451  ;;  %v7450_v51 = vpop.permute.xlu1 %7449  ;;  %v8623_v55 = vmul.f32 %v8526_v31, %v8393_v62  ;;  %19706 = vst [vmem:[#allocation13_spill] sm:$0xff] %v17255_v42  ;;  %v8286_v6 = vadd.f32 %v19713_v52, %v7745_v57  ;;  %v19715_v57 = vld [vmem:[#allocation88_spill] sm:$0xff] }
 0xc0c   : > { %v5456_v25 = vsub.f32 %v5406_v48, %v11336_v35  ;;  %v7536_v4 = vsel %vm7509_vm10, %v7448_v32, %v7452_v36  ;;  %v19711_v35 = vld [vmem:[#allocation26_spill] sm:$0xff]  ;;  %v7539_v32 = vsel %vm7509_vm10, %v7446_v40, %v7450_v51  ;;  %v8092_v40 = vrot.slane %v17219_v7, %v16473_v22 }
 0xc0d   : > { %v13821_v30 = vpack.c.bf16 %v8623_v55, %v8603_v18  ;;  %v8285_v29 = vadd.f32 %v19711_v35, %v7744_v60  ;;  %v7746_v63 = vmul.f32 %v17255_v42, %v7536_v4  ;;  %v7765_v52 = vmul.f32 %v17229_v43, %v7539_v32 }
 0xc0e   : > { %10918 = vperm.xlu1 %13928, %v10914_v27   ;;  %v19708_v27 = vld [vmem:[#allocation87_spill] sm:$0xff]  ;;  %v8442_v48 = vrot.slane %v5456_v25, %v19693_v17 }
 0xc0f   : > { %13822 = vmatpush1.bf16.msra.mxu0 %v13821_v30  ;;  %v17233_v14 = vpop.permute.xlu1 %7453  ;;  %v17235_v33 = vpop.permute.xlu0 %7455  ;;  %v17274_v30 = vrot.slane %v8088_v23, %v16453_v20 }
 0xc10   : > { %v7537_v26 = vsel %vm7509_vm10, %v7450_v51, %v17233_v14  ;;  %v7534_v51 = vsel %vm7509_vm10, %v7452_v36, %v17235_v33 }
 0xc11   : > { %19710 = vst [vmem:[#allocation15_spill] sm:$0xff] %v17274_v30 }
 0xc12   : > { %11524 = vmatmul.mubr.msk.f32.vlgmr.msra.gmra.mrb[240].mxu0 %vm8661_vm12, %v19705_v2 }
 0xc13   : > { %v7961_v31 = vpop.permute.xlu0 %7960  ;;  %v17257_v62 = vpop.permute.xlu1 %7457  ;;  %8786 = vmatprep.mubr.f32.mxu0 %v19617_v28 }
 0xc14   : > { %v8049_v18 = vsel %vm8020_vm11, %v19708_v27, %v7961_v31  ;;  %v19714_v27 = vld [vmem:[#allocation29_spill] sm:$0xff] }
 0xc15   : > { %v8245_v55 = vmul.f32 %v17242_v9, %v8049_v18  ;;  %v8305_v18 = vadd.f32 %v19714_v27, %v7764_v15  ;;  %v7766_v15 = vmul.f32 %v17255_v42, %v7537_v26  ;;  %v5457_v27 = vsub.f32 %v5407_v41, %v11337_v16  ;;  %v19719_v41 = vld [vmem:[#allocation33_spill] sm:$0xff] }
 0xc16   : > { %11525 = vmatmul.mubr.msk.f32.gmra.mrb[242].mxu0 %vm8661_vm12, %v19712_v34  ;;  %v7747_v26 = vmul.f32 %v17264_v12, %v7534_v51  ;;  %v19721_v51 = vld [vmem:[#allocation3_spill] sm:$0xff] }
 0xc17   : > { %v7965_v23 = vpop.permute.xlu0 %7964  ;;  %v7963_v60 = vpop.permute.xlu1 %7962  ;;  %8792 = vmatprep.mubr.f32.mxu0 %v19617_v28  ;;  %v8325_v35 = vadd.f32 %v8285_v29, %v8245_v55  ;;  %v19716_v55 = vld [vmem:[#allocation97_spill] sm:$0xff]  ;;  %v8542_v29 = vrot.slane %v8442_v48, %v19693_v17 }
 0xc18   : > { %v8047_v46 = vsel %vm8020_vm11, %v7961_v31, %v7965_v23  ;;  %v8050_v4 = vsel %vm8020_vm11, %v19715_v57, %v7963_v60  ;;  %v8446_v31 = vrot.slane %v5456_v25, %v19690_v44  ;;  %v19717_v57 = vld [vmem:[#allocation32_spill] sm:$0xff] }
 0xc19   : > { %v8246_v13 = vmul.f32 %v17271_v0, %v8047_v46  ;;  %v8265_v7 = vmul.f32 %v17242_v9, %v8050_v4  ;;  %v8287_v32 = vadd.f32 %v19717_v57, %v7746_v63  ;;  %v17312_v46 = vrot.slane %v8092_v40, %v16453_v20  ;;  %v19720_v40 = vld [vmem:[#allocation34_spill] sm:$0xff] }
 0xc1a   : > { %11526 = vmatmul.mubr.msk.f32.gmra.mrb[244].mxu0 %vm8661_vm12, %v19716_v55  ;;  %v8377_v4 = vadd.f32 %v19692_v38, %v8325_v35  ;;  %v7535_v35 = vsel %vm7509_vm10, %v17233_v14, %v17257_v62 }
 0xc1b   : > { %v8326_v43 = vadd.f32 %v8286_v6, %v8246_v13  ;;  %v8345_v39 = vadd.f32 %v8305_v18, %v8265_v7  ;;  %v7967_v59 = vpop.permute.xlu1 %7966  ;;  %v7969_v36 = vpop.permute.xlu0 %7968  ;;  %8797 = vmatprep.mubr.f32.mxu0 %v19617_v28  ;;  %19718 = vst [vmem:[#allocation25_spill] sm:$0xff] %v17312_v46  ;;  %v8306_v13 = vadd.f32 %v19719_v41, %v7765_v52 }
 0xc1c   : > { %v8048_v25 = vsel %vm8020_vm11, %v7963_v60, %v7967_v59  ;;  %v8045_v48 = vsel %vm8020_vm11, %v7965_v23, %v7969_v36  ;;  %v8307_v18 = vadd.f32 %v19720_v40, %v7766_v15  ;;  %v8546_v23 = vrot.slane %v8446_v31, %v19693_v17 }
 0xc1d   : > { %v8397_v16 = vadd.f32 %v19694_v5, %v8345_v39  ;;  %v8266_v6 = vmul.f32 %v17271_v0, %v8048_v25  ;;  %v8247_v63 = vmul.f32 %v17274_v30, %v8045_v48  ;;  %v8450_v60 = vrot.slane %v5457_v27, %v19693_v17  ;;  %v19722_v25 = vld [vmem:[#allocation45_spill] sm:$0xff] }
 0xc1e   : > { %11527 = vmatmul.mubr.msk.f32.gmra.mrb[246].mxu0 %vm8661_vm12, %v19721_v51  ;;  %v8378_v15 = vadd.f32 %v19692_v38, %v8326_v43  ;;  %v8288_v48 = vadd.f32 %v19722_v25, %v7747_v26  ;;  %v8607_v41 = vmul.f32 %v8542_v29, %v8377_v4 }
 0xc1f   : > { %v8346_v52 = vadd.f32 %v8306_v13, %v8266_v6  ;;  %v8327_v39 = vadd.f32 %v8287_v32, %v8247_v63  ;;  %v17333_v7 = vpop.permute.xlu0 %7972  ;;  %v7971_v55 = vpop.permute.xlu1 %7970  ;;  %8802 = vmatprep.mubr.f32.mxu0 %v19617_v28  ;;  %v8627_v57 = vmul.f32 %v8542_v29, %v8397_v16  ;;  %v7767_v32 = vmul.f32 %v17264_v12, %v7535_v35  ;;  %v19723_v16 = vld [vmem:[#allocation10_spill] sm:$0xff] }
 0xc20   : > { %v8043_v14 = vsel %vm8020_vm11, %v7969_v36, %v17333_v7  ;;  %v8046_v31 = vsel %vm8020_vm11, %v7967_v59, %v7971_v55  ;;  %v8454_v36 = vrot.slane %v5457_v27, %v19690_v44  ;;  %v8550_v40 = vrot.slane %v8450_v60, %v19693_v17 }
 0xc21   : > { %v8248_v13 = vmul.f32 %v17312_v46, %v8043_v14  ;;  %v8267_v6 = vmul.f32 %v17274_v30, %v8046_v31  ;;  %v8398_v63 = vadd.f32 %v19694_v5, %v8346_v52  ;;  %v8379_v43 = vadd.f32 %v19692_v38, %v8327_v39  ;;  %v19724_v39 = vld [vmem:[#allocation49_spill] sm:$0xff] }
 0xc22   : > { %11528 = vmatmul.mubr.msk.f32.gmra.mrb[248].mxu0 %vm8661_vm12, %v19723_v16  ;;  %v13829_v26 = vpack.c.bf16 %v8627_v57, %v8607_v41  ;;  %v8608_v51 = vmul.f32 %v8546_v23, %v8378_v15  ;;  %v8308_v14 = vadd.f32 %v19724_v39, %v7767_v32 }
 0xc23   : > { %v8328_v59 = vadd.f32 %v8288_v48, %v8248_v13  ;;  %v8347_v29 = vadd.f32 %v8307_v18, %v8267_v6  ;;  %v7460_v4 = vpop.permute.xlu0 %7459  ;;  %v17352_v35 = vpop.permute.xlu1 %7974  ;;  %8807 = vmatprep.mubr.f32.mxu0 %v19617_v28  ;;  %v8628_v25 = vmul.f32 %v8546_v23, %v8398_v63  ;;  %v19725_v48 = vld [vmem:[#allocation12_spill] sm:$0xff]  ;;  %v8554_v18 = vrot.slane %v8454_v36, %v19693_v17  ;;  %v5387_v23 = vld [vmem:[%s19385_s4 + $0x20] sm:$0xff] }
 0xc24   : > { %v8044_v52 = vsel %vm8020_vm11, %v7971_v55, %v17352_v35  ;;  %v8609_v31 = vmul.f32 %v8550_v40, %v8379_v43  ;;  %v5408_v16 = vsub.f32 1.0, %v5387_v23  ;;  %v11338_v36 = vrot.slane %v5387_v23, 9 }
 0xc25   : > { %v8399_v57 = vadd.f32 %v19694_v5, %v8347_v29  ;;  %v8268_v27 = vmul.f32 %v17312_v46, %v8044_v52  ;;  %v13827_v60 = vpack.c.bf16 %v8628_v25, %v8608_v51  ;;  %v8380_v32 = vadd.f32 %v19692_v38, %v8328_v59  ;;  %v19726_v29 = vld [vmem:[#allocation14_spill] sm:$0xff]  ;;  %v5388_v51 = vld [vmem:[%s19385_s4 + $0x28] sm:$0xff] }
 0xc26   : > { %11529 = vmatmul.mubr.msk.f32.gmra.mrb[250].mxu0 %vm8661_vm12, %v19725_v48  ;;  %v7595_v43 = vrot.slane %v5387_v23, %v16423_v19  ;;  %v7599_v59 = vrot.slane %v5387_v23, %v19683_v8  ;;  %v7603_v39 = vrot.slane %v5388_v51, %v16423_v19  ;;  %v19728_v48 = vld [vmem:[#allocation6_spill] sm:$0xff] }
 0xc27   : > { %v8348_v15 = vadd.f32 %v8308_v14, %v8268_v27  ;;  %13828 = vmatprep.subr.bf16.mxu0 %v13827_v60  ;;  %v7464_v55 = vpop.permute.xlu0 %7463  ;;  %v7462_v41 = vpop.permute.xlu1 %7461  ;;  %8812 = vmatprep.mubr.f32.mxu0 %v19617_v28  ;;  %v8629_v13 = vmul.f32 %v8550_v40, %v8399_v57  ;;  %v8096_v57 = vrot.slane %v5387_v23, %v16453_v20 }
 0xc28   : > { %13830 = vmatpush1.bf16.msra.mxu0 %v13829_v26  ;;  %v8610_v26 = vmul.f32 %v8554_v18, %v8380_v32  ;;  %v5458_v27 = vsub.f32 %v5408_v16, %v11338_v36  ;;  %v17383_v60 = vrot.slane %v7595_v43, %v16423_v19  ;;  %v5409_v16 = vsub.f32 1.0, %v5388_v51 }
 0xc29   : > { %v8400_v6 = vadd.f32 %v19694_v5, %v8348_v15  ;;  %v13833_v63 = vpack.c.bf16 %v8629_v13, %v8609_v31  ;;  %v7532_v31 = vsel %vm7509_vm10, %v17235_v33, %v7460_v4  ;;  %v7607_v15 = vrot.slane %v5388_v51, %v19683_v8 }
 0xc2a   : > { %11530 = vmatmul.mubr.msk.f32.gmra.mrb[252].mxu0 %vm8661_vm12, %v19726_v29  ;;  %19727 = vst [vmem:[#allocation24_spill] sm:$0xff] %v17383_v60  ;;  %v17397_v13 = vrot.slane %v7599_v59, %v16423_v19  ;;  %v11339_v36 = vrot.slane %v5388_v51, 9  ;;  %v17401_v43 = vrot.slane %v7603_v39, %v16423_v19  ;;  %v17404_v33 = vrot.slane %v8096_v57, %v16453_v20 }
 0xc2b   : > { %v17376_v25 = vpop.permute.xlu0 %7467  ;;  %v7466_v52 = vpop.permute.xlu1 %7465  ;;  %8817 = vmatprep.mubr.f32.mxu0 %v19617_v28  ;;  %v8630_v40 = vmul.f32 %v8554_v18, %v8400_v6  ;;  %v8100_v6 = vrot.slane %v5387_v23, %v16473_v22  ;;  %v8104_v29 = vrot.slane %v5388_v51, %v16453_v20  ;;  %v7530_v59 = vsel %vm7509_vm10, %v7460_v4, %v7464_v55 }
 0xc2c   : > { %19729 = vst [vmem:[#allocation17_spill] sm:$0xff] %v17397_v13  ;;  %19730 = vst [vmem:[#allocation27_spill] sm:$0xff] %v17401_v43  ;;  %v7533_v23 = vsel %vm7509_vm10, %v17257_v62, %v7462_v41  ;;  %v8462_v39 = vrot.slane %v5458_v27, %v19690_v44  ;;  %v17421_v57 = vrot.slane %v7607_v15, %v16423_v19 }
 0xc2d   : > { %v13831_v14 = vpack.c.bf16 %v8630_v40, %v8610_v26  ;;  %19731 = vst [vmem:[#allocation28_spill] sm:$0xff] %v17404_v33  ;;  %v8458_v26 = vrot.slane %v5458_v27, %v19693_v17  ;;  %v7748_v40 = vmul.f32 %v17383_v60, %v7532_v31  ;;  %v8108_v62 = vrot.slane %v5388_v51, %v16473_v22 }
 0xc2e   : > { %11531 = vmatmul.mubr.msk.f32.gmra.mrb[254].mxu0 %vm8661_vm12, %v19728_v48  ;;  %19733 = vst [vmem:[#allocation20_spill] sm:$0xff] %v17421_v57  ;;  %v7531_v27 = vsel %vm7509_vm10, %v7462_v41, %v7466_v52  ;;  %v17436_v31 = vrot.slane %v8100_v6, %v16453_v20  ;;  %v7749_v15 = vmul.f32 %v17397_v13, %v7530_v59  ;;  %v19735_v41 = vld [vmem:[#allocation47_spill] sm:$0xff] }
 0xc2f   : > { %13832 = vmatprep.subr.bf16.mxu1 %v13831_v14  ;;  %v17390_v18 = vpop.permute.xlu1 %7469  ;;  %v17393_v32 = vpop.permute.xlu0 %7471  ;;  %8822 = vmatprep.mubr.f32.mxu0 %v19617_v28  ;;  %v7528_v14 = vsel %vm7509_vm10, %v7464_v55, %v17376_v25  ;;  %v8558_v46 = vrot.slane %v8458_v26, %v19693_v17  ;;  %v8289_v30 = vadd.f32 %v19735_v41, %v7748_v40 }
 0xc30   : > { %13834 = vmatpush1.bf16.msra.mxu1 %v13833_v63  ;;  %v19732_v63 = vld [vmem:[#allocation16_spill] sm:$0xff]  ;;  %19734 = vst [vmem:[#allocation30_spill] sm:$0xff] %v17436_v31  ;;  %v7750_v12 = vmul.f32 %v17401_v43, %v7528_v14  ;;  %v17452_v6 = vrot.slane %v8462_v39, %v19693_v17  ;;  %v19738_v39 = vld [vmem:[#allocation54_spill] sm:$0xff] }
 0xc31   : > { %v8290_v14 = vadd.f32 %v19738_v39, %v7749_v15 }
 0xc32   : > { %11532 = vmatmul.mubr.msk.f32.gmra.mrb[0].mxu0 %vm8661_vm12, %v19732_v63  ;;  %v7768_v63 = vmul.f32 %v17383_v60, %v7533_v23  ;;  %v19754_v60 = vld [vmem:[#allocation40_spill] sm:$0xff] }
 0xc33   : > { %11578 = vmatmul.mubr.msk.f32.vlgmr.msra.gmra.mrb[20].mxu1 %vm8661_vm12, %v19705_v2  ;;  %v7977_v4 = vpop.permute.xlu0 %7976  ;;  %v17425_v48 = vpop.permute.xlu1 %7473  ;;  %8826 = vmatprep.mubr.f32.mxu0 %v19617_v28  ;;  %v17438_v2 = vsub.f32 %v5409_v16, %v11339_v36  ;;  %v7769_v16 = vmul.f32 %v17397_v13, %v7531_v27  ;;  %v7529_v36 = vsel %vm7509_vm10, %v7466_v52, %v17390_v18 }
 0xc34   : > { %v8041_v55 = vsel %vm8020_vm11, %v17333_v7, %v7977_v4  ;;  %9275 = vmatprep.mubr.f32.mxu1 %v19617_v28  ;;  %v17449_v7 = vrot.slane %v8104_v29, %v16453_v20  ;;  %v17467_v29 = vld [vmem:[%s19385_s4 + $0x30] sm:$0xff] }
 0xc35   : > { %v8249_v51 = vmul.f32 %v17404_v33, %v8041_v55  ;;  %v8466_v52 = vrot.slane %v17438_v2, %v19693_v17  ;;  %v7611_v15 = vrot.slane %v17467_v29, %v16423_v19 }
 0xc36   : > { %11533 = vmatmul.mubr.msk.f32.gmra.mrb[2].mxu0 %vm8661_vm12, %v16832_v61  ;;  %19736 = vst [vmem:[#allocation39_spill] sm:$0xff] %v17449_v7  ;;  %v17462_v61 = vrot.slane %v8108_v62, %v16453_v20  ;;  %v19739_v62 = vld [vmem:[#allocation51_spill] sm:$0xff] }
 0xc37   : > { %11579 = vmatmul.mubr.msk.f32.gmra.mrb[22].mxu1 %vm8661_vm12, %v19712_v34  ;;  %v7981_v26 = vpop.permute.xlu0 %7980  ;;  %v7979_v40 = vpop.permute.xlu1 %7978  ;;  %8830 = vmatprep.mubr.f32.mxu0 %v19617_v28  ;;  %v8329_v59 = vadd.f32 %v8289_v30, %v8249_v51  ;;  %v8309_v27 = vadd.f32 %v19739_v62, %v7768_v63  ;;  %v19740_v51 = vld [vmem:[#allocation56_spill] sm:$0xff]  ;;  %v19741_v63 = vld [vmem:[#allocation58_spill] sm:$0xff] }
 0xc38   : > { %19737 = vst [vmem:[#allocation35_spill] sm:$0xff] %v17462_v61  ;;  %v8039_v23 = vsel %vm8020_vm11, %v7977_v4, %v7981_v26  ;;  %v8042_v34 = vsel %vm8020_vm11, %v17352_v35, %v7979_v40  ;;  %9281 = vmatprep.mubr.f32.mxu1 %v19617_v28  ;;  %v8291_v41 = vadd.f32 %v19740_v51, %v7750_v12  ;;  %v17495_v12 = vld [vmem:[%s19391_s10 + $0x10] sm:$0xff]  ;;  %v19742_v51 = vld [vmem:[#allocation60_spill] sm:$0xff] }
 0xc39   : > { %v8250_v55 = vmul.f32 %v17436_v31, %v8039_v23  ;;  %v8269_v30 = vmul.f32 %v17404_v33, %v8042_v34  ;;  %v7770_v4 = vmul.f32 %v17401_v43, %v7529_v36  ;;  %v7526_v35 = vsel %vm7509_vm10, %v17376_v25, %v17393_v32 }
 0xc3a   : > { %11534 = vmatmul.mubr.msk.f32.gmra.mrb[4].mxu0 %vm8661_vm12, %v16852_v21  ;;  %v8310_v39 = vadd.f32 %v19741_v63, %v7769_v16  ;;  %v8381_v21 = vadd.f32 %v19692_v38, %v8329_v59  ;;  %v7527_v16 = vsel %vm7509_vm10, %v17390_v18, %v17425_v48  ;;  %v17518_v18 = vrot.slane %v7611_v15, %v16423_v19 }
 0xc3b   : > { %v8330_v23 = vadd.f32 %v8290_v14, %v8250_v55  ;;  %v8349_v62 = vadd.f32 %v8309_v27, %v8269_v30  ;;  %11580 = vmatmul.mubr.msk.f32.gmra.mrb[24].mxu1 %vm8661_vm12, %v17495_v12  ;;  %v7983_v36 = vpop.permute.xlu1 %7982  ;;  %v7985_v25 = vpop.permute.xlu0 %7984  ;;  %8834 = vmatprep.mubr.f32.mxu0 %v19617_v28  ;;  %v7751_v27 = vmul.f32 %v17421_v57, %v7526_v35 }
 0xc3c   : > { %v8040_v34 = vsel %vm8020_vm11, %v7979_v40, %v7983_v36  ;;  %v8037_v14 = vsel %vm8020_vm11, %v7981_v26, %v7985_v25  ;;  %9287 = vmatprep.mubr.f32.mxu1 %v19617_v28  ;;  %v8311_v63 = vadd.f32 %v19742_v51, %v7770_v4  ;;  %19743 = vst [vmem:[#allocation42_spill] sm:$0xff] %v17518_v18 }
 0xc3d   : > { %v8401_v55 = vadd.f32 %v19694_v5, %v8349_v62  ;;  %v8270_v30 = vmul.f32 %v17436_v31, %v8040_v34  ;;  %v8251_v59 = vmul.f32 %v17449_v7, %v8037_v14  ;;  %v8382_v26 = vadd.f32 %v19692_v38, %v8330_v23  ;;  %v17527_v34 = vld [vmem:[%s19391_s10 + $0x18] sm:$0xff]  ;;  %v19744_v23 = vld [vmem:[#allocation89_spill] sm:$0xff] }
 0xc3e   : > { %11535 = vmatmul.mubr.msk.f32.gmra.mrb[6].mxu0 %vm8661_vm12, %v16875_v45  ;;  %v8470_v40 = vrot.slane %v17438_v2, %v19690_v44  ;;  %v7771_v35 = vmul.f32 %v17421_v57, %v7527_v16  ;;  %v17540_v15 = vmul.f32 %v8558_v46, %v8381_v21  ;;  %v8292_v16 = vadd.f32 %v19744_v23, %v7751_v27 }
 0xc3f   : > { %v8350_v62 = vadd.f32 %v8310_v39, %v8270_v30  ;;  %v8331_v33 = vadd.f32 %v8291_v41, %v8251_v59  ;;  %11581 = vmatmul.mubr.msk.f32.gmra.mrb[26].mxu1 %vm8661_vm12, %v17527_v34  ;;  %v17531_v45 = vpop.permute.xlu0 %7988  ;;  %v7987_v4 = vpop.permute.xlu1 %7986  ;;  %8838 = vmatprep.mubr.f32.mxu0 %v19617_v28  ;;  %v17542_v39 = vmul.f32 %v8558_v46, %v8401_v55  ;;  %v17558_v55 = vld [vmem:[%s19391_s10 + $0x20] sm:$0xff] }
 0xc40   : > { %v8035_v2 = vsel %vm8020_vm11, %v7985_v25, %v17531_v45  ;;  %v8038_v41 = vsel %vm8020_vm11, %v7983_v36, %v7987_v4  ;;  %9293 = vmatprep.mubr.f32.mxu1 %v19617_v28  ;;  %v8612_v36 = vmul.f32 %v17452_v6, %v8382_v26  ;;  %v8566_v25 = vrot.slane %v8466_v52, %v19693_v17  ;;  %v19745_v52 = vld [vmem:[#allocation91_spill] sm:$0xff] }
 0xc41   : > { %v8252_v14 = vmul.f32 %v17462_v61, %v8035_v2  ;;  %v8271_v30 = vmul.f32 %v17449_v7, %v8038_v41  ;;  %v8402_v59 = vadd.f32 %v19694_v5, %v8350_v62  ;;  %v8383_v51 = vadd.f32 %v19692_v38, %v8331_v33 }
 0xc42   : > { %11536 = vmatmul.mubr.msk.f32.gmra.mrb[8].mxu0 %vm8661_vm12, %v16899_v58  ;;  %v8312_v26 = vadd.f32 %v19745_v52, %v7771_v35  ;;  %v8570_v41 = vrot.slane %v8470_v40, %v19693_v17  ;;  %v11340_v35 = vrot.slane %v17467_v29, 9 }
 0xc43   : > { %v8332_v21 = vadd.f32 %v8292_v16, %v8252_v14  ;;  %v8351_v27 = vadd.f32 %v8311_v63, %v8271_v30  ;;  %11582 = vmatmul.mubr.msk.f32.gmra.mrb[28].mxu1 %vm8661_vm12, %v17558_v55  ;;  %v7476_v33 = vpop.permute.xlu0 %7475  ;;  %v17562_v62 = vpop.permute.xlu1 %7990  ;;  %8842 = vmatprep.mubr.f32.mxu0 %v19617_v28  ;;  %v8632_v58 = vmul.f32 %v17452_v6, %v8402_v59  ;;  %v19746_v59 = vld [vmem:[#allocation90_spill] sm:$0xff] }
 0xc44   : > { %v7524_v63 = vsel %vm7509_vm10, %v17393_v32, %v7476_v33  ;;  %v8036_v2 = vsel %vm8020_vm11, %v7987_v4, %v17562_v62  ;;  %9299 = vmatprep.mubr.f32.mxu1 %v19617_v28  ;;  %v5410_v32 = vsub.f32 1.0, %v17467_v29  ;;  %v8613_v30 = vmul.f32 %v8566_v25, %v8383_v51 }
 0xc45   : > { %v8403_v23 = vadd.f32 %v19694_v5, %v8351_v27  ;;  %v7752_v16 = vmul.f32 %v17518_v18, %v7524_v63  ;;  %v8272_v6 = vmul.f32 %v17462_v61, %v8036_v2  ;;  %v13835_v14 = vpack.c.bf16 %v8632_v58, %v8612_v36  ;;  %v17587_v27 = vld [vmem:[%s19391_s10 + $0x28] sm:$0xff]  ;;  %v17604_v63 = vld [vmem:[%s19385_s4 + $0x38] sm:$0xff] }
 0xc46   : > { %11537 = vmatmul.mubr.msk.f32.gmra.mrb[10].mxu0 %vm8661_vm12, %v16924_v24  ;;  %v8384_v4 = vadd.f32 %v19692_v38, %v8332_v21  ;;  %v7615_v21 = vrot.slane %v17467_v29, %v19683_v8  ;;  %v8120_v57 = vrot.slane %v17604_v63, %v16453_v20 }
 0xc47   : > { %v8293_v52 = vadd.f32 %v19746_v59, %v7752_v16  ;;  %v8352_v40 = vadd.f32 %v8312_v26, %v8272_v6  ;;  %11583 = vmatmul.mubr.msk.f32.gmra.mrb[30].mxu1 %vm8661_vm12, %v17587_v27  ;;  %13836 = vmatprep.subr.bf16.mxu0 %v13835_v14  ;;  %v17591_v24 = vpop.permute.xlu0 %7479  ;;  %v7478_v36 = vpop.permute.xlu1 %7477  ;;  %v8633_v58 = vmul.f32 %v8566_v25, %v8403_v23  ;;  %v19747_v16 = vld [vmem:[#allocation92_spill] sm:$0xff]  ;;  %v17619_v14 = vld [vmem:[%s19391_s10 + $0x30] sm:$0xff] }
 0xc48   : > { %v7525_v51 = vsel %vm7509_vm10, %v17425_v48, %v7478_v36  ;;  %8846 = vmatprep.mubr.f32.mxu0 %v19617_v28  ;;  %9305 = vmatprep.mubr.f32.mxu1 %v19617_v28  ;;  %v8112_v25 = vrot.slane %v17467_v29, %v16453_v20  ;;  %v17611_v48 = vsub.f32 %v5410_v32, %v11340_v35 }
 0xc49   : > { %v7772_v26 = vmul.f32 %v17518_v18, %v7525_v51  ;;  %v8404_v2 = vadd.f32 %v19694_v5, %v8352_v40  ;;  %v13841_v23 = vpack.c.bf16 %v8633_v58, %v8613_v30  ;;  %v8614_v30 = vmul.f32 %v8570_v41, %v8384_v4  ;;  %v17688_v18 = vld [vmem:[%s19391_s10 + $0x40] sm:$0xff] }
 0xc4a   : > { %11538 = vmatmul.mubr.msk.f32.gmra.mrb[12].mxu0 %vm8661_vm12, %v16949_v49  ;;  %v17627_v32 = vrot.slane %v7615_v21, %v16423_v19  ;;  %v7619_v35 = vrot.slane %v17604_v63, %v16423_v19  ;;  %v7522_v58 = vsel %vm7509_vm10, %v7476_v33, %v17591_v24  ;;  %v17636_v51 = vrot.slane %v8112_v25, %v16453_v20 }
 0xc4b   : > { %v17614_v6 = vadd.f32 %v19747_v16, %v7772_v26  ;;  %11584 = vmatmul.mubr.msk.f32.gmra.mrb[32].mxu1 %vm8661_vm12, %v17619_v14  ;;  %v17623_v59 = vpop.permute.xlu0 %7483  ;;  %v7482_v40 = vpop.permute.xlu1 %7481  ;;  %8850 = vmatprep.mubr.f32.mxu0 %v19617_v28  ;;  %v8634_v49 = vmul.f32 %v8570_v41, %v8404_v2  ;;  %v8116_v4 = vrot.slane %v17467_v29, %v16473_v22  ;;  %v17649_v2 = vld [vmem:[%s19391_s10 + $0x38] sm:$0xff] }
 0xc4c   : > { %19748 = vst [vmem:[#allocation36_spill] sm:$0xff] %v17627_v32  ;;  %9311 = vmatprep.mubr.f32.mxu1 %v19617_v28  ;;  %19749 = vst [vmem:[#allocation37_spill] sm:$0xff] %v17636_v51  ;;  %v17640_v41 = vpop.f32.mrb[240].mxu1  ;;  %v8474_v33 = vrot.slane %v17611_v48, %v19693_v17  ;;  %v7753_v16 = vmul.f32 %v17627_v32, %v7522_v58 }
 0xc4d   : > { %v13839_v26 = vpack.c.bf16 %v8634_v49, %v8614_v30  ;;  %v17644_v21 = vpop.f32.mrb[241].mxu1  ;;  %v17665_v49 = vrot.slane %v7619_v35, %v16423_v19  ;;  %v5411_v35 = vsub.f32 1.0, %v17604_v63 }
 0xc4e   : > { %11539 = vmatmul.mubr.msk.f32.gmra.mrb[14].mxu0 %vm8661_vm12, %v16973_v3  ;;  %19750 = vst [vmem:[#allocation38_spill] sm:$0xff] %v17644_v21  ;;  %v17662_v30 = vpop.f32.mrb[242].mxu1  ;;  %v8294_v31 = vadd.f32 %v19754_v60, %v7753_v16 }
 0xc4f   : > { %11585 = vmatmul.mubr.msk.f32.gmra.mrb[34].mxu1 %vm8661_vm12, %v17649_v2  ;;  %v7993_v25 = vpop.permute.xlu0 %7992  ;;  %13840 = vmatprep.subr.bf16.mxu1 %v13839_v26  ;;  %v17655_v29 = vpop.permute.xlu1 %7485  ;;  %19751 = vst [vmem:[#allocation53_spill] sm:$0xff] %v17665_v49  ;;  %v17670_v26 = vrot.slane %v8116_v4, %v16453_v20  ;;  %v8574_v4 = vrot.slane %v8474_v33, %v19693_v17 }
 0xc50   : > { %v8033_v3 = vsel %vm8020_vm11, %v17531_v45, %v7993_v25  ;;  %13842 = vmatpush1.bf16.msra.mxu1 %v13841_v23  ;;  %8854 = vmatprep.mubr.f32.mxu0 %v19617_v28  ;;  %v17672_v58 = vpop.f32.mrb[243].mxu1  ;;  %v7523_v45 = vsel %vm7509_vm10, %v7478_v36, %v7482_v40  ;;  %v7623_v23 = vrot.slane %v17604_v63, %v19683_v8 }
 0xc51   : > { %v8253_v46 = vmul.f32 %v17636_v51, %v8033_v3  ;;  %9317 = vmatprep.mubr.f32.mxu1 %v19617_v28  ;;  %19752 = vst [vmem:[#allocation55_spill] sm:$0xff] %v17670_v26  ;;  %19753 = vst [vmem:[#allocation57_spill] sm:$0xff] %v17672_v58  ;;  %v11341_v3 = vrot.slane %v17604_v63, 9  ;;  %v17682_v61 = vpop.f32.mrb[244].mxu1  ;;  %v7773_v43 = vmul.f32 %v17627_v32, %v7523_v45 }
 0xc52   : > { %11540 = vmatmul.mubr.msk.f32.gmra.mrb[16].mxu0 %vm8661_vm12, %v16997_v53  ;;  %v17706_v13 = vpop.f32.mrb[245].mxu1 }
 0xc53   : > { %v8333_v7 = vadd.f32 %v8293_v52, %v8253_v46  ;;  %11586 = vmatmul.mubr.msk.f32.gmra.mrb[36].mxu1 %vm8661_vm12, %v17688_v18  ;;  %v7997_v53 = vpop.permute.xlu0 %7996  ;;  %v7995_v36 = vpop.permute.xlu1 %7994  ;;  %8858 = vmatprep.mubr.f32.mxu0 %v19617_v28  ;;  %v7520_v46 = vsel %vm7509_vm10, %v17591_v24, %v17623_v59  ;;  %19755 = vst [vmem:[#allocation41_spill] sm:$0xff] %v17706_v13 }
 0xc54   : > { %v8031_v52 = vsel %vm8020_vm11, %v7993_v25, %v7997_v53  ;;  %v8034_v33 = vsel %vm8020_vm11, %v17562_v62, %v7995_v36  ;;  %9323 = vmatprep.mubr.f32.mxu1 %v19617_v28  ;;  %v17712_v24 = vpop.f32.mrb[246].mxu1  ;;  %v7521_v25 = vsel %vm7509_vm10, %v7482_v40, %v17655_v29  ;;  %v17720_v62 = vrot.slane %v7623_v23, %v16423_v19  ;;  %v17734_v40 = vld [vmem:[%s19391_s10 + $0x48] sm:$0xff] }
 0xc55   : > { %v8385_v60 = vadd.f32 %v19692_v38, %v8333_v7  ;;  %v8254_v16 = vmul.f32 %v17670_v26, %v8031_v52  ;;  %v8273_v9 = vmul.f32 %v17636_v51, %v8034_v33  ;;  %v17722_v0 = vsub.f32 %v5411_v35, %v11341_v3  ;;  %v17726_v45 = vpop.f32.mrb[247].mxu1 }
 0xc56   : > { %11541 = vmatmul.mubr.msk.f32.gmra.mrb[18].mxu0 %vm8661_vm12, %v17021_v56  ;;  %19756 = vst [vmem:[#allocation59_spill] sm:$0xff] %v17720_v62  ;;  %v8478_v7 = vrot.slane %v17611_v48, %v19690_v44  ;;  %19757 = vst [vmem:[#allocation46_spill] sm:$0xff] %v17726_v45  ;;  %v17744_v48 = vld [vmem:[%s19385_s4 + $0x40] sm:$0xff]  ;;  %v8124_v35 = vrot.slane %v17604_v63, %v16473_v22  ;;  %v17755_v3 = vpop.f32.mrb[248].mxu1 }
 0xc57   : > { %v17728_v52 = vmul.f32 %v8574_v4, %v8385_v60  ;;  %v8334_v33 = vadd.f32 %v8294_v31, %v8254_v16  ;;  %v8353_v51 = vadd.f32 %v17614_v6, %v8273_v9  ;;  %11587 = vmatmul.mubr.msk.f32.gmra.mrb[38].mxu1 %vm8661_vm12, %v17734_v40  ;;  %v7999_v56 = vpop.permute.xlu1 %7998  ;;  %v17738_v23 = vpop.permute.xlu0 %7487  ;;  %9096 = vmatprep.mubr.f32.mxu0 %v19617_v28  ;;  %v19760_v60 = vld [vmem:[#allocation44_spill] sm:$0xff]  ;;  %v17770_v63 = vld [vmem:[%s19391_s10] sm:$0xff] }
 0xc58   : > { %v7754_v9 = vmul.f32 %v17665_v49, %v7520_v46  ;;  %v8032_v31 = vsel %vm8020_vm11, %v7995_v36, %v7999_v56  ;;  %9329 = vmatprep.mubr.f32.mxu1 %v19617_v28  ;;  %v17751_v6 = vrot.slane %v8120_v57, %v16453_v20  ;;  %v8314_v16 = vadd.f32 %v19760_v60, %v7773_v43  ;;  %v17764_v46 = vpop.f32.mrb[249].mxu1 }
 0xc59   : > { %19758 = vst [vmem:[#allocation43_spill] sm:$0xff] %v17728_v52  ;;  %v8405_v32 = vadd.f32 %v19694_v5, %v8353_v51  ;;  %v8274_v42 = vmul.f32 %v17670_v26, %v8032_v31  ;;  %v7518_v36 = vsel %vm7509_vm10, %v17623_v59, %v17738_v23  ;;  %19761 = vst [vmem:[#allocation50_spill] sm:$0xff] %v17764_v46  ;;  %v17779_v31 = vpop.f32.mrb[250].mxu1  ;;  %v17790_v46 = vld [vmem:[%s19391_s10 + $0x50] sm:$0xff] }
 0xc5a   : > { %19759 = vst [vmem:[#allocation48_spill] sm:$0xff] %v17751_v6  ;;  %v7774_v57 = vmul.f32 %v17665_v49, %v7521_v25  ;;  %11560 = vmatmul.mubr.msk.f32.vlgmr.msra.gmra.mrb[20].mxu0 %vm8661_vm12, %v17770_v63  ;;  %v8482_v43 = vrot.slane %v17722_v0, %v19693_v17  ;;  %v8578_v51 = vrot.slane %v8478_v7, %v19693_v17 }
 0xc5b   : > { %v7627_v59 = vrot.slane %v17744_v48, %v16423_v19  ;;  %v8386_v25 = vadd.f32 %v19692_v38, %v8334_v33  ;;  %v17782_v60 = vmul.f32 %v8574_v4, %v8405_v32  ;;  %v8354_v26 = vadd.f32 %v8314_v16, %v8274_v42  ;;  %11588 = vmatmul.mubr.msk.f32.gmra.mrb[40].mxu1 %vm8661_vm12, %v17790_v46  ;;  %v17794_v7 = vpop.permute.xlu1 %7489  ;;  %v8001_v45 = vpop.permute.xlu0 %8000  ;;  %v19765_v32 = vld [vmem:[#allocation93_spill] sm:$0xff] }
 0xc5c   : > { %v19762_v49 = vpack.c.bf16 %v17542_v39, %v17540_v15  ;;  %v7755_v33 = vmul.f32 %v17720_v62, %v7518_v36  ;;  %v8029_v42 = vsel %vm8020_vm11, %v7997_v53, %v8001_v45  ;;  %9102 = vmatprep.mubr.f32.mxu0 %v19617_v28  ;;  %9335 = vmatprep.mubr.f32.mxu1 %v19617_v28  ;;  %v17804_v39 = vpop.f32.mrb[251].mxu1  ;;  %v19767_v53 = vld [vmem:[#allocation94_spill] sm:$0xff] }
 0xc5d   : > { %v17802_v15 = vrot.slane %v8124_v35, %v16453_v20  ;;  %19764 = vst [vmem:[#allocation61_spill] sm:$0xff] %v17804_v39  ;;  %v8406_v4 = vadd.f32 %v19694_v5, %v8354_v26  ;;  %v8255_v16 = vmul.f32 %v17751_v6, %v8029_v42  ;;  %v17811_v13 = vpop.f32.mrb[252].mxu1  ;;  %v8315_v58 = vadd.f32 %v19767_v53, %v7774_v57 }
 0xc5e   : > { %13838 = vmatpush1.bf16.msra.mxu0 %v19762_v49  ;;  %v8295_v49 = vadd.f32 %v19765_v32, %v7754_v9  ;;  %19766 = vst [vmem:[#allocation62_spill] sm:$0xff] %v17811_v13  ;;  %v7519_v35 = vsel %vm7509_vm10, %v17655_v29, %v17794_v7  ;;  %v17821_v9 = vld [vmem:[%s19391_s10 + $0x8] sm:$0xff]  ;;  %v17826_v26 = vrot.slane %v7627_v59, %v16423_v19  ;;  %v8967_v57 = vpop.f32.mrb[253].mxu1  ;;  %v17833_v29 = vld [vmem:[%s19391_s10 + $0x58] sm:$0xff] }
 0xc5f   : > { %19763 = vst [vmem:[#allocation52_spill] sm:$0xff] %v17802_v15  ;;  %11561 = vmatmul.mubr.msk.f32.gmra.mrb[22].mxu0 %vm8661_vm12, %v17821_v9  ;;  %v8486_v42 = vrot.slane %v17722_v0, %v19690_v44  ;;  %11589 = vmatmul.mubr.msk.f32.gmra.mrb[42].mxu1 %vm8661_vm12, %v17833_v29  ;;  %v17837_v53 = vpop.permute.xlu0 %8004  ;;  %v8003_v36 = vpop.permute.xlu1 %8002  ;;  %v8616_v59 = vmul.f32 %v8578_v51, %v8386_v25 }
 0xc60   : > { %19768 = vst [vmem:[#allocation64_spill] sm:$0xff] %v17826_v26  ;;  %v8335_v32 = vadd.f32 %v8295_v49, %v8255_v16  ;;  %9108 = vmatprep.mubr.f32.mxu0 %v19617_v28  ;;  %v8636_v39 = vmul.f32 %v8578_v51, %v8406_v4  ;;  %v8296_v21 = vadd.f32 %v16941_v11, %v7755_v33  ;;  %v17850_v13 = vpop.f32.mrb[254].mxu1 }
 0xc61   : > { %v8027_v0 = vsel %vm8020_vm11, %v8001_v45, %v17837_v53  ;;  %v8030_v49 = vsel %vm8020_vm11, %v7999_v56, %v8003_v36  ;;  %9341 = vmatprep.mubr.f32.mxu1 %v19617_v28  ;;  %v17848_v16 = vadd.f32 %v8967_v57, %v17640_v41  ;;  %v7775_v52 = vmul.f32 %v17720_v62, %v7519_v35  ;;  %v17858_v45 = vld [vmem:[%s19385_s4 + $0x48] sm:$0xff]  ;;  %v8973_v56 = vpop.f32.mrb[255].mxu1 }
 0xc62   : > { %v8256_v51 = vmul.f32 %v17802_v15, %v8027_v0  ;;  %v8275_v11 = vmul.f32 %v17751_v6, %v8030_v49  ;;  %v13843_v25 = vpack.c.bf16 %v8636_v39, %v8616_v59  ;;  %v8582_v33 = vrot.slane %v8482_v43, %v19693_v17  ;;  %v17867_v35 = vpop.f32.mrb[0].mxu1  ;;  %v17872_v59 = vld [vmem:[%s19391_s10 + $0x60] sm:$0xff] }
 0xc63   : > { %19769 = vst [vmem:[#allocation65_spill] sm:$0xff] %v17848_v16  ;;  %v8387_v41 = vadd.f32 %v19692_v38, %v8335_v32  ;;  %11562 = vmatmul.mubr.msk.f32.gmra.mrb[24].mxu0 %vm8661_vm12, %v17495_v12  ;;  %v17865_v4 = vadd.f32 %v8973_v56, %v17662_v30  ;;  %11590 = vmatmul.mubr.msk.f32.gmra.mrb[44].mxu1 %vm8661_vm12, %v17872_v59  ;;  %v17876_v43 = vpop.permute.xlu0 %7491  ;;  %v17878_v32 = vpop.permute.xlu1 %8006  ;;  %v5412_v49 = vsub.f32 1.0, %v17744_v48  ;;  %v11342_v62 = vrot.slane %v17744_v48, 9 }
 0xc64   : > { %v8336_v57 = vadd.f32 %v8296_v21, %v8256_v51  ;;  %v8355_v39 = vadd.f32 %v8315_v58, %v8275_v11  ;;  %13844 = vmatprep.subr.bf16.mxu0 %v13843_v25  ;;  %v8586_v30 = vrot.slane %v8486_v42, %v19693_v17  ;;  %v7516_v21 = vsel %vm7509_vm10, %v17738_v23, %v17876_v43  ;;  %v8979_v51 = vpop.f32.mrb[1].mxu1 }
 0xc65   : > { %19770 = vst [vmem:[#allocation77_spill] sm:$0xff] %v17865_v4  ;;  %v8028_v58 = vsel %vm8020_vm11, %v8003_v36, %v17878_v32  ;;  %9114 = vmatprep.mubr.f32.mxu0 %v19617_v28  ;;  %9347 = vmatprep.mubr.f32.mxu1 %v19617_v28  ;;  %v7635_v0 = vrot.slane %v17858_v45, %v16423_v19  ;;  %v17897_v56 = vpop.f32.mrb[2].mxu1 }
 0xc66   : > { %v8316_v42 = vadd.f32 %v16965_v37, %v7775_v52  ;;  %v8407_v11 = vadd.f32 %v19694_v5, %v8355_v39  ;;  %v7756_v23 = vmul.f32 %v17826_v26, %v7516_v21  ;;  %v8276_v25 = vmul.f32 %v17802_v15, %v8028_v58  ;;  %19771 = vst [vmem:[#allocation75_spill] sm:$0xff] %v17897_v56  ;;  %v8985_v37 = vpop.f32.mrb[3].mxu1 }
 0xc67   : > { %v17899_v36 = vmul.f32 %v8582_v33, %v8387_v41  ;;  %v8388_v6 = vadd.f32 %v19692_v38, %v8336_v57  ;;  %11563 = vmatmul.mubr.msk.f32.gmra.mrb[26].mxu0 %vm8661_vm12, %v17527_v34  ;;  %v17906_v4 = vadd.f32 %v8979_v51, %v17682_v61  ;;  %v17916_v41 = vld [vmem:[%s19391_s10 + $0x68] sm:$0xff]  ;;  %v7496_v57 = vpop.permute.xlu0 %7495  ;;  %v17921_v61 = vpop.f32.mrb[4].mxu1  ;;  %v17930_v51 = vadd.f32 %v8985_v37, %v17712_v24 }
 0xc68   : > { %v17908_v52 = vmul.f32 %v8582_v33, %v8407_v11  ;;  %v17911_v39 = vadd.f32 %v16952_v47, %v7756_v23  ;;  %v8356_v21 = vadd.f32 %v8316_v42, %v8276_v25  ;;  %11591 = vmatmul.mubr.msk.f32.gmra.mrb[46].mxu1 %vm8661_vm12, %v17916_v41  ;;  %9120 = vmatprep.mubr.f32.mxu0 %v19617_v28  ;;  %v17925_v58 = vpop.permute.xlu1 %7493  ;;  %v8991_v42 = vpop.f32.mrb[5].mxu1 }
 0xc69   : > { %19772 = vst [vmem:[#allocation72_spill] sm:$0xff] %v17906_v4  ;;  %19773 = vst [vmem:[#allocation67_spill] sm:$0xff] %v17921_v61  ;;  %v7631_v33 = vrot.slane %v17744_v48, %v19683_v8  ;;  %9353 = vmatprep.mubr.f32.mxu1 %v19617_v28  ;;  %v7735_v47 = vrot.slane %v7635_v0, %v16423_v19  ;;  %v7517_v23 = vsel %vm7509_vm10, %v17794_v7, %v17925_v58  ;;  %v17941_v4 = vpop.f32.mrb[6].mxu1  ;;  %v17953_v7 = vld [vmem:[%s19391_s10 + $0x70] sm:$0xff] }
 0xc6a   : > { %19774 = vst [vmem:[#allocation18_spill] sm:$0xff] %v17930_v51  ;;  %v8408_v11 = vadd.f32 %v19694_v5, %v8356_v21  ;;  %v8128_v25 = vrot.slane %v17744_v48, %v16453_v20  ;;  %19775 = vst [vmem:[#allocation76_spill] sm:$0xff] %v17941_v4  ;;  %v7776_v0 = vmul.f32 %v17826_v26, %v7517_v23  ;;  %v8997_v21 = vpop.f32.mrb[7].mxu1 }
 0xc6b   : > { %11564 = vmatmul.mubr.msk.f32.gmra.mrb[28].mxu0 %vm8661_vm12, %v17558_v55  ;;  %v7639_v24 = vrot.slane %v17858_v45, %v19683_v8  ;;  %v17948_v37 = vsub.f32 %v5412_v49, %v11342_v62  ;;  %v7500_v15 = vpop.permute.xlu0 %7499  ;;  %v8618_v23 = vmul.f32 %v8586_v30, %v8388_v6  ;;  %v17959_v51 = vadd.f32 %v8991_v42, %v17755_v3  ;;  %v17961_v8 = vpop.f32.mrb[8].mxu1  ;;  %v19779_v49 = vld [vmem:[#allocation19_spill] sm:$0xff] }
 0xc6c   : > { %11592 = vmatmul.mubr.msk.f32.gmra.mrb[48].mxu1 %vm8661_vm12, %v17953_v7  ;;  %9126 = vmatprep.mubr.f32.mxu0 %v19617_v28  ;;  %v8638_v26 = vmul.f32 %v8586_v30, %v8408_v11  ;;  %19777 = vst [vmem:[#allocation86_spill] sm:$0xff] %v17961_v8  ;;  %v17964_v62 = vrot.slane %v7631_v33, %v16423_v19  ;;  %v7498_v61 = vpop.permute.xlu1 %7497  ;;  %v17972_v56 = vpop.f32.mrb[9].mxu1 }
 0xc6d   : > { %19776 = vst [vmem:[#allocation70_spill] sm:$0xff] %v17959_v51  ;;  %v17967_v16 = vadd.f32 %v19779_v49, %v7776_v0  ;;  %v7512_v4 = vsel %vm7509_vm10, %v7496_v57, %v7500_v15  ;;  %9359 = vmatprep.mubr.f32.mxu1 %v19617_v28  ;;  %v17975_v3 = vrot.slane %v8128_v25, %v16453_v20  ;;  %v17979_v42 = vpop.f32.mrb[10].mxu1  ;;  %v11343_v49 = vrot.slane %v17858_v45, 9 }
 0xc6e   : > { %19778 = vst [vmem:[#allocation21_spill] sm:$0xff] %v17964_v62  ;;  %v7758_v6 = vmul.f32 %v7735_v47, %v7512_v4  ;;  %v13847_v30 = vpack.c.bf16 %v8638_v26, %v8618_v23  ;;  %v8132_v33 = vrot.slane %v17744_v48, %v16473_v22  ;;  %19781 = vst [vmem:[#allocation81_spill] sm:$0xff] %v17979_v42  ;;  %v17990_v25 = vpop.f32.mrb[11].mxu1 }
 0xc6f   : > { %19780 = vst [vmem:[#allocation63_spill] sm:$0xff] %v17975_v3  ;;  %v7514_v11 = vsel %vm7509_vm10, %v17876_v43, %v7496_v57  ;;  %11565 = vmatmul.mubr.msk.f32.gmra.mrb[30].mxu0 %vm8661_vm12, %v17587_v27  ;;  %v8490_v0 = vrot.slane %v17948_v37, %v19693_v17  ;;  %v8136_v4 = vrot.slane %v17858_v45, %v16453_v20  ;;  %v17999_v43 = vld [vmem:[%s19391_s10 + $0x78] sm:$0xff]  ;;  %v8009_v57 = vpop.permute.xlu0 %8008 }
 0xc70   : > { %v7739_v26 = vrot.slane %v7639_v24, %v16423_v19  ;;  %v17994_v48 = vadd.f32 %v17007_v54, %v7758_v6  ;;  %11593 = vmatmul.mubr.msk.f32.gmra.mrb[50].mxu1 %vm8661_vm12, %v17999_v43  ;;  %13848 = vmatprep.subr.bf16.mxu1 %v13847_v30  ;;  %v18004_v23 = vadd.f32 %v8997_v21, %v17779_v31  ;;  %v7502_v24 = vpop.permute.xlu1 %7501  ;;  %v5413_v54 = vsub.f32 1.0, %v17858_v45 }
 0xc71   : > { %v8025_v19 = vsel %vm8020_vm11, %v17837_v53, %v8009_v57  ;;  %9132 = vmatprep.mubr.f32.mxu0 %v19617_v28  ;;  %9365 = vmatprep.mubr.f32.mxu1 %v19617_v28  ;;  %v8140_v6 = vrot.slane %v17858_v45, %v16473_v22  ;;  %v7757_v30 = vmul.f32 %v17964_v62, %v7514_v11 }
 0xc72   : > { %19782 = vst [vmem:[#allocation66_spill] sm:$0xff] %v18004_v23  ;;  %v8257_v31 = vmul.f32 %v17975_v3, %v8025_v19  ;;  %v7513_v21 = vsel %vm7509_vm10, %v7498_v61, %v7502_v24  ;;  %v18020_v53 = vrot.slane %v8132_v33, %v16453_v20  ;;  %v9013_v23 = vpop.f32.mrb[12].mxu1  ;;  %v8590_v51 = vrot.slane %v8490_v0, %v19693_v17  ;;  %v18042_v0 = vld [vmem:[%s19391_s10 + $0x80] sm:$0xff] }
 0xc73   : > { %v7778_v42 = vmul.f32 %v7735_v47, %v7513_v21  ;;  %11566 = vmatmul.mubr.msk.f32.gmra.mrb[32].mxu0 %vm8661_vm12, %v17619_v14  ;;  %v18026_v8 = vrot.slane %v8136_v4, %v16453_v20  ;;  %v8494_v22 = vrot.slane %v17948_v37, %v19690_v44  ;;  %v18030_v45 = vpop.f32.mrb[13].mxu1  ;;  %v7510_v33 = vsel %vm7509_vm10, %v7500_v15, %v17161_v50  ;;  %v8013_v37 = vpop.permute.xlu0 %8012 }
 0xc74   : > { %19783 = vst [vmem:[#allocation4_spill] sm:$0xff] %v18020_v53  ;;  %19784 = vst [vmem:[#allocation5_spill] sm:$0xff] %v18030_v45  ;;  %v7515_v11 = vsel %vm7509_vm10, %v17925_v58, %v7498_v61  ;;  %v8337_v47 = vadd.f32 %v17911_v39, %v8257_v31  ;;  %11594 = vmatmul.mubr.msk.f32.gmra.mrb[52].mxu1 %vm8661_vm12, %v18042_v0  ;;  %9138 = vmatprep.mubr.f32.mxu0 %v19617_v28  ;;  %v8011_v15 = vpop.permute.xlu1 %8010  ;;  %v19785_v58 = vld [vmem:[#allocation69_spill] sm:$0xff]  ;;  %v19786_v45 = vld [vmem:[#allocation71_spill] sm:$0xff] }
 0xc75   : > { %v18048_v4 = vadd.f32 %v17031_v10, %v7778_v42  ;;  %v8023_v50 = vsel %vm8020_vm11, %v8009_v57, %v8013_v37  ;;  %9371 = vmatprep.mubr.f32.mxu1 %v19617_v28  ;;  %v18053_v39 = vsub.f32 %v5413_v54, %v11343_v49  ;;  %v8240_v61 = vrot.slane %v8140_v6, %v16453_v20  ;;  %v9018_v42 = vpop.f32.mrb[14].mxu1 }
 0xc76   : > { %v8298_v23 = vadd.f32 %v19785_v58, %v7757_v30  ;;  %v8389_v19 = vadd.f32 %v19692_v38, %v8337_v47  ;;  %v8258_v31 = vmul.f32 %v18020_v53, %v8023_v50  ;;  %v8026_v10 = vsel %vm8020_vm11, %v17878_v32, %v8011_v15  ;;  %v18069_v49 = vpop.f32.mrb[15].mxu1  ;;  %v18076_v32 = vld [vmem:[%s19391_s10 + $0x88] sm:$0xff]  ;;  %v19788_v50 = vld [vmem:[#allocation22_spill] sm:$0xff] }
 0xc77   : > { %v7759_v21 = vmul.f32 %v7739_v26, %v7510_v33  ;;  %v7777_v57 = vmul.f32 %v17964_v62, %v7515_v11  ;;  %v7511_v54 = vsel %vm7509_vm10, %v7502_v24, %v19786_v45  ;;  %v8277_v20 = vmul.f32 %v17975_v3, %v8026_v10  ;;  %11567 = vmatmul.mubr.msk.f32.gmra.mrb[34].mxu0 %vm8661_vm12, %v17649_v2  ;;  %v8017_v33 = vpop.permute.xlu0 %8016  ;;  %v19789_v42 = vld [vmem:[#allocation68_spill] sm:$0xff] }
 0xc78   : > { %19787 = vst [vmem:[#allocation80_spill] sm:$0xff] %v18069_v49  ;;  %v18071_v6 = vmul.f32 %v8590_v51, %v8389_v19  ;;  %v8338_v30 = vadd.f32 %v8298_v23, %v8258_v31  ;;  %11595 = vmatmul.mubr.msk.f32.gmra.mrb[54].mxu1 %vm8661_vm12, %v18076_v32  ;;  %9144 = vmatprep.mubr.f32.mxu0 %v19617_v28  ;;  %v8015_v23 = vpop.permute.xlu1 %8014  ;;  %v19790_v3 = vld [vmem:[#allocation8_spill] sm:$0xff] }
 0xc79   : > { %v8594_v24 = vrot.slane %v8494_v22, %v19693_v17  ;;  %v8357_v45 = vadd.f32 %v17967_v16, %v8277_v20  ;;  %v8498_v11 = vrot.slane %v18053_v39, %v19693_v17  ;;  %v8021_v47 = vsel %vm8020_vm11, %v8013_v37, %v8017_v33  ;;  %9615 = vmatprep.mubr.f32.mxu1 %v19617_v28  ;;  %v9023_v22 = vpop.f32.mrb[16].mxu1 }
 0xc7a   : > { %v8059_v58 = vsel %vm8020_vm11, %v8017_v33, %v19788_v50  ;;  %v7779_v19 = vmul.f32 %v7739_v26, %v7511_v54  ;;  %v8259_v31 = vmul.f32 %v18026_v8, %v8021_v47  ;;  %v8024_v16 = vsel %vm8020_vm11, %v8011_v15, %v8015_v23  ;;  %v18100_v33 = vpop.f32.mrb[17].mxu1 }
 0xc7b   : > { %v8260_v10 = vmul.f32 %v8240_v61, %v8059_v58  ;;  %v8300_v20 = vadd.f32 %v19789_v42, %v7759_v21  ;;  %v8318_v62 = vadd.f32 %v19790_v3, %v7777_v57  ;;  %v8409_v37 = vadd.f32 %v19694_v5, %v8357_v45  ;;  %11568 = vmatmul.mubr.msk.f32.gmra.mrb[36].mxu0 %vm8661_vm12, %v17688_v18 }
 0xc7c   : > { %v8278_v49 = vmul.f32 %v18020_v53, %v8024_v16  ;;  %v8390_v26 = vadd.f32 %v19692_v38, %v8338_v30  ;;  %v8339_v54 = vadd.f32 %v17994_v48, %v8259_v31  ;;  %11614 = vmatmul.mubr.msk.f32.vlgmr.msra.gmra.mrb[56].mxu1 %vm8661_vm12, %v17770_v63  ;;  %9150 = vmatprep.mubr.f32.mxu0 %v19617_v28  ;;  %v8019_v47 = vpop.permute.xlu1 %8018  ;;  %v19792_v48 = vld [vmem:[#allocation7_spill] sm:$0xff]  ;;  %v19793_v31 = vld [vmem:[#allocation9_spill] sm:$0xff] }
 0xc7d   : > { %v8502_v3 = vrot.slane %v18053_v39, %v19690_v44  ;;  %v18109_v15 = vmul.f32 %v8590_v51, %v8409_v37  ;;  %v8340_v21 = vadd.f32 %v8300_v20, %v8260_v10  ;;  %v19791_v45 = vpack.c.bf16 %v17908_v52, %v17899_v36  ;;  %9621 = vmatprep.mubr.f32.mxu1 %v19617_v28  ;;  %v9028_v51 = vpop.f32.mrb[18].mxu1 }
 0xc7e   : > { %v8358_v57 = vadd.f32 %v8318_v62, %v8278_v49  ;;  %v8320_v30 = vadd.f32 %v19792_v48, %v7779_v19  ;;  %v8598_v50 = vrot.slane %v8498_v11, %v19693_v17  ;;  %v8022_v58 = vsel %vm8020_vm11, %v8015_v23, %v8019_v47  ;;  %v18128_v49 = vpop.f32.mrb[19].mxu1 }
 0xc7f   : > { %13850 = vmatpush1.bf16.msra.mxu1 %v19791_v45  ;;  %v8060_v44 = vsel %vm8020_vm11, %v8019_v47, %v19793_v31  ;;  %v8279_v36 = vmul.f32 %v18026_v8, %v8022_v58  ;;  %11569 = vmatmul.mubr.msk.f32.gmra.mrb[38].mxu0 %vm8661_vm12, %v17734_v40  ;;  %v13853_v39 = vpack.c.bf16 %v18109_v15, %v18071_v6  ;;  %v19797_v15 = vld [vmem:[#allocation5_spill] sm:$0xff]  ;;  %v19799_v51 = vld [vmem:[#allocation80_spill] sm:$0xff] }
 0xc80   : > { %v8410_v62 = vadd.f32 %v19694_v5, %v8358_v57  ;;  %v8280_v52 = vmul.f32 %v8240_v61, %v8060_v44  ;;  %v8391_v11 = vadd.f32 %v19692_v38, %v8339_v54  ;;  %11615 = vmatmul.mubr.msk.f32.gmra.mrb[58].mxu1 %vm8661_vm12, %v17821_v9  ;;  %9156 = vmatprep.mubr.f32.mxu0 %v19617_v28 }
 0xc81   : > { %v8602_v23 = vrot.slane %v8502_v3, %v19693_v17  ;;  %v8620_v19 = vmul.f32 %v8594_v24, %v8390_v26  ;;  %v8392_v8 = vadd.f32 %v19692_v38, %v8340_v21  ;;  %v8359_v61 = vadd.f32 %v18048_v4, %v8279_v36  ;;  %9627 = vmatprep.mubr.f32.mxu1 %v19617_v28  ;;  %v19794_v26 = vld [vmem:[#allocation43_spill] sm:$0xff]  ;;  %v18351_v36 = vld [vmem:[%s19391_s10 + $0x18] sm:$0xff] }
 0xc82   : > { %v8360_v10 = vadd.f32 %v8320_v30, %v8280_v52  ;;  %v8640_v16 = vmul.f32 %v8594_v24, %v8410_v62  ;;  %v18145_v38 = vmul.f32 %v8598_v50, %v8391_v11  ;;  %v19795_v54 = vpack.c.bf16 %v17782_v60, %v19794_v26  ;;  %v19796_v60 = vld [vmem:[#allocation62_spill] sm:$0xff] }
 0xc83   : > { %v8411_v22 = vadd.f32 %v19694_v5, %v8359_v61  ;;  %11570 = vmatmul.mubr.msk.f32.gmra.mrb[40].mxu0 %vm8661_vm12, %v17790_v46  ;;  %v8622_v4 = vmul.f32 %v8602_v23, %v8392_v8  ;;  %v19801_v61 = vld [vmem:[#allocation76_spill] sm:$0xff] }
 0xc84   : > { %v8412_v42 = vadd.f32 %v19694_v5, %v8360_v10  ;;  %v13851_v20 = vpack.c.bf16 %v8640_v16, %v8620_v19  ;;  %11616 = vmatmul.mubr.msk.f32.gmra.mrb[60].mxu1 %vm8661_vm12, %v17495_v12  ;;  %9162 = vmatprep.mubr.f32.mxu0 %v19617_v28 }
 0xc85   : > { %v18147_v17 = vmul.f32 %v8598_v50, %v8411_v22  ;;  %9633 = vmatprep.mubr.f32.mxu1 %v19617_v28  ;;  %v18336_v50 = vld [vmem:[%s19391_s10 + $0x10] sm:$0xff] }
 0xc86   : > { %v8642_v24 = vmul.f32 %v8602_v23, %v8412_v42 }
 0xc87   : > { %11571 = vmatmul.mubr.msk.f32.gmra.mrb[42].mxu0 %vm8661_vm12, %v17833_v29  ;;  %v13857_v37 = vpack.c.bf16 %v18147_v17, %v18145_v38 }
 0xc88   : > { %v13855_v5 = vpack.c.bf16 %v8642_v24, %v8622_v4  ;;  %11617 = vmatmul.mubr.msk.f32.gmra.mrb[62].mxu1 %vm8661_vm12, %v17527_v34  ;;  %9168 = vmatprep.mubr.f32.mxu0 %v19617_v28 }
 0xc89   : > { %9639 = vmatprep.mubr.f32.mxu1 %v19617_v28 }
 0xc8a   : > { %13856 = vmatprep.subr.bf16.mxu1 %v13855_v5 }
 0xc8b   : > { %11572 = vmatmul.mubr.msk.f32.gmra.mrb[44].mxu0 %vm8661_vm12, %v17872_v59 }
 0xc8c   : > { %11618 = vmatmul.mubr.msk.f32.gmra.mrb[64].mxu1 %vm8661_vm12, %v17558_v55  ;;  %9174 = vmatprep.mubr.f32.mxu0 %v19617_v28 }
 0xc8d   : > { %9645 = vmatprep.mubr.f32.mxu1 %v19617_v28 }
 0xc8f   : > { %11573 = vmatmul.mubr.msk.f32.gmra.mrb[46].mxu0 %vm8661_vm12, %v17916_v41 }
 0xc90   : > { %11619 = vmatmul.mubr.msk.f32.gmra.mrb[66].mxu1 %vm8661_vm12, %v17587_v27  ;;  %9180 = vmatprep.mubr.f32.mxu0 %v19617_v28 }
 0xc91   : > { %9651 = vmatprep.mubr.f32.mxu1 %v19617_v28 }
 0xc93   : > { %11574 = vmatmul.mubr.msk.f32.gmra.mrb[48].mxu0 %vm8661_vm12, %v17953_v7 }
 0xc94   : > { %11620 = vmatmul.mubr.msk.f32.gmra.mrb[68].mxu1 %vm8661_vm12, %v17619_v14  ;;  %9186 = vmatprep.mubr.f32.mxu0 %v19617_v28 }
 0xc95   : > { %9657 = vmatprep.mubr.f32.mxu1 %v19617_v28 }
 0xc97   : > { %11575 = vmatmul.mubr.msk.f32.gmra.mrb[50].mxu0 %vm8661_vm12, %v17999_v43 }
 0xc98   : > { %11621 = vmatmul.mubr.msk.f32.gmra.mrb[70].mxu1 %vm8661_vm12, %v17649_v2  ;;  %9192 = vmatprep.mubr.f32.mxu0 %v19617_v28 }
 0xc99   : > { %9663 = vmatprep.mubr.f32.mxu1 %v19617_v28 }
 0xc9b   : > { %11576 = vmatmul.mubr.msk.f32.gmra.mrb[52].mxu0 %vm8661_vm12, %v18042_v0 }
 0xc9c   : > { %11622 = vmatmul.mubr.msk.f32.gmra.mrb[72].mxu1 %vm8661_vm12, %v17688_v18  ;;  %9198 = vmatprep.mubr.f32.mxu0 %v19617_v28 }
 0xc9d   : > { %9669 = vmatprep.mubr.f32.mxu1 %v19617_v28 }
 0xc9f   : > { %11577 = vmatmul.mubr.msk.f32.gmra.mrb[54].mxu0 %vm8661_vm12, %v18076_v32 }
 0xca0   : > { %11623 = vmatmul.mubr.msk.f32.gmra.mrb[74].mxu1 %vm8661_vm12, %v17734_v40  ;;  %9442 = vmatprep.mubr.f32.mxu0 %v19617_v28 }
 0xca1   : > { %9675 = vmatprep.mubr.f32.mxu1 %v19617_v28 }
 0xca3   : > { %11596 = vmatmul.mubr.msk.f32.vlgmr.msra.gmra.mrb[56].mxu0 %vm8661_vm12, %v17770_v63 }
 0xca4   : > { %13846 = vmatpush1.bf16.msra.mxu0 %v19795_v54  ;;  %11624 = vmatmul.mubr.msk.f32.gmra.mrb[76].mxu1 %vm8661_vm12, %v17790_v46 }
 0xca5   : > { %13852 = vmatprep.subr.bf16.mxu0 %v13851_v20  ;;  %9448 = vmatprep.mubr.f32.mxu0 %v19617_v28 }
 0xca6   : > { %9681 = vmatprep.mubr.f32.mxu1 %v19617_v28 }
 0xca7   : > { %11597 = vmatmul.mubr.msk.f32.gmra.mrb[58].mxu0 %vm8661_vm12, %v17821_v9 }
 0xca8   : > { %11625 = vmatmul.mubr.msk.f32.gmra.mrb[78].mxu1 %vm8661_vm12, %v17833_v29  ;;  %9454 = vmatprep.mubr.f32.mxu0 %v19617_v28 }
 0xca9   : > { %9687 = vmatprep.mubr.f32.mxu1 %v19617_v28 }
 0xcab   : > { %11598 = vmatmul.mubr.msk.f32.gmra.mrb[60].mxu0 %vm8661_vm12, %v17495_v12 }
 0xcac   : > { %11626 = vmatmul.mubr.msk.f32.gmra.mrb[80].mxu1 %vm8661_vm12, %v17872_v59  ;;  %9460 = vmatprep.mubr.f32.mxu0 %v19617_v28 }
 0xcad   : > { %9693 = vmatprep.mubr.f32.mxu1 %v19617_v28 }
 0xcaf   : > { %11599 = vmatmul.mubr.msk.f32.gmra.mrb[62].mxu0 %vm8661_vm12, %v17527_v34 }
 0xcb0   : > { %11627 = vmatmul.mubr.msk.f32.gmra.mrb[82].mxu1 %vm8661_vm12, %v17916_v41  ;;  %9466 = vmatprep.mubr.f32.mxu0 %v19617_v28 }
 0xcb1   : > { %9699 = vmatprep.mubr.f32.mxu1 %v19617_v28 }
 0xcb3   : > { %11600 = vmatmul.mubr.msk.f32.gmra.mrb[64].mxu0 %vm8661_vm12, %v17558_v55 }
 0xcb4   : > { %11628 = vmatmul.mubr.msk.f32.gmra.mrb[84].mxu1 %vm8661_vm12, %v17953_v7  ;;  %9472 = vmatprep.mubr.f32.mxu0 %v19617_v28 }
 0xcb5   : > { %9705 = vmatprep.mubr.f32.mxu1 %v19617_v28 }
 0xcb7   : > { %11601 = vmatmul.mubr.msk.f32.gmra.mrb[66].mxu0 %vm8661_vm12, %v17587_v27 }
 0xcb8   : > { %11629 = vmatmul.mubr.msk.f32.gmra.mrb[86].mxu1 %vm8661_vm12, %v17999_v43  ;;  %9478 = vmatprep.mubr.f32.mxu0 %v19617_v28 }
 0xcb9   : > { %9711 = vmatprep.mubr.f32.mxu1 %v19617_v28 }
 0xcbb   : > { %11602 = vmatmul.mubr.msk.f32.gmra.mrb[68].mxu0 %vm8661_vm12, %v17619_v14 }
 0xcbc   : > { %11630 = vmatmul.mubr.msk.f32.gmra.mrb[88].mxu1 %vm8661_vm12, %v18042_v0  ;;  %9484 = vmatprep.mubr.f32.mxu0 %v19617_v28 }
 0xcbd   : > { %9717 = vmatprep.mubr.f32.mxu1 %v19617_v28 }
 0xcbf   : > { %11603 = vmatmul.mubr.msk.f32.gmra.mrb[70].mxu0 %vm8661_vm12, %v17649_v2 }
 0xcc0   : > { %11631 = vmatmul.mubr.msk.f32.gmra.mrb[90].mxu1 %vm8661_vm12, %v18076_v32  ;;  %9490 = vmatprep.mubr.f32.mxu0 %v19617_v28 }
 0xcc1   : > { %9961 = vmatprep.mubr.f32.mxu1 %v19617_v28 }
 0xcc3   : > { %11604 = vmatmul.mubr.msk.f32.gmra.mrb[72].mxu0 %vm8661_vm12, %v17688_v18 }
 0xcc4   : > { %11650 = vmatmul.mubr.msk.f32.vlgmr.msra.gmra.mrb[92].mxu1 %vm8661_vm12, %v17770_v63  ;;  %9496 = vmatprep.mubr.f32.mxu0 %v19617_v28 }
 0xcc5   : > { %13858 = vmatpush1.bf16.msra.mxu1 %v13857_v37  ;;  %9967 = vmatprep.mubr.f32.mxu1 %v19617_v28 }
 0xcc7   : > { %11605 = vmatmul.mubr.msk.f32.gmra.mrb[74].mxu0 %vm8661_vm12, %v17734_v40 }
 0xcc8   : > { %11651 = vmatmul.mubr.msk.f32.gmra.mrb[94].mxu1 %vm8661_vm12, %v17821_v9  ;;  %9502 = vmatprep.mubr.f32.mxu0 %v19617_v28 }
 0xcc9   : > { %9973 = vmatprep.mubr.f32.mxu1 %v19617_v28 }
 0xccb   : > { %11606 = vmatmul.mubr.msk.f32.gmra.mrb[76].mxu0 %vm8661_vm12, %v17790_v46 }
 0xccc   : > { %11652 = vmatmul.mubr.msk.f32.gmra.mrb[96].mxu1 %vm8661_vm12, %v17495_v12  ;;  %9508 = vmatprep.mubr.f32.mxu0 %v19617_v28 }
 0xccd   : > { %9979 = vmatprep.mubr.f32.mxu1 %v19617_v28 }
 0xccf   : > { %11607 = vmatmul.mubr.msk.f32.gmra.mrb[78].mxu0 %vm8661_vm12, %v17833_v29 }
 0xcd0   : > { %11653 = vmatmul.mubr.msk.f32.gmra.mrb[98].mxu1 %vm8661_vm12, %v17527_v34  ;;  %9514 = vmatprep.mubr.f32.mxu0 %v19617_v28 }
 0xcd1   : > { %9985 = vmatprep.mubr.f32.mxu1 %v19617_v28 }
 0xcd3   : > { %11608 = vmatmul.mubr.msk.f32.gmra.mrb[80].mxu0 %vm8661_vm12, %v17872_v59 }
 0xcd4   : > { %11654 = vmatmul.mubr.msk.f32.gmra.mrb[100].mxu1 %vm8661_vm12, %v17558_v55  ;;  %9520 = vmatprep.mubr.f32.mxu0 %v19617_v28 }
 0xcd5   : > { %9991 = vmatprep.mubr.f32.mxu1 %v19617_v28 }
 0xcd7   : > { %11609 = vmatmul.mubr.msk.f32.gmra.mrb[82].mxu0 %vm8661_vm12, %v17916_v41 }
 0xcd8   : > { %11655 = vmatmul.mubr.msk.f32.gmra.mrb[102].mxu1 %vm8661_vm12, %v17587_v27  ;;  %9526 = vmatprep.mubr.f32.mxu0 %v19617_v28 }
 0xcd9   : > { %9997 = vmatprep.mubr.f32.mxu1 %v19617_v28 }
 0xcdb   : > { %11610 = vmatmul.mubr.msk.f32.gmra.mrb[84].mxu0 %vm8661_vm12, %v17953_v7 }
 0xcdc   : > { %11656 = vmatmul.mubr.msk.f32.gmra.mrb[104].mxu1 %vm8661_vm12, %v17619_v14  ;;  %9532 = vmatprep.mubr.f32.mxu0 %v19617_v28 }
 0xcdd   : > { %10003 = vmatprep.mubr.f32.mxu1 %v19617_v28 }
 0xcdf   : > { %11611 = vmatmul.mubr.msk.f32.gmra.mrb[86].mxu0 %vm8661_vm12, %v17999_v43 }
 0xce0   : > { %11657 = vmatmul.mubr.msk.f32.gmra.mrb[106].mxu1 %vm8661_vm12, %v17649_v2  ;;  %9538 = vmatprep.mubr.f32.mxu0 %v19617_v28 }
 0xce1   : > { %10009 = vmatprep.mubr.f32.mxu1 %v19617_v28 }
 0xce3   : > { %11612 = vmatmul.mubr.msk.f32.gmra.mrb[88].mxu0 %vm8661_vm12, %v18042_v0 }
 0xce4   : > { %11658 = vmatmul.mubr.msk.f32.gmra.mrb[108].mxu1 %vm8661_vm12, %v17688_v18  ;;  %9544 = vmatprep.mubr.f32.mxu0 %v19617_v28 }
 0xce5   : > { %10015 = vmatprep.mubr.f32.mxu1 %v19617_v28  ;;  %v8782_v12 = vpop.f32.mrb[240].mxu0 }
 0xce6   : > { %v8784_v34 = vpop.f32.mrb[241].mxu0 }
 0xce7   : > { %11613 = vmatmul.mubr.msk.f32.gmra.mrb[90].mxu0 %vm8661_vm12, %v18076_v32  ;;  %v10387_v3 = vadd.f32 %v19796_v60, %v8784_v34 }
 0xce8   : > { %11659 = vmatmul.mubr.msk.f32.gmra.mrb[110].mxu1 %vm8661_vm12, %v17734_v40  ;;  %9788 = vmatprep.mubr.f32.mxu0 %v19617_v28 }
 0xce9   : > { %10021 = vmatprep.mubr.f32.mxu1 %v19617_v28  ;;  %v8788_v21 = vpop.f32.mrb[242].mxu0  ;;  %v10421_v57 = vadd.f32 %v10387_v3, %v17972_v56 }
 0xcea   : > { %v8790_v45 = vpop.f32.mrb[243].mxu0 }
 0xceb   : > { %11632 = vmatmul.mubr.msk.f32.vlgmr.msra.gmra.mrb[92].mxu0 %vm8661_vm12, %v17770_v63  ;;  %v10404_v47 = vadd.f32 %v17850_v13, %v8790_v45  ;;  %10458 = vrot.lane.b32.xlu0 %v10421_v57, %s14015_s26 }
 0xcec   : > { %13854 = vmatpush1.bf16.msra.mxu0 %v13853_v39  ;;  %11660 = vmatmul.mubr.msk.f32.gmra.mrb[112].mxu1 %vm8661_vm12, %v17790_v46  ;;  %v19800_v39 = vld [vmem:[#allocation67_spill] sm:$0xff] }
 0xced   : > { %9794 = vmatprep.mubr.f32.mxu0 %v19617_v28  ;;  %10027 = vmatprep.mubr.f32.mxu1 %v19617_v28  ;;  %v8794_v48 = vpop.f32.mrb[244].mxu0  ;;  %v10438_v56 = vadd.f32 %v10404_v47, %v17990_v25 }
 0xcee   : > { %v8795_v30 = vpop.f32.mrb[245].mxu0 }
 0xcef   : > { %11633 = vmatmul.mubr.msk.f32.gmra.mrb[94].mxu0 %vm8661_vm12, %v17821_v9  ;;  %v10586_v13 = vadd.f32 %v17867_v35, %v8795_v30  ;;  %10460 = vrot.lane.b32.xlu1 %v10438_v56, %s14015_s26  ;;  %v19798_v35 = vld [vmem:[#allocation75_spill] sm:$0xff] }
 0xcf0   : > { %11661 = vmatmul.mubr.msk.f32.gmra.mrb[114].mxu1 %vm8661_vm12, %v17833_v29  ;;  %9800 = vmatprep.mubr.f32.mxu0 %v19617_v28 }
 0xcf1   : > { %10033 = vmatprep.mubr.f32.mxu1 %v19617_v28  ;;  %v8799_v6 = vpop.f32.mrb[246].mxu0  ;;  %v18331_v25 = vadd.f32 %v10586_v13, %v19797_v15 }
 0xcf2   : > { %v8800_v58 = vpop.f32.mrb[247].mxu0 }
 0xcf3   : > { %11634 = vmatmul.mubr.msk.f32.gmra.mrb[96].mxu0 %vm8661_vm12, %v18336_v50  ;;  %v10602_v31 = vadd.f32 %v19798_v35, %v8800_v58  ;;  %v18437_v58 = vld [vmem:[%s19391_s10 + $0x20] sm:$0xff] }
 0xcf4   : > { %11662 = vmatmul.mubr.msk.f32.gmra.mrb[116].mxu1 %vm8661_vm12, %v17872_v59  ;;  %9806 = vmatprep.mubr.f32.mxu0 %v19617_v28 }
 0xcf5   : > { %10039 = vmatprep.mubr.f32.mxu1 %v19617_v28  ;;  %v8804_v44 = vpop.f32.mrb[248].mxu0  ;;  %v18346_v62 = vadd.f32 %v10602_v31, %v19799_v51 }
 0xcf6   : > { %v8805_v52 = vpop.f32.mrb[249].mxu0 }
 0xcf7   : > { %11635 = vmatmul.mubr.msk.f32.gmra.mrb[98].mxu0 %vm8661_vm12, %v18351_v36  ;;  %v10650_v11 = vadd.f32 %v19800_v39, %v8805_v52  ;;  %v18450_v52 = vld [vmem:[%s19391_s10 + $0x28] sm:$0xff] }
 0xcf8   : > { %11663 = vmatmul.mubr.msk.f32.gmra.mrb[118].mxu1 %vm8661_vm12, %v17916_v41  ;;  %9812 = vmatprep.mubr.f32.mxu0 %v19617_v28 }
 0xcf9   : > { %10045 = vmatprep.mubr.f32.mxu1 %v19617_v28  ;;  %v8809_v23 = vpop.f32.mrb[250].mxu0  ;;  %v10684_v19 = vadd.f32 %v10650_v11, %v18100_v33  ;;  %v19802_v33 = vld [vmem:[#allocation86_spill] sm:$0xff] }
 0xcfa   : > { %v8810_v8 = vpop.f32.mrb[251].mxu0 }
 0xcfb   : > { %11636 = vmatmul.mubr.msk.f32.gmra.mrb[100].mxu0 %vm8661_vm12, %v17558_v55  ;;  %v10667_v10 = vadd.f32 %v19801_v61, %v8810_v8  ;;  %10718 = vrot.lane.b32.xlu0 %v10684_v19, %s14016_s28 }
 0xcfc   : > { %11664 = vmatmul.mubr.msk.f32.gmra.mrb[120].mxu1 %vm8661_vm12, %v17953_v7  ;;  %9818 = vmatprep.mubr.f32.mxu0 %v19617_v28 }
 0xcfd   : > { %10051 = vmatprep.mubr.f32.mxu1 %v19617_v28  ;;  %v8814_v16 = vpop.f32.mrb[252].mxu0  ;;  %v10701_v22 = vadd.f32 %v10667_v10, %v18128_v49  ;;  %v18463_v10 = vld [vmem:[%s19391_s10 + $0x30] sm:$0xff] }
 0xcfe   : > { %v8815_v42 = vpop.f32.mrb[253].mxu0 }
 0xcff   : > { %11637 = vmatmul.mubr.msk.f32.gmra.mrb[102].mxu0 %vm8661_vm12, %v17587_v27  ;;  %v10386_v55 = vadd.f32 %v8815_v42, %v8782_v12  ;;  %10720 = vrot.lane.b32.xlu1 %v10701_v22, %s14016_s28  ;;  %v19803_v27 = vld [vmem:[#allocation81_spill] sm:$0xff] }
 0xd00   : > { %11665 = vmatmul.mubr.msk.f32.gmra.mrb[122].mxu1 %vm8661_vm12, %v17999_v43  ;;  %9824 = vmatprep.mubr.f32.mxu0 %v19617_v28 }
 0xd01   : > { %10057 = vmatprep.mubr.f32.mxu1 %v19617_v28  ;;  %v10420_v20 = vadd.f32 %v10386_v55, %v19802_v33  ;;  %v8819_v38 = vpop.f32.mrb[254].mxu0 }
 0xd02   : > { %v8820_v17 = vpop.f32.mrb[255].mxu0 }
 0xd03   : > { %11638 = vmatmul.mubr.msk.f32.gmra.mrb[104].mxu0 %vm8661_vm12, %v17619_v14  ;;  %v10403_v49 = vadd.f32 %v8820_v17, %v8788_v21  ;;  %10454 = vrot.lane.b32.xlu0 %v10420_v20, %s14015_s26  ;;  %v18476_v20 = vld [vmem:[%s19391_s10 + $0x38] sm:$0xff] }
 0xd04   : > { %11666 = vmatmul.mubr.msk.f32.gmra.mrb[124].mxu1 %vm8661_vm12, %v18042_v0  ;;  %9830 = vmatprep.mubr.f32.mxu0 %v19617_v28 }
 0xd05   : > { %10063 = vmatprep.mubr.f32.mxu1 %v19617_v28  ;;  %v10437_v4 = vadd.f32 %v10403_v49, %v19803_v27  ;;  %v8824_v24 = vpop.f32.mrb[0].mxu0 }
 0xd06   : > { %v8825_v5 = vpop.f32.mrb[1].mxu0  ;;  %v9271_v37 = vpop.f32.mrb[20].mxu1  ;;  %v18489_v24 = vld [vmem:[%s19391_s10 + $0x40] sm:$0xff] }
 0xd07   : > { %11639 = vmatmul.mubr.msk.f32.gmra.mrb[106].mxu0 %vm8661_vm12, %v17649_v2  ;;  %10456 = vrot.lane.b32.xlu1 %v10437_v4, %s14015_s26  ;;  %v18391_v14 = vpop.f32.mrb[21].mxu1 }
 0xd08   : > { %11667 = vmatmul.mubr.msk.f32.gmra.mrb[126].mxu1 %vm8661_vm12, %v18076_v32  ;;  %9836 = vmatprep.mubr.f32.mxu0 %v19617_v28 }
 0xd09   : > { %10303 = vmatprep.mubr.f32.mxu1 %v19617_v28  ;;  %v8828_v26 = vpop.f32.mrb[2].mxu0 }
 0xd0a   : > { %v8829_v54 = vpop.f32.mrb[3].mxu0  ;;  %v9277_v12 = vpop.f32.mrb[22].mxu1 }
 0xd0b   : > { %11640 = vmatmul.mubr.msk.f32.gmra.mrb[108].mxu0 %vm8661_vm12, %v17688_v18  ;;  %v18400_v2 = vpop.f32.mrb[23].mxu1 }
 0xd0c   : > { %9842 = vmatprep.mubr.f32.mxu0 %v19617_v28  ;;  %11686 = vmatmul.mubr.msk.f32.vlgmr.msra.gmra.mrb[128].mxu1 %vm8661_vm12, %v17770_v63 }
 0xd0d   : > { %10307 = vmatprep.mubr.f32.mxu1 %v19617_v28  ;;  %v8832_v34 = vpop.f32.mrb[4].mxu0 }
 0xd0e   : > { %v8833_v60 = vpop.f32.mrb[5].mxu0  ;;  %v9283_v3 = vpop.f32.mrb[24].mxu1 }
 0xd0f   : > { %11641 = vmatmul.mubr.msk.f32.gmra.mrb[110].mxu0 %vm8661_vm12, %v17734_v40  ;;  %v18408_v18 = vpop.f32.mrb[25].mxu1  ;;  %v18504_v60 = vld [vmem:[%s19391_s10 + $0x48] sm:$0xff] }
 0xd10   : > { %9848 = vmatprep.mubr.f32.mxu0 %v19617_v28  ;;  %11687 = vmatmul.mubr.msk.f32.gmra.mrb[130].mxu1 %vm8661_vm12, %v17821_v9 }
 0xd11   : > { %10311 = vmatprep.mubr.f32.mxu1 %v19617_v28  ;;  %v8836_v21 = vpop.f32.mrb[6].mxu0 }
 0xd12   : > { %v8837_v57 = vpop.f32.mrb[7].mxu0  ;;  %v9289_v45 = vpop.f32.mrb[26].mxu1 }
 0xd13   : > { %11642 = vmatmul.mubr.msk.f32.gmra.mrb[112].mxu0 %vm8661_vm12, %v17790_v46  ;;  %v18416_v40 = vpop.f32.mrb[27].mxu1 }
 0xd14   : > { %9854 = vmatprep.mubr.f32.mxu0 %v19617_v28  ;;  %11688 = vmatmul.mubr.msk.f32.gmra.mrb[132].mxu1 %vm8661_vm12, %v18336_v50 }
 0xd15   : > { %10315 = vmatprep.mubr.f32.mxu1 %v19617_v28  ;;  %v8840_v47 = vpop.f32.mrb[8].mxu0 }
 0xd16   : > { %v8841_v48 = vpop.f32.mrb[9].mxu0  ;;  %v18421_v56 = vpop.f32.mrb[28].mxu1 }
 0xd17   : > { %11643 = vmatmul.mubr.msk.f32.gmra.mrb[114].mxu0 %vm8661_vm12, %v17833_v29  ;;  %v18426_v30 = vpop.f32.mrb[29].mxu1 }
 0xd18   : > { %9860 = vmatprep.mubr.f32.mxu0 %v19617_v28  ;;  %11689 = vmatmul.mubr.msk.f32.gmra.mrb[134].mxu1 %vm8661_vm12, %v18351_v36 }
 0xd19   : > { %10319 = vmatprep.mubr.f32.mxu1 %v19617_v28  ;;  %v8844_v13 = vpop.f32.mrb[10].mxu0 }
 0xd1a   : > { %v8845_v6 = vpop.f32.mrb[11].mxu0  ;;  %v18431_v15 = vpop.f32.mrb[30].mxu1 }
 0xd1b   : > { %11644 = vmatmul.mubr.msk.f32.gmra.mrb[116].mxu0 %vm8661_vm12, %v17872_v59  ;;  %v18441_v35 = vpop.f32.mrb[31].mxu1 }
 0xd1c   : > { %9866 = vmatprep.mubr.f32.mxu0 %v19617_v28  ;;  %11690 = vmatmul.mubr.msk.f32.gmra.mrb[136].mxu1 %vm8661_vm12, %v18437_v58 }
 0xd1d   : > { %10323 = vmatprep.mubr.f32.mxu1 %v19617_v28  ;;  %v8848_v31 = vpop.f32.mrb[12].mxu0 }
 0xd1e   : > { %v8849_v44 = vpop.f32.mrb[13].mxu0  ;;  %v9307_v51 = vpop.f32.mrb[32].mxu1 }
 0xd1f   : > { %11645 = vmatmul.mubr.msk.f32.gmra.mrb[118].mxu0 %vm8661_vm12, %v17916_v41  ;;  %v9309_v39 = vpop.f32.mrb[33].mxu1 }
 0xd20   : > { %9872 = vmatprep.mubr.f32.mxu0 %v19617_v28  ;;  %11691 = vmatmul.mubr.msk.f32.gmra.mrb[138].mxu1 %vm8661_vm12, %v18450_v52  ;;  %v18454_v11 = vadd.f32 %v9309_v39, %v9271_v37 }
 0xd21   : > { %10327 = vmatprep.mubr.f32.mxu1 %v19617_v28  ;;  %v8852_v23 = vpop.f32.mrb[14].mxu0 }
 0xd22   : > { %v8853_v19 = vpop.f32.mrb[15].mxu0  ;;  %v9313_v8 = vpop.f32.mrb[34].mxu1 }
 0xd23   : > { %11646 = vmatmul.mubr.msk.f32.gmra.mrb[120].mxu0 %vm8661_vm12, %v17953_v7  ;;  %v9315_v61 = vpop.f32.mrb[35].mxu1 }
 0xd24   : > { %9878 = vmatprep.mubr.f32.mxu0 %v19617_v28  ;;  %11692 = vmatmul.mubr.msk.f32.gmra.mrb[140].mxu1 %vm8661_vm12, %v18463_v10  ;;  %v18467_v16 = vadd.f32 %v9315_v61, %v9277_v12 }
 0xd25   : > { %10331 = vmatprep.mubr.f32.mxu1 %v19617_v28  ;;  %v8856_v22 = vpop.f32.mrb[16].mxu0 }
 0xd26   : > { %v8857_v42 = vpop.f32.mrb[17].mxu0  ;;  %v9319_v55 = vpop.f32.mrb[36].mxu1 }
 0xd27   : > { %11647 = vmatmul.mubr.msk.f32.gmra.mrb[122].mxu0 %vm8661_vm12, %v17999_v43  ;;  %v9321_v33 = vpop.f32.mrb[37].mxu1 }
 0xd28   : > { %9884 = vmatprep.mubr.f32.mxu0 %v19617_v28  ;;  %11693 = vmatmul.mubr.msk.f32.gmra.mrb[142].mxu1 %vm8661_vm12, %v18476_v20  ;;  %v18480_v38 = vadd.f32 %v9321_v33, %v9283_v3 }
 0xd29   : > { %10335 = vmatprep.mubr.f32.mxu1 %v19617_v28  ;;  %v8860_v17 = vpop.f32.mrb[18].mxu0 }
 0xd2a   : > { %v8861_v49 = vpop.f32.mrb[19].mxu0  ;;  %v9325_v27 = vpop.f32.mrb[38].mxu1 }
 0xd2b   : > { %11648 = vmatmul.mubr.msk.f32.gmra.mrb[124].mxu0 %vm8661_vm12, %v18042_v0  ;;  %v9327_v4 = vpop.f32.mrb[39].mxu1 }
 0xd2c   : > { %9890 = vmatprep.mubr.f32.mxu0 %v19617_v28  ;;  %11694 = vmatmul.mubr.msk.f32.gmra.mrb[144].mxu1 %vm8661_vm12, %v18489_v24  ;;  %v18493_v5 = vadd.f32 %v9327_v4, %v9289_v45 }
 0xd2d   : > { %10339 = vmatprep.mubr.f32.mxu1 %v19617_v28  ;;  %v18496_v37 = vpop.f32.mrb[20].mxu0 }
 0xd2e   : > { %v9100_v26 = vpop.f32.mrb[21].mxu0  ;;  %v9331_v54 = vpop.f32.mrb[40].mxu1 }
 0xd2f   : > { %11649 = vmatmul.mubr.msk.f32.gmra.mrb[126].mxu0 %vm8661_vm12, %v18076_v32  ;;  %v10391_v12 = vadd.f32 %v9307_v51, %v9100_v26  ;;  %v9333_v34 = vpop.f32.mrb[41].mxu1 }
 0xd30   : > { %10134 = vmatprep.mubr.f32.mxu0 %v19617_v28  ;;  %11695 = vmatmul.mubr.msk.f32.gmra.mrb[146].mxu1 %vm8661_vm12, %v18504_v60  ;;  %v18509_v3 = vadd.f32 %v9333_v34, %v18421_v56 }
 0xd31   : > { %10343 = vmatprep.mubr.f32.mxu1 %v19617_v28 }
 0xd32   : > { %v18512_v21 = vpop.f32.mrb[22].mxu0  ;;  %v9337_v45 = vpop.f32.mrb[42].mxu1 }
 0xd33   : > { %11668 = vmatmul.mubr.msk.f32.vlgmr.msra.gmra.mrb[128].mxu0 %vm8661_vm12, %v17770_v63  ;;  %v9106_v57 = vpop.f32.mrb[23].mxu0  ;;  %v9339_v48 = vpop.f32.mrb[43].mxu1 }
 0xd34   : > { %10139 = vmatprep.mubr.f32.mxu0 %v19617_v28  ;;  %v10408_v47 = vadd.f32 %v9313_v8, %v9106_v57  ;;  %11696 = vmatmul.mubr.msk.f32.gmra.mrb[148].mxu1 %vm8661_vm12, %v17790_v46  ;;  %v18520_v13 = vadd.f32 %v9339_v48, %v18431_v15 }
 0xd35   : > { %10348 = vmatprep.mubr.f32.mxu1 %v19617_v28 }
 0xd36   : > { %v18523_v56 = vpop.f32.mrb[24].mxu0  ;;  %v9343_v6 = vpop.f32.mrb[44].mxu1 }
 0xd37   : > { %11669 = vmatmul.mubr.msk.f32.gmra.mrb[130].mxu0 %vm8661_vm12, %v17821_v9  ;;  %v9112_v63 = vpop.f32.mrb[25].mxu0  ;;  %v9345_v44 = vpop.f32.mrb[45].mxu1 }
 0xd38   : > { %10144 = vmatprep.mubr.f32.mxu0 %v19617_v28  ;;  %v10590_v31 = vadd.f32 %v9319_v55, %v9112_v63  ;;  %11697 = vmatmul.mubr.msk.f32.gmra.mrb[150].mxu1 %vm8661_vm12, %v17833_v29  ;;  %v10425_v46 = vadd.f32 %v10391_v12, %v9345_v44  ;;  %v19806_v44 = vld [vmem:[#allocation41_spill] sm:$0xff] }
 0xd39   : > { %10353 = vmatprep.mubr.f32.mxu1 %v19617_v28 }
 0xd3a   : > { %v18531_v15 = vpop.f32.mrb[26].mxu0  ;;  %10474 = vrot.lane.b32.xlu0 %v10425_v46, %s14015_s26 }
 0xd3b   : > { %11670 = vmatmul.mubr.msk.f32.gmra.mrb[132].mxu0 %vm8661_vm12, %v18336_v50  ;;  %v9118_v51 = vpop.f32.mrb[27].mxu0  ;;  %v9349_v39 = vpop.f32.mrb[46].mxu1 }
 0xd3c   : > { %10149 = vmatprep.mubr.f32.mxu0 %v19617_v28  ;;  %v10606_v9 = vadd.f32 %v9325_v27, %v9118_v51  ;;  %v9351_v23 = vpop.f32.mrb[47].mxu1  ;;  %11698 = vmatmul.mubr.msk.f32.gmra.mrb[152].mxu1 %vm8661_vm12, %v17872_v59  ;;  %v19804_v27 = vld [vmem:[#allocation38_spill] sm:$0xff] }
 0xd3d   : > { %v10442_v29 = vadd.f32 %v10408_v47, %v9351_v23  ;;  %10358 = vmatprep.mubr.f32.mxu1 %v19617_v28  ;;  %v19807_v23 = vld [vmem:[#allocation46_spill] sm:$0xff] }
 0xd3e   : > { %v18540_v19 = vpop.f32.mrb[28].mxu0 }
 0xd3f   : > { %11671 = vmatmul.mubr.msk.f32.gmra.mrb[134].mxu0 %vm8661_vm12, %v18351_v36  ;;  %v9124_v50 = vpop.f32.mrb[29].mxu0  ;;  %v9355_v8 = vpop.f32.mrb[48].mxu1  ;;  %10476 = vrot.lane.b32.xlu1 %v10442_v29, %s14015_s26 }
 0xd40   : > { %10154 = vmatprep.mubr.f32.mxu0 %v19617_v28  ;;  %v10654_v61 = vadd.f32 %v9331_v54, %v9124_v50  ;;  %v9357_v22 = vpop.f32.mrb[49].mxu1  ;;  %11699 = vmatmul.mubr.msk.f32.gmra.mrb[154].mxu1 %vm8661_vm12, %v17916_v41 }
 0xd41   : > { %v18548_v59 = vadd.f32 %v10590_v31, %v9357_v22  ;;  %10363 = vmatprep.mubr.f32.mxu1 %v19617_v28  ;;  %v19808_v22 = vld [vmem:[#allocation50_spill] sm:$0xff] }
 0xd42   : > { %v18551_v42 = vpop.f32.mrb[30].mxu0 }
 0xd43   : > { %11672 = vmatmul.mubr.msk.f32.gmra.mrb[136].mxu0 %vm8661_vm12, %v18437_v58  ;;  %v9130_v36 = vpop.f32.mrb[31].mxu0  ;;  %v9361_v55 = vpop.f32.mrb[50].mxu1 }
 0xd44   : > { %v10671_v33 = vadd.f32 %v9337_v45, %v9130_v36  ;;  %v9363_v17 = vpop.f32.mrb[51].mxu1  ;;  %10160 = vmatprep.mubr.f32.mxu0 %v19617_v28  ;;  %11700 = vmatmul.mubr.msk.f32.gmra.mrb[156].mxu1 %vm8661_vm12, %v17953_v7  ;;  %v19805_v45 = vld [vmem:[#allocation57_spill] sm:$0xff] }
 0xd45   : > { %v18558_v49 = vadd.f32 %v10606_v9, %v9363_v17  ;;  %10368 = vmatprep.mubr.f32.mxu1 %v19617_v28 }
 0xd46   : > { %v9134_v41 = vpop.f32.mrb[32].mxu0 }
 0xd47   : > { %v18562_v4 = vadd.f32 %v9134_v41, %v19804_v27  ;;  %v9367_v26 = vpop.f32.mrb[52].mxu1  ;;  %11673 = vmatmul.mubr.msk.f32.gmra.mrb[138].mxu0 %vm8661_vm12, %v18450_v52  ;;  %v9136_v58 = vpop.f32.mrb[33].mxu0 }
 0xd48   : > { %v9369_v54 = vpop.f32.mrb[53].mxu1  ;;  %v10390_v12 = vadd.f32 %v9136_v58, %v18496_v37  ;;  %10166 = vmatprep.mubr.f32.mxu0 %v19617_v28  ;;  %11701 = vmatmul.mubr.msk.f32.gmra.mrb[158].mxu1 %vm8661_vm12, %v17999_v43 }
 0xd49   : > { %v10688_v7 = vadd.f32 %v10654_v61, %v9369_v54  ;;  %10373 = vmatprep.mubr.f32.mxu1 %v19617_v28 }
 0xd4a   : > { %v10424_v34 = vadd.f32 %v10390_v12, %v9343_v6  ;;  %v9140_v57 = vpop.f32.mrb[34].mxu0 }
 0xd4b   : > { %v18572_v47 = vadd.f32 %v9140_v57, %v19805_v45  ;;  %v9373_v48 = vpop.f32.mrb[54].mxu1  ;;  %10734 = vrot.lane.b32.xlu0 %v10688_v7, %s14016_s28  ;;  %11674 = vmatmul.mubr.msk.f32.gmra.mrb[140].mxu0 %vm8661_vm12, %v18463_v10  ;;  %v9142_v52 = vpop.f32.mrb[35].mxu0  ;;  %v13981_v7 = vld [vmem:[%s19391_s10 + $0x50] sm:$0xff] }
 0xd4c   : > { %v9375_v37 = vpop.f32.mrb[55].mxu1  ;;  %v10407_v63 = vadd.f32 %v9142_v52, %v18512_v21  ;;  %10172 = vmatprep.mubr.f32.mxu0 %v19617_v28  ;;  %11702 = vmatmul.mubr.msk.f32.gmra.mrb[160].mxu1 %vm8661_vm12, %v18042_v0  ;;  %v19810_v57 = vld [vmem:[#allocation65_spill] sm:$0xff] }
 0xd4d   : > { %v10705_v43 = vadd.f32 %v10671_v33, %v9375_v37  ;;  %10379 = vmatprep.mubr.f32.mxu1 %v19617_v28 }
 0xd4e   : > { %v10441_v6 = vadd.f32 %v10407_v63, %v9349_v39  ;;  %v9146_v31 = vpop.f32.mrb[36].mxu0 }
 0xd4f   : > { %v18583_v46 = vadd.f32 %v9146_v31, %v19806_v44  ;;  %10470 = vrot.lane.b32.xlu0 %v10424_v34, %s14015_s26  ;;  %10736 = vrot.lane.b32.xlu1 %v10705_v43, %s14016_s28  ;;  %v9148_v10 = vpop.f32.mrb[37].mxu0  ;;  %v18587_v51 = vpop.f32.mrb[56].mxu1  ;;  %v13982_v43 = vld [vmem:[%s19391_s10 + $0x58] sm:$0xff] }
 0xd50   : > { %11675 = vmatmul.mubr.msk.f32.gmra.mrb[142].mxu0 %vm8661_vm12, %v18476_v20  ;;  %v10589_v0 = vadd.f32 %v9148_v10, %v18523_v56  ;;  %11703 = vmatmul.mubr.msk.f32.gmra.mrb[162].mxu1 %vm8661_vm12, %v18076_v32  ;;  %v18594_v21 = vpop.f32.mrb[57].mxu1  ;;  %v13983_v10 = vld [vmem:[%s19391_s10 + $0x60] sm:$0xff] }
 0xd51   : > { %10178 = vmatprep.mubr.f32.mxu0 %v19617_v28 }
 0xd52   : > { %v18597_v39 = vadd.f32 %v10589_v0, %v9355_v8  ;;  %v9152_v9 = vpop.f32.mrb[38].mxu0 }
 0xd53   : > { %v18600_v29 = vadd.f32 %v9152_v9, %v19807_v23  ;;  %10472 = vrot.lane.b32.xlu1 %v10441_v6, %s14015_s26  ;;  %v9154_v50 = vpop.f32.mrb[39].mxu0  ;;  %v18603_v61 = vpop.f32.mrb[58].mxu1  ;;  %v19811_v6 = vld [vmem:[#allocation77_spill] sm:$0xff] }
 0xd54   : > { %11676 = vmatmul.mubr.msk.f32.gmra.mrb[144].mxu0 %vm8661_vm12, %v18489_v24  ;;  %v10605_v32 = vadd.f32 %v9154_v50, %v18531_v15  ;;  %v18608_v20 = vpop.f32.mrb[59].mxu1  ;;  %v19812_v50 = vld [vmem:[#allocation72_spill] sm:$0xff] }
 0xd55   : > { %10184 = vmatprep.mubr.f32.mxu0 %v19617_v28 }
 0xd56   : > { %v18611_v56 = vadd.f32 %v10605_v32, %v9361_v55  ;;  %v9158_v8 = vpop.f32.mrb[40].mxu0  ;;  %v19809_v55 = vld [vmem:[#allocation61_spill] sm:$0xff] }
 0xd57   : > { %v18614_v36 = vadd.f32 %v9158_v8, %v19808_v22  ;;  %v9160_v33 = vpop.f32.mrb[41].mxu0  ;;  %v18616_v17 = vpop.f32.mrb[60].mxu1 }
 0xd58   : > { %11677 = vmatmul.mubr.msk.f32.gmra.mrb[146].mxu0 %vm8661_vm12, %v18504_v60  ;;  %v10653_v24 = vadd.f32 %v9160_v33, %v18540_v19  ;;  %v18621_v41 = vpop.f32.mrb[61].mxu1  ;;  %v13984_v33 = vld [vmem:[%s19391_s10 + $0x68] sm:$0xff] }
 0xd59   : > { %10190 = vmatprep.mubr.f32.mxu0 %v19617_v28 }
 0xd5a   : > { %v10687_v15 = vadd.f32 %v10653_v24, %v9367_v26  ;;  %v9164_v27 = vpop.f32.mrb[42].mxu0 }
 0xd5b   : > { %v18625_v58 = vadd.f32 %v9164_v27, %v19809_v55  ;;  %v9166_v54 = vpop.f32.mrb[43].mxu0  ;;  %v18627_v12 = vpop.f32.mrb[62].mxu1  ;;  %v19813_v55 = vld [vmem:[#allocation18_spill] sm:$0xff] }
 0xd5c   : > { %11678 = vmatmul.mubr.msk.f32.gmra.mrb[148].mxu0 %vm8661_vm12, %v13981_v7  ;;  %v10670_v60 = vadd.f32 %v9166_v54, %v18551_v42  ;;  %10730 = vrot.lane.b32.xlu0 %v10687_v15, %s14016_s28  ;;  %v18635_v19 = vpop.f32.mrb[63].mxu1 }
 0xd5d   : > { %10196 = vmatprep.mubr.f32.mxu0 %v19617_v28 }
 0xd5e   : > { %v10704_v26 = vadd.f32 %v10670_v60, %v9373_v48  ;;  %v9170_v34 = vpop.f32.mrb[44].mxu0 }
 0xd5f   : > { %v10422_v45 = vadd.f32 %v19810_v57, %v9170_v34  ;;  %v9172_v52 = vpop.f32.mrb[45].mxu0  ;;  %v18639_v37 = vpop.f32.mrb[64].mxu1 }
 0xd60   : > { %v10423_v63 = vadd.f32 %v18562_v4, %v9172_v52  ;;  %11679 = vmatmul.mubr.msk.f32.gmra.mrb[150].mxu0 %vm8661_vm12, %v13982_v43  ;;  %10732 = vrot.lane.b32.xlu1 %v10704_v26, %s14016_s28  ;;  %v18647_v42 = vpop.f32.mrb[65].mxu1  ;;  %v13985_v26 = vld [vmem:[%s19391_s10 + $0x70] sm:$0xff] }
 0xd61   : > { %10462 = vrot.lane.b32.xlu0 %v10422_v45, %s14015_s26  ;;  %10202 = vmatprep.mubr.f32.mxu0 %v19617_v28  ;;  %v19814_v45 = vld [vmem:[#allocation70_spill] sm:$0xff] }
 0xd62   : > { %v9176_v48 = vpop.f32.mrb[46].mxu0 }
 0xd63   : > { %v10439_v31 = vadd.f32 %v19811_v6, %v9176_v48  ;;  %v9178_v44 = vpop.f32.mrb[47].mxu0  ;;  %v18657_v0 = vpop.f32.mrb[66].mxu1 }
 0xd64   : > { %v10440_v4 = vadd.f32 %v18572_v47, %v9178_v44  ;;  %11680 = vmatmul.mubr.msk.f32.gmra.mrb[152].mxu0 %vm8661_vm12, %v13983_v10  ;;  %v18661_v9 = vpop.f32.mrb[67].mxu1  ;;  %v19815_v44 = vld [vmem:[#allocation66_spill] sm:$0xff] }
 0xd65   : > { %10466 = vrot.lane.b32.xlu0 %v10423_v63, %s14015_s26  ;;  %10464 = vrot.lane.b32.xlu1 %v10439_v31, %s14015_s26 }
 0xd66   : > { %v9182_v23 = vpop.f32.mrb[48].mxu0  ;;  %10208 = vmatprep.mubr.f32.mxu0 %v19617_v28 }
 0xd67   : > { %v18665_v32 = vadd.f32 %v19812_v50, %v9182_v23  ;;  %v9184_v47 = vpop.f32.mrb[49].mxu0  ;;  %v9653_v8 = vpop.f32.mrb[68].mxu1  ;;  %v13987_v23 = vld [vmem:[%s19391_s10 + $0x80] sm:$0xff] }
 0xd68   : > { %v18668_v22 = vadd.f32 %v18583_v46, %v9184_v47  ;;  %11681 = vmatmul.mubr.msk.f32.gmra.mrb[154].mxu0 %vm8661_vm12, %v13984_v33  ;;  %v9655_v24 = vpop.f32.mrb[69].mxu1 }
 0xd69   : > { %10468 = vrot.lane.b32.xlu1 %v10440_v4, %s14015_s26  ;;  %10214 = vmatprep.mubr.f32.mxu0 %v19617_v28  ;;  %v18677_v15 = vadd.f32 %v9655_v24, %v18587_v51 }
 0xd6a   : > { %v9188_v27 = vpop.f32.mrb[50].mxu0 }
 0xd6b   : > { %v18680_v54 = vadd.f32 %v19813_v55, %v9188_v27  ;;  %v9190_v46 = vpop.f32.mrb[51].mxu0  ;;  %v9659_v7 = vpop.f32.mrb[70].mxu1  ;;  %v13988_v27 = vld [vmem:[%s19391_s10 + $0x88] sm:$0xff] }
 0xd6c   : > { %v18683_v60 = vadd.f32 %v18600_v29, %v9190_v46  ;;  %11682 = vmatmul.mubr.msk.f32.gmra.mrb[156].mxu0 %vm8661_vm12, %v13985_v26  ;;  %v9661_v34 = vpop.f32.mrb[71].mxu1  ;;  %v13986_v29 = vld [vmem:[%s19391_s10 + $0x78] sm:$0xff] }
 0xd6d   : > { %10220 = vmatprep.mubr.f32.mxu0 %v19617_v28  ;;  %v18691_v51 = vadd.f32 %v9661_v34, %v18603_v61 }
 0xd6e   : > { %v9194_v57 = vpop.f32.mrb[52].mxu0 }
 0xd6f   : > { %v10685_v52 = vadd.f32 %v19814_v45, %v9194_v57  ;;  %v9196_v63 = vpop.f32.mrb[53].mxu0  ;;  %v9665_v48 = vpop.f32.mrb[72].mxu1 }
 0xd70   : > { %v10686_v43 = vadd.f32 %v18614_v36, %v9196_v63  ;;  %11683 = vmatmul.mubr.msk.f32.gmra.mrb[158].mxu0 %vm8661_vm12, %v13986_v29  ;;  %v9667_v6 = vpop.f32.mrb[73].mxu1 }
 0xd71   : > { %10722 = vrot.lane.b32.xlu0 %v10685_v52, %s14016_s28  ;;  %10226 = vmatprep.mubr.f32.mxu0 %v19617_v28  ;;  %v18702_v31 = vadd.f32 %v9667_v6, %v18616_v17 }
 0xd72   : > { %v9200_v61 = vpop.f32.mrb[54].mxu0 }
 0xd73   : > { %v10702_v4 = vadd.f32 %v19815_v44, %v9200_v61  ;;  %v9202_v10 = vpop.f32.mrb[55].mxu0  ;;  %v9671_v50 = vpop.f32.mrb[74].mxu1 }
 0xd74   : > { %v10703_v36 = vadd.f32 %v18625_v58, %v9202_v10  ;;  %11684 = vmatmul.mubr.msk.f32.gmra.mrb[160].mxu0 %vm8661_vm12, %v13987_v23  ;;  %v9673_v47 = vpop.f32.mrb[75].mxu1 }
 0xd75   : > { %10726 = vrot.lane.b32.xlu0 %v10686_v43, %s14016_s28  ;;  %10724 = vrot.lane.b32.xlu1 %v10702_v4, %s14016_s28  ;;  %v18714_v33 = vadd.f32 %v9673_v47, %v18627_v12 }
 0xd76   : > { %10232 = vmatprep.mubr.f32.mxu0 %v19617_v28  ;;  %v9444_v17 = vpop.f32.mrb[56].mxu0 }
 0xd77   : > { %v9446_v24 = vpop.f32.mrb[57].mxu0  ;;  %v9677_v58 = vpop.f32.mrb[76].mxu1 }
 0xd78   : > { %11685 = vmatmul.mubr.msk.f32.gmra.mrb[162].mxu0 %vm8661_vm12, %v13988_v27  ;;  %v10395_v55 = vadd.f32 %v9653_v8, %v9446_v24  ;;  %v9679_v46 = vpop.f32.mrb[77].mxu1 }
 0xd79   : > { %10728 = vrot.lane.b32.xlu1 %v10703_v36, %s14016_s28  ;;  %v18722_v26 = vadd.f32 %v9679_v46, %v18639_v37 }
 0xd7a   : > { %v9450_v28 = vpop.f32.mrb[58].mxu0 }
 0xd7b   : > { %19816 = vst [vmem:[#allocation84_spill] sm:$0xff] %v18722_v26  ;;  %v9452_v34 = vpop.f32.mrb[59].mxu0  ;;  %v9683_v57 = vpop.f32.mrb[78].mxu1 }
 0xd7c   : > { %v10412_v12 = vadd.f32 %v9659_v7, %v9452_v34  ;;  %v9685_v45 = vpop.f32.mrb[79].mxu1 }
 0xd7d   : > { %v18725_v52 = vadd.f32 %v9685_v45, %v18657_v0 }
 0xd7e   : > { %v9456_v63 = vpop.f32.mrb[60].mxu0 }
 0xd7f   : > { %19817 = vst [vmem:[#allocation95_spill] sm:$0xff] %v18725_v52  ;;  %v9458_v43 = vpop.f32.mrb[61].mxu0  ;;  %v9689_v29 = vpop.f32.mrb[80].mxu1 }
 0xd80   : > { %v10594_v6 = vadd.f32 %v9665_v48, %v9458_v43  ;;  %v9691_v61 = vpop.f32.mrb[81].mxu1 }
 0xd81   : > { %v10429_v8 = vadd.f32 %v10395_v55, %v9691_v61 }
 0xd82   : > { %v9462_v44 = vpop.f32.mrb[62].mxu0 }
 0xd83   : > { %v9464_v4 = vpop.f32.mrb[63].mxu0  ;;  %v9695_v10 = vpop.f32.mrb[82].mxu1  ;;  %10490 = vrot.lane.b32.xlu0 %v10429_v8, %s14015_s26 }
 0xd84   : > { %v10610_v37 = vadd.f32 %v9671_v50, %v9464_v4  ;;  %v9697_v36 = vpop.f32.mrb[83].mxu1 }
 0xd85   : > { %v10446_v23 = vadd.f32 %v10412_v12, %v9697_v36 }
 0xd86   : > { %v9468_v47 = vpop.f32.mrb[64].mxu0 }
 0xd87   : > { %v9470_v7 = vpop.f32.mrb[65].mxu0  ;;  %v9701_v24 = vpop.f32.mrb[84].mxu1  ;;  %10492 = vrot.lane.b32.xlu1 %v10446_v23, %s14015_s26 }
 0xd88   : > { %v10658_v0 = vadd.f32 %v9677_v58, %v9470_v7  ;;  %v9703_v27 = vpop.f32.mrb[85].mxu1 }
 0xd89   : > { %v18729_v46 = vadd.f32 %v10594_v6, %v9703_v27 }
 0xd8a   : > { %v9474_v48 = vpop.f32.mrb[66].mxu0 }
 0xd8b   : > { %19818 = vst [vmem:[#allocation87_spill] sm:$0xff] %v18729_v46  ;;  %v9476_v34 = vpop.f32.mrb[67].mxu0  ;;  %v9707_v55 = vpop.f32.mrb[86].mxu1 }
 0xd8c   : > { %v10675_v45 = vadd.f32 %v9683_v57, %v9476_v34  ;;  %v9709_v43 = vpop.f32.mrb[87].mxu1 }
 0xd8d   : > { %v18731_v61 = vadd.f32 %v10610_v37, %v9709_v43 }
 0xd8e   : > { %v9480_v8 = vpop.f32.mrb[68].mxu0 }
 0xd8f   : > { %19819 = vst [vmem:[#allocation26_spill] sm:$0xff] %v18731_v61  ;;  %v10393_v50 = vadd.f32 %v9480_v8, %v18391_v14  ;;  %v9713_v12 = vpop.f32.mrb[88].mxu1  ;;  %v9482_v4 = vpop.f32.mrb[69].mxu0 }
 0xd90   : > { %v9715_v36 = vpop.f32.mrb[89].mxu1  ;;  %v10394_v53 = vadd.f32 %v9482_v4, %v9444_v17 }
 0xd91   : > { %v10692_v52 = vadd.f32 %v10658_v0, %v9715_v36 }
 0xd92   : > { %v10428_v23 = vadd.f32 %v10394_v53, %v9689_v29  ;;  %v9486_v58 = vpop.f32.mrb[70].mxu0 }
 0xd93   : > { %v10410_v6 = vadd.f32 %v9486_v58, %v18400_v2  ;;  %v9719_v7 = vpop.f32.mrb[90].mxu1  ;;  %10750 = vrot.lane.b32.xlu0 %v10692_v52, %s14016_s28  ;;  %v9488_v27 = vpop.f32.mrb[71].mxu0 }
 0xd94   : > { %v9721_v57 = vpop.f32.mrb[91].mxu1  ;;  %v10411_v34 = vadd.f32 %v9488_v27, %v9450_v28 }
 0xd95   : > { %v10709_v37 = vadd.f32 %v10675_v45, %v9721_v57 }
 0xd96   : > { %v10445_v43 = vadd.f32 %v10411_v34, %v9695_v10  ;;  %v9492_v61 = vpop.f32.mrb[72].mxu0 }
 0xd97   : > { %v10592_v14 = vadd.f32 %v9492_v61, %v18408_v18  ;;  %10486 = vrot.lane.b32.xlu0 %v10428_v23, %s14015_s26  ;;  %10752 = vrot.lane.b32.xlu1 %v10709_v37, %s14016_s28  ;;  %v9494_v17 = vpop.f32.mrb[73].mxu0  ;;  %v9963_v53 = vpop.f32.mrb[92].mxu1 }
 0xd98   : > { %v10593_v29 = vadd.f32 %v9494_v17, %v9456_v63  ;;  %v18739_v0 = vpop.f32.mrb[93].mxu1 }
 0xd99   : > { %19820 = vst [vmem:[#allocation96_spill] sm:$0xff] %v18739_v0 }
 0xd9a   : > { %v18741_v2 = vadd.f32 %v10593_v29, %v9701_v24  ;;  %v9498_v52 = vpop.f32.mrb[74].mxu0 }
 0xd9b   : > { %v10608_v8 = vadd.f32 %v9498_v52, %v18416_v40  ;;  %10488 = vrot.lane.b32.xlu1 %v10445_v43, %s14015_s26  ;;  %v9500_v28 = vpop.f32.mrb[75].mxu0  ;;  %v9969_v10 = vpop.f32.mrb[94].mxu1 }
 0xd9c   : > { %19821 = vst [vmem:[#allocation31_spill] sm:$0xff] %v18741_v2  ;;  %v10609_v45 = vadd.f32 %v9500_v28, %v9462_v44  ;;  %v18745_v18 = vpop.f32.mrb[95].mxu1 }
 0xd9d   : > { %19822 = vst [vmem:[#allocation29_spill] sm:$0xff] %v18745_v18 }
 0xd9e   : > { %v18747_v61 = vadd.f32 %v10609_v45, %v9707_v55  ;;  %v9504_v4 = vpop.f32.mrb[76].mxu0 }
 0xd9f   : > { %v10656_v36 = vadd.f32 %v9504_v4, %v18426_v30  ;;  %v9506_v63 = vpop.f32.mrb[77].mxu0  ;;  %v9975_v23 = vpop.f32.mrb[96].mxu1 }
 0xda0   : > { %19823 = vst [vmem:[#allocation88_spill] sm:$0xff] %v18747_v61  ;;  %v10657_v58 = vadd.f32 %v9506_v63, %v9468_v47  ;;  %v18750_v24 = vpop.f32.mrb[97].mxu1  ;;  %v18772_v63 = vpop.permute.xlu1 %10918 }
 0xda1   : > { %19824 = vst [vmem:[#allocation97_spill] sm:$0xff] %v18750_v24 }
 0xda2   : > { %v10691_v27 = vadd.f32 %v10657_v58, %v9713_v12  ;;  %v9510_v57 = vpop.f32.mrb[78].mxu0 }
 0xda3   : > { %v10673_v40 = vadd.f32 %v9510_v57, %v18441_v35  ;;  %v9512_v34 = vpop.f32.mrb[79].mxu0  ;;  %v18753_v37 = vpop.f32.mrb[98].mxu1 }
 0xda4   : > { %v10674_v44 = vadd.f32 %v9512_v34, %v9474_v48  ;;  %10746 = vrot.lane.b32.xlu0 %v10691_v27, %s14016_s28  ;;  %v18756_v55 = vpop.f32.mrb[99].mxu1  ;;  %v18764_v35 = vpop.permute.xlu0 %10923 }
 0xda5   : > { %19825 = vst [vmem:[#allocation32_spill] sm:$0xff] %v18756_v55 }
 0xda6   : > { %v10708_v43 = vadd.f32 %v10674_v44, %v9719_v7  ;;  %v9516_v17 = vpop.f32.mrb[80].mxu0 }
 0xda7   : > { %v10426_v30 = vadd.f32 %v18454_v11, %v9516_v17  ;;  %v9518_v29 = vpop.f32.mrb[81].mxu0  ;;  %v18759_v47 = vpop.f32.mrb[100].mxu1 }
 0xda8   : > { %v10427_v52 = vadd.f32 %v10393_v50, %v9518_v29  ;;  %10748 = vrot.lane.b32.xlu1 %v10708_v43, %s14016_s28  ;;  %v18762_v12 = vpop.f32.mrb[101].mxu1  ;;  %v18774_v50 = vpop.permute.xlu0 %10458 }
 0xda9   : > { %19826 = vst [vmem:[#allocation33_spill] sm:$0xff] %v18762_v12  ;;  %10478 = vrot.lane.b32.xlu0 %v10426_v30, %s14015_s26  ;;  %v18785_v43 = vpop.permute.xlu1 %10460 }
 0xdaa   : > { %v9522_v48 = vpop.f32.mrb[82].mxu0 }
 0xdab   : > { %v10443_v28 = vadd.f32 %v18467_v16, %v9522_v48  ;;  %v9524_v45 = vpop.f32.mrb[83].mxu0  ;;  %v18768_v7 = vpop.f32.mrb[102].mxu1 }
 0xdac   : > { %v10444_v4 = vadd.f32 %v10410_v6, %v9524_v45  ;;  %v18770_v11 = vpop.f32.mrb[103].mxu1  ;;  %v18783_v6 = vpop.permute.xlu0 %10718 }
 0xdad   : > { %19827 = vst [vmem:[#allocation34_spill] sm:$0xff] %v18770_v11  ;;  %10482 = vrot.lane.b32.xlu0 %v10427_v52, %s14015_s26  ;;  %10480 = vrot.lane.b32.xlu1 %v10443_v28, %s14015_s26  ;;  %v18797_v45 = vpop.permute.xlu1 %10720 }
 0xdae   : > { %v9528_v58 = vpop.f32.mrb[84].mxu0 }
 0xdaf   : > { %v18779_v27 = vadd.f32 %v18480_v38, %v9528_v58  ;;  %v9530_v57 = vpop.f32.mrb[85].mxu0  ;;  %v9999_v16 = vpop.f32.mrb[104].mxu1 }
 0xdb0   : > { %v18781_v34 = vadd.f32 %v10592_v14, %v9530_v57  ;;  %v10001_v44 = vpop.f32.mrb[105].mxu1  ;;  %v18795_v14 = vpop.permute.xlu0 %10454 }
 0xdb1   : > { %19828 = vst [vmem:[#allocation3_spill] sm:$0xff] %v18779_v27  ;;  %10484 = vrot.lane.b32.xlu1 %v10444_v4, %s14015_s26  ;;  %v18788_v17 = vadd.f32 %v10001_v44, %v9963_v53 }
 0xdb2   : > { %19829 = vst [vmem:[#allocation45_spill] sm:$0xff] %v18781_v34  ;;  %v9534_v30 = vpop.f32.mrb[86].mxu0 }
 0xdb3   : > { %19830 = vst [vmem:[#allocation10_spill] sm:$0xff] %v18788_v17  ;;  %v18791_v29 = vadd.f32 %v18493_v5, %v9534_v30  ;;  %v9536_v52 = vpop.f32.mrb[87].mxu0  ;;  %v10005_v38 = vpop.f32.mrb[106].mxu1 }
 0xdb4   : > { %v18793_v48 = vadd.f32 %v10608_v8, %v9536_v52  ;;  %v10007_v28 = vpop.f32.mrb[107].mxu1  ;;  %v18802_v5 = vpop.permute.xlu1 %10456 }
 0xdb5   : > { %19831 = vst [vmem:[#allocation49_spill] sm:$0xff] %v18791_v29  ;;  %v18799_v58 = vadd.f32 %v10007_v28, %v9969_v10  ;;  %v18804_v30 = vpop.permute.xlu0 %10474 }
 0xdb6   : > { %19832 = vst [vmem:[#allocation12_spill] sm:$0xff] %v18793_v48  ;;  %v9540_v57 = vpop.f32.mrb[88].mxu0  ;;  %19834 = vst [vmem:[#allocation6_spill] sm:$0xff] %v18804_v30 }
 0xdb7   : > { %19833 = vst [vmem:[#allocation14_spill] sm:$0xff] %v18799_v58  ;;  %v10689_v4 = vadd.f32 %v18509_v3, %v9540_v57  ;;  %v9542_v53 = vpop.f32.mrb[89].mxu0  ;;  %v10011_v44 = vpop.f32.mrb[108].mxu1 }
 0xdb8   : > { %v10690_v17 = vadd.f32 %v10656_v36, %v9542_v53  ;;  %v10013_v11 = vpop.f32.mrb[109].mxu1  ;;  %v18814_v36 = vpop.permute.xlu1 %10476 }
 0xdb9   : > { %10738 = vrot.lane.b32.xlu0 %v10689_v4, %s14016_s28  ;;  %v18807_v8 = vadd.f32 %v10013_v11, %v9975_v23  ;;  %19837 = vst [vmem:[#allocation54_spill] sm:$0xff] %v18814_v36 }
 0xdba   : > { %v9546_v52 = vpop.f32.mrb[90].mxu0 }
 0xdbb   : > { %19835 = vst [vmem:[#allocation16_spill] sm:$0xff] %v18807_v8  ;;  %v10706_v48 = vadd.f32 %v18520_v13, %v9546_v52  ;;  %v9548_v10 = vpop.f32.mrb[91].mxu0  ;;  %v10017_v28 = vpop.f32.mrb[110].mxu1 }
 0xdbc   : > { %v10707_v58 = vadd.f32 %v10673_v40, %v9548_v10  ;;  %v10019_v29 = vpop.f32.mrb[111].mxu1 }
 0xdbd   : > { %v18810_v3 = vpop.permute.xlu0 %10734  ;;  %10742 = vrot.lane.b32.xlu0 %v10690_v17, %s14016_s28  ;;  %10740 = vrot.lane.b32.xlu1 %v10706_v48, %s14016_s28  ;;  %v18817_v57 = vadd.f32 %v10019_v29, %v18753_v37  ;;  %v19840_v37 = vld [vmem:[#allocation13_spill] sm:$0xff] }
 0xdbe   : > { %19836 = vst [vmem:[#allocation47_spill] sm:$0xff] %v18810_v3  ;;  %v9790_v23 = vpop.f32.mrb[92].mxu0 }
 0xdbf   : > { %19838 = vst [vmem:[#allocation51_spill] sm:$0xff] %v18817_v57  ;;  %v9792_v11 = vpop.f32.mrb[93].mxu0  ;;  %v10023_v4 = vpop.f32.mrb[112].mxu1 }
 0xdc0   : > { %v10399_v53 = vadd.f32 %v9999_v16, %v9792_v11  ;;  %v10025_v13 = vpop.f32.mrb[113].mxu1 }
 0xdc1   : > { %v10471_v52 = vpop.permute.xlu0 %10470  ;;  %10744 = vrot.lane.b32.xlu1 %v10707_v58, %s14016_s28  ;;  %v18820_v40 = vpop.permute.xlu1 %10736  ;;  %v18823_v10 = vadd.f32 %v10025_v13, %v18759_v47 }
 0xdc2   : > { %v10544_v17 = vsel %vm7509_vm10, %v10471_v52, %v18804_v30  ;;  %v18828_v48 = vpop.f32.mrb[94].mxu0 }
 0xdc3   : > { %19839 = vst [vmem:[#allocation56_spill] sm:$0xff] %v18823_v10  ;;  %v10558_v29 = vmul.f32 %v10544_v17, %v19840_v37  ;;  %v9798_v57 = vpop.f32.mrb[95].mxu0  ;;  %v10029_v8 = vpop.f32.mrb[114].mxu1 }
 0xdc4   : > { %v10416_v16 = vadd.f32 %v10005_v38, %v9798_v57  ;;  %v10031_v11 = vpop.f32.mrb[115].mxu1 }
 0xdc5   : > { %v18832_v12 = vadd.f32 %v18548_v59, %v10558_v29  ;;  %v10473_v58 = vpop.permute.xlu1 %10472  ;;  %v18835_v34 = vadd.f32 %v10031_v11, %v18768_v7 }
 0xdc6   : > { %v10545_v47 = vsel %vm7509_vm10, %v10473_v58, %v18814_v36  ;;  %v18840_v13 = vpop.f32.mrb[96].mxu0 }
 0xdc7   : > { %19841 = vst [vmem:[#allocation58_spill] sm:$0xff] %v18832_v12  ;;  %19842 = vst [vmem:[#allocation60_spill] sm:$0xff] %v18835_v34  ;;  %v10574_v10 = vmul.f32 %v10545_v47, %v19840_v37  ;;  %v9804_v17 = vpop.f32.mrb[97].mxu0  ;;  %v10035_v27 = vpop.f32.mrb[116].mxu1 }
 0xdc8   : > { %v10598_v55 = vadd.f32 %v10011_v44, %v9804_v17  ;;  %v10037_v38 = vpop.f32.mrb[117].mxu1 }
 0xdc9   : > { %v18844_v57 = vadd.f32 %v18558_v49, %v10574_v10  ;;  %v10433_v59 = vadd.f32 %v10399_v53, %v10037_v38 }
 0xdca   : > { %v18846_v29 = vpop.f32.mrb[98].mxu0 }
 0xdcb   : > { %19843 = vst [vmem:[#allocation89_spill] sm:$0xff] %v18844_v57  ;;  %v9810_v7 = vpop.f32.mrb[99].mxu0  ;;  %v10041_v11 = vpop.f32.mrb[118].mxu1  ;;  %10506 = vrot.lane.b32.xlu0 %v10433_v59, %s14015_s26 }
 0xdcc   : > { %v10614_v34 = vadd.f32 %v10017_v28, %v9810_v7  ;;  %v10043_v12 = vpop.f32.mrb[119].mxu1 }
 0xdcd   : > { %v10450_v36 = vadd.f32 %v10416_v16, %v10043_v12 }
 0xdce   : > { %v18849_v24 = vpop.permute.xlu0 %10730  ;;  %v18851_v37 = vpop.f32.mrb[100].mxu0 }
 0xdcf   : > { %v9816_v47 = vpop.f32.mrb[101].mxu0  ;;  %v10047_v44 = vpop.f32.mrb[120].mxu1  ;;  %10508 = vrot.lane.b32.xlu1 %v10450_v36, %s14015_s26 }
 0xdd0   : > { %v10662_v49 = vadd.f32 %v10023_v4, %v9816_v47  ;;  %v10049_v10 = vpop.f32.mrb[121].mxu1 }
 0xdd1   : > { %v18854_v53 = vadd.f32 %v10598_v55, %v10049_v10  ;;  %v10810_v55 = vsel %vm8020_vm11, %v18849_v24, %v18810_v3 }
 0xdd2   : > { %v18856_v17 = vpop.permute.xlu1 %10732  ;;  %v18858_v38 = vpop.f32.mrb[102].mxu0 }
 0xdd3   : > { %19844 = vst [vmem:[#allocation91_spill] sm:$0xff] %v18854_v53  ;;  %v10463_v59 = vpop.permute.xlu0 %10462  ;;  %v9822_v28 = vpop.f32.mrb[103].mxu0  ;;  %v19847_v53 = vld [vmem:[#allocation23_spill] sm:$0xff] }
 0xdd4   : > { %v10679_v7 = vadd.f32 %v10029_v8, %v9822_v28  ;;  %v18860_v12 = vpop.f32.mrb[122].mxu1  ;;  %v19846_v28 = vld [vmem:[#allocation11_spill] sm:$0xff]  ;;  %v10821_v18 = vmul.f32 %v10810_v55, %v19847_v53 }
 0xdd5   : > { %v10055_v16 = vpop.f32.mrb[123].mxu1 }
 0xdd6   : > { %v9826_v57 = vpop.f32.mrb[104].mxu0  ;;  %v18862_v61 = vadd.f32 %v10614_v34, %v10055_v16 }
 0xdd7   : > { %v18865_v30 = vadd.f32 %v9826_v57, %v18594_v21  ;;  %v10467_v36 = vpop.permute.xlu0 %10466  ;;  %v18867_v4 = vpop.f32.mrb[124].mxu1 }
 0xdd8   : > { %19845 = vst [vmem:[#allocation90_spill] sm:$0xff] %v18862_v61  ;;  %v10546_v8 = vsel %vm7509_vm10, %v10467_v36, %v10471_v52  ;;  %v18875_v47 = vpop.permute.xlu1 %10464  ;;  %v10061_v10 = vpop.f32.mrb[125].mxu1 }
 0xdd9   : > { %v10557_v34 = vmul.f32 %v10546_v8, %v19846_v28  ;;  %v10696_v16 = vadd.f32 %v10662_v49, %v10061_v10  ;;  %v9828_v61 = vpop.f32.mrb[105].mxu0 }
 0xdda   : > { %v10398_v21 = vadd.f32 %v9828_v61, %v9790_v23  ;;  %v9832_v57 = vpop.f32.mrb[106].mxu0  ;;  %v10811_v61 = vsel %vm8020_vm11, %v18856_v17, %v18820_v40 }
 0xddb   : > { %v10853_v2 = vadd.f32 %v18597_v39, %v10557_v34  ;;  %v18881_v0 = vadd.f32 %v9832_v57, %v18608_v20  ;;  %10766 = vrot.lane.b32.xlu0 %v10696_v16, %s14016_s28  ;;  %v18884_v52 = vpop.f32.mrb[126].mxu1  ;;  %v9834_v3 = vpop.f32.mrb[107].mxu0  ;;  %v10837_v10 = vmul.f32 %v10811_v61, %v19847_v53  ;;  %v19848_v16 = vld [vmem:[#allocation79_spill] sm:$0xff] }
 0xddc   : > { %v10432_v46 = vadd.f32 %v10398_v21, %v10035_v27  ;;  %v10469_v26 = vpop.permute.xlu1 %10468  ;;  %v10067_v8 = vpop.f32.mrb[127].mxu1  ;;  %v10415_v49 = vadd.f32 %v9834_v3, %v18828_v48  ;;  %v10552_v27 = vsel %vm7509_vm10, %v18795_v14, %v18774_v50 }
 0xddd   : > { %v10885_v23 = vadd.f32 %v10853_v2, %v10821_v18  ;;  %v10547_v39 = vsel %vm7509_vm10, %v10469_v26, %v10473_v58  ;;  %v10713_v20 = vadd.f32 %v10679_v7, %v10067_v8  ;;  %v10553_v18 = vsel %vm7509_vm10, %v18802_v5, %v18785_v43 }
 0xdde   : > { %v10573_v3 = vmul.f32 %v10547_v39, %v19846_v28  ;;  %v10449_v48 = vadd.f32 %v10415_v49, %v10041_v11  ;;  %v9838_v2 = vpop.f32.mrb[108].mxu0  ;;  %v10550_v11 = vsel %vm7509_vm10, %v18774_v50, %v10463_v59  ;;  %v10570_v21 = vmul.f32 %v10553_v18, %v19848_v16  ;;  %v19849_v50 = vld [vmem:[#allocation82_spill] sm:$0xff] }
 0xddf   : > { %v10929_v58 = vadd.f32 %v18772_v63, %v10885_v23  ;;  %v18911_v7 = vadd.f32 %v9838_v2, %v18621_v41  ;;  %10502 = vrot.lane.b32.xlu0 %v10432_v46, %s14015_s26  ;;  %10768 = vrot.lane.b32.xlu1 %v10713_v20, %s14016_s28  ;;  %v9840_v14 = vpop.f32.mrb[109].mxu0  ;;  %v10305_v55 = vpop.f32.mrb[128].mxu1  ;;  %v10554_v41 = vmul.f32 %v10552_v27, %v19848_v16  ;;  %v19853_v16 = vld [vmem:[#allocation74_spill] sm:$0xff] }
 0xde0   : > { %v10869_v28 = vadd.f32 %v18611_v56, %v10573_v3  ;;  %v10597_v5 = vadd.f32 %v9840_v14, %v18840_v13  ;;  %v10306_v34 = vpop.f32.mrb[129].mxu1  ;;  %v10548_v46 = vsel %vm7509_vm10, %v10463_v59, %v10467_v36  ;;  %v10555_v23 = vmul.f32 %v10550_v11, %v19849_v50  ;;  %v19850_v36 = vld [vmem:[#allocation73_spill] sm:$0xff]  ;;  %v19851_v3 = vld [vmem:[#allocation83_spill] sm:$0xff] }
 0xde1   : > { %10961 = vst [vmem:[%s18898_s13 + $0x18] sm:$0xff] %v10929_v58  ;;  %v10551_v56 = vsel %vm7509_vm10, %v18785_v43, %v18875_v47  ;;  %v10556_v61 = vmul.f32 %v10548_v46, %v19850_v36  ;;  %v10850_v43 = vadd.f32 %v18331_v25, %v10554_v41  ;;  %v10866_v18 = vadd.f32 %v18346_v62, %v10570_v21 }
 0xde2   : > { %v10901_v57 = vadd.f32 %v10869_v28, %v10837_v10  ;;  %v18926_v8 = vadd.f32 %v10597_v5, %v10047_v44  ;;  %v9844_v49 = vpop.f32.mrb[110].mxu0  ;;  %v10851_v55 = vadd.f32 %v18665_v32, %v10555_v23  ;;  %v19852_v5 = vld [vmem:[#allocation85_spill] sm:$0xff] }
 0xde3   : > { %v18934_v13 = vadd.f32 %v9844_v49, %v18635_v19  ;;  %v10723_v53 = vpop.permute.xlu0 %10722  ;;  %10504 = vrot.lane.b32.xlu1 %v10449_v48, %s14015_s26  ;;  %v9846_v59 = vpop.f32.mrb[111].mxu0  ;;  %v10571_v48 = vmul.f32 %v10551_v56, %v19849_v50  ;;  %v10852_v62 = vadd.f32 %v18668_v22, %v10556_v61 }
 0xde4   : > { %v10945_v44 = vadd.f32 %v18764_v35, %v10901_v57  ;;  %v10816_v39 = vsel %vm8020_vm11, %v18783_v6, %v10723_v53  ;;  %v10613_v20 = vadd.f32 %v9846_v59, %v18846_v29  ;;  %v10309_v27 = vpop.f32.mrb[130].mxu1  ;;  %v10549_v6 = vsel %vm7509_vm10, %v18875_v47, %v10469_v26 }
 0xde5   : > { %v10818_v19 = vmul.f32 %v10816_v39, %v19851_v3  ;;  %v10310_v2 = vpop.f32.mrb[131].mxu1  ;;  %v10572_v21 = vmul.f32 %v10549_v6, %v19850_v36 }
 0xde6   : > { %10977 = vst [vmem:[%s18898_s13 + $0x98] sm:$0xff] %v10945_v44  ;;  %v18949_v58 = vadd.f32 %v10613_v20, %v18860_v12  ;;  %v9850_v14 = vpop.f32.mrb[112].mxu0 }
 0xde7   : > { %v10882_v29 = vadd.f32 %v10850_v43, %v10818_v19  ;;  %v18956_v25 = vadd.f32 %v9850_v14, %v18647_v42  ;;  %v10727_v11 = vpop.permute.xlu0 %10726  ;;  %v10725_v10 = vpop.permute.xlu1 %10724  ;;  %v10868_v43 = vadd.f32 %v18683_v60, %v10572_v21 }
 0xde8   : > { %v10812_v12 = vsel %vm8020_vm11, %v10727_v11, %v18849_v24  ;;  %v10814_v32 = vsel %vm8020_vm11, %v10723_v53, %v10727_v11  ;;  %v10817_v26 = vsel %vm8020_vm11, %v18797_v45, %v10725_v10  ;;  %v9852_v47 = vpop.f32.mrb[113].mxu0  ;;  %v10313_v28 = vpop.f32.mrb[132].mxu1  ;;  %v10867_v24 = vadd.f32 %v18680_v54, %v10571_v48 }
 0xde9   : > { %v10926_v42 = vadd.f32 %v18772_v63, %v10882_v29  ;;  %v10819_v34 = vmul.f32 %v10814_v32, %v19852_v5  ;;  %v10820_v41 = vmul.f32 %v10812_v12, %v19853_v16  ;;  %v10834_v22 = vmul.f32 %v10817_v26, %v19851_v3  ;;  %v10314_v46 = vpop.f32.mrb[133].mxu1 }
 0xdea   : > { %v10661_v57 = vadd.f32 %v9852_v47, %v18851_v37  ;;  %v9856_v49 = vpop.f32.mrb[114].mxu0 }
 0xdeb   : > { %10958 = vst [vmem:[%s18898_s13] sm:$0xff] %v10926_v42  ;;  %v10883_v45 = vadd.f32 %v10851_v55, %v10819_v34  ;;  %v10884_v50 = vadd.f32 %v10852_v62, %v10820_v41  ;;  %v10898_v23 = vadd.f32 %v10866_v18, %v10834_v22  ;;  %v18976_v56 = vadd.f32 %v9856_v49, %v18661_v9  ;;  %v10729_v53 = vpop.permute.xlu1 %10728  ;;  %v9858_v59 = vpop.f32.mrb[115].mxu0  ;;  %v19854_v22 = vld [vmem:[#allocation84_spill] sm:$0xff] }
 0xdec   : > { %v10695_v61 = vadd.f32 %v10661_v57, %v18867_v4  ;;  %v10813_v54 = vsel %vm8020_vm11, %v10729_v53, %v18856_v17  ;;  %v10815_v37 = vsel %vm8020_vm11, %v10725_v10, %v10729_v53  ;;  %v10678_v36 = vadd.f32 %v9858_v59, %v18858_v38  ;;  %v10317_v44 = vpop.f32.mrb[134].mxu1 }
 0xded   : > { %v10927_v9 = vadd.f32 %v18772_v63, %v10883_v45  ;;  %v10928_v39 = vadd.f32 %v18772_v63, %v10884_v50  ;;  %v10942_v20 = vadd.f32 %v18764_v35, %v10898_v23  ;;  %v10835_v4 = vmul.f32 %v10815_v37, %v19852_v5  ;;  %v10318_v27 = vpop.f32.mrb[135].mxu1  ;;  %v19855_v45 = vld [vmem:[#allocation95_spill] sm:$0xff] }
 0xdee   : > { %v10836_v17 = vmul.f32 %v10813_v54, %v19853_v16  ;;  %v10712_v3 = vadd.f32 %v10678_v36, %v18884_v52  ;;  %10762 = vrot.lane.b32.xlu0 %v10695_v61, %s14016_s28  ;;  %v9862_v19 = vpop.f32.mrb[116].mxu0 }
 0xdef   : > { %10959 = vst [vmem:[%s18898_s13 + $0x8] sm:$0xff] %v10927_v9  ;;  %10960 = vst [vmem:[%s18898_s13 + $0x10] sm:$0xff] %v10928_v39  ;;  %v10899_v38 = vadd.f32 %v10867_v24, %v10835_v4  ;;  %v10430_v2 = vadd.f32 %v18677_v15, %v9862_v19  ;;  %v9864_v18 = vpop.f32.mrb[117].mxu0  ;;  %v10321_v48 = vpop.f32.mrb[136].mxu1  ;;  %v19856_v4 = vld [vmem:[#allocation27_spill] sm:$0xff] }
 0xdf0   : > { %10974 = vst [vmem:[%s18898_s13 + $0x80] sm:$0xff] %v10942_v20  ;;  %v10900_v14 = vadd.f32 %v10868_v43, %v10836_v17  ;;  %v10431_v60 = vadd.f32 %v18865_v30, %v9864_v18  ;;  %10764 = vrot.lane.b32.xlu1 %v10712_v3, %s14016_s28  ;;  %v10322_v55 = vpop.f32.mrb[137].mxu1  ;;  %v19857_v19 = vld [vmem:[#allocation87_spill] sm:$0xff] }
 0xdf1   : > { %v10943_v52 = vadd.f32 %v18764_v35, %v10899_v38 }
 0xdf2   : > { %v10944_v6 = vadd.f32 %v18764_v35, %v10900_v14  ;;  %10494 = vrot.lane.b32.xlu0 %v10430_v2, %s14015_s26  ;;  %v9868_v29 = vpop.f32.mrb[118].mxu0 }
 0xdf3   : > { %10975 = vst [vmem:[%s18898_s13 + $0x88] sm:$0xff] %v10943_v52  ;;  %v10447_v11 = vadd.f32 %v18691_v51, %v9868_v29  ;;  %v9870_v10 = vpop.f32.mrb[119].mxu0  ;;  %v10325_v15 = vpop.f32.mrb[138].mxu1 }
 0xdf4   : > { %10976 = vst [vmem:[%s18898_s13 + $0x90] sm:$0xff] %v10944_v6  ;;  %v10448_v62 = vadd.f32 %v18881_v0, %v9870_v10  ;;  %v10326_v12 = vpop.f32.mrb[139].mxu1  ;;  %v19858_v6 = vld [vmem:[#allocation26_spill] sm:$0xff] }
 0xdf5   : > { %10496 = vrot.lane.b32.xlu1 %v10447_v11, %s14015_s26  ;;  %v19023_v49 = vpop.permute.xlu0 %10490 }
 0xdf6   : > { %10498 = vrot.lane.b32.xlu0 %v10431_v60, %s14015_s26  ;;  %v9874_v30 = vpop.f32.mrb[120].mxu0 }
 0xdf7   : > { %v19009_v32 = vadd.f32 %v18702_v31, %v9874_v30  ;;  %v9876_v26 = vpop.f32.mrb[121].mxu0  ;;  %v10329_v47 = vpop.f32.mrb[140].mxu1 }
 0xdf8   : > { %v19012_v28 = vadd.f32 %v18911_v7, %v9876_v26  ;;  %v10330_v51 = vpop.f32.mrb[141].mxu1 }
 0xdf9   : > { %10500 = vrot.lane.b32.xlu1 %v10448_v62, %s14015_s26 }
 0xdfa   : > { %v9880_v42 = vpop.f32.mrb[122].mxu0 }
 0xdfb   : > { %v19016_v0 = vadd.f32 %v18714_v33, %v9880_v42  ;;  %v9882_v5 = vpop.f32.mrb[123].mxu0  ;;  %v10333_v34 = vpop.f32.mrb[142].mxu1 }
 0xdfc   : > { %v19019_v16 = vadd.f32 %v18934_v13, %v9882_v5  ;;  %v10334_v41 = vpop.f32.mrb[143].mxu1 }
 0xdfe   : > { %v9886_v31 = vpop.f32.mrb[124].mxu0 }
 0xdff   : > { %v10693_v46 = vadd.f32 %v19854_v22, %v9886_v31  ;;  %v9888_v24 = vpop.f32.mrb[125].mxu0  ;;  %v10337_v21 = vpop.f32.mrb[144].mxu1 }
 0xe00   : > { %v10694_v7 = vadd.f32 %v18956_v25, %v9888_v24  ;;  %v10338_v57 = vpop.f32.mrb[145].mxu1  ;;  %v19032_v25 = vpop.permute.xlu1 %10492 }
 0xe01   : > { %10754 = vrot.lane.b32.xlu0 %v10693_v46, %s14016_s28 }
 0xe02   : > { %v9892_v33 = vpop.f32.mrb[126].mxu0 }
 0xe03   : > { %v10710_v50 = vadd.f32 %v19855_v45, %v9892_v33  ;;  %v9894_v23 = vpop.f32.mrb[127].mxu0  ;;  %v10341_v53 = vpop.f32.mrb[146].mxu1 }
 0xe04   : > { %v10711_v13 = vadd.f32 %v18976_v56, %v9894_v23  ;;  %v10342_v59 = vpop.f32.mrb[147].mxu1 }
 0xe05   : > { %v19028_v61 = vpop.permute.xlu0 %10750  ;;  %10758 = vrot.lane.b32.xlu0 %v10694_v7, %s14016_s28  ;;  %10756 = vrot.lane.b32.xlu1 %v10710_v50, %s14016_s28  ;;  %v19859_v7 = vld [vmem:[#allocation96_spill] sm:$0xff]  ;;  %v19860_v59 = vld [vmem:[#allocation17_spill] sm:$0xff] }
 0xe06   : > { %v10136_v54 = vpop.f32.mrb[128].mxu0 }
 0xe07   : > { %v10138_v37 = vpop.f32.mrb[129].mxu0  ;;  %v10345_v36 = vpop.f32.mrb[148].mxu1 }
 0xe08   : > { %v10347_v44 = vpop.f32.mrb[149].mxu1 }
 0xe09   : > { %v10487_v9 = vpop.permute.xlu0 %10486  ;;  %10760 = vrot.lane.b32.xlu1 %v10711_v13, %s14016_s28  ;;  %v19035_v39 = vpop.permute.xlu1 %10752 }
 0xe0a   : > { %v10536_v56 = vsel %vm7509_vm10, %v10487_v9, %v19023_v49  ;;  %v10141_v20 = vpop.f32.mrb[130].mxu0 }
 0xe0b   : > { %v10562_v27 = vmul.f32 %v10536_v56, %v19856_v4  ;;  %v10143_v43 = vpop.f32.mrb[131].mxu0  ;;  %v10350_v17 = vpop.f32.mrb[150].mxu1 }
 0xe0c   : > { %v10352_v3 = vpop.f32.mrb[151].mxu1  ;;  %v19862_v43 = vld [vmem:[#allocation31_spill] sm:$0xff] }
 0xe0d   : > { %v19042_v38 = vadd.f32 %v19857_v19, %v10562_v27  ;;  %v10489_v2 = vpop.permute.xlu1 %10488 }
 0xe0e   : > { %v10537_v18 = vsel %vm7509_vm10, %v10489_v2, %v19032_v25  ;;  %v10146_v48 = vpop.f32.mrb[132].mxu0 }
 0xe0f   : > { %v10578_v14 = vmul.f32 %v10537_v18, %v19856_v4  ;;  %v10148_v60 = vpop.f32.mrb[133].mxu0  ;;  %v10355_v55 = vpop.f32.mrb[152].mxu1  ;;  %v19861_v4 = vld [vmem:[#allocation30_spill] sm:$0xff] }
 0xe10   : > { %v10357_v52 = vpop.f32.mrb[153].mxu1 }
 0xe11   : > { %v19049_v29 = vadd.f32 %v19858_v6, %v10578_v14  ;;  %v19863_v14 = vld [vmem:[#allocation29_spill] sm:$0xff] }
 0xe12   : > { %v19051_v11 = vpop.f32.mrb[134].mxu0 }
 0xe13   : > { %v10153_v10 = vpop.f32.mrb[135].mxu0  ;;  %v10360_v15 = vpop.f32.mrb[154].mxu1 }
 0xe14   : > { %v10362_v62 = vpop.f32.mrb[155].mxu1 }
 0xe16   : > { %v19053_v12 = vpop.permute.xlu0 %10746  ;;  %v19055_v30 = vpop.f32.mrb[136].mxu0 }
 0xe17   : > { %v10158_v26 = vpop.f32.mrb[137].mxu0  ;;  %v10365_v47 = vpop.f32.mrb[156].mxu1  ;;  %v10802_v50 = vsel %vm8020_vm11, %v19053_v12, %v19028_v61 }
 0xe18   : > { %v10666_v51 = vadd.f32 %v10345_v36, %v10158_v26  ;;  %v10367_v42 = vpop.f32.mrb[157].mxu1  ;;  %v10825_v27 = vmul.f32 %v10802_v50, %v19861_v4 }
 0xe1a   : > { %v19057_v5 = vpop.permute.xlu1 %10748  ;;  %v19059_v34 = vpop.f32.mrb[138].mxu0 }
 0xe1b   : > { %v10479_v41 = vpop.permute.xlu0 %10478  ;;  %v10164_v31 = vpop.f32.mrb[139].mxu0 }
 0xe1c   : > { %v10683_v22 = vadd.f32 %v10350_v17, %v10164_v31  ;;  %v19061_v46 = vpop.f32.mrb[158].mxu1 }
 0xe1d   : > { %v10372_v24 = vpop.f32.mrb[159].mxu1 }
 0xe1e   : > { %v10168_v21 = vpop.f32.mrb[140].mxu0 }
 0xe1f   : > { %v19064_v57 = vadd.f32 %v10168_v21, %v19859_v7  ;;  %v10483_v33 = vpop.permute.xlu0 %10482  ;;  %v10481_v45 = vpop.permute.xlu1 %10480  ;;  %v19865_v21 = vld [vmem:[#allocation88_spill] sm:$0xff] }
 0xe20   : > { %v10538_v23 = vsel %vm7509_vm10, %v10483_v33, %v10487_v9  ;;  %v10170_v53 = vpop.f32.mrb[141].mxu0  ;;  %v19072_v13 = vpop.f32.mrb[160].mxu1  ;;  %v10803_v9 = vsel %vm8020_vm11, %v19057_v5, %v19035_v39 }
 0xe21   : > { %v10561_v37 = vmul.f32 %v10538_v23, %v19860_v59  ;;  %v10402_v36 = vadd.f32 %v10170_v53, %v10136_v54  ;;  %v10377_v44 = vpop.f32.mrb[161].mxu1  ;;  %v10841_v24 = vmul.f32 %v10803_v9, %v19861_v4  ;;  %v19866_v53 = vld [vmem:[#allocation97_spill] sm:$0xff]  ;;  %v19870_v9 = vld [vmem:[#allocation32_spill] sm:$0xff] }
 0xe22   : > { %v19075_v56 = vadd.f32 %v10666_v51, %v10377_v44  ;;  %v19864_v51 = vld [vmem:[#allocation6_spill] sm:$0xff] }
 0xe23   : > { %v10857_v17 = vadd.f32 %v19862_v43, %v10561_v37  ;;  %v10174_v3 = vpop.f32.mrb[142].mxu0  ;;  %v10485_v19 = vpop.permute.xlu1 %10484  ;;  %v10436_v18 = vadd.f32 %v10402_v36, %v10355_v55  ;;  %v10542_v42 = vsel %vm7509_vm10, %v19864_v51, %v10479_v41  ;;  %v19867_v44 = vld [vmem:[#allocation78_spill] sm:$0xff] }
 0xe24   : > { %v19084_v60 = vadd.f32 %v10174_v3, %v19863_v14  ;;  %v10539_v54 = vsel %vm7509_vm10, %v10485_v19, %v10489_v2  ;;  %v10176_v52 = vpop.f32.mrb[143].mxu0  ;;  %v19088_v6 = vpop.f32.mrb[162].mxu1  ;;  %v10559_v4 = vmul.f32 %v10542_v42, %v19867_v44  ;;  %v19874_v42 = vld [vmem:[#allocation45_spill] sm:$0xff] }
 0xe25   : > { %v10889_v10 = vadd.f32 %v10857_v17, %v10825_v27  ;;  %v10577_v62 = vmul.f32 %v10539_v54, %v19860_v59  ;;  %v10419_v26 = vadd.f32 %v10176_v52, %v10141_v20  ;;  %10518 = vrot.lane.b32.xlu0 %v10436_v18, %s14015_s26  ;;  %v10383_v55 = vpop.f32.mrb[163].mxu1  ;;  %v10540_v20 = vsel %vm7509_vm10, %v10479_v41, %v10483_v33  ;;  %v19868_v27 = vld [vmem:[#allocation24_spill] sm:$0xff]  ;;  %v19869_v41 = vld [vmem:[#allocation54_spill] sm:$0xff] }
 0xe26   : > { %v19095_v31 = vadd.f32 %v10683_v22, %v10383_v55  ;;  %v10560_v43 = vmul.f32 %v10540_v20, %v19868_v27  ;;  %v10543_v33 = vsel %vm7509_vm10, %v19869_v41, %v10481_v45  ;;  %v19873_v55 = vld [vmem:[#allocation3_spill] sm:$0xff] }
 0xe27   : > { %v10933_v2 = vadd.f32 %v18772_v63, %v10889_v10  ;;  %v10873_v7 = vadd.f32 %v19865_v21, %v10577_v62  ;;  %v10180_v50 = vpop.f32.mrb[144].mxu0  ;;  %v10453_v23 = vadd.f32 %v10419_v26, %v10360_v15  ;;  %v10541_v10 = vsel %vm7509_vm10, %v10481_v45, %v10485_v19  ;;  %v19872_v62 = vld [vmem:[#allocation15_spill] sm:$0xff]  ;;  %v19875_v21 = vld [vmem:[#allocation58_spill] sm:$0xff]  ;;  %v19876_v19 = vld [vmem:[#allocation33_spill] sm:$0xff] }
 0xe28   : > { %v19103_v59 = vadd.f32 %v10180_v50, %v19866_v53  ;;  %v10182_v37 = vpop.f32.mrb[145].mxu0  ;;  %v10855_v51 = vadd.f32 %v19873_v55, %v10559_v4  ;;  %v10576_v45 = vmul.f32 %v10541_v10, %v19868_v27  ;;  %v19877_v4 = vld [vmem:[#allocation25_spill] sm:$0xff] }
 0xe29   : > { %10965 = vst [vmem:[%s18898_s13 + $0x38] sm:$0xff] %v10933_v2  ;;  %v10905_v36 = vadd.f32 %v10873_v7, %v10841_v24  ;;  %v10601_v22 = vadd.f32 %v10182_v37, %v10146_v48  ;;  %10520 = vrot.lane.b32.xlu1 %v10453_v23, %s14015_s26  ;;  %v19871_v48 = vld [vmem:[#allocation47_spill] sm:$0xff]  ;;  %v10856_v24 = vadd.f32 %v19874_v42, %v10560_v43  ;;  %v19881_v10 = vld [vmem:[#allocation89_spill] sm:$0xff] }
 0xe2a   : > { %v10575_v2 = vmul.f32 %v10543_v33, %v19867_v44 }
 0xe2b   : > { %v10949_v17 = vadd.f32 %v18764_v35, %v10905_v36  ;;  %v10186_v15 = vpop.f32.mrb[146].mxu0  ;;  %v10739_v3 = vpop.permute.xlu0 %10738  ;;  %v19110_v18 = vadd.f32 %v10601_v22, %v10365_v47 }
 0xe2c   : > { %v19116_v14 = vadd.f32 %v10186_v15, %v19870_v9  ;;  %v10808_v54 = vsel %vm8020_vm11, %v19871_v48, %v10739_v3  ;;  %v10188_v52 = vpop.f32.mrb[147].mxu0 }
 0xe2d   : > { %10981 = vst [vmem:[%s18898_s13 + $0xb8] sm:$0xff] %v10949_v17  ;;  %v10822_v26 = vmul.f32 %v10808_v54, %v19872_v62  ;;  %v10617_v47 = vadd.f32 %v10188_v52, %v19051_v11  ;;  %v19880_v54 = vld [vmem:[#allocation12_spill] sm:$0xff] }
 0xe2e   : > { %v10872_v52 = vadd.f32 %v19880_v54, %v10576_v45 }
 0xe2f   : > { %v10886_v7 = vadd.f32 %v19875_v21, %v10822_v26  ;;  %v10192_v50 = vpop.f32.mrb[148].mxu0  ;;  %v10743_v23 = vpop.permute.xlu0 %10742  ;;  %v19131_v20 = vadd.f32 %v10617_v47, %v19061_v46  ;;  %v19878_v46 = vld [vmem:[#allocation28_spill] sm:$0xff]  ;;  %v19882_v47 = vld [vmem:[#allocation34_spill] sm:$0xff] }
 0xe30   : > { %v19135_v53 = vadd.f32 %v10192_v50, %v19876_v19  ;;  %v10804_v11 = vsel %vm8020_vm11, %v10743_v23, %v19053_v12  ;;  %v10806_v37 = vsel %vm8020_vm11, %v10739_v3, %v10743_v23  ;;  %v10741_v36 = vpop.permute.xlu1 %10740  ;;  %v10194_v22 = vpop.f32.mrb[149].mxu0  ;;  %v19879_v12 = vld [vmem:[#allocation49_spill] sm:$0xff]  ;;  %v19883_v19 = vld [vmem:[#allocation10_spill] sm:$0xff] }
 0xe31   : > { %v10930_v44 = vadd.f32 %v18772_v63, %v10886_v7  ;;  %v10823_v43 = vmul.f32 %v10806_v37, %v19877_v4  ;;  %v10824_v17 = vmul.f32 %v10804_v11, %v19878_v46  ;;  %v10809_v27 = vsel %vm8020_vm11, %v18820_v40, %v10741_v36 }
 0xe32   : > { %v10838_v15 = vmul.f32 %v10809_v27, %v19872_v62  ;;  %v10665_v41 = vadd.f32 %v10194_v22, %v19055_v30  ;;  %v10871_v33 = vadd.f32 %v19879_v12, %v10575_v2 }
 0xe33   : > { %10962 = vst [vmem:[%s18898_s13 + $0x20] sm:$0xff] %v10930_v44  ;;  %v10887_v3 = vadd.f32 %v10855_v51, %v10823_v43  ;;  %v10888_v9 = vadd.f32 %v10856_v24, %v10824_v17  ;;  %v10198_v48 = vpop.f32.mrb[150].mxu0  ;;  %v19884_v43 = vld [vmem:[#allocation14_spill] sm:$0xff] }
 0xe34   : > { %v10902_v26 = vadd.f32 %v19881_v10, %v10838_v15  ;;  %v10681_v55 = vadd.f32 %v10198_v48, %v19882_v47  ;;  %v10699_v40 = vadd.f32 %v10665_v41, %v19072_v13  ;;  %v10745_v62 = vpop.permute.xlu1 %10744  ;;  %v10200_v42 = vpop.f32.mrb[151].mxu0 }
 0xe35   : > { %v10931_v30 = vadd.f32 %v18772_v63, %v10887_v3  ;;  %v10932_v2 = vadd.f32 %v18772_v63, %v10888_v9  ;;  %v10805_v51 = vsel %vm8020_vm11, %v10745_v62, %v19057_v5  ;;  %v10807_v24 = vsel %vm8020_vm11, %v10741_v36, %v10745_v62  ;;  %v19886_v3 = vld [vmem:[#allocation51_spill] sm:$0xff]  ;;  %v19888_v62 = vld [vmem:[#allocation60_spill] sm:$0xff] }
 0xe36   : > { %v10946_v21 = vadd.f32 %v18764_v35, %v10902_v26  ;;  %v10839_v7 = vmul.f32 %v10807_v24, %v19877_v4  ;;  %v10840_v50 = vmul.f32 %v10805_v51, %v19878_v46  ;;  %v10682_v13 = vadd.f32 %v10200_v42, %v19059_v34  ;;  %10778 = vrot.lane.b32.xlu0 %v10699_v40, %s14016_s28 }
 0xe37   : > { %10963 = vst [vmem:[%s18898_s13 + $0x28] sm:$0xff] %v10931_v30  ;;  %10964 = vst [vmem:[%s18898_s13 + $0x30] sm:$0xff] %v10932_v2  ;;  %v10204_v23 = vpop.f32.mrb[152].mxu0 }
 0xe38   : > { %10978 = vst [vmem:[%s18898_s13 + $0xa0] sm:$0xff] %v10946_v21  ;;  %v10903_v5 = vadd.f32 %v10871_v33, %v10839_v7  ;;  %v10904_v45 = vadd.f32 %v10872_v52, %v10840_v50  ;;  %v10434_v11 = vadd.f32 %v19883_v19, %v10204_v23  ;;  %v10716_v37 = vadd.f32 %v10682_v13, %v19088_v6  ;;  %v10206_v36 = vpop.f32.mrb[153].mxu0  ;;  %v19885_v6 = vld [vmem:[#allocation16_spill] sm:$0xff]  ;;  %v19890_v50 = vld [vmem:[#allocation91_spill] sm:$0xff]  ;;  %v19891_v19 = vld [vmem:[#allocation90_spill] sm:$0xff] }
 0xe39   : > { %v10435_v22 = vadd.f32 %v19064_v57, %v10206_v36  ;;  %v19887_v52 = vld [vmem:[#allocation56_spill] sm:$0xff] }
 0xe3a   : > { %v10947_v44 = vadd.f32 %v18764_v35, %v10903_v5  ;;  %v10948_v34 = vadd.f32 %v18764_v35, %v10904_v45  ;;  %10510 = vrot.lane.b32.xlu0 %v10434_v11, %s14015_s26  ;;  %10780 = vrot.lane.b32.xlu1 %v10716_v37, %s14016_s28 }
 0xe3b   : > { %v10210_v4 = vpop.f32.mrb[154].mxu0 }
 0xe3c   : > { %10979 = vst [vmem:[%s18898_s13 + $0xa8] sm:$0xff] %v10947_v44  ;;  %10980 = vst [vmem:[%s18898_s13 + $0xb0] sm:$0xff] %v10948_v34  ;;  %v10451_v46 = vadd.f32 %v19884_v43, %v10210_v4  ;;  %v10212_v17 = vpop.f32.mrb[155].mxu0  ;;  %v19892_v4 = vld [vmem:[#allocation36_spill] sm:$0xff] }
 0xe3d   : > { %v10452_v27 = vadd.f32 %v19084_v60, %v10212_v17  ;;  %v19199_v40 = vpop.permute.xlu0 %10506  ;;  %v19893_v17 = vld [vmem:[#allocation55_spill] sm:$0xff] }
 0xe3e   : > { %10514 = vrot.lane.b32.xlu0 %v10435_v22, %s14015_s26  ;;  %10512 = vrot.lane.b32.xlu1 %v10451_v46, %s14015_s26 }
 0xe3f   : > { %v10216_v57 = vpop.f32.mrb[156].mxu0 }
 0xe40   : > { %v19185_v15 = vadd.f32 %v19885_v6, %v10216_v57  ;;  %v10218_v41 = vpop.f32.mrb[157].mxu0 }
 0xe41   : > { %v19188_v12 = vadd.f32 %v19103_v59, %v10218_v41  ;;  %v19205_v24 = vpop.permute.xlu1 %10508 }
 0xe42   : > { %10516 = vrot.lane.b32.xlu1 %v10452_v27, %s14015_s26 }
 0xe43   : > { %v10222_v33 = vpop.f32.mrb[158].mxu0 }
 0xe44   : > { %v19192_v9 = vadd.f32 %v19886_v3, %v10222_v33  ;;  %v10224_v48 = vpop.f32.mrb[159].mxu0 }
 0xe45   : > { %v19195_v60 = vadd.f32 %v19116_v14, %v10224_v48 }
 0xe47   : > { %v10228_v54 = vpop.f32.mrb[160].mxu0 }
 0xe48   : > { %v10697_v10 = vadd.f32 %v19887_v52, %v10228_v54  ;;  %v10230_v26 = vpop.f32.mrb[161].mxu0 }
 0xe49   : > { %v10698_v47 = vadd.f32 %v19135_v53, %v10230_v26 }
 0xe4a   : > { %10770 = vrot.lane.b32.xlu0 %v10697_v10, %s14016_s28 }
 0xe4b   : > { %v10234_v59 = vpop.f32.mrb[162].mxu0 }
 0xe4c   : > { %v10714_v42 = vadd.f32 %v19888_v62, %v10234_v59  ;;  %v10236_v30 = vpop.f32.mrb[163].mxu0 }
 0xe4d   : > { %v10715_v2 = vadd.f32 %v10681_v55, %v10236_v30  ;;  %v19203_v51 = vpop.permute.xlu0 %10766  ;;  %v19889_v55 = vld [vmem:[#allocation53_spill] sm:$0xff]  ;;  %v19895_v30 = vld [vmem:[#allocation42_spill] sm:$0xff] }
 0xe4e   : > { %10774 = vrot.lane.b32.xlu0 %v10698_v47, %s14016_s28  ;;  %10772 = vrot.lane.b32.xlu1 %v10714_v42, %s14016_s28  ;;  %v19894_v47 = vld [vmem:[#allocation20_spill] sm:$0xff] }
 0xe51   : > { %v10503_v14 = vpop.permute.xlu0 %10502  ;;  %v19209_v21 = vpop.permute.xlu1 %10768 }
 0xe52   : > { %v10528_v53 = vsel %vm7509_vm10, %v10503_v14, %v19199_v40  ;;  %10782 = vrot.lane.b32.xlu0 %v19075_v56, %s14016_s28  ;;  %10776 = vrot.lane.b32.xlu1 %v10715_v2, %s14016_s28 }
 0xe53   : > { %v10566_v7 = vmul.f32 %v10528_v53, %v19889_v55 }
 0xe55   : > { %v19219_v13 = vadd.f32 %v19890_v50, %v10566_v7  ;;  %v10505_v23 = vpop.permute.xlu1 %10504 }
 0xe56   : > { %10784 = vrot.lane.b32.xlu1 %v19095_v31, %s14016_s28  ;;  %v10529_v5 = vsel %vm7509_vm10, %v10505_v23, %v19205_v24 }
 0xe57   : > { %v10582_v45 = vmul.f32 %v10529_v5, %v19889_v55 }
 0xe59   : > { %v19228_v11 = vadd.f32 %v19891_v19, %v10582_v45 }
 0xe60   : > { %v10763_v56 = vpop.permute.xlu0 %10762 }
 0xe61   : > { %v10794_v34 = vsel %vm8020_vm11, %v10763_v56, %v19203_v51 }
 0xe62   : > { %v10765_v37 = vpop.permute.xlu1 %10764  ;;  %v10829_v27 = vmul.f32 %v10794_v34, %v19893_v17  ;;  %v19898_v34 = vld [vmem:[#allocation37_spill] sm:$0xff] }
 0xe63   : > { %v10795_v57 = vsel %vm8020_vm11, %v10765_v37, %v19209_v21 }
 0xe64   : > { %v10495_v36 = vpop.permute.xlu0 %10494  ;;  %v10845_v48 = vmul.f32 %v10795_v57, %v19893_v17 }
 0xe65   : > { %v10534_v52 = vsel %vm7509_vm10, %v19023_v49, %v10495_v36 }
 0xe66   : > { %v10563_v59 = vmul.f32 %v10534_v52, %v19894_v47 }
 0xe67   : > { %v10497_v22 = vpop.permute.xlu1 %10496 }
 0xe68   : > { %v10499_v44 = vpop.permute.xlu0 %10498  ;;  %v10859_v55 = vadd.f32 %v19009_v32, %v10563_v59 }
 0xe69   : > { %v10530_v31 = vsel %vm7509_vm10, %v10499_v44, %v10503_v14  ;;  %v19896_v14 = vld [vmem:[#allocation39_spill] sm:$0xff] }
 0xe6a   : > { %v10565_v43 = vmul.f32 %v10530_v31, %v19892_v4 }
 0xe6b   : > { %v10501_v46 = vpop.permute.xlu1 %10500 }
 0xe6c   : > { %v10861_v6 = vadd.f32 %v18926_v8, %v10565_v43  ;;  %v10531_v41 = vsel %vm7509_vm10, %v10501_v46, %v10505_v23  ;;  %v10532_v8 = vsel %vm7509_vm10, %v10495_v36, %v10499_v44  ;;  %v10533_v50 = vsel %vm7509_vm10, %v10497_v22, %v10501_v46  ;;  %v19897_v44 = vld [vmem:[#allocation35_spill] sm:$0xff] }
 0xe6d   : > { %v10581_v33 = vmul.f32 %v10531_v41, %v19892_v4  ;;  %v10564_v2 = vmul.f32 %v10532_v8, %v19895_v30 }
 0xe6e   : > { %v10893_v3 = vadd.f32 %v10861_v6, %v10829_v27 }
 0xe6f   : > { %v10877_v54 = vadd.f32 %v18949_v58, %v10581_v33  ;;  %v10535_v58 = vsel %vm7509_vm10, %v19032_v25, %v10497_v22  ;;  %v10860_v25 = vadd.f32 %v19012_v28, %v10564_v2  ;;  %v10580_v28 = vmul.f32 %v10533_v50, %v19895_v30  ;;  %v19899_v30 = vld [vmem:[#allocation59_spill] sm:$0xff]  ;;  %v19901_v50 = vld [vmem:[#allocation48_spill] sm:$0xff] }
 0xe70   : > { %v10937_v10 = vadd.f32 %v18772_v63, %v10893_v3  ;;  %v10579_v7 = vmul.f32 %v10535_v58, %v19894_v47  ;;  %v19900_v58 = vld [vmem:[#allocation64_spill] sm:$0xff] }
 0xe71   : > { %v10909_v26 = vadd.f32 %v10877_v54, %v10845_v48 }
 0xe72   : > { %10969 = vst [vmem:[%s18898_s13 + $0x58] sm:$0xff] %v10937_v10 }
 0xe73   : > { %v10953_v62 = vadd.f32 %v18764_v35, %v10909_v26  ;;  %v10755_v42 = vpop.permute.xlu0 %10754 }
 0xe74   : > { %v10800_v49 = vsel %vm8020_vm11, %v19028_v61, %v10755_v42 }
 0xe75   : > { %10985 = vst [vmem:[%s18898_s13 + $0xd8] sm:$0xff] %v10953_v62  ;;  %v10826_v53 = vmul.f32 %v10800_v49, %v19896_v14 }
 0xe77   : > { %v10890_v23 = vadd.f32 %v19042_v38, %v10826_v53  ;;  %v10759_v5 = vpop.permute.xlu0 %10758  ;;  %v10757_v45 = vpop.permute.xlu1 %10756 }
 0xe78   : > { %v10796_v61 = vsel %vm8020_vm11, %v10759_v5, %v10763_v56  ;;  %v10798_v19 = vsel %vm8020_vm11, %v10755_v42, %v10759_v5  ;;  %v10801_v32 = vsel %vm8020_vm11, %v19035_v39, %v10757_v45  ;;  %v10875_v39 = vadd.f32 %v19016_v0, %v10579_v7 }
 0xe79   : > { %v10934_v36 = vadd.f32 %v18772_v63, %v10890_v23  ;;  %v10827_v22 = vmul.f32 %v10798_v19, %v19897_v44  ;;  %v10828_v38 = vmul.f32 %v10796_v61, %v19898_v34  ;;  %v10842_v31 = vmul.f32 %v10801_v32, %v19896_v14 }
 0xe7b   : > { %10966 = vst [vmem:[%s18898_s13 + $0x40] sm:$0xff] %v10934_v36  ;;  %v10891_v56 = vadd.f32 %v10859_v55, %v10827_v22  ;;  %v10892_v4 = vadd.f32 %v10860_v25, %v10828_v38  ;;  %v10906_v43 = vadd.f32 %v19049_v29, %v10842_v31  ;;  %v10761_v46 = vpop.permute.xlu1 %10760  ;;  %v10876_v29 = vadd.f32 %v19019_v16, %v10580_v28 }
 0xe7c   : > { %v10797_v17 = vsel %vm8020_vm11, %v10761_v46, %v10765_v37  ;;  %v10799_v27 = vsel %vm8020_vm11, %v10757_v45, %v10761_v46  ;;  %v19902_v45 = vld [vmem:[#allocation21_spill] sm:$0xff] }
 0xe7d   : > { %v10935_v57 = vadd.f32 %v18772_v63, %v10891_v56  ;;  %v10936_v6 = vadd.f32 %v18772_v63, %v10892_v4  ;;  %v10950_v41 = vadd.f32 %v18764_v35, %v10906_v43  ;;  %v10843_v33 = vmul.f32 %v10799_v27, %v19897_v44 }
 0xe7e   : > { %v10844_v0 = vmul.f32 %v10797_v17, %v19898_v34  ;;  %v19903_v34 = vld [vmem:[#allocation52_spill] sm:$0xff] }
 0xe7f   : > { %10967 = vst [vmem:[%s18898_s13 + $0x48] sm:$0xff] %v10935_v57  ;;  %10968 = vst [vmem:[%s18898_s13 + $0x50] sm:$0xff] %v10936_v6  ;;  %v10907_v37 = vadd.f32 %v10875_v39, %v10843_v33 }
 0xe80   : > { %10982 = vst [vmem:[%s18898_s13 + $0xc0] sm:$0xff] %v10950_v41  ;;  %v10908_v3 = vadd.f32 %v10876_v29, %v10844_v0  ;;  %v19905_v0 = vld [vmem:[#allocation4_spill] sm:$0xff] }
 0xe81   : > { %v10951_v48 = vadd.f32 %v18764_v35, %v10907_v37 }
 0xe82   : > { %v10952_v54 = vadd.f32 %v18764_v35, %v10908_v3 }
 0xe83   : > { %10983 = vst [vmem:[%s18898_s13 + $0xc8] sm:$0xff] %v10951_v48 }
 0xe84   : > { %10984 = vst [vmem:[%s18898_s13 + $0xd0] sm:$0xff] %v10952_v54 }
 0xe97   : > { %v10519_v52 = vpop.permute.xlu0 %10518 }
 0xe9b   : > { %v10521_v8 = vpop.permute.xlu1 %10520 }
 0xea8   : > { %v10779_v10 = vpop.permute.xlu0 %10778 }
 0xeac   : > { %v10511_v26 = vpop.permute.xlu0 %10510  ;;  %v10781_v47 = vpop.permute.xlu1 %10780 }
 0xead   : > { %v10526_v62 = vsel %vm7509_vm10, %v19199_v40, %v10511_v26 }
 0xeae   : > { %v10567_v2 = vmul.f32 %v10526_v62, %v19899_v30 }
 0xeb0   : > { %v10515_v59 = vpop.permute.xlu0 %10514  ;;  %v10513_v16 = vpop.permute.xlu1 %10512  ;;  %v10863_v40 = vadd.f32 %v19185_v15, %v10567_v2 }
 0xeb1   : > { %v10524_v42 = vsel %vm7509_vm10, %v10511_v26, %v10515_v59  ;;  %v10522_v55 = vsel %vm7509_vm10, %v10515_v59, %v10519_v52  ;;  %v10527_v5 = vsel %vm7509_vm10, %v19205_v24, %v10513_v16 }
 0xeb2   : > { %v10568_v49 = vmul.f32 %v10524_v42, %v19900_v58  ;;  %v10569_v25 = vmul.f32 %v10522_v55, %v19902_v45  ;;  %v10583_v56 = vmul.f32 %v10527_v5, %v19899_v30 }
 0xeb4   : > { %v10517_v14 = vpop.permute.xlu1 %10516  ;;  %v10864_v61 = vadd.f32 %v19188_v12, %v10568_v49  ;;  %v10865_v43 = vadd.f32 %v19110_v18, %v10569_v25  ;;  %v10879_v3 = vadd.f32 %v19192_v9, %v10583_v56 }
 0xeb5   : > { %v10525_v19 = vsel %vm7509_vm10, %v10513_v16, %v10517_v14  ;;  %v10523_v44 = vsel %vm7509_vm10, %v10517_v14, %v10521_v8 }
 0xeb6   : > { %v10584_v4 = vmul.f32 %v10525_v19, %v19900_v58  ;;  %v10585_v57 = vmul.f32 %v10523_v44, %v19902_v45 }
 0xeb8   : > { %v10880_v48 = vadd.f32 %v19195_v60, %v10584_v4  ;;  %v10881_v60 = vadd.f32 %v19131_v20, %v10585_v57 }
 0xebc   : > { %v10771_v53 = vpop.permute.xlu0 %10770 }
 0xebd   : > { %v10792_v7 = vsel %vm8020_vm11, %v19203_v51, %v10771_v53 }
 0xebe   : > { %v10830_v23 = vmul.f32 %v10792_v7, %v19901_v50 }
 0xec0   : > { %v10894_v32 = vadd.f32 %v19219_v13, %v10830_v23  ;;  %v10775_v36 = vpop.permute.xlu0 %10774  ;;  %v10773_v51 = vpop.permute.xlu1 %10772  ;;  %v19904_v13 = vld [vmem:[#allocation63_spill] sm:$0xff] }
 0xec1   : > { %v10788_v15 = vsel %vm8020_vm11, %v10775_v36, %v10779_v10  ;;  %v10790_v24 = vsel %vm8020_vm11, %v10771_v53, %v10775_v36  ;;  %v10793_v12 = vsel %vm8020_vm11, %v19209_v21, %v10773_v51 }
 0xec2   : > { %v10938_v22 = vadd.f32 %v18772_v63, %v10894_v32  ;;  %v10831_v38 = vmul.f32 %v10790_v24, %v19903_v34  ;;  %v10832_v31 = vmul.f32 %v10788_v15, %v19904_v13  ;;  %v10846_v28 = vmul.f32 %v10793_v12, %v19901_v50 }
 0xec4   : > { %10970 = vst [vmem:[%s18898_s13 + $0x60] sm:$0xff] %v10938_v22  ;;  %v10895_v46 = vadd.f32 %v10863_v40, %v10831_v38  ;;  %v10896_v39 = vadd.f32 %v10864_v61, %v10832_v31  ;;  %v10910_v21 = vadd.f32 %v19228_v11, %v10846_v28  ;;  %v10783_v17 = vpop.permute.xlu0 %10782  ;;  %v10777_v27 = vpop.permute.xlu1 %10776 }
 0xec5   : > { %v10786_v6 = vsel %vm8020_vm11, %v10779_v10, %v10783_v17  ;;  %v10789_v41 = vsel %vm8020_vm11, %v10777_v27, %v10781_v47  ;;  %v10791_v18 = vsel %vm8020_vm11, %v10773_v51, %v10777_v27 }
 0xec6   : > { %v10939_v33 = vadd.f32 %v18772_v63, %v10895_v46  ;;  %v10940_v29 = vadd.f32 %v18772_v63, %v10896_v39  ;;  %v10954_v11 = vadd.f32 %v18764_v35, %v10910_v21  ;;  %v10833_v37 = vmul.f32 %v10786_v6, %v19905_v0 }
 0xec7   : > { %v10847_v54 = vmul.f32 %v10791_v18, %v19903_v34  ;;  %v10848_v52 = vmul.f32 %v10789_v41, %v19904_v13 }
 0xec8   : > { %10971 = vst [vmem:[%s18898_s13 + $0x68] sm:$0xff] %v10939_v33  ;;  %10972 = vst [vmem:[%s18898_s13 + $0x70] sm:$0xff] %v10940_v29  ;;  %v10897_v10 = vadd.f32 %v10865_v43, %v10833_v37  ;;  %v10785_v8 = vpop.permute.xlu1 %10784 }
 0xec9   : > { %10986 = vst [vmem:[%s18898_s13 + $0xe0] sm:$0xff] %v10954_v11  ;;  %v10911_v26 = vadd.f32 %v10879_v3, %v10847_v54  ;;  %v10912_v59 = vadd.f32 %v10880_v48, %v10848_v52  ;;  %v10787_v9 = vsel %vm8020_vm11, %v10781_v47, %v10785_v8 }
 0xeca   : > { %v10941_v16 = vadd.f32 %v18772_v63, %v10897_v10  ;;  %v10849_v62 = vmul.f32 %v10787_v9, %v19905_v0 }
 0xecb   : > { %v10955_v42 = vadd.f32 %v18764_v35, %v10911_v26  ;;  %v10956_v30 = vadd.f32 %v18764_v35, %v10912_v59 }
 0xecc   : > { %10973 = vst [vmem:[%s18898_s13 + $0x78] sm:$0xff] %v10941_v16  ;;  %v10913_v2 = vadd.f32 %v10881_v60, %v10849_v62 }
 0xecd   : > { %10987 = vst [vmem:[%s18898_s13 + $0xe8] sm:$0xff] %v10955_v42  ;;  %10988 = vst [vmem:[%s18898_s13 + $0xf0] sm:$0xff] %v10956_v30 }
 0xece   : > { %v10957_v58 = vadd.f32 %v18764_v35, %v10913_v2 }
 0xed0   : > { %10989 = vst [vmem:[%s18898_s13 + $0xf8] sm:$0xff] %v10957_v58 }
 0xed1 PF: > { %s22_s23 = sadd.s32 1, %s14011_s23   ;;  %s19906_s21 = smov %s14007_s22 }
 0xed2   : > { %p19_p5 = scmp.ge.s32.totalorder %s22_s23, 4   ;;  %s19907_s22 = smov %s19909_s24 }
 0xed4   :  { %21 = sbr.rel (!%p19_p5) target bundleno = 2 (0x2), region = 111 }

</bundles_post_ra>
